<compile_context>
chip_gen: v7x
topology: tpu7x:2x2x1
jax: 0.10.0
libtpu: 0.0.40
codegen_flags: <defaults>
</compile_context>

<pallas_src>
import functools

import jax
import jax.numpy as jnp
from jax.experimental import pallas as pl
from jax.experimental.pallas import tpu as pltpu

LRELU_SLOPE = 0.2
BN_EPS = 1e-5
ACT_DTYPE = jnp.bfloat16          # inter-layer activation storage dtype


def _round_up(x, m):
    return (x + m - 1) // m * m


@functools.lru_cache(maxsize=1)
def _vmem_limit_bytes():
    """Generation-aware scoped-VMEM budget (worst-case tile use is ~19 MiB)."""
    try:
        phys = int(pltpu.get_tpu_info().vmem_capacity_bytes)
        return int(min(max(phys * 3 // 4, 32 * 1024 * 1024), 96 * 1024 * 1024))
    except Exception:
        return 32 * 1024 * 1024


def _compiler_params(n_parallel_axes):
    return pltpu.CompilerParams(
        dimension_semantics=("parallel",) * n_parallel_axes,
        vmem_limit_bytes=_vmem_limit_bytes())


# --------------------- conv GEMM (full-K blocks, + BN stats / + activation) --

def _make_gemm_kernel(tm, m_valid, ragged, use_bn, act):
    """a_ref: (TM, Kp) bf16, b_ref: (Kp, TN) bf16 (resident), o_ref: (TM, TN).
    use_bn: also emit per-tile channel sum / sum-of-squares (f32)."""

    def kernel(a_ref, b_ref, o_ref, *stats_refs):
        acc = jnp.dot(a_ref[...], b_ref[...],
                      preferred_element_type=jnp.float32)
        if use_bn:
            sum_ref, sq_ref = stats_refs
            # Raw conv output in bf16; BN+LReLU applied in a second tiled pass
            # once the global batch statistics are reduced.
            o_ref[...] = acc.astype(o_ref.dtype)
            if ragged:
                row = (pl.program_id(0) * tm
                       + jax.lax.broadcasted_iota(jnp.int32, (tm, 1), 0))
                valid = jnp.where(row < m_valid, acc, 0.0)
            else:
                valid = acc
            tn = acc.shape[1]
            s = jnp.sum(valid, axis=0, keepdims=True)            # (1, TN) f32
            q = jnp.sum(valid * valid, axis=0, keepdims=True)
            # Stats blocks are (1, 8, TN) to satisfy the (8, 128) tiling rule;
            # all 8 sublanes carry the same value, the wrapper reads row 0.
            sum_ref[0] = jnp.broadcast_to(s, (8, tn))
            sq_ref[0] = jnp.broadcast_to(q, (8, tn))
        else:
            if act == "lrelu":
                acc = jnp.where(acc > 0, acc, LRELU_SLOPE * acc)
            elif act == "sigmoid":
                acc = jax.nn.sigmoid(acc)
            o_ref[...] = acc.astype(o_ref.dtype)

    return kernel


def _conv_gemm(A, B, m_valid, use_bn, act):
    """A: (M, Kp) bf16, B: (Kp, C) bf16.  Kp is a multiple of 128 and is kept
    fully resident (no K grid axis)."""
    M, Kp = A.shape
    _, C = B.shape

    # M tile: as large as possible while keeping the double-buffered A tile
    # around ~8 MiB (amortizes per-grid-step overhead).
    cap = (8 * 1024 * 1024) // max(4 * Kp, 1)
    cap = max(256, min(1024, cap))
    cap -= cap % 128
    TM = min(M, cap)                  # M is always a multiple of 16 here
    n_m = pl.cdiv(M, TM)

    # Optional output-channel split: feed both v7x TensorCores when the deep
    # layers have too few M tiles (small batch).
    if C >= 256 and C % 256 == 0 and n_m < 4:
        TN = C // 2
    else:
        TN = C
    n_c = C // TN

    kernel = _make_gemm_kernel(TM, m_valid, M % TM != 0, use_bn, act)

    in_specs = [pl.BlockSpec((TM, Kp), lambda i, j: (i, 0)),
                pl.BlockSpec((Kp, TN), lambda i, j: (0, j))]
    if use_bn:
        out_shape = (jax.ShapeDtypeStruct((M, C), ACT_DTYPE),
                     jax.ShapeDtypeStruct((n_m, 8, C), jnp.float32),
                     jax.ShapeDtypeStruct((n_m, 8, C), jnp.float32))
        out_specs = (pl.BlockSpec((TM, TN), lambda i, j: (i, j)),
                     pl.BlockSpec((1, 8, TN), lambda i, j: (i, 0, j)),
                     pl.BlockSpec((1, 8, TN), lambda i, j: (i, 0, j)))
    else:
        out_shape = jax.ShapeDtypeStruct((M, C), ACT_DTYPE)
        out_specs = pl.BlockSpec((TM, TN), lambda i, j: (i, j))

    return pl.pallas_call(
        kernel,
        out_shape=out_shape,
        grid=(n_m, n_c),
        in_specs=in_specs,
        out_specs=out_specs,
        compiler_params=_compiler_params(2),
    )(A, B)


# --------------------- BN apply (precomputed scale/shift) + LeakyReLU --------

def _bn_lrelu_kernel(x_ref, scale_ref, shift_ref, o_ref):
    y = x_ref[...].astype(jnp.float32) * scale_ref[...] + shift_ref[...]
    o_ref[...] = jnp.where(y > 0, y, LRELU_SLOPE * y).astype(o_ref.dtype)


def _bn_lrelu(x2d, scale, shift):
    M, C = x2d.shape
    TM = min(M, 1024)
    return pl.pallas_call(
        _bn_lrelu_kernel,
        out_shape=jax.ShapeDtypeStruct((M, C), ACT_DTYPE),
        grid=(pl.cdiv(M, TM),),
        in_specs=[pl.BlockSpec((TM, C), lambda i: (i, 0)),
                  pl.BlockSpec((1, C), lambda i: (0, 0)),
                  pl.BlockSpec((1, C), lambda i: (0, 0))],
        out_specs=pl.BlockSpec((TM, C), lambda i: (i, 0)),
        compiler_params=_compiler_params(1),
    )(x2d, scale.reshape(1, C), shift.reshape(1, C))


# --------------------- conv layer: bf16 im2col + GEMM [+ BN] [+ act] ---------

def conv_bn_act(x_nhwc, w, stride, pad, gamma=None, beta=None,
                use_bn=False, act="lrelu"):
    N, H, W, Cin = x_nhwc.shape
    Cout, Cin_w, KH, KW = w.shape
    assert Cin == Cin_w
    Ho = (H + 2 * pad - KH) // stride + 1
    Wo = (W + 2 * pad - KW) // stride + 1

    # ---- im2col, bf16-first (single fused XLA copy) ----
    # TODO(synk): implicit GEMM would remove this patch replication entirely.
    x = x_nhwc.astype(ACT_DTYPE)
    xp = jnp.pad(x, ((0, 0), (pad, pad), (pad, pad), (0, 0)))
    cols = []
    for kh in range(KH):
        for kw in range(KW):
            cols.append(xp[:, kh:kh + stride * (Ho - 1) + 1:stride,
                            kw:kw + stride * (Wo - 1) + 1:stride, :])
    # A rows index (n, ho, wo); columns index (kh, kw, cin)
    A = jnp.stack(cols, axis=3).reshape(N * Ho * Wo, KH * KW * Cin)
    # B rows index (kh, kw, cin); columns index cout
    B = jnp.transpose(w, (2, 3, 1, 0)).reshape(KH * KW * Cin, Cout)
    B = B.astype(ACT_DTYPE)

    M, K = A.shape
    Kp = _round_up(K, 128)
    if Kp != K:                      # only layer 1 (K = 75); bf16 pad, fused
        A = jnp.pad(A, ((0, 0), (0, Kp - K)))
        B = jnp.pad(B, ((0, Kp - K), (0, 0)))

    res = _conv_gemm(A, B, M, use_bn, act)

    if use_bn:
        out, psum, psq = res
        total = psum[:, 0, :].sum(axis=0)
        totsq = psq[:, 0, :].sum(axis=0)
        # Training-mode (per-batch, biased-variance) BatchNorm, matching
        # PyTorch's default train() semantics for the discriminator forward.
        mean = total / M
        var = jnp.maximum(totsq / M - mean * mean, 0.0)   # guard cancellation
        scale = gamma.astype(jnp.float32) * jax.lax.rsqrt(var + BN_EPS)
        shift = beta.astype(jnp.float32) - mean * scale
        out = _bn_lrelu(out, scale, shift)
    else:
        out = res

    return out.reshape(N, Ho, Wo, Cout)


# --------------------- final Cout=1 conv + sigmoid as a VPU matvec -----------

def _matvec_sigmoid_kernel(a_ref, w_ref, o_ref):
    a = a_ref[...].astype(jnp.float32)
    s = jnp.sum(a * w_ref[...], axis=-1, keepdims=True)
    o_ref[...] = jax.nn.sigmoid(s)


def final_conv_sigmoid(x_nhwc, w):
    """Conv(Cin->1, KHxKW, stride 1, pad 0) where spatial size == kernel size
    (NetD: 4x4 -> 1x1), followed by Sigmoid.  Lane-dense f32 reduction over a
    bf16 activation (upcast inside the kernel, no wrapper-side copies)."""
    N, H, W, Cin = x_nhwc.shape
    Cout, Cin_w, KH, KW = w.shape
    assert Cout == 1 and Cin == Cin_w and H == KH and W == KW

    K = KH * KW * Cin
    A = x_nhwc.reshape(N, K)                               # bf16, (h, w, c)
    wv = jnp.transpose(w, (2, 3, 1, 0)).reshape(1, K).astype(jnp.float32)

    TM = min(N, 512)
    out = pl.pallas_call(
        _matvec_sigmoid_kernel,
        out_shape=jax.ShapeDtypeStruct((N, 1), jnp.float32),
        grid=(pl.cdiv(N, TM),),
        in_specs=[pl.BlockSpec((TM, K), lambda i: (i, 0)),
                  pl.BlockSpec((1, K), lambda i: (0, 0))],
        out_specs=pl.BlockSpec((TM, 1), lambda i: (i, 0)),
        compiler_params=_compiler_params(1),
    )(A, wv)
    return out[:, 0]


# --------------------- params + forward --------------------------------------

def init_netd_params(key, ndf):
    """Deterministic synthetic init (DCGAN-style N(0, 0.02) conv weights)."""
    ks = jax.random.split(key, 5)

    def w(k, shape):
        return jax.random.normal(k, shape, jnp.float32) * 0.02

    return {
        "w1": w(ks[0], (ndf, 3, 5, 5)),
        "w2": w(ks[1], (ndf * 2, ndf, 4, 4)),
        "g2": jnp.ones((ndf * 2,), jnp.float32),
        "b2": jnp.zeros((ndf * 2,), jnp.float32),
        "w3": w(ks[2], (ndf * 4, ndf * 2, 4, 4)),
        "g3": jnp.ones((ndf * 4,), jnp.float32),
        "b3": jnp.zeros((ndf * 4,), jnp.float32),
        "w4": w(ks[3], (ndf * 8, ndf * 4, 4, 4)),
        "g4": jnp.ones((ndf * 8,), jnp.float32),
        "b4": jnp.zeros((ndf * 8,), jnp.float32),
        "w5": w(ks[4], (1, ndf * 8, 4, 4)),
    }


def netd_forward(params, x_nchw):
    """NetD.forward: returns sigmoid scores, shape (N,) (the .view(-1))."""
    x = jnp.transpose(x_nchw, (0, 2, 3, 1))                  # NCHW -> NHWC
    # Conv(3->ndf, 5, s3, p1) + LeakyReLU(0.2)
    x = conv_bn_act(x, params["w1"], 3, 1, use_bn=False, act="lrelu")
    # Conv(ndf->2ndf, 4, s2, p1) + BN + LeakyReLU
    x = conv_bn_act(x, params["w2"], 2, 1, params["g2"], params["b2"], True, "lrelu")
    # Conv(2ndf->4ndf, 4, s2, p1) + BN + LeakyReLU
    x = conv_bn_act(x, params["w3"], 2, 1, params["g3"], params["b3"], True, "lrelu")
    # Conv(4ndf->8ndf, 4, s2, p1) + BN + LeakyReLU
    x = conv_bn_act(x, params["w4"], 2, 1, params["g4"], params["b4"], True, "lrelu")
    # Conv(8ndf->1, 4, s1, p0) + Sigmoid (lane-dense matvec kernel)
    return final_conv_sigmoid(x, params["w5"])


if __name__ == "__main__":
    # The architecture requires image_size=96 (96->32->16->8->4->1); keep the
    # model small (ndf=32, batch=2) while still exercising the channel-split
    # GEMM path on the last conv (C = 8*ndf = 256).
    batch, ndf, image_size = 2, 32, 96
    key = jax.random.PRNGKey(0)
    pkey, xkey = jax.random.split(key)

    params = init_netd_params(pkey, ndf)
    x = jax.random.normal(xkey, (batch, 3, image_size, image_size), jnp.float32)

    fwd = jax.jit(netd_forward)
    out = jax.block_until_ready(fwd(params, x))
    assert out.shape == (batch,), out.shape
    assert bool(jnp.all(jnp.isfinite(out)))
    assert bool(jnp.all((out >= 0.0) & (out <= 1.0)))
    print("KERNEL_OK")
</pallas_src>

<mosaic_0001>
module attributes {stable_mosaic.version = 11 : i64} {
  func.func @kernel(%arg0: i32, %arg1: i32, %arg2: memref<1024x128xbf16, #tpu.memory_space<vmem>>, %arg3: memref<128x32xbf16, #tpu.memory_space<vmem>>, %arg4: memref<1024x32xbf16, #tpu.memory_space<vmem>>) attributes {dimension_semantics = [#tpu.dimension_semantics<parallel>, #tpu.dimension_semantics<parallel>], iteration_bounds = array<i64: 2, 1>, scalar_prefetch = 0 : i64, scratch_operands = 0 : i64, tpu.core_type = #tpu.core_type<tc>, window_params = [{transform_indices = @transform_0, window_bounds = array<i64: 1024, 128>}, {transform_indices = @transform_1, window_bounds = array<i64: 128, 32>}, {transform_indices = @transform_2, window_bounds = array<i64: 1024, 32>}]} {
    %c0 = arith.constant 0 : index
    %c0_0 = arith.constant 0 : index
    %0 = vector.load %arg2[%c0, %c0_0] : memref<1024x128xbf16, #tpu.memory_space<vmem>>, vector<1024x128xbf16>
    %c0_1 = arith.constant 0 : index
    %c0_2 = arith.constant 0 : index
    %1 = vector.load %arg3[%c0_1, %c0_2] : memref<128x32xbf16, #tpu.memory_space<vmem>>, vector<128x32xbf16>
    %cst = arith.constant dense<0.000000e+00> : vector<1024x32xf32>
    %2 = tpu.matmul %0, %1, %cst {dimension_numbers = #tpu.dot_dimension_numbers<[1], [0], [0], [1], [0, 0, 1, 1], [], []>} : vector<1024x128xbf16>, vector<128x32xbf16>, vector<1024x32xf32> -> vector<1024x32xf32>
    %cst_3 = arith.constant 0.000000e+00 : f32
    %3 = vector.broadcast %cst_3 : f32 to vector<1024x32xf32>
    %4 = arith.cmpf ogt, %2, %3 : vector<1024x32xf32>
    %cst_4 = arith.constant 2.000000e-01 : f32
    %5 = vector.broadcast %cst_4 : f32 to vector<1024x32xf32>
    %6 = arith.mulf %5, %2 : vector<1024x32xf32>
    %7 = arith.select %4, %2, %6 : vector<1024x32xi1>, vector<1024x32xf32>
    %8 = arith.truncf %7 : vector<1024x32xf32> to vector<1024x32xbf16>
    %c0_5 = arith.constant 0 : index
    %c0_6 = arith.constant 0 : index
    %9 = vector.load %arg4[%c0_5, %c0_6] : memref<1024x32xbf16, #tpu.memory_space<vmem>>, vector<1024x32xbf16>
    tpu.vector_store %arg4[%c0_5, %c0_6], %8 {strides = array<i32>} : memref<1024x32xbf16, #tpu.memory_space<vmem>>, vector<1024x32xbf16>,
    return
  }
  func.func @transform_0(%arg0: i32, %arg1: i32) -> (i32, i32) {
    %c0_i32 = arith.constant 0 : i32
    %c0_i32_0 = arith.constant 0 : i32
    return %arg0, %c0_i32 : i32, i32
  }
  func.func @transform_1(%arg0: i32, %arg1: i32) -> (i32, i32) {
    %c0_i32 = arith.constant 0 : i32
    %c0_i32_0 = arith.constant 0 : i32
    return %c0_i32, %arg1 : i32, i32
  }
  func.func @transform_2(%arg0: i32, %arg1: i32) -> (i32, i32) {
    %c0_i32 = arith.constant 0 : i32
    return %arg0, %arg1 : i32, i32
  }
}

module attributes {stable_mosaic.version = 11 : i64} {
  func.func @kernel(%arg0: i32, %arg1: i32, %arg2: memref<512x512xbf16, #tpu.memory_space<vmem>>, %arg3: memref<512x64xbf16, #tpu.memory_space<vmem>>, %arg4: memref<512x64xbf16, #tpu.memory_space<vmem>>, %arg5: memref<1x8x64xf32, #tpu.memory_space<vmem>>, %arg6: memref<1x8x64xf32, #tpu.memory_space<vmem>>) attributes {dimension_semantics = [#tpu.dimension_semantics<parallel>, #tpu.dimension_semantics<parallel>], iteration_bounds = array<i64: 1, 1>, scalar_prefetch = 0 : i64, scratch_operands = 0 : i64, tpu.core_type = #tpu.core_type<tc>, window_params = [{transform_indices = @transform_0, window_bounds = array<i64: 512, 512>}, {transform_indices = @transform_1, window_bounds = array<i64: 512, 64>}, {transform_indices = @transform_2, window_bounds = array<i64: 512, 64>}, {transform_indices = @transform_3, window_bounds = array<i64: 1, 8, 64>}, {transform_indices = @transform_4, window_bounds = array<i64: 1, 8, 64>}]} {
    %c0 = arith.constant 0 : index
    %c0_0 = arith.constant 0 : index
    %0 = vector.load %arg2[%c0, %c0_0] : memref<512x512xbf16, #tpu.memory_space<vmem>>, vector<512x512xbf16>
    %c0_1 = arith.constant 0 : index
    %c0_2 = arith.constant 0 : index
    %1 = vector.load %arg3[%c0_1, %c0_2] : memref<512x64xbf16, #tpu.memory_space<vmem>>, vector<512x64xbf16>
    %cst = arith.constant dense<0.000000e+00> : vector<512x64xf32>
    %2 = tpu.matmul %0, %1, %cst {dimension_numbers = #tpu.dot_dimension_numbers<[1], [0], [0], [1], [0, 0, 1, 1], [], []>} : vector<512x512xbf16>, vector<512x64xbf16>, vector<512x64xf32> -> vector<512x64xf32>
    %3 = arith.truncf %2 : vector<512x64xf32> to vector<512x64xbf16>
    %c0_3 = arith.constant 0 : index
    %c0_4 = arith.constant 0 : index
    %4 = vector.load %arg4[%c0_3, %c0_4] : memref<512x64xbf16, #tpu.memory_space<vmem>>, vector<512x64xbf16>
    tpu.vector_store %arg4[%c0_3, %c0_4], %3 {strides = array<i32>} : memref<512x64xbf16, #tpu.memory_space<vmem>>, vector<512x64xbf16>,
    %cst_5 = arith.constant dense<0.000000e+00> : vector<64xf32>
    %5 = vector.multi_reduction <add>, %2, %cst_5 [0] : vector<512x64xf32> to vector<64xf32>
    %6 = vector.shape_cast %5 : vector<64xf32> to vector<1x64xf32>
    %7 = arith.mulf %2, %2 : vector<512x64xf32>
    %cst_6 = arith.constant dense<0.000000e+00> : vector<64xf32>
    %8 = vector.multi_reduction <add>, %7, %cst_6 [0] : vector<512x64xf32> to vector<64xf32>
    %9 = vector.shape_cast %8 : vector<64xf32> to vector<1x64xf32>
    %10 = vector.shape_cast %6 : vector<1x64xf32> to vector<1x64xf32>
    %11 = vector.broadcast %10 : vector<1x64xf32> to vector<8x64xf32>
    %c0_7 = arith.constant 0 : index
    %c0_8 = arith.constant 0 : index
    %c0_9 = arith.constant 0 : index
    %12 = vector.load %arg5[%c0_7, %c0_8, %c0_9] : memref<1x8x64xf32, #tpu.memory_space<vmem>>, vector<1x8x64xf32>
    %13 = vector.shape_cast %12 : vector<1x8x64xf32> to vector<8x64xf32>
    %14 = vector.shape_cast %11 : vector<8x64xf32> to vector<1x8x64xf32>
    tpu.vector_store %arg5[%c0_7, %c0_8, %c0_9], %14 {strides = array<i32>} : memref<1x8x64xf32, #tpu.memory_space<vmem>>, vector<1x8x64xf32>,
    %15 = vector.shape_cast %9 : vector<1x64xf32> to vector<1x64xf32>
    %16 = vector.broadcast %15 : vector<1x64xf32> to vector<8x64xf32>
    %c0_10 = arith.constant 0 : index
    %c0_11 = arith.constant 0 : index
    %c0_12 = arith.constant 0 : index
    %17 = vector.load %arg6[%c0_10, %c0_11, %c0_12] : memref<1x8x64xf32, #tpu.memory_space<vmem>>, vector<1x8x64xf32>
    %18 = vector.shape_cast %17 : vector<1x8x64xf32> to vector<8x64xf32>
    %19 = vector.shape_cast %16 : vector<8x64xf32> to vector<1x8x64xf32>
    tpu.vector_store %arg6[%c0_10, %c0_11, %c0_12], %19 {strides = array<i32>} : memref<1x8x64xf32, #tpu.memory_space<vmem>>, vector<1x8x64xf32>,
    return
  }
  func.func @transform_0(%arg0: i32, %arg1: i32) -> (i32, i32) {
    %c0_i32 = arith.constant 0 : i32
    %c0_i32_0 = arith.constant 0 : i32
    return %arg0, %c0_i32 : i32, i32
  }
  func.func @transform_1(%arg0: i32, %arg1: i32) -> (i32, i32) {
    %c0_i32 = arith.constant 0 : i32
    %c0_i32_0 = arith.constant 0 : i32
    return %c0_i32, %arg1 : i32, i32
  }
  func.func @transform_2(%arg0: i32, %arg1: i32) -> (i32, i32) {
    %c0_i32 = arith.constant 0 : i32
    return %arg0, %arg1 : i32, i32
  }
  func.func @transform_3(%arg0: i32, %arg1: i32) -> (i32, i32, i32) {
    %c0_i32 = arith.constant 0 : i32
    %c0_i32_0 = arith.constant 0 : i32
    return %arg0, %c0_i32, %arg1 : i32, i32, i32
  }
  func.func @transform_4(%arg0: i32, %arg1: i32) -> (i32, i32, i32) {
    %c0_i32 = arith.constant 0 : i32
    %c0_i32_0 = arith.constant 0 : i32
    return %arg0, %c0_i32, %arg1 : i32, i32, i32
  }
}

module attributes {stable_mosaic.version = 11 : i64} {
  func.func @_bn_lrelu_kernel(%arg0: i32, %arg1: memref<512x64xbf16, #tpu.memory_space<vmem>>, %arg2: memref<1x64xf32, #tpu.memory_space<vmem>>, %arg3: memref<1x64xf32, #tpu.memory_space<vmem>>, %arg4: memref<512x64xbf16, #tpu.memory_space<vmem>>) attributes {dimension_semantics = [#tpu.dimension_semantics<parallel>], iteration_bounds = array<i64: 1>, scalar_prefetch = 0 : i64, scratch_operands = 0 : i64, tpu.core_type = #tpu.core_type<tc>, window_params = [{transform_indices = @transform_0, window_bounds = array<i64: 512, 64>}, {pipeline_mode = #tpu.pipeline_mode<synchronous>, transform_indices = @transform_1, window_bounds = array<i64: 1, 64>}, {pipeline_mode = #tpu.pipeline_mode<synchronous>, transform_indices = @transform_2, window_bounds = array<i64: 1, 64>}, {transform_indices = @transform_3, window_bounds = array<i64: 512, 64>}]} {
    %c0 = arith.constant 0 : index
    %c0_0 = arith.constant 0 : index
    %0 = vector.load %arg1[%c0, %c0_0] : memref<512x64xbf16, #tpu.memory_space<vmem>>, vector<512x64xbf16>
    %1 = arith.extf %0 : vector<512x64xbf16> to vector<512x64xf32>
    %c0_1 = arith.constant 0 : index
    %c0_2 = arith.constant 0 : index
    %2 = vector.load %arg2[%c0_1, %c0_2] : memref<1x64xf32, #tpu.memory_space<vmem>>, vector<1x64xf32>
    %3 = vector.broadcast %2 : vector<1x64xf32> to vector<512x64xf32>
    %4 = arith.mulf %1, %3 : vector<512x64xf32>
    %c0_3 = arith.constant 0 : index
    %c0_4 = arith.constant 0 : index
    %5 = vector.load %arg3[%c0_3, %c0_4] : memref<1x64xf32, #tpu.memory_space<vmem>>, vector<1x64xf32>
    %6 = vector.broadcast %5 : vector<1x64xf32> to vector<512x64xf32>
    %7 = arith.addf %4, %6 : vector<512x64xf32>
    %cst = arith.constant 0.000000e+00 : f32
    %8 = vector.broadcast %cst : f32 to vector<512x64xf32>
    %9 = arith.cmpf ogt, %7, %8 : vector<512x64xf32>
    %cst_5 = arith.constant 2.000000e-01 : f32
    %10 = vector.broadcast %cst_5 : f32 to vector<512x64xf32>
    %11 = arith.mulf %10, %7 : vector<512x64xf32>
    %12 = arith.select %9, %7, %11 : vector<512x64xi1>, vector<512x64xf32>
    %13 = arith.truncf %12 : vector<512x64xf32> to vector<512x64xbf16>
    %c0_6 = arith.constant 0 : index
    %c0_7 = arith.constant 0 : index
    %14 = vector.load %arg4[%c0_6, %c0_7] : memref<512x64xbf16, #tpu.memory_space<vmem>>, vector<512x64xbf16>
    tpu.vector_store %arg4[%c0_6, %c0_7], %13 {strides = array<i32>} : memref<512x64xbf16, #tpu.memory_space<vmem>>, vector<512x64xbf16>,
    return
  }
  func.func @transform_0(%arg0: i32) -> (i32, i32) {
    %c0_i32 = arith.constant 0 : i32
    %c0_i32_0 = arith.constant 0 : i32
    return %arg0, %c0_i32 : i32, i32
  }
  func.func @transform_1(%arg0: i32) -> (i32, i32) {
    %c0_i32 = arith.constant 0 : i32
    %c0_i32_0 = arith.constant 0 : i32
    %c0_i32_1 = arith.constant 0 : i32
    return %c0_i32, %c0_i32_0 : i32, i32
  }
  func.func @transform_2(%arg0: i32) -> (i32, i32) {
    %c0_i32 = arith.constant 0 : i32
    %c0_i32_0 = arith.constant 0 : i32
    %c0_i32_1 = arith.constant 0 : i32
    return %c0_i32, %c0_i32_0 : i32, i32
  }
  func.func @transform_3(%arg0: i32) -> (i32, i32) {
    %c0_i32 = arith.constant 0 : i32
    %c0_i32_0 = arith.constant 0 : i32
    return %arg0, %c0_i32 : i32, i32
  }
}

module attributes {stable_mosaic.version = 11 : i64} {
  func.func @kernel(%arg0: i32, %arg1: i32, %arg2: memref<128x1024xbf16, #tpu.memory_space<vmem>>, %arg3: memref<1024x128xbf16, #tpu.memory_space<vmem>>, %arg4: memref<128x128xbf16, #tpu.memory_space<vmem>>, %arg5: memref<1x8x128xf32, #tpu.memory_space<vmem>>, %arg6: memref<1x8x128xf32, #tpu.memory_space<vmem>>) attributes {dimension_semantics = [#tpu.dimension_semantics<parallel>, #tpu.dimension_semantics<parallel>], iteration_bounds = array<i64: 1, 1>, scalar_prefetch = 0 : i64, scratch_operands = 0 : i64, tpu.core_type = #tpu.core_type<tc>, window_params = [{transform_indices = @transform_0, window_bounds = array<i64: 128, 1024>}, {transform_indices = @transform_1, window_bounds = array<i64: 1024, 128>}, {transform_indices = @transform_2, window_bounds = array<i64: 128, 128>}, {transform_indices = @transform_3, window_bounds = array<i64: 1, 8, 128>}, {transform_indices = @transform_4, window_bounds = array<i64: 1, 8, 128>}]} {
    %c0 = arith.constant 0 : index
    %c0_0 = arith.constant 0 : index
    %0 = vector.load %arg2[%c0, %c0_0] : memref<128x1024xbf16, #tpu.memory_space<vmem>>, vector<128x1024xbf16>
    %c0_1 = arith.constant 0 : index
    %c0_2 = arith.constant 0 : index
    %1 = vector.load %arg3[%c0_1, %c0_2] : memref<1024x128xbf16, #tpu.memory_space<vmem>>, vector<1024x128xbf16>
    %cst = arith.constant dense<0.000000e+00> : vector<128x128xf32>
    %2 = tpu.matmul %0, %1, %cst {dimension_numbers = #tpu.dot_dimension_numbers<[1], [0], [0], [1], [0, 0, 1, 1], [], []>} : vector<128x1024xbf16>, vector<1024x128xbf16>, vector<128x128xf32> -> vector<128x128xf32>
    %3 = arith.truncf %2 : vector<128x128xf32> to vector<128x128xbf16>
    %c0_3 = arith.constant 0 : index
    %c0_4 = arith.constant 0 : index
    %4 = vector.load %arg4[%c0_3, %c0_4] : memref<128x128xbf16, #tpu.memory_space<vmem>>, vector<128x128xbf16>
    tpu.vector_store %arg4[%c0_3, %c0_4], %3 {strides = array<i32>} : memref<128x128xbf16, #tpu.memory_space<vmem>>, vector<128x128xbf16>,
    %cst_5 = arith.constant dense<0.000000e+00> : vector<128xf32>
    %5 = vector.multi_reduction <add>, %2, %cst_5 [0] : vector<128x128xf32> to vector<128xf32>
    %6 = vector.shape_cast %5 : vector<128xf32> to vector<1x128xf32>
    %7 = arith.mulf %2, %2 : vector<128x128xf32>
    %cst_6 = arith.constant dense<0.000000e+00> : vector<128xf32>
    %8 = vector.multi_reduction <add>, %7, %cst_6 [0] : vector<128x128xf32> to vector<128xf32>
    %9 = vector.shape_cast %8 : vector<128xf32> to vector<1x128xf32>
    %10 = vector.shape_cast %6 : vector<1x128xf32> to vector<1x128xf32>
    %11 = vector.broadcast %10 : vector<1x128xf32> to vector<8x128xf32>
    %c0_7 = arith.constant 0 : index
    %c0_8 = arith.constant 0 : index
    %c0_9 = arith.constant 0 : index
    %12 = vector.load %arg5[%c0_7, %c0_8, %c0_9] : memref<1x8x128xf32, #tpu.memory_space<vmem>>, vector<1x8x128xf32>
    %13 = vector.shape_cast %12 : vector<1x8x128xf32> to vector<8x128xf32>
    %14 = vector.shape_cast %11 : vector<8x128xf32> to vector<1x8x128xf32>
    tpu.vector_store %arg5[%c0_7, %c0_8, %c0_9], %14 {strides = array<i32>} : memref<1x8x128xf32, #tpu.memory_space<vmem>>, vector<1x8x128xf32>,
    %15 = vector.shape_cast %9 : vector<1x128xf32> to vector<1x128xf32>
    %16 = vector.broadcast %15 : vector<1x128xf32> to vector<8x128xf32>
    %c0_10 = arith.constant 0 : index
    %c0_11 = arith.constant 0 : index
    %c0_12 = arith.constant 0 : index
    %17 = vector.load %arg6[%c0_10, %c0_11, %c0_12] : memref<1x8x128xf32, #tpu.memory_space<vmem>>, vector<1x8x128xf32>
    %18 = vector.shape_cast %17 : vector<1x8x128xf32> to vector<8x128xf32>
    %19 = vector.shape_cast %16 : vector<8x128xf32> to vector<1x8x128xf32>
    tpu.vector_store %arg6[%c0_10, %c0_11, %c0_12], %19 {strides = array<i32>} : memref<1x8x128xf32, #tpu.memory_space<vmem>>, vector<1x8x128xf32>,
    return
  }
  func.func @transform_0(%arg0: i32, %arg1: i32) -> (i32, i32) {
    %c0_i32 = arith.constant 0 : i32
    %c0_i32_0 = arith.constant 0 : i32
    return %arg0, %c0_i32 : i32, i32
  }
  func.func @transform_1(%arg0: i32, %arg1: i32) -> (i32, i32) {
    %c0_i32 = arith.constant 0 : i32
    %c0_i32_0 = arith.constant 0 : i32
    return %c0_i32, %arg1 : i32, i32
  }
  func.func @transform_2(%arg0: i32, %arg1: i32) -> (i32, i32) {
    %c0_i32 = arith.constant 0 : i32
    return %arg0, %arg1 : i32, i32
  }
  func.func @transform_3(%arg0: i32, %arg1: i32) -> (i32, i32, i32) {
    %c0_i32 = arith.constant 0 : i32
    %c0_i32_0 = arith.constant 0 : i32
    return %arg0, %c0_i32, %arg1 : i32, i32, i32
  }
  func.func @transform_4(%arg0: i32, %arg1: i32) -> (i32, i32, i32) {
    %c0_i32 = arith.constant 0 : i32
    %c0_i32_0 = arith.constant 0 : i32
    return %arg0, %c0_i32, %arg1 : i32, i32, i32
  }
}

module attributes {stable_mosaic.version = 11 : i64} {
  func.func @_bn_lrelu_kernel(%arg0: i32, %arg1: memref<128x128xbf16, #tpu.memory_space<vmem>>, %arg2: memref<1x128xf32, #tpu.memory_space<vmem>>, %arg3: memref<1x128xf32, #tpu.memory_space<vmem>>, %arg4: memref<128x128xbf16, #tpu.memory_space<vmem>>) attributes {dimension_semantics = [#tpu.dimension_semantics<parallel>], iteration_bounds = array<i64: 1>, scalar_prefetch = 0 : i64, scratch_operands = 0 : i64, tpu.core_type = #tpu.core_type<tc>, window_params = [{transform_indices = @transform_0, window_bounds = array<i64: 128, 128>}, {pipeline_mode = #tpu.pipeline_mode<synchronous>, transform_indices = @transform_1, window_bounds = array<i64: 1, 128>}, {pipeline_mode = #tpu.pipeline_mode<synchronous>, transform_indices = @transform_2, window_bounds = array<i64: 1, 128>}, {transform_indices = @transform_3, window_bounds = array<i64: 128, 128>}]} {
    %c0 = arith.constant 0 : index
    %c0_0 = arith.constant 0 : index
    %0 = vector.load %arg1[%c0, %c0_0] : memref<128x128xbf16, #tpu.memory_space<vmem>>, vector<128x128xbf16>
    %1 = arith.extf %0 : vector<128x128xbf16> to vector<128x128xf32>
    %c0_1 = arith.constant 0 : index
    %c0_2 = arith.constant 0 : index
    %2 = vector.load %arg2[%c0_1, %c0_2] : memref<1x128xf32, #tpu.memory_space<vmem>>, vector<1x128xf32>
    %3 = vector.broadcast %2 : vector<1x128xf32> to vector<128x128xf32>
    %4 = arith.mulf %1, %3 : vector<128x128xf32>
    %c0_3 = arith.constant 0 : index
    %c0_4 = arith.constant 0 : index
    %5 = vector.load %arg3[%c0_3, %c0_4] : memref<1x128xf32, #tpu.memory_space<vmem>>, vector<1x128xf32>
    %6 = vector.broadcast %5 : vector<1x128xf32> to vector<128x128xf32>
    %7 = arith.addf %4, %6 : vector<128x128xf32>
    %cst = arith.constant 0.000000e+00 : f32
    %8 = vector.broadcast %cst : f32 to vector<128x128xf32>
    %9 = arith.cmpf ogt, %7, %8 : vector<128x128xf32>
    %cst_5 = arith.constant 2.000000e-01 : f32
    %10 = vector.broadcast %cst_5 : f32 to vector<128x128xf32>
    %11 = arith.mulf %10, %7 : vector<128x128xf32>
    %12 = arith.select %9, %7, %11 : vector<128x128xi1>, vector<128x128xf32>
    %13 = arith.truncf %12 : vector<128x128xf32> to vector<128x128xbf16>
    %c0_6 = arith.constant 0 : index
    %c0_7 = arith.constant 0 : index
    %14 = vector.load %arg4[%c0_6, %c0_7] : memref<128x128xbf16, #tpu.memory_space<vmem>>, vector<128x128xbf16>
    tpu.vector_store %arg4[%c0_6, %c0_7], %13 {strides = array<i32>} : memref<128x128xbf16, #tpu.memory_space<vmem>>, vector<128x128xbf16>,
    return
  }
  func.func @transform_0(%arg0: i32) -> (i32, i32) {
    %c0_i32 = arith.constant 0 : i32
    %c0_i32_0 = arith.constant 0 : i32
    return %arg0, %c0_i32 : i32, i32
  }
  func.func @transform_1(%arg0: i32) -> (i32, i32) {
    %c0_i32 = arith.constant 0 : i32
    %c0_i32_0 = arith.constant 0 : i32
    %c0_i32_1 = arith.constant 0 : i32
    return %c0_i32, %c0_i32_0 : i32, i32
  }
  func.func @transform_2(%arg0: i32) -> (i32, i32) {
    %c0_i32 = arith.constant 0 : i32
    %c0_i32_0 = arith.constant 0 : i32
    %c0_i32_1 = arith.constant 0 : i32
    return %c0_i32, %c0_i32_0 : i32, i32
  }
  func.func @transform_3(%arg0: i32) -> (i32, i32) {
    %c0_i32 = arith.constant 0 : i32
    %c0_i32_0 = arith.constant 0 : i32
    return %arg0, %c0_i32 : i32, i32
  }
}

module attributes {stable_mosaic.version = 11 : i64} {
  func.func @kernel(%arg0: i32, %arg1: i32, %arg2: memref<32x2048xbf16, #tpu.memory_space<vmem>>, %arg3: memref<2048x128xbf16, #tpu.memory_space<vmem>>, %arg4: memref<32x128xbf16, #tpu.memory_space<vmem>>, %arg5: memref<1x8x128xf32, #tpu.memory_space<vmem>>, %arg6: memref<1x8x128xf32, #tpu.memory_space<vmem>>) attributes {dimension_semantics = [#tpu.dimension_semantics<parallel>, #tpu.dimension_semantics<parallel>], iteration_bounds = array<i64: 1, 2>, scalar_prefetch = 0 : i64, scratch_operands = 0 : i64, tpu.core_type = #tpu.core_type<tc>, window_params = [{transform_indices = @transform_0, window_bounds = array<i64: 32, 2048>}, {transform_indices = @transform_1, window_bounds = array<i64: 2048, 128>}, {transform_indices = @transform_2, window_bounds = array<i64: 32, 128>}, {transform_indices = @transform_3, window_bounds = array<i64: 1, 8, 128>}, {transform_indices = @transform_4, window_bounds = array<i64: 1, 8, 128>}]} {
    %c0 = arith.constant 0 : index
    %c0_0 = arith.constant 0 : index
    %0 = vector.load %arg2[%c0, %c0_0] : memref<32x2048xbf16, #tpu.memory_space<vmem>>, vector<32x2048xbf16>
    %c0_1 = arith.constant 0 : index
    %c0_2 = arith.constant 0 : index
    %1 = vector.load %arg3[%c0_1, %c0_2] : memref<2048x128xbf16, #tpu.memory_space<vmem>>, vector<2048x128xbf16>
    %cst = arith.constant dense<0.000000e+00> : vector<32x128xf32>
    %2 = tpu.matmul %0, %1, %cst {dimension_numbers = #tpu.dot_dimension_numbers<[1], [0], [0], [1], [0, 0, 1, 1], [], []>} : vector<32x2048xbf16>, vector<2048x128xbf16>, vector<32x128xf32> -> vector<32x128xf32>
    %3 = arith.truncf %2 : vector<32x128xf32> to vector<32x128xbf16>
    %c0_3 = arith.constant 0 : index
    %c0_4 = arith.constant 0 : index
    %4 = vector.load %arg4[%c0_3, %c0_4] : memref<32x128xbf16, #tpu.memory_space<vmem>>, vector<32x128xbf16>
    tpu.vector_store %arg4[%c0_3, %c0_4], %3 {strides = array<i32>} : memref<32x128xbf16, #tpu.memory_space<vmem>>, vector<32x128xbf16>,
    %cst_5 = arith.constant dense<0.000000e+00> : vector<128xf32>
    %5 = vector.multi_reduction <add>, %2, %cst_5 [0] : vector<32x128xf32> to vector<128xf32>
    %6 = vector.shape_cast %5 : vector<128xf32> to vector<1x128xf32>
    %7 = arith.mulf %2, %2 : vector<32x128xf32>
    %cst_6 = arith.constant dense<0.000000e+00> : vector<128xf32>
    %8 = vector.multi_reduction <add>, %7, %cst_6 [0] : vector<32x128xf32> to vector<128xf32>
    %9 = vector.shape_cast %8 : vector<128xf32> to vector<1x128xf32>
    %10 = vector.shape_cast %6 : vector<1x128xf32> to vector<1x128xf32>
    %11 = vector.broadcast %10 : vector<1x128xf32> to vector<8x128xf32>
    %c0_7 = arith.constant 0 : index
    %c0_8 = arith.constant 0 : index
    %c0_9 = arith.constant 0 : index
    %12 = vector.load %arg5[%c0_7, %c0_8, %c0_9] : memref<1x8x128xf32, #tpu.memory_space<vmem>>, vector<1x8x128xf32>
    %13 = vector.shape_cast %12 : vector<1x8x128xf32> to vector<8x128xf32>
    %14 = vector.shape_cast %11 : vector<8x128xf32> to vector<1x8x128xf32>
    tpu.vector_store %arg5[%c0_7, %c0_8, %c0_9], %14 {strides = array<i32>} : memref<1x8x128xf32, #tpu.memory_space<vmem>>, vector<1x8x128xf32>,
    %15 = vector.shape_cast %9 : vector<1x128xf32> to vector<1x128xf32>
    %16 = vector.broadcast %15 : vector<1x128xf32> to vector<8x128xf32>
    %c0_10 = arith.constant 0 : index
    %c0_11 = arith.constant 0 : index
    %c0_12 = arith.constant 0 : index
    %17 = vector.load %arg6[%c0_10, %c0_11, %c0_12] : memref<1x8x128xf32, #tpu.memory_space<vmem>>, vector<1x8x128xf32>
    %18 = vector.shape_cast %17 : vector<1x8x128xf32> to vector<8x128xf32>
    %19 = vector.shape_cast %16 : vector<8x128xf32> to vector<1x8x128xf32>
    tpu.vector_store %arg6[%c0_10, %c0_11, %c0_12], %19 {strides = array<i32>} : memref<1x8x128xf32, #tpu.memory_space<vmem>>, vector<1x8x128xf32>,
    return
  }
  func.func @transform_0(%arg0: i32, %arg1: i32) -> (i32, i32) {
    %c0_i32 = arith.constant 0 : i32
    %c0_i32_0 = arith.constant 0 : i32
    return %arg0, %c0_i32 : i32, i32
  }
  func.func @transform_1(%arg0: i32, %arg1: i32) -> (i32, i32) {
    %c0_i32 = arith.constant 0 : i32
    %c0_i32_0 = arith.constant 0 : i32
    return %c0_i32, %arg1 : i32, i32
  }
  func.func @transform_2(%arg0: i32, %arg1: i32) -> (i32, i32) {
    %c0_i32 = arith.constant 0 : i32
    return %arg0, %arg1 : i32, i32
  }
  func.func @transform_3(%arg0: i32, %arg1: i32) -> (i32, i32, i32) {
    %c0_i32 = arith.constant 0 : i32
    %c0_i32_0 = arith.constant 0 : i32
    return %arg0, %c0_i32, %arg1 : i32, i32, i32
  }
  func.func @transform_4(%arg0: i32, %arg1: i32) -> (i32, i32, i32) {
    %c0_i32 = arith.constant 0 : i32
    %c0_i32_0 = arith.constant 0 : i32
    return %arg0, %c0_i32, %arg1 : i32, i32, i32
  }
}

module attributes {stable_mosaic.version = 11 : i64} {
  func.func @_bn_lrelu_kernel(%arg0: i32, %arg1: memref<32x256xbf16, #tpu.memory_space<vmem>>, %arg2: memref<1x256xf32, #tpu.memory_space<vmem>>, %arg3: memref<1x256xf32, #tpu.memory_space<vmem>>, %arg4: memref<32x256xbf16, #tpu.memory_space<vmem>>) attributes {dimension_semantics = [#tpu.dimension_semantics<parallel>], iteration_bounds = array<i64: 1>, scalar_prefetch = 0 : i64, scratch_operands = 0 : i64, tpu.core_type = #tpu.core_type<tc>, window_params = [{transform_indices = @transform_0, window_bounds = array<i64: 32, 256>}, {pipeline_mode = #tpu.pipeline_mode<synchronous>, transform_indices = @transform_1, window_bounds = array<i64: 1, 256>}, {pipeline_mode = #tpu.pipeline_mode<synchronous>, transform_indices = @transform_2, window_bounds = array<i64: 1, 256>}, {transform_indices = @transform_3, window_bounds = array<i64: 32, 256>}]} {
    %c0 = arith.constant 0 : index
    %c0_0 = arith.constant 0 : index
    %0 = vector.load %arg1[%c0, %c0_0] : memref<32x256xbf16, #tpu.memory_space<vmem>>, vector<32x256xbf16>
    %1 = arith.extf %0 : vector<32x256xbf16> to vector<32x256xf32>
    %c0_1 = arith.constant 0 : index
    %c0_2 = arith.constant 0 : index
    %2 = vector.load %arg2[%c0_1, %c0_2] : memref<1x256xf32, #tpu.memory_space<vmem>>, vector<1x256xf32>
    %3 = vector.broadcast %2 : vector<1x256xf32> to vector<32x256xf32>
    %4 = arith.mulf %1, %3 : vector<32x256xf32>
    %c0_3 = arith.constant 0 : index
    %c0_4 = arith.constant 0 : index
    %5 = vector.load %arg3[%c0_3, %c0_4] : memref<1x256xf32, #tpu.memory_space<vmem>>, vector<1x256xf32>
    %6 = vector.broadcast %5 : vector<1x256xf32> to vector<32x256xf32>
    %7 = arith.addf %4, %6 : vector<32x256xf32>
    %cst = arith.constant 0.000000e+00 : f32
    %8 = vector.broadcast %cst : f32 to vector<32x256xf32>
    %9 = arith.cmpf ogt, %7, %8 : vector<32x256xf32>
    %cst_5 = arith.constant 2.000000e-01 : f32
    %10 = vector.broadcast %cst_5 : f32 to vector<32x256xf32>
    %11 = arith.mulf %10, %7 : vector<32x256xf32>
    %12 = arith.select %9, %7, %11 : vector<32x256xi1>, vector<32x256xf32>
    %13 = arith.truncf %12 : vector<32x256xf32> to vector<32x256xbf16>
    %c0_6 = arith.constant 0 : index
    %c0_7 = arith.constant 0 : index
    %14 = vector.load %arg4[%c0_6, %c0_7] : memref<32x256xbf16, #tpu.memory_space<vmem>>, vector<32x256xbf16>
    tpu.vector_store %arg4[%c0_6, %c0_7], %13 {strides = array<i32>} : memref<32x256xbf16, #tpu.memory_space<vmem>>, vector<32x256xbf16>,
    return
  }
  func.func @transform_0(%arg0: i32) -> (i32, i32) {
    %c0_i32 = arith.constant 0 : i32
    %c0_i32_0 = arith.constant 0 : i32
    return %arg0, %c0_i32 : i32, i32
  }
  func.func @transform_1(%arg0: i32) -> (i32, i32) {
    %c0_i32 = arith.constant 0 : i32
    %c0_i32_0 = arith.constant 0 : i32
    %c0_i32_1 = arith.constant 0 : i32
    return %c0_i32, %c0_i32_0 : i32, i32
  }
  func.func @transform_2(%arg0: i32) -> (i32, i32) {
    %c0_i32 = arith.constant 0 : i32
    %c0_i32_0 = arith.constant 0 : i32
    %c0_i32_1 = arith.constant 0 : i32
    return %c0_i32, %c0_i32_0 : i32, i32
  }
  func.func @transform_3(%arg0: i32) -> (i32, i32) {
    %c0_i32 = arith.constant 0 : i32
    %c0_i32_0 = arith.constant 0 : i32
    return %arg0, %c0_i32 : i32, i32
  }
}

module attributes {stable_mosaic.version = 11 : i64} {
  func.func @_matvec_sigmoid_kernel(%arg0: i32, %arg1: memref<2x4096xbf16, #tpu.memory_space<vmem>>, %arg2: memref<1x4096xf32, #tpu.memory_space<vmem>>, %arg3: memref<2x1xf32, #tpu.memory_space<vmem>>) attributes {dimension_semantics = [#tpu.dimension_semantics<parallel>], iteration_bounds = array<i64: 1>, scalar_prefetch = 0 : i64, scratch_operands = 0 : i64, tpu.core_type = #tpu.core_type<tc>, window_params = [{transform_indices = @transform_0, window_bounds = array<i64: 2, 4096>}, {pipeline_mode = #tpu.pipeline_mode<synchronous>, transform_indices = @transform_1, window_bounds = array<i64: 1, 4096>}, {transform_indices = @transform_2, window_bounds = array<i64: 2, 1>}]} {
    %c0 = arith.constant 0 : index
    %c0_0 = arith.constant 0 : index
    %0 = vector.load %arg1[%c0, %c0_0] : memref<2x4096xbf16, #tpu.memory_space<vmem>>, vector<2x4096xbf16>
    %1 = arith.extf %0 : vector<2x4096xbf16> to vector<2x4096xf32>
    %c0_1 = arith.constant 0 : index
    %c0_2 = arith.constant 0 : index
    %2 = vector.load %arg2[%c0_1, %c0_2] : memref<1x4096xf32, #tpu.memory_space<vmem>>, vector<1x4096xf32>
    %3 = vector.broadcast %2 : vector<1x4096xf32> to vector<2x4096xf32>
    %4 = arith.mulf %1, %3 : vector<2x4096xf32>
    %cst = arith.constant dense<0.000000e+00> : vector<2xf32>
    %5 = vector.multi_reduction <add>, %4, %cst [1] : vector<2x4096xf32> to vector<2xf32>
    %6 = vector.shape_cast %5 : vector<2xf32> to vector<2x1xf32>
    %7 = arith.negf %6 : vector<2x1xf32>
    %8 = math.exp %7 : vector<2x1xf32>
    %cst_3 = arith.constant 1.000000e+00 : f32
    %9 = vector.broadcast %cst_3 : f32 to vector<2x1xf32>
    %10 = arith.addf %9, %8 : vector<2x1xf32>
    %11 = arith.divf %9, %10 : vector<2x1xf32>
    %c0_4 = arith.constant 0 : index
    %c0_5 = arith.constant 0 : index
    %12 = vector.load %arg3[%c0_4, %c0_5] : memref<2x1xf32, #tpu.memory_space<vmem>>, vector<2x1xf32>
    tpu.vector_store %arg3[%c0_4, %c0_5], %11 {strides = array<i32>} : memref<2x1xf32, #tpu.memory_space<vmem>>, vector<2x1xf32>,
    return
  }
  func.func @transform_0(%arg0: i32) -> (i32, i32) {
    %c0_i32 = arith.constant 0 : i32
    %c0_i32_0 = arith.constant 0 : i32
    return %arg0, %c0_i32 : i32, i32
  }
  func.func @transform_1(%arg0: i32) -> (i32, i32) {
    %c0_i32 = arith.constant 0 : i32
    %c0_i32_0 = arith.constant 0 : i32
    %c0_i32_1 = arith.constant 0 : i32
    return %c0_i32, %c0_i32_0 : i32, i32
  }
  func.func @transform_2(%arg0: i32) -> (i32, i32) {
    %c0_i32 = arith.constant 0 : i32
    %c0_i32_0 = arith.constant 0 : i32
    return %arg0, %c0_i32 : i32, i32
  }
}

</mosaic_0001>

<bundles_post_ra>
// kernel: netd_forward.8
= control target key start
LH: loop header
LB: loop body
LE: loop exit
PB: predicated region body
PF: predicated region fallthrough
CT: control target
= control target key end

     0   :  { %s3128_s9 = smov 0   ;;  %s3130_s10 = smov 0   ;;  %s3517_s0 = inlined_call_operand.vmem [shape: bf16[2048,128], index: 0, kind: input, shape index: {}]   ;;  %s3518_s1 = inlined_call_operand.vmem [shape: bf16[128,32], index: 1, kind: input, shape index: {}]   ;;  %s3519_s2 = inlined_call_operand.vmem [shape: bf16[2048,32], index: 2, kind: output, shape index: {}]  }
   0x1   :  { %s3132_s11 = smov 0  }
   0x2 LB: > { %s24_s12 = sadd.s32 1, %s3107_s10  ;;  %p2426_p0 = scmp.ge.s32.totalorder %s3111_s11, 1  ;;  %s3111_s11 = sphi %s3132_s11, %s12_s11   ;;  %s3107_s10 = sphi %s3130_s10, %s3521_s10   ;;  %s3103_s9 = sphi %s3128_s9, %s3520_s9  }
   0x3   : > { %p26_p1 = scmp.ge.s32.totalorder %s24_s12, 2  ;;  %p136_p2 = scmp.lt.s32.totalorder %s3111_s11, 3 }
   0x5   : > { %s3523_s12 = smov (%p26_p1, %s24_s12), 0  ;;  %p137_p3 = pnand %p2426_p0, %p136_p2 }
   0x6   : > { %v3017_v0 = vld [vmem:[%s3518_s1] sm:$0xff] (!%p137_p3)   ;;  %s2427_s15 = sshll.u32 (!%p137_p3), %s3103_s9, 7  ;;  %v3018_v1 = vld [vmem:[%s3518_s1 + $0x8] sm:$0xff] (!%p137_p3)   ;;  %v3019_v2 = vld [vmem:[%s3518_s1 + $0x10] sm:$0xff] (!%p137_p3)   ;;  %vm2202_vm2 = vcmask (!%p137_p3), 257024  }
   0x7   : > { %140 = sbr.rel (%p137_p3) target bundleno = 387 (0x183), region = 28  ;;  %p166_p4 = scmp.lt.s32.totalorder (!%p137_p3), %s2427_s15, 255  ;;  %2833 = vmatprep.subr.bf16.mxu0 (!%p137_p3), %v3017_v0  ;;  %2977 = vmatprep.subr.bf16.mxu1 (!%p137_p3), %v3017_v0  ;;  %v3020_v3 = vld [vmem:[%s3518_s1 + $0x18] sm:$0xff] (!%p137_p3)   ;;  %v3021_v6 = vld [vmem:[%s3518_s1 + $0x20] sm:$0xff] (!%p137_p3)   ;;  %v3022_v7 = vld [vmem:[%s3518_s1 + $0x28] sm:$0xff] (!%p137_p3)  }
   0x8   : > { %2834 = vmatpush3.bf16.msra.mxu0 (!%p137_p3), %v3017_v0  ;;  %2985 = vmatpush3.bf16.msra.mxu1 (!%p137_p3), %v3017_v0  ;;  %v3023_v8 = vld [vmem:[%s3518_s1 + $0x30] sm:$0xff] (!%p137_p3)   ;;  %v3024_v9 = vld [vmem:[%s3518_s1 + $0x38] sm:$0xff] (!%p137_p3)  }
   0x9   : > { %2835 = vmatprep.subr.bf16.mxu0 (!%p137_p3), %v3018_v1  ;;  %2978 = vmatprep.subr.bf16.mxu1 (!%p137_p3), %v3018_v1 }
   0xc   : > { %2836 = vmatpush3.bf16.msra.mxu0 (!%p137_p3), %v3018_v1  ;;  %2986 = vmatpush3.bf16.msra.mxu1 (!%p137_p3), %v3018_v1 }
   0xd   : > { %2837 = vmatprep.subr.bf16.mxu0 (!%p137_p3), %v3019_v2  ;;  %2979 = vmatprep.subr.bf16.mxu1 (!%p137_p3), %v3019_v2 }
   0xe   : > { %s3525_s15 = smov (!%p166_p4, %s2427_s15), 255 }
   0xf   : > { %s2428_s20 = sshll.u32 %s3525_s15, 2 }
  0x10   : > { %s3163_s23 = scalar_lea.vmem %s3517_s0, %s2428_s20  ;;  %2838 = vmatpush3.bf16.msra.mxu0 %v3019_v2  ;;  %2987 = vmatpush3.bf16.msra.mxu1 %v3019_v2  ;;  %s3249_s8 = scalar_lea.vmem %s3519_s2, %s2428_s20 }
  0x11   : > { %v3025_v4 = vld [vmem:[%s3163_s23] sm:$0xff]   ;;  %2839 = vmatprep.subr.bf16.mxu0 %v3020_v3  ;;  %2980 = vmatprep.subr.bf16.mxu1 %v3020_v3  ;;  %v3027_v10 = vld [vmem:[%s3163_s23 + $0x8] sm:$0xff]   ;;  %v3029_v12 = vld [vmem:[%s3163_s23 + $0x10] sm:$0xff]  }
  0x12   : > { %v3026_v5 = vld [vmem:[%s3163_s23 + $0x100] sm:$0xff]   ;;  %2849 = vmatprep.mubr.bf16.mxu0 %v3025_v4  ;;  %v3028_v11 = vld [vmem:[%s3163_s23 + $0x108] sm:$0xff]   ;;  %v3030_v13 = vld [vmem:[%s3163_s23 + $0x110] sm:$0xff]  }
  0x13   : > { %2913 = vmatprep.mubr.bf16.mxu1 %v3026_v5  ;;  %v3031_v14 = vld [vmem:[%s3163_s23 + $0x18] sm:$0xff]   ;;  %v3033_v16 = vld [vmem:[%s3163_s23 + $0x20] sm:$0xff]   ;;  %v3035_v18 = vld [vmem:[%s3163_s23 + $0x28] sm:$0xff]  }
  0x14   : > { %2840 = vmatpush3.bf16.msra.mxu0 %v3020_v3  ;;  %2988 = vmatpush3.bf16.msra.mxu1 %v3020_v3  ;;  %v3032_v15 = vld [vmem:[%s3163_s23 + $0x118] sm:$0xff]   ;;  %v3034_v17 = vld [vmem:[%s3163_s23 + $0x120] sm:$0xff]   ;;  %v3036_v19 = vld [vmem:[%s3163_s23 + $0x128] sm:$0xff]  }
  0x15   : > { %2841 = vmatprep.subr.bf16.mxu0 %v3021_v6  ;;  %2981 = vmatprep.subr.bf16.mxu1 %v3021_v6  ;;  %v3037_v20 = vld [vmem:[%s3163_s23 + $0x30] sm:$0xff]   ;;  %v3039_v22 = vld [vmem:[%s3163_s23 + $0x38] sm:$0xff]   ;;  %v3041_v24 = vld [vmem:[%s3163_s23 + $0x40] sm:$0xff]  }
  0x16   : > { %v3038_v21 = vld [vmem:[%s3163_s23 + $0x130] sm:$0xff]   ;;  %v3040_v23 = vld [vmem:[%s3163_s23 + $0x138] sm:$0xff]   ;;  %v3042_v25 = vld [vmem:[%s3163_s23 + $0x140] sm:$0xff]  }
  0x17   : > { %v3043_v26 = vld [vmem:[%s3163_s23 + $0x48] sm:$0xff]   ;;  %v3045_v28 = vld [vmem:[%s3163_s23 + $0x50] sm:$0xff]   ;;  %v3047_v30 = vld [vmem:[%s3163_s23 + $0x58] sm:$0xff]  }
  0x18   : > { %2842 = vmatpush3.bf16.msra.mxu0 %v3021_v6  ;;  %2989 = vmatpush3.bf16.msra.mxu1 %v3021_v6  ;;  %v3044_v27 = vld [vmem:[%s3163_s23 + $0x148] sm:$0xff]   ;;  %v3046_v29 = vld [vmem:[%s3163_s23 + $0x150] sm:$0xff]   ;;  %v3048_v31 = vld [vmem:[%s3163_s23 + $0x158] sm:$0xff]  }
  0x19   : > { %2843 = vmatprep.subr.bf16.mxu0 %v3022_v7  ;;  %2982 = vmatprep.subr.bf16.mxu1 %v3022_v7  ;;  %v3049_v32 = vld [vmem:[%s3163_s23 + $0x60] sm:$0xff]   ;;  %v3051_v34 = vld [vmem:[%s3163_s23 + $0x68] sm:$0xff]   ;;  %v3053_v36 = vld [vmem:[%s3163_s23 + $0x70] sm:$0xff]  }
  0x1a   : > { %v3050_v33 = vld [vmem:[%s3163_s23 + $0x160] sm:$0xff]   ;;  %v3052_v35 = vld [vmem:[%s3163_s23 + $0x168] sm:$0xff]   ;;  %v3054_v37 = vld [vmem:[%s3163_s23 + $0x170] sm:$0xff]  }
  0x1b   : > { %v3055_v38 = vld [vmem:[%s3163_s23 + $0x78] sm:$0xff]   ;;  %v3057_v40 = vld [vmem:[%s3163_s23 + $0x80] sm:$0xff]   ;;  %v3059_v42 = vld [vmem:[%s3163_s23 + $0x88] sm:$0xff]  }
  0x1c   : > { %2844 = vmatpush3.bf16.msra.mxu0 %v3022_v7  ;;  %2990 = vmatpush3.bf16.msra.mxu1 %v3022_v7  ;;  %v3056_v39 = vld [vmem:[%s3163_s23 + $0x178] sm:$0xff]   ;;  %v3058_v41 = vld [vmem:[%s3163_s23 + $0x180] sm:$0xff]   ;;  %v3060_v43 = vld [vmem:[%s3163_s23 + $0x188] sm:$0xff]  }
  0x1d   : > { %2845 = vmatprep.subr.bf16.mxu0 %v3023_v8  ;;  %2983 = vmatprep.subr.bf16.mxu1 %v3023_v8  ;;  %v3061_v44 = vld [vmem:[%s3163_s23 + $0x90] sm:$0xff]   ;;  %v3063_v46 = vld [vmem:[%s3163_s23 + $0x98] sm:$0xff]   ;;  %v3065_v48 = vld [vmem:[%s3163_s23 + $0xa0] sm:$0xff]  }
  0x1e   : > { %v3062_v45 = vld [vmem:[%s3163_s23 + $0x190] sm:$0xff]   ;;  %v3064_v47 = vld [vmem:[%s3163_s23 + $0x198] sm:$0xff]   ;;  %v3066_v49 = vld [vmem:[%s3163_s23 + $0x1a0] sm:$0xff]  }
  0x1f   : > { %v3067_v50 = vld [vmem:[%s3163_s23 + $0xa8] sm:$0xff]   ;;  %v3069_v52 = vld [vmem:[%s3163_s23 + $0xb0] sm:$0xff]   ;;  %v3071_v54 = vld [vmem:[%s3163_s23 + $0xb8] sm:$0xff]  }
  0x20   : > { %2846 = vmatpush3.bf16.msra.mxu0 %v3023_v8  ;;  %2991 = vmatpush3.bf16.msra.mxu1 %v3023_v8  ;;  %v3068_v51 = vld [vmem:[%s3163_s23 + $0x1a8] sm:$0xff]   ;;  %v3070_v53 = vld [vmem:[%s3163_s23 + $0x1b0] sm:$0xff]   ;;  %v3072_v55 = vld [vmem:[%s3163_s23 + $0x1b8] sm:$0xff]  }
  0x21   : > { %2847 = vmatprep.subr.bf16.mxu0 %v3024_v9  ;;  %2984 = vmatprep.subr.bf16.mxu1 %v3024_v9  ;;  %v3073_v56 = vld [vmem:[%s3163_s23 + $0xc0] sm:$0xff]   ;;  %v3075_v58 = vld [vmem:[%s3163_s23 + $0xc8] sm:$0xff]   ;;  %v3077_v60 = vld [vmem:[%s3163_s23 + $0xd0] sm:$0xff]  }
  0x22   : > { %v3074_v57 = vld [vmem:[%s3163_s23 + $0x1c0] sm:$0xff]   ;;  %v3076_v59 = vld [vmem:[%s3163_s23 + $0x1c8] sm:$0xff]   ;;  %v3078_v61 = vld [vmem:[%s3163_s23 + $0x1d0] sm:$0xff]  }
  0x23   : > { %v3079_v62 = vld [vmem:[%s3163_s23 + $0xd8] sm:$0xff]   ;;  %v3081_v0 = vld [vmem:[%s3163_s23 + $0xe0] sm:$0xff]   ;;  %v3083_v2 = vld [vmem:[%s3163_s23 + $0xe8] sm:$0xff]  }
  0x24   : > { %2848 = vmatpush3.bf16.msra.mxu0 %v3024_v9  ;;  %2992 = vmatpush3.bf16.msra.mxu1 %v3024_v9  ;;  %v3080_v63 = vld [vmem:[%s3163_s23 + $0x1d8] sm:$0xff]   ;;  %v3082_v1 = vld [vmem:[%s3163_s23 + $0x1e0] sm:$0xff]   ;;  %v3084_v3 = vld [vmem:[%s3163_s23 + $0x1e8] sm:$0xff]  }
  0x25   : > { %v3085_v4 = vld [vmem:[%s3163_s23 + $0xf0] sm:$0xff]   ;;  %v3087_v6 = vld [vmem:[%s3163_s23 + $0xf8] sm:$0xff]  }
  0x26   : > { %v3086_v5 = vld [vmem:[%s3163_s23 + $0x1f0] sm:$0xff]   ;;  %v3088_v7 = vld [vmem:[%s3163_s23 + $0x1f8] sm:$0xff]  }
  0x27   : > { %2850 = vmatmul.mubr.bf16.vlgmr.msra.gmra.mrb[0].mxu0 %v3027_v10  ;;  %2914 = vmatmul.mubr.bf16.vlgmr.msra.gmra.mrb[0].mxu1 %v3028_v11 }
  0x28   : > { %2853 = vmatprep.mubr.bf16.mxu0 %v3029_v12  ;;  %2917 = vmatprep.mubr.bf16.mxu1 %v3030_v13 }
  0x2f   : > { %2854 = vmatmul.mubr.bf16.gmra.mrb[4].mxu0 %v3031_v14  ;;  %2918 = vmatmul.mubr.bf16.gmra.mrb[4].mxu1 %v3032_v15 }
  0x30   : > { %2857 = vmatprep.mubr.bf16.mxu0 %v3033_v16  ;;  %2921 = vmatprep.mubr.bf16.mxu1 %v3034_v17 }
  0x37   : > { %2858 = vmatmul.mubr.bf16.gmra.mrb[8].mxu0 %v3035_v18  ;;  %2922 = vmatmul.mubr.bf16.gmra.mrb[8].mxu1 %v3036_v19 }
  0x38   : > { %2861 = vmatprep.mubr.bf16.mxu0 %v3037_v20  ;;  %2925 = vmatprep.mubr.bf16.mxu1 %v3038_v21 }
  0x3f   : > { %2862 = vmatmul.mubr.bf16.gmra.mrb[12].mxu0 %v3039_v22  ;;  %2926 = vmatmul.mubr.bf16.gmra.mrb[12].mxu1 %v3040_v23 }
  0x40   : > { %2865 = vmatprep.mubr.bf16.mxu0 %v3041_v24  ;;  %2929 = vmatprep.mubr.bf16.mxu1 %v3042_v25 }
  0x47   : > { %2866 = vmatmul.mubr.bf16.gmra.mrb[16].mxu0 %v3043_v26  ;;  %2930 = vmatmul.mubr.bf16.gmra.mrb[16].mxu1 %v3044_v27 }
  0x48   : > { %2869 = vmatprep.mubr.bf16.mxu0 %v3045_v28  ;;  %2933 = vmatprep.mubr.bf16.mxu1 %v3046_v29 }
  0x4f   : > { %2870 = vmatmul.mubr.bf16.gmra.mrb[20].mxu0 %v3047_v30  ;;  %2934 = vmatmul.mubr.bf16.gmra.mrb[20].mxu1 %v3048_v31 }
  0x50   : > { %2873 = vmatprep.mubr.bf16.mxu0 %v3049_v32  ;;  %2937 = vmatprep.mubr.bf16.mxu1 %v3050_v33 }
  0x57   : > { %2874 = vmatmul.mubr.bf16.gmra.mrb[24].mxu0 %v3051_v34  ;;  %2938 = vmatmul.mubr.bf16.gmra.mrb[24].mxu1 %v3052_v35 }
  0x58   : > { %2877 = vmatprep.mubr.bf16.mxu0 %v3053_v36  ;;  %2941 = vmatprep.mubr.bf16.mxu1 %v3054_v37 }
  0x5f   : > { %2878 = vmatmul.mubr.bf16.gmra.mrb[28].mxu0 %v3055_v38  ;;  %2942 = vmatmul.mubr.bf16.gmra.mrb[28].mxu1 %v3056_v39 }
  0x60   : > { %2881 = vmatprep.mubr.bf16.mxu0 %v3057_v40  ;;  %2945 = vmatprep.mubr.bf16.mxu1 %v3058_v41 }
  0x67   : > { %2882 = vmatmul.mubr.bf16.gmra.mrb[32].mxu0 %v3059_v42  ;;  %2946 = vmatmul.mubr.bf16.gmra.mrb[32].mxu1 %v3060_v43 }
  0x68   : > { %2885 = vmatprep.mubr.bf16.mxu0 %v3061_v44  ;;  %2949 = vmatprep.mubr.bf16.mxu1 %v3062_v45 }
  0x6f   : > { %2886 = vmatmul.mubr.bf16.gmra.mrb[36].mxu0 %v3063_v46  ;;  %2950 = vmatmul.mubr.bf16.gmra.mrb[36].mxu1 %v3064_v47 }
  0x70   : > { %2889 = vmatprep.mubr.bf16.mxu0 %v3065_v48  ;;  %2953 = vmatprep.mubr.bf16.mxu1 %v3066_v49 }
  0x77   : > { %2890 = vmatmul.mubr.bf16.gmra.mrb[40].mxu0 %v3067_v50  ;;  %2954 = vmatmul.mubr.bf16.gmra.mrb[40].mxu1 %v3068_v51 }
  0x78   : > { %2893 = vmatprep.mubr.bf16.mxu0 %v3069_v52  ;;  %2957 = vmatprep.mubr.bf16.mxu1 %v3070_v53 }
  0x7f   : > { %2894 = vmatmul.mubr.bf16.gmra.mrb[44].mxu0 %v3071_v54  ;;  %2958 = vmatmul.mubr.bf16.gmra.mrb[44].mxu1 %v3072_v55 }
  0x80   : > { %2897 = vmatprep.mubr.bf16.mxu0 %v3073_v56  ;;  %2961 = vmatprep.mubr.bf16.mxu1 %v3074_v57 }
  0x87   : > { %2898 = vmatmul.mubr.bf16.gmra.mrb[48].mxu0 %v3075_v58  ;;  %2962 = vmatmul.mubr.bf16.gmra.mrb[48].mxu1 %v3076_v59 }
  0x88   : > { %2901 = vmatprep.mubr.bf16.mxu0 %v3077_v60  ;;  %2965 = vmatprep.mubr.bf16.mxu1 %v3078_v61 }
  0x8f   : > { %2902 = vmatmul.mubr.bf16.gmra.mrb[52].mxu0 %v3079_v62  ;;  %2966 = vmatmul.mubr.bf16.gmra.mrb[52].mxu1 %v3080_v63 }
  0x90   : > { %2905 = vmatprep.mubr.bf16.mxu0 %v3081_v0  ;;  %2969 = vmatprep.mubr.bf16.mxu1 %v3082_v1 }
  0x97   : > { %2906 = vmatmul.mubr.bf16.gmra.mrb[56].mxu0 %v3083_v2  ;;  %2970 = vmatmul.mubr.bf16.gmra.mrb[56].mxu1 %v3084_v3 }
  0x98   : > { %2909 = vmatprep.mubr.bf16.mxu0 %v3085_v4  ;;  %2973 = vmatprep.mubr.bf16.mxu1 %v3086_v5 }
  0x9f   : > { %2910 = vmatmul.mubr.bf16.gmra.mrb[60].mxu0 %v3087_v6  ;;  %2974 = vmatmul.mubr.bf16.gmra.mrb[60].mxu1 %v3088_v7 }
  0xfa   : > { %v2851_v8 = vpop.f32.mrb[0].mxu0  ;;  %v2915_v9 = vpop.f32.mrb[0].mxu1 }
  0xfb   : > { %vm1308_vm0 = vcmp.gt.f32.partialorder %v2851_v8, 0.0  ;;  %v1436_v10 = vmul.f32 0.2, %v2851_v8  ;;  %vm1372_vm1 = vcmp.gt.f32.partialorder %v2915_v9, 0.0  ;;  %v1500_v11 = vmul.f32 0.2, %v2915_v9 }
  0xfc   : > { %v795_v12 = vpop.f32.mrb[1].mxu0  ;;  %v1051_v13 = vpop.f32.mrb[1].mxu1 }
  0xfd   : > { %v1564_v14 = vsel %vm1308_vm0, %v2851_v8, %v1436_v10  ;;  %v1628_v15 = vsel %vm1372_vm1, %v2915_v9, %v1500_v11  ;;  %vm1306_vm3 = vcmp.gt.f32.partialorder %v795_v12, 0.0  ;;  %v1434_v16 = vmul.f32 0.2, %v795_v12  ;;  %v2852_v17 = vpop.f32.mrb[2].mxu0  ;;  %v2916_v18 = vpop.f32.mrb[2].mxu1 }
  0xfe   : > { %v2635_v19 = vpack.c.bf16 %v1564_v14, %v1564_v14  ;;  %v2699_v20 = vpack.c.bf16 %v1628_v15, %v1628_v15  ;;  %vm1370_vm4 = vcmp.gt.f32.partialorder %v1051_v13, 0.0  ;;  %v1498_v21 = vmul.f32 0.2, %v1051_v13  ;;  %v798_v22 = vpop.f32.mrb[3].mxu0  ;;  %v1054_v23 = vpop.f32.mrb[3].mxu1 }
  0xff   : > { %v1562_v24 = vsel %vm1306_vm3, %v795_v12, %v1434_v16  ;;  %vm1309_vm5 = vcmp.gt.f32.partialorder %v2852_v17, 0.0  ;;  %v1437_v25 = vmul.f32 0.2, %v2852_v17  ;;  %vm1373_vm6 = vcmp.gt.f32.partialorder %v2916_v18, 0.0 }
 0x100   : > { %2205 = vst.msk [vmem:[%s3249_s8 + $0x8] sm:$0xf] %vm2202_vm2, %v2635_v19  ;;  %2269 = vst.msk [vmem:[%s3249_s8 + $0x108] sm:$0xf] %vm2202_vm2, %v2699_v20  ;;  %v2633_v26 = vpack.c.bf16 %v1562_v24, %v1562_v24  ;;  %v1626_v27 = vsel %vm1370_vm4, %v1051_v13, %v1498_v21  ;;  %v1501_v28 = vmul.f32 0.2, %v2916_v18 }
 0x101   : > { %vm1307_vm7 = vcmp.gt.f32.partialorder %v798_v22, 0.0  ;;  %v2697_v29 = vpack.c.bf16 %v1626_v27, %v1626_v27  ;;  %v1565_v30 = vsel %vm1309_vm5, %v2852_v17, %v1437_v25  ;;  %v1435_v31 = vmul.f32 0.2, %v798_v22 }
 0x102   : > { %vm1371_vm8 = vcmp.gt.f32.partialorder %v1054_v23, 0.0  ;;  %2203 = vst.msk [vmem:[%s3249_s8] sm:$0xf] %vm2202_vm2, %v2633_v26  ;;  %v2636_v32 = vpack.c.bf16 %v1565_v30, %v1565_v30  ;;  %v1629_v33 = vsel %vm1373_vm6, %v2916_v18, %v1501_v28  ;;  %v1499_v34 = vmul.f32 0.2, %v1054_v23  ;;  %v2855_v35 = vpop.f32.mrb[4].mxu0 }
 0x103   : > { %v2919_v36 = vpop.f32.mrb[4].mxu1  ;;  %2267 = vst.msk [vmem:[%s3249_s8 + $0x100] sm:$0xf] %vm2202_vm2, %v2697_v29  ;;  %v2700_v37 = vpack.c.bf16 %v1629_v33, %v1629_v33  ;;  %v1563_v38 = vsel %vm1307_vm7, %v798_v22, %v1435_v31  ;;  %vm1312_vm9 = vcmp.gt.f32.partialorder %v2855_v35, 0.0  ;;  %v1440_v39 = vmul.f32 0.2, %v2855_v35 }
 0x104   : > { %v811_v40 = vpop.f32.mrb[5].mxu0  ;;  %v1067_v41 = vpop.f32.mrb[5].mxu1  ;;  %2206 = vst.msk [vmem:[%s3249_s8 + $0xc] sm:$0xf] %vm2202_vm2, %v2636_v32  ;;  %v2634_v42 = vpack.c.bf16 %v1563_v38, %v1563_v38  ;;  %v1627_v43 = vsel %vm1371_vm8, %v1054_v23, %v1499_v34  ;;  %vm1376_vm10 = vcmp.gt.f32.partialorder %v2919_v36, 0.0 }
 0x105   : > { %v1504_v44 = vmul.f32 0.2, %v2919_v36  ;;  %v2856_v45 = vpop.f32.mrb[6].mxu0  ;;  %v2920_v46 = vpop.f32.mrb[6].mxu1  ;;  %2270 = vst.msk [vmem:[%s3249_s8 + $0x10c] sm:$0xf] %vm2202_vm2, %v2700_v37  ;;  %v2698_v47 = vpack.c.bf16 %v1627_v43, %v1627_v43  ;;  %v1568_v48 = vsel %vm1312_vm9, %v2855_v35, %v1440_v39 }
 0x106   : > { %vm1310_vm11 = vcmp.gt.f32.partialorder %v811_v40, 0.0  ;;  %v1438_v49 = vmul.f32 0.2, %v811_v40  ;;  %v814_v50 = vpop.f32.mrb[7].mxu0  ;;  %v1070_v51 = vpop.f32.mrb[7].mxu1  ;;  %v2639_v52 = vpack.c.bf16 %v1568_v48, %v1568_v48  ;;  %vm1374_vm12 = vcmp.gt.f32.partialorder %v1067_v41, 0.0 }
 0x107   : > { %2204 = vst.msk [vmem:[%s3249_s8 + $0x4] sm:$0xf] %vm2202_vm2, %v2634_v42  ;;  %v1632_v53 = vsel %vm1376_vm10, %v2919_v36, %v1504_v44  ;;  %v1502_v54 = vmul.f32 0.2, %v1067_v41  ;;  %2268 = vst.msk [vmem:[%s3249_s8 + $0x104] sm:$0xf] %vm2202_vm2, %v2698_v47 }
 0x108   : > { %v2703_v55 = vpack.c.bf16 %v1632_v53, %v1632_v53  ;;  %v1566_v56 = vsel %vm1310_vm11, %v811_v40, %v1438_v49  ;;  %vm1313_vm13 = vcmp.gt.f32.partialorder %v2856_v45, 0.0  ;;  %v1441_v57 = vmul.f32 0.2, %v2856_v45  ;;  %2209 = vst.msk [vmem:[%s3249_s8 + $0x18] sm:$0xf] %vm2202_vm2, %v2639_v52 }
 0x109   : > { %v2637_v58 = vpack.c.bf16 %v1566_v56, %v1566_v56  ;;  %v1630_v59 = vsel %vm1374_vm12, %v1067_v41, %v1502_v54  ;;  %vm1377_vm14 = vcmp.gt.f32.partialorder %v2920_v46, 0.0  ;;  %v1505_v60 = vmul.f32 0.2, %v2920_v46 }
 0x10a   : > { %2273 = vst.msk [vmem:[%s3249_s8 + $0x118] sm:$0xf] %vm2202_vm2, %v2703_v55  ;;  %v2701_v61 = vpack.c.bf16 %v1630_v59, %v1630_v59  ;;  %v1569_v62 = vsel %vm1313_vm13, %v2856_v45, %v1441_v57  ;;  %vm1311_vm15 = vcmp.gt.f32.partialorder %v814_v50, 0.0  ;;  %v1439_v63 = vmul.f32 0.2, %v814_v50  ;;  %v2859_v3 = vpop.f32.mrb[8].mxu0 }
 0x10b   : > { %2207 = vst.msk [vmem:[%s3249_s8 + $0x10] sm:$0xf] %vm2202_vm2, %v2637_v58  ;;  %v2640_v0 = vpack.c.bf16 %v1569_v62, %v1569_v62  ;;  %v1633_v1 = vsel %vm1377_vm14, %v2920_v46, %v1505_v60  ;;  %vm1375_vm0 = vcmp.gt.f32.partialorder %v1070_v51, 0.0  ;;  %v1503_v2 = vmul.f32 0.2, %v1070_v51  ;;  %v2923_v4 = vpop.f32.mrb[8].mxu1 }
 0x10c   : > { %2271 = vst.msk [vmem:[%s3249_s8 + $0x110] sm:$0xf] %vm2202_vm2, %v2701_v61  ;;  %v2704_v5 = vpack.c.bf16 %v1633_v1, %v1633_v1  ;;  %v1567_v6 = vsel %vm1311_vm15, %v814_v50, %v1439_v63  ;;  %vm1316_vm1 = vcmp.gt.f32.partialorder %v2859_v3, 0.0  ;;  %v1444_v7 = vmul.f32 0.2, %v2859_v3  ;;  %v827_v8 = vpop.f32.mrb[9].mxu0 }
 0x10d   : > { %v1083_v9 = vpop.f32.mrb[9].mxu1  ;;  %2210 = vst.msk [vmem:[%s3249_s8 + $0x1c] sm:$0xf] %vm2202_vm2, %v2640_v0  ;;  %v2638_v10 = vpack.c.bf16 %v1567_v6, %v1567_v6  ;;  %v1631_v11 = vsel %vm1375_vm0, %v1070_v51, %v1503_v2  ;;  %vm1380_vm3 = vcmp.gt.f32.partialorder %v2923_v4, 0.0  ;;  %v1508_v12 = vmul.f32 0.2, %v2923_v4 }
 0x10e   : > { %v2860_v13 = vpop.f32.mrb[10].mxu0  ;;  %v2924_v14 = vpop.f32.mrb[10].mxu1  ;;  %2274 = vst.msk [vmem:[%s3249_s8 + $0x11c] sm:$0xf] %vm2202_vm2, %v2704_v5  ;;  %v2702_v15 = vpack.c.bf16 %v1631_v11, %v1631_v11  ;;  %v1572_v16 = vsel %vm1316_vm1, %v2859_v3, %v1444_v7  ;;  %vm1314_vm4 = vcmp.gt.f32.partialorder %v827_v8, 0.0  ;;  %vm1378_vm5 = vcmp.gt.f32.partialorder %v1083_v9, 0.0 }
 0x10f   : > { %v1442_v17 = vmul.f32 0.2, %v827_v8  ;;  %v830_v18 = vpop.f32.mrb[11].mxu0  ;;  %v1086_v19 = vpop.f32.mrb[11].mxu1  ;;  %2208 = vst.msk [vmem:[%s3249_s8 + $0x14] sm:$0xf] %vm2202_vm2, %v2638_v10  ;;  %v2643_v20 = vpack.c.bf16 %v1572_v16, %v1572_v16  ;;  %v1636_v21 = vsel %vm1380_vm3, %v2923_v4, %v1508_v12 }
 0x110   : > { %v1506_v22 = vmul.f32 0.2, %v1083_v9  ;;  %2272 = vst.msk [vmem:[%s3249_s8 + $0x114] sm:$0xf] %vm2202_vm2, %v2702_v15  ;;  %v2707_v23 = vpack.c.bf16 %v1636_v21, %v1636_v21  ;;  %vm1317_vm6 = vcmp.gt.f32.partialorder %v2860_v13, 0.0  ;;  %vm1381_vm7 = vcmp.gt.f32.partialorder %v2924_v14, 0.0 }
 0x111   : > { %v1570_v24 = vsel %vm1314_vm4, %v827_v8, %v1442_v17  ;;  %v1445_v25 = vmul.f32 0.2, %v2860_v13  ;;  %2213 = vst.msk [vmem:[%s3249_s8 + $0x28] sm:$0xf] %vm2202_vm2, %v2643_v20  ;;  %v1509_v28 = vmul.f32 0.2, %v2924_v14 }
 0x112   : > { %v2641_v26 = vpack.c.bf16 %v1570_v24, %v1570_v24  ;;  %v1634_v27 = vsel %vm1378_vm5, %v1083_v9, %v1506_v22  ;;  %2277 = vst.msk [vmem:[%s3249_s8 + $0x128] sm:$0xf] %vm2202_vm2, %v2707_v23  ;;  %vm1315_vm8 = vcmp.gt.f32.partialorder %v830_v18, 0.0  ;;  %v1443_v31 = vmul.f32 0.2, %v830_v18  ;;  %v2863_v35 = vpop.f32.mrb[12].mxu0 }
 0x113   : > { %v2705_v29 = vpack.c.bf16 %v1634_v27, %v1634_v27  ;;  %v1573_v30 = vsel %vm1317_vm6, %v2860_v13, %v1445_v25  ;;  %v1637_v33 = vsel %vm1381_vm7, %v2924_v14, %v1509_v28  ;;  %vm1379_vm9 = vcmp.gt.f32.partialorder %v1086_v19, 0.0  ;;  %v2927_v36 = vpop.f32.mrb[12].mxu1  ;;  %v843_v40 = vpop.f32.mrb[13].mxu0 }
 0x114   : > { %2211 = vst.msk [vmem:[%s3249_s8 + $0x20] sm:$0xf] %vm2202_vm2, %v2641_v26  ;;  %v2644_v32 = vpack.c.bf16 %v1573_v30, %v1573_v30  ;;  %v1507_v34 = vmul.f32 0.2, %v1086_v19  ;;  %v2708_v37 = vpack.c.bf16 %v1637_v33, %v1637_v33  ;;  %v1571_v38 = vsel %vm1315_vm8, %v830_v18, %v1443_v31  ;;  %v1099_v41 = vpop.f32.mrb[13].mxu1  ;;  %v2864_v45 = vpop.f32.mrb[14].mxu0 }
 0x115   : > { %2275 = vst.msk [vmem:[%s3249_s8 + $0x120] sm:$0xf] %vm2202_vm2, %v2705_v29  ;;  %vm1320_vm10 = vcmp.gt.f32.partialorder %v2863_v35, 0.0  ;;  %v1448_v39 = vmul.f32 0.2, %v2863_v35  ;;  %v2642_v42 = vpack.c.bf16 %v1571_v38, %v1571_v38  ;;  %vm1384_vm11 = vcmp.gt.f32.partialorder %v2927_v36, 0.0 }
 0x116   : > { %2214 = vst.msk [vmem:[%s3249_s8 + $0x2c] sm:$0xf] %vm2202_vm2, %v2644_v32  ;;  %v1635_v43 = vsel %vm1379_vm9, %v1086_v19, %v1507_v34  ;;  %v1512_v44 = vmul.f32 0.2, %v2927_v36  ;;  %v2928_v46 = vpop.f32.mrb[14].mxu1  ;;  %vm1318_vm12 = vcmp.gt.f32.partialorder %v843_v40, 0.0 }
 0x117   : > { %2278 = vst.msk [vmem:[%s3249_s8 + $0x12c] sm:$0xf] %vm2202_vm2, %v2708_v37  ;;  %v2706_v47 = vpack.c.bf16 %v1635_v43, %v1635_v43  ;;  %v1576_v48 = vsel %vm1320_vm10, %v2863_v35, %v1448_v39  ;;  %v1446_v49 = vmul.f32 0.2, %v843_v40  ;;  %v846_v50 = vpop.f32.mrb[15].mxu0  ;;  %v1102_v51 = vpop.f32.mrb[15].mxu1 }
 0x118   : > { %2212 = vst.msk [vmem:[%s3249_s8 + $0x24] sm:$0xf] %vm2202_vm2, %v2642_v42  ;;  %v2647_v52 = vpack.c.bf16 %v1576_v48, %v1576_v48  ;;  %v1640_v53 = vsel %vm1384_vm11, %v2927_v36, %v1512_v44  ;;  %vm1382_vm13 = vcmp.gt.f32.partialorder %v1099_v41, 0.0  ;;  %v1510_v54 = vmul.f32 0.2, %v1099_v41 }
 0x119   : > { %2276 = vst.msk [vmem:[%s3249_s8 + $0x124] sm:$0xf] %vm2202_vm2, %v2706_v47  ;;  %v2711_v55 = vpack.c.bf16 %v1640_v53, %v1640_v53  ;;  %v1574_v56 = vsel %vm1318_vm12, %v843_v40, %v1446_v49  ;;  %vm1321_vm14 = vcmp.gt.f32.partialorder %v2864_v45, 0.0  ;;  %v1449_v57 = vmul.f32 0.2, %v2864_v45 }
 0x11a   : > { %2217 = vst.msk [vmem:[%s3249_s8 + $0x38] sm:$0xf] %vm2202_vm2, %v2647_v52  ;;  %v2645_v58 = vpack.c.bf16 %v1574_v56, %v1574_v56  ;;  %v1638_v59 = vsel %vm1382_vm13, %v1099_v41, %v1510_v54  ;;  %vm1385_vm15 = vcmp.gt.f32.partialorder %v2928_v46, 0.0  ;;  %v1513_v60 = vmul.f32 0.2, %v2928_v46  ;;  %v2867_v3 = vpop.f32.mrb[16].mxu0 }
 0x11b   : > { %2281 = vst.msk [vmem:[%s3249_s8 + $0x138] sm:$0xf] %vm2202_vm2, %v2711_v55  ;;  %v2709_v61 = vpack.c.bf16 %v1638_v59, %v1638_v59  ;;  %v1577_v62 = vsel %vm1321_vm14, %v2864_v45, %v1449_v57  ;;  %vm1319_vm0 = vcmp.gt.f32.partialorder %v846_v50, 0.0  ;;  %v1447_v63 = vmul.f32 0.2, %v846_v50  ;;  %v2931_v4 = vpop.f32.mrb[16].mxu1 }
 0x11c   : > { %2215 = vst.msk [vmem:[%s3249_s8 + $0x30] sm:$0xf] %vm2202_vm2, %v2645_v58  ;;  %v2648_v0 = vpack.c.bf16 %v1577_v62, %v1577_v62  ;;  %v1641_v1 = vsel %vm1385_vm15, %v2928_v46, %v1513_v60  ;;  %vm1383_vm1 = vcmp.gt.f32.partialorder %v1102_v51, 0.0  ;;  %v1511_v2 = vmul.f32 0.2, %v1102_v51  ;;  %v859_v8 = vpop.f32.mrb[17].mxu0 }
 0x11d   : > { %2279 = vst.msk [vmem:[%s3249_s8 + $0x130] sm:$0xf] %vm2202_vm2, %v2709_v61  ;;  %v2712_v5 = vpack.c.bf16 %v1641_v1, %v1641_v1  ;;  %v1575_v6 = vsel %vm1319_vm0, %v846_v50, %v1447_v63  ;;  %vm1324_vm3 = vcmp.gt.f32.partialorder %v2867_v3, 0.0  ;;  %v1452_v7 = vmul.f32 0.2, %v2867_v3  ;;  %v1115_v9 = vpop.f32.mrb[17].mxu1 }
 0x11e   : > { %2218 = vst.msk [vmem:[%s3249_s8 + $0x3c] sm:$0xf] %vm2202_vm2, %v2648_v0  ;;  %v2646_v10 = vpack.c.bf16 %v1575_v6, %v1575_v6  ;;  %v1639_v11 = vsel %vm1383_vm1, %v1102_v51, %v1511_v2  ;;  %vm1388_vm4 = vcmp.gt.f32.partialorder %v2931_v4, 0.0  ;;  %v1516_v12 = vmul.f32 0.2, %v2931_v4  ;;  %v2868_v13 = vpop.f32.mrb[18].mxu0 }
 0x11f   : > { %v2932_v14 = vpop.f32.mrb[18].mxu1  ;;  %2282 = vst.msk [vmem:[%s3249_s8 + $0x13c] sm:$0xf] %vm2202_vm2, %v2712_v5  ;;  %v2710_v15 = vpack.c.bf16 %v1639_v11, %v1639_v11  ;;  %v1580_v16 = vsel %vm1324_vm3, %v2867_v3, %v1452_v7  ;;  %vm1322_vm5 = vcmp.gt.f32.partialorder %v859_v8, 0.0  ;;  %v1450_v17 = vmul.f32 0.2, %v859_v8 }
 0x120   : > { %v862_v18 = vpop.f32.mrb[19].mxu0  ;;  %v1118_v19 = vpop.f32.mrb[19].mxu1  ;;  %2216 = vst.msk [vmem:[%s3249_s8 + $0x34] sm:$0xf] %vm2202_vm2, %v2646_v10  ;;  %v2651_v20 = vpack.c.bf16 %v1580_v16, %v1580_v16  ;;  %v1644_v21 = vsel %vm1388_vm4, %v2931_v4, %v1516_v12  ;;  %vm1386_vm6 = vcmp.gt.f32.partialorder %v1115_v9, 0.0  ;;  %vm1325_vm7 = vcmp.gt.f32.partialorder %v2868_v13, 0.0 }
 0x121   : > { %v1514_v22 = vmul.f32 0.2, %v1115_v9  ;;  %2280 = vst.msk [vmem:[%s3249_s8 + $0x134] sm:$0xf] %vm2202_vm2, %v2710_v15  ;;  %v2715_v23 = vpack.c.bf16 %v1644_v21, %v1644_v21  ;;  %v1578_v24 = vsel %vm1322_vm5, %v859_v8, %v1450_v17  ;;  %v1453_v25 = vmul.f32 0.2, %v2868_v13 }
 0x122   : > { %2221 = vst.msk [vmem:[%s3249_s8 + $0x48] sm:$0xf] %vm2202_vm2, %v2651_v20  ;;  %v2649_v26 = vpack.c.bf16 %v1578_v24, %v1578_v24  ;;  %vm1389_vm8 = vcmp.gt.f32.partialorder %v2932_v14, 0.0  ;;  %v1517_v28 = vmul.f32 0.2, %v2932_v14  ;;  %vm1323_vm9 = vcmp.gt.f32.partialorder %v862_v18, 0.0 }
 0x123   : > { %v1642_v27 = vsel %vm1386_vm6, %v1115_v9, %v1514_v22  ;;  %2285 = vst.msk [vmem:[%s3249_s8 + $0x148] sm:$0xf] %vm2202_vm2, %v2715_v23  ;;  %v1581_v30 = vsel %vm1325_vm7, %v2868_v13, %v1453_v25  ;;  %v1451_v31 = vmul.f32 0.2, %v862_v18  ;;  %vm1387_vm10 = vcmp.gt.f32.partialorder %v1118_v19, 0.0  ;;  %v2871_v35 = vpop.f32.mrb[20].mxu0 }
 0x124   : > { %v2713_v29 = vpack.c.bf16 %v1642_v27, %v1642_v27  ;;  %2219 = vst.msk [vmem:[%s3249_s8 + $0x40] sm:$0xf] %vm2202_vm2, %v2649_v26  ;;  %v2652_v32 = vpack.c.bf16 %v1581_v30, %v1581_v30  ;;  %v1645_v33 = vsel %vm1389_vm8, %v2932_v14, %v1517_v28  ;;  %v1515_v34 = vmul.f32 0.2, %v1118_v19  ;;  %v2935_v36 = vpop.f32.mrb[20].mxu1  ;;  %v875_v40 = vpop.f32.mrb[21].mxu0 }
 0x125   : > { %v2716_v37 = vpack.c.bf16 %v1645_v33, %v1645_v33  ;;  %v1579_v38 = vsel %vm1323_vm9, %v862_v18, %v1451_v31  ;;  %vm1328_vm11 = vcmp.gt.f32.partialorder %v2871_v35, 0.0  ;;  %v1456_v39 = vmul.f32 0.2, %v2871_v35  ;;  %v1131_v41 = vpop.f32.mrb[21].mxu1  ;;  %v2872_v45 = vpop.f32.mrb[22].mxu0 }
 0x126   : > { %2283 = vst.msk [vmem:[%s3249_s8 + $0x140] sm:$0xf] %vm2202_vm2, %v2713_v29  ;;  %2222 = vst.msk [vmem:[%s3249_s8 + $0x4c] sm:$0xf] %vm2202_vm2, %v2652_v32  ;;  %v2650_v42 = vpack.c.bf16 %v1579_v38, %v1579_v38  ;;  %v1643_v43 = vsel %vm1387_vm10, %v1118_v19, %v1515_v34  ;;  %vm1392_vm12 = vcmp.gt.f32.partialorder %v2935_v36, 0.0  ;;  %v2936_v46 = vpop.f32.mrb[22].mxu1 }
 0x127   : > { %v1520_v44 = vmul.f32 0.2, %v2935_v36  ;;  %2286 = vst.msk [vmem:[%s3249_s8 + $0x14c] sm:$0xf] %vm2202_vm2, %v2716_v37  ;;  %v2714_v47 = vpack.c.bf16 %v1643_v43, %v1643_v43  ;;  %v1584_v48 = vsel %vm1328_vm11, %v2871_v35, %v1456_v39  ;;  %vm1326_vm13 = vcmp.gt.f32.partialorder %v875_v40, 0.0  ;;  %v878_v50 = vpop.f32.mrb[23].mxu0 }
 0x128   : > { %v1454_v49 = vmul.f32 0.2, %v875_v40  ;;  %v1134_v51 = vpop.f32.mrb[23].mxu1  ;;  %2220 = vst.msk [vmem:[%s3249_s8 + $0x44] sm:$0xf] %vm2202_vm2, %v2650_v42  ;;  %v2655_v52 = vpack.c.bf16 %v1584_v48, %v1584_v48  ;;  %vm1390_vm14 = vcmp.gt.f32.partialorder %v1131_v41, 0.0 }
 0x129   : > { %v1648_v53 = vsel %vm1392_vm12, %v2935_v36, %v1520_v44  ;;  %v1518_v54 = vmul.f32 0.2, %v1131_v41  ;;  %2284 = vst.msk [vmem:[%s3249_s8 + $0x144] sm:$0xf] %vm2202_vm2, %v2714_v47  ;;  %vm1329_vm15 = vcmp.gt.f32.partialorder %v2872_v45, 0.0  ;;  %vm1393_vm0 = vcmp.gt.f32.partialorder %v2936_v46, 0.0 }
 0x12a   : > { %v2719_v55 = vpack.c.bf16 %v1648_v53, %v1648_v53  ;;  %v1582_v56 = vsel %vm1326_vm13, %v875_v40, %v1454_v49  ;;  %v1457_v57 = vmul.f32 0.2, %v2872_v45  ;;  %2225 = vst.msk [vmem:[%s3249_s8 + $0x58] sm:$0xf] %vm2202_vm2, %v2655_v52  ;;  %v1521_v60 = vmul.f32 0.2, %v2936_v46 }
 0x12b   : > { %v2653_v58 = vpack.c.bf16 %v1582_v56, %v1582_v56  ;;  %v1646_v59 = vsel %vm1390_vm14, %v1131_v41, %v1518_v54  ;;  %vm1327_vm1 = vcmp.gt.f32.partialorder %v878_v50, 0.0  ;;  %v1455_v63 = vmul.f32 0.2, %v878_v50  ;;  %v2875_v3 = vpop.f32.mrb[24].mxu0  ;;  %v2939_v4 = vpop.f32.mrb[24].mxu1 }
 0x12c   : > { %2289 = vst.msk [vmem:[%s3249_s8 + $0x158] sm:$0xf] %vm2202_vm2, %v2719_v55  ;;  %v2717_v61 = vpack.c.bf16 %v1646_v59, %v1646_v59  ;;  %v1585_v62 = vsel %vm1329_vm15, %v2872_v45, %v1457_v57  ;;  %v1649_v1 = vsel %vm1393_vm0, %v2936_v46, %v1521_v60  ;;  %vm1391_vm3 = vcmp.gt.f32.partialorder %v1134_v51, 0.0  ;;  %v891_v8 = vpop.f32.mrb[25].mxu0  ;;  %v1147_v9 = vpop.f32.mrb[25].mxu1 }
 0x12d   : > { %2223 = vst.msk [vmem:[%s3249_s8 + $0x50] sm:$0xf] %vm2202_vm2, %v2653_v58  ;;  %v2656_v0 = vpack.c.bf16 %v1585_v62, %v1585_v62  ;;  %v1519_v2 = vmul.f32 0.2, %v1134_v51  ;;  %v2720_v5 = vpack.c.bf16 %v1649_v1, %v1649_v1  ;;  %v1583_v6 = vsel %vm1327_vm1, %v878_v50, %v1455_v63  ;;  %v2876_v13 = vpop.f32.mrb[26].mxu0  ;;  %v2940_v14 = vpop.f32.mrb[26].mxu1 }
 0x12e   : > { %2287 = vst.msk [vmem:[%s3249_s8 + $0x150] sm:$0xf] %vm2202_vm2, %v2717_v61  ;;  %vm1332_vm4 = vcmp.gt.f32.partialorder %v2875_v3, 0.0  ;;  %v1460_v7 = vmul.f32 0.2, %v2875_v3  ;;  %v2654_v10 = vpack.c.bf16 %v1583_v6, %v1583_v6  ;;  %vm1396_vm5 = vcmp.gt.f32.partialorder %v2939_v4, 0.0 }
 0x12f   : > { %2226 = vst.msk [vmem:[%s3249_s8 + $0x5c] sm:$0xf] %vm2202_vm2, %v2656_v0  ;;  %v1647_v11 = vsel %vm1391_vm3, %v1134_v51, %v1519_v2  ;;  %v1524_v12 = vmul.f32 0.2, %v2939_v4  ;;  %2290 = vst.msk [vmem:[%s3249_s8 + $0x15c] sm:$0xf] %vm2202_vm2, %v2720_v5 }
 0x130   : > { %v2718_v15 = vpack.c.bf16 %v1647_v11, %v1647_v11  ;;  %v1588_v16 = vsel %vm1332_vm4, %v2875_v3, %v1460_v7  ;;  %vm1330_vm6 = vcmp.gt.f32.partialorder %v891_v8, 0.0  ;;  %v1458_v17 = vmul.f32 0.2, %v891_v8  ;;  %v894_v18 = vpop.f32.mrb[27].mxu0  ;;  %v1150_v19 = vpop.f32.mrb[27].mxu1 }
 0x131   : > { %2224 = vst.msk [vmem:[%s3249_s8 + $0x54] sm:$0xf] %vm2202_vm2, %v2654_v10  ;;  %v2659_v20 = vpack.c.bf16 %v1588_v16, %v1588_v16  ;;  %v1652_v21 = vsel %vm1396_vm5, %v2939_v4, %v1524_v12  ;;  %vm1394_vm7 = vcmp.gt.f32.partialorder %v1147_v9, 0.0  ;;  %v1522_v22 = vmul.f32 0.2, %v1147_v9 }
 0x132   : > { %2288 = vst.msk [vmem:[%s3249_s8 + $0x154] sm:$0xf] %vm2202_vm2, %v2718_v15  ;;  %v2723_v23 = vpack.c.bf16 %v1652_v21, %v1652_v21  ;;  %v1586_v24 = vsel %vm1330_vm6, %v891_v8, %v1458_v17  ;;  %vm1333_vm8 = vcmp.gt.f32.partialorder %v2876_v13, 0.0  ;;  %v1461_v25 = vmul.f32 0.2, %v2876_v13  ;;  %v2879_v35 = vpop.f32.mrb[28].mxu0 }
 0x133   : > { %2229 = vst.msk [vmem:[%s3249_s8 + $0x68] sm:$0xf] %vm2202_vm2, %v2659_v20  ;;  %v2657_v26 = vpack.c.bf16 %v1586_v24, %v1586_v24  ;;  %v1650_v27 = vsel %vm1394_vm7, %v1147_v9, %v1522_v22  ;;  %vm1397_vm9 = vcmp.gt.f32.partialorder %v2940_v14, 0.0  ;;  %v1525_v28 = vmul.f32 0.2, %v2940_v14  ;;  %v2943_v36 = vpop.f32.mrb[28].mxu1 }
 0x134   : > { %2293 = vst.msk [vmem:[%s3249_s8 + $0x168] sm:$0xf] %vm2202_vm2, %v2723_v23  ;;  %v2721_v29 = vpack.c.bf16 %v1650_v27, %v1650_v27  ;;  %v1589_v30 = vsel %vm1333_vm8, %v2876_v13, %v1461_v25  ;;  %vm1331_vm10 = vcmp.gt.f32.partialorder %v894_v18, 0.0  ;;  %v1459_v31 = vmul.f32 0.2, %v894_v18  ;;  %v907_v40 = vpop.f32.mrb[29].mxu0 }
 0x135   : > { %2227 = vst.msk [vmem:[%s3249_s8 + $0x60] sm:$0xf] %vm2202_vm2, %v2657_v26  ;;  %v2660_v32 = vpack.c.bf16 %v1589_v30, %v1589_v30  ;;  %v1653_v33 = vsel %vm1397_vm9, %v2940_v14, %v1525_v28  ;;  %vm1395_vm11 = vcmp.gt.f32.partialorder %v1150_v19, 0.0  ;;  %v1523_v34 = vmul.f32 0.2, %v1150_v19  ;;  %v1163_v41 = vpop.f32.mrb[29].mxu1 }
 0x136   : > { %2291 = vst.msk [vmem:[%s3249_s8 + $0x160] sm:$0xf] %vm2202_vm2, %v2721_v29  ;;  %v2724_v37 = vpack.c.bf16 %v1653_v33, %v1653_v33  ;;  %v1587_v38 = vsel %vm1331_vm10, %v894_v18, %v1459_v31  ;;  %vm1336_vm12 = vcmp.gt.f32.partialorder %v2879_v35, 0.0  ;;  %v1464_v39 = vmul.f32 0.2, %v2879_v35  ;;  %v2880_v45 = vpop.f32.mrb[30].mxu0 }
 0x137   : > { %2230 = vst.msk [vmem:[%s3249_s8 + $0x6c] sm:$0xf] %vm2202_vm2, %v2660_v32  ;;  %v2658_v42 = vpack.c.bf16 %v1587_v38, %v1587_v38  ;;  %v1651_v43 = vsel %vm1395_vm11, %v1150_v19, %v1523_v34  ;;  %vm1400_vm13 = vcmp.gt.f32.partialorder %v2943_v36, 0.0  ;;  %v1528_v44 = vmul.f32 0.2, %v2943_v36  ;;  %v2944_v46 = vpop.f32.mrb[30].mxu1 }
 0x138   : > { %2294 = vst.msk [vmem:[%s3249_s8 + $0x16c] sm:$0xf] %vm2202_vm2, %v2724_v37  ;;  %v2722_v47 = vpack.c.bf16 %v1651_v43, %v1651_v43  ;;  %v1592_v48 = vsel %vm1336_vm12, %v2879_v35, %v1464_v39  ;;  %vm1334_vm14 = vcmp.gt.f32.partialorder %v907_v40, 0.0  ;;  %v1462_v49 = vmul.f32 0.2, %v907_v40  ;;  %v910_v50 = vpop.f32.mrb[31].mxu0 }
 0x139   : > { %v1166_v51 = vpop.f32.mrb[31].mxu1  ;;  %2228 = vst.msk [vmem:[%s3249_s8 + $0x64] sm:$0xf] %vm2202_vm2, %v2658_v42  ;;  %v2663_v52 = vpack.c.bf16 %v1592_v48, %v1592_v48  ;;  %v1656_v53 = vsel %vm1400_vm13, %v2943_v36, %v1528_v44  ;;  %vm1398_vm15 = vcmp.gt.f32.partialorder %v1163_v41, 0.0  ;;  %v1526_v54 = vmul.f32 0.2, %v1163_v41 }
 0x13a   : > { %2292 = vst.msk [vmem:[%s3249_s8 + $0x164] sm:$0xf] %vm2202_vm2, %v2722_v47  ;;  %v2727_v55 = vpack.c.bf16 %v1656_v53, %v1656_v53  ;;  %v1590_v56 = vsel %vm1334_vm14, %v907_v40, %v1462_v49  ;;  %vm1337_vm0 = vcmp.gt.f32.partialorder %v2880_v45, 0.0  ;;  %v1465_v57 = vmul.f32 0.2, %v2880_v45  ;;  %v2883_v3 = vpop.f32.mrb[32].mxu0 }
 0x13b   : > { %2233 = vst.msk [vmem:[%s3249_s8 + $0x78] sm:$0xf] %vm2202_vm2, %v2663_v52  ;;  %v2661_v58 = vpack.c.bf16 %v1590_v56, %v1590_v56  ;;  %v1654_v59 = vsel %vm1398_vm15, %v1163_v41, %v1526_v54  ;;  %vm1401_vm1 = vcmp.gt.f32.partialorder %v2944_v46, 0.0  ;;  %v1529_v60 = vmul.f32 0.2, %v2944_v46  ;;  %v2947_v4 = vpop.f32.mrb[32].mxu1 }
 0x13c   : > { %2297 = vst.msk [vmem:[%s3249_s8 + $0x178] sm:$0xf] %vm2202_vm2, %v2727_v55  ;;  %v2725_v61 = vpack.c.bf16 %v1654_v59, %v1654_v59  ;;  %v1593_v62 = vsel %vm1337_vm0, %v2880_v45, %v1465_v57  ;;  %vm1335_vm3 = vcmp.gt.f32.partialorder %v910_v50, 0.0  ;;  %v1463_v63 = vmul.f32 0.2, %v910_v50  ;;  %v923_v8 = vpop.f32.mrb[33].mxu0 }
 0x13d   : > { %2231 = vst.msk [vmem:[%s3249_s8 + $0x70] sm:$0xf] %vm2202_vm2, %v2661_v58  ;;  %v2664_v0 = vpack.c.bf16 %v1593_v62, %v1593_v62  ;;  %v1657_v1 = vsel %vm1401_vm1, %v2944_v46, %v1529_v60  ;;  %vm1399_vm4 = vcmp.gt.f32.partialorder %v1166_v51, 0.0  ;;  %v1527_v2 = vmul.f32 0.2, %v1166_v51  ;;  %v1179_v9 = vpop.f32.mrb[33].mxu1 }
 0x13e   : > { %2295 = vst.msk [vmem:[%s3249_s8 + $0x170] sm:$0xf] %vm2202_vm2, %v2725_v61  ;;  %v2728_v5 = vpack.c.bf16 %v1657_v1, %v1657_v1  ;;  %v1591_v6 = vsel %vm1335_vm3, %v910_v50, %v1463_v63  ;;  %vm1340_vm5 = vcmp.gt.f32.partialorder %v2883_v3, 0.0  ;;  %v1468_v7 = vmul.f32 0.2, %v2883_v3  ;;  %v2884_v13 = vpop.f32.mrb[34].mxu0 }
 0x13f   : > { %2234 = vst.msk [vmem:[%s3249_s8 + $0x7c] sm:$0xf] %vm2202_vm2, %v2664_v0  ;;  %v2662_v10 = vpack.c.bf16 %v1591_v6, %v1591_v6  ;;  %v1655_v11 = vsel %vm1399_vm4, %v1166_v51, %v1527_v2  ;;  %vm1404_vm6 = vcmp.gt.f32.partialorder %v2947_v4, 0.0  ;;  %v1532_v12 = vmul.f32 0.2, %v2947_v4  ;;  %v2948_v14 = vpop.f32.mrb[34].mxu1 }
 0x140   : > { %2298 = vst.msk [vmem:[%s3249_s8 + $0x17c] sm:$0xf] %vm2202_vm2, %v2728_v5  ;;  %v2726_v15 = vpack.c.bf16 %v1655_v11, %v1655_v11  ;;  %v1596_v16 = vsel %vm1340_vm5, %v2883_v3, %v1468_v7  ;;  %vm1338_vm7 = vcmp.gt.f32.partialorder %v923_v8, 0.0  ;;  %v1466_v17 = vmul.f32 0.2, %v923_v8  ;;  %v926_v18 = vpop.f32.mrb[35].mxu0 }
 0x141   : > { %v1182_v19 = vpop.f32.mrb[35].mxu1  ;;  %2232 = vst.msk [vmem:[%s3249_s8 + $0x74] sm:$0xf] %vm2202_vm2, %v2662_v10  ;;  %v2667_v20 = vpack.c.bf16 %v1596_v16, %v1596_v16  ;;  %v1660_v21 = vsel %vm1404_vm6, %v2947_v4, %v1532_v12  ;;  %vm1402_vm8 = vcmp.gt.f32.partialorder %v1179_v9, 0.0  ;;  %v1530_v22 = vmul.f32 0.2, %v1179_v9 }
 0x142   : > { %2296 = vst.msk [vmem:[%s3249_s8 + $0x174] sm:$0xf] %vm2202_vm2, %v2726_v15  ;;  %v2731_v23 = vpack.c.bf16 %v1660_v21, %v1660_v21  ;;  %v1594_v24 = vsel %vm1338_vm7, %v923_v8, %v1466_v17  ;;  %vm1341_vm9 = vcmp.gt.f32.partialorder %v2884_v13, 0.0  ;;  %v1469_v25 = vmul.f32 0.2, %v2884_v13  ;;  %v2887_v35 = vpop.f32.mrb[36].mxu0 }
 0x143   : > { %2237 = vst.msk [vmem:[%s3249_s8 + $0x88] sm:$0xf] %vm2202_vm2, %v2667_v20  ;;  %v2665_v26 = vpack.c.bf16 %v1594_v24, %v1594_v24  ;;  %v1658_v27 = vsel %vm1402_vm8, %v1179_v9, %v1530_v22  ;;  %vm1405_vm10 = vcmp.gt.f32.partialorder %v2948_v14, 0.0  ;;  %v1533_v28 = vmul.f32 0.2, %v2948_v14  ;;  %v2951_v36 = vpop.f32.mrb[36].mxu1 }
 0x144   : > { %2301 = vst.msk [vmem:[%s3249_s8 + $0x188] sm:$0xf] %vm2202_vm2, %v2731_v23  ;;  %v2729_v29 = vpack.c.bf16 %v1658_v27, %v1658_v27  ;;  %v1597_v30 = vsel %vm1341_vm9, %v2884_v13, %v1469_v25  ;;  %vm1339_vm11 = vcmp.gt.f32.partialorder %v926_v18, 0.0  ;;  %v1467_v31 = vmul.f32 0.2, %v926_v18  ;;  %v939_v40 = vpop.f32.mrb[37].mxu0 }
 0x145   : > { %2235 = vst.msk [vmem:[%s3249_s8 + $0x80] sm:$0xf] %vm2202_vm2, %v2665_v26  ;;  %v2668_v32 = vpack.c.bf16 %v1597_v30, %v1597_v30  ;;  %v1661_v33 = vsel %vm1405_vm10, %v2948_v14, %v1533_v28  ;;  %vm1403_vm12 = vcmp.gt.f32.partialorder %v1182_v19, 0.0  ;;  %v1531_v34 = vmul.f32 0.2, %v1182_v19  ;;  %v1195_v41 = vpop.f32.mrb[37].mxu1 }
 0x146   : > { %2299 = vst.msk [vmem:[%s3249_s8 + $0x180] sm:$0xf] %vm2202_vm2, %v2729_v29  ;;  %v2732_v37 = vpack.c.bf16 %v1661_v33, %v1661_v33  ;;  %v1595_v38 = vsel %vm1339_vm11, %v926_v18, %v1467_v31  ;;  %vm1344_vm13 = vcmp.gt.f32.partialorder %v2887_v35, 0.0  ;;  %v1472_v39 = vmul.f32 0.2, %v2887_v35  ;;  %v2888_v45 = vpop.f32.mrb[38].mxu0 }
 0x147   : > { %2238 = vst.msk [vmem:[%s3249_s8 + $0x8c] sm:$0xf] %vm2202_vm2, %v2668_v32  ;;  %v2666_v42 = vpack.c.bf16 %v1595_v38, %v1595_v38  ;;  %v1659_v43 = vsel %vm1403_vm12, %v1182_v19, %v1531_v34  ;;  %vm1408_vm14 = vcmp.gt.f32.partialorder %v2951_v36, 0.0  ;;  %v1536_v44 = vmul.f32 0.2, %v2951_v36  ;;  %v2952_v46 = vpop.f32.mrb[38].mxu1 }
 0x148   : > { %2302 = vst.msk [vmem:[%s3249_s8 + $0x18c] sm:$0xf] %vm2202_vm2, %v2732_v37  ;;  %v2730_v47 = vpack.c.bf16 %v1659_v43, %v1659_v43  ;;  %v1600_v48 = vsel %vm1344_vm13, %v2887_v35, %v1472_v39  ;;  %vm1342_vm15 = vcmp.gt.f32.partialorder %v939_v40, 0.0  ;;  %v1470_v49 = vmul.f32 0.2, %v939_v40  ;;  %v942_v50 = vpop.f32.mrb[39].mxu0 }
 0x149   : > { %v1198_v51 = vpop.f32.mrb[39].mxu1  ;;  %2236 = vst.msk [vmem:[%s3249_s8 + $0x84] sm:$0xf] %vm2202_vm2, %v2666_v42  ;;  %v2671_v52 = vpack.c.bf16 %v1600_v48, %v1600_v48  ;;  %v1664_v53 = vsel %vm1408_vm14, %v2951_v36, %v1536_v44  ;;  %vm1406_vm0 = vcmp.gt.f32.partialorder %v1195_v41, 0.0  ;;  %v1534_v54 = vmul.f32 0.2, %v1195_v41 }
 0x14a   : > { %2300 = vst.msk [vmem:[%s3249_s8 + $0x184] sm:$0xf] %vm2202_vm2, %v2730_v47  ;;  %v2735_v55 = vpack.c.bf16 %v1664_v53, %v1664_v53  ;;  %v1598_v56 = vsel %vm1342_vm15, %v939_v40, %v1470_v49  ;;  %vm1345_vm1 = vcmp.gt.f32.partialorder %v2888_v45, 0.0  ;;  %v1473_v57 = vmul.f32 0.2, %v2888_v45  ;;  %v2891_v3 = vpop.f32.mrb[40].mxu0 }
 0x14b   : > { %2241 = vst.msk [vmem:[%s3249_s8 + $0x98] sm:$0xf] %vm2202_vm2, %v2671_v52  ;;  %v2669_v58 = vpack.c.bf16 %v1598_v56, %v1598_v56  ;;  %v1662_v59 = vsel %vm1406_vm0, %v1195_v41, %v1534_v54  ;;  %vm1409_vm3 = vcmp.gt.f32.partialorder %v2952_v46, 0.0  ;;  %v1537_v60 = vmul.f32 0.2, %v2952_v46  ;;  %v2955_v4 = vpop.f32.mrb[40].mxu1 }
 0x14c   : > { %2305 = vst.msk [vmem:[%s3249_s8 + $0x198] sm:$0xf] %vm2202_vm2, %v2735_v55  ;;  %v2733_v61 = vpack.c.bf16 %v1662_v59, %v1662_v59  ;;  %v1601_v62 = vsel %vm1345_vm1, %v2888_v45, %v1473_v57  ;;  %vm1343_vm4 = vcmp.gt.f32.partialorder %v942_v50, 0.0  ;;  %v1471_v63 = vmul.f32 0.2, %v942_v50  ;;  %v955_v8 = vpop.f32.mrb[41].mxu0 }
 0x14d   : > { %2239 = vst.msk [vmem:[%s3249_s8 + $0x90] sm:$0xf] %vm2202_vm2, %v2669_v58  ;;  %v2672_v0 = vpack.c.bf16 %v1601_v62, %v1601_v62  ;;  %v1665_v1 = vsel %vm1409_vm3, %v2952_v46, %v1537_v60  ;;  %vm1407_vm5 = vcmp.gt.f32.partialorder %v1198_v51, 0.0  ;;  %v1535_v2 = vmul.f32 0.2, %v1198_v51  ;;  %v1211_v9 = vpop.f32.mrb[41].mxu1 }
 0x14e   : > { %2303 = vst.msk [vmem:[%s3249_s8 + $0x190] sm:$0xf] %vm2202_vm2, %v2733_v61  ;;  %v2736_v5 = vpack.c.bf16 %v1665_v1, %v1665_v1  ;;  %v1599_v6 = vsel %vm1343_vm4, %v942_v50, %v1471_v63  ;;  %vm1348_vm6 = vcmp.gt.f32.partialorder %v2891_v3, 0.0  ;;  %v1476_v7 = vmul.f32 0.2, %v2891_v3  ;;  %v2892_v13 = vpop.f32.mrb[42].mxu0 }
 0x14f   : > { %2242 = vst.msk [vmem:[%s3249_s8 + $0x9c] sm:$0xf] %vm2202_vm2, %v2672_v0  ;;  %v2670_v10 = vpack.c.bf16 %v1599_v6, %v1599_v6  ;;  %v1663_v11 = vsel %vm1407_vm5, %v1198_v51, %v1535_v2  ;;  %vm1412_vm7 = vcmp.gt.f32.partialorder %v2955_v4, 0.0  ;;  %v1540_v12 = vmul.f32 0.2, %v2955_v4  ;;  %v2956_v14 = vpop.f32.mrb[42].mxu1 }
 0x150   : > { %2306 = vst.msk [vmem:[%s3249_s8 + $0x19c] sm:$0xf] %vm2202_vm2, %v2736_v5  ;;  %v2734_v15 = vpack.c.bf16 %v1663_v11, %v1663_v11  ;;  %v1604_v16 = vsel %vm1348_vm6, %v2891_v3, %v1476_v7  ;;  %vm1346_vm8 = vcmp.gt.f32.partialorder %v955_v8, 0.0  ;;  %v1474_v17 = vmul.f32 0.2, %v955_v8  ;;  %v958_v18 = vpop.f32.mrb[43].mxu0 }
 0x151   : > { %v1214_v19 = vpop.f32.mrb[43].mxu1  ;;  %2240 = vst.msk [vmem:[%s3249_s8 + $0x94] sm:$0xf] %vm2202_vm2, %v2670_v10  ;;  %v2675_v20 = vpack.c.bf16 %v1604_v16, %v1604_v16  ;;  %v1668_v21 = vsel %vm1412_vm7, %v2955_v4, %v1540_v12  ;;  %vm1410_vm9 = vcmp.gt.f32.partialorder %v1211_v9, 0.0  ;;  %v1538_v22 = vmul.f32 0.2, %v1211_v9 }
 0x152   : > { %2304 = vst.msk [vmem:[%s3249_s8 + $0x194] sm:$0xf] %vm2202_vm2, %v2734_v15  ;;  %v2739_v23 = vpack.c.bf16 %v1668_v21, %v1668_v21  ;;  %v1602_v24 = vsel %vm1346_vm8, %v955_v8, %v1474_v17  ;;  %vm1349_vm10 = vcmp.gt.f32.partialorder %v2892_v13, 0.0  ;;  %v1477_v25 = vmul.f32 0.2, %v2892_v13  ;;  %v2895_v35 = vpop.f32.mrb[44].mxu0 }
 0x153   : > { %2245 = vst.msk [vmem:[%s3249_s8 + $0xa8] sm:$0xf] %vm2202_vm2, %v2675_v20  ;;  %v2673_v26 = vpack.c.bf16 %v1602_v24, %v1602_v24  ;;  %v1666_v27 = vsel %vm1410_vm9, %v1211_v9, %v1538_v22  ;;  %vm1413_vm11 = vcmp.gt.f32.partialorder %v2956_v14, 0.0  ;;  %v1541_v28 = vmul.f32 0.2, %v2956_v14  ;;  %v2959_v36 = vpop.f32.mrb[44].mxu1 }
 0x154   : > { %2309 = vst.msk [vmem:[%s3249_s8 + $0x1a8] sm:$0xf] %vm2202_vm2, %v2739_v23  ;;  %v2737_v29 = vpack.c.bf16 %v1666_v27, %v1666_v27  ;;  %v1605_v30 = vsel %vm1349_vm10, %v2892_v13, %v1477_v25  ;;  %vm1347_vm12 = vcmp.gt.f32.partialorder %v958_v18, 0.0  ;;  %v1475_v31 = vmul.f32 0.2, %v958_v18  ;;  %v971_v40 = vpop.f32.mrb[45].mxu0 }
 0x155   : > { %2243 = vst.msk [vmem:[%s3249_s8 + $0xa0] sm:$0xf] %vm2202_vm2, %v2673_v26  ;;  %v2676_v32 = vpack.c.bf16 %v1605_v30, %v1605_v30  ;;  %v1669_v33 = vsel %vm1413_vm11, %v2956_v14, %v1541_v28  ;;  %vm1411_vm13 = vcmp.gt.f32.partialorder %v1214_v19, 0.0  ;;  %v1539_v34 = vmul.f32 0.2, %v1214_v19  ;;  %v1227_v41 = vpop.f32.mrb[45].mxu1 }
 0x156   : > { %2307 = vst.msk [vmem:[%s3249_s8 + $0x1a0] sm:$0xf] %vm2202_vm2, %v2737_v29  ;;  %v2740_v37 = vpack.c.bf16 %v1669_v33, %v1669_v33  ;;  %v1603_v38 = vsel %vm1347_vm12, %v958_v18, %v1475_v31  ;;  %vm1352_vm14 = vcmp.gt.f32.partialorder %v2895_v35, 0.0  ;;  %v1480_v39 = vmul.f32 0.2, %v2895_v35  ;;  %v2896_v45 = vpop.f32.mrb[46].mxu0 }
 0x157   : > { %2246 = vst.msk [vmem:[%s3249_s8 + $0xac] sm:$0xf] %vm2202_vm2, %v2676_v32  ;;  %v2674_v42 = vpack.c.bf16 %v1603_v38, %v1603_v38  ;;  %v1667_v43 = vsel %vm1411_vm13, %v1214_v19, %v1539_v34  ;;  %vm1416_vm15 = vcmp.gt.f32.partialorder %v2959_v36, 0.0  ;;  %v1544_v44 = vmul.f32 0.2, %v2959_v36  ;;  %v2960_v46 = vpop.f32.mrb[46].mxu1 }
 0x158   : > { %2310 = vst.msk [vmem:[%s3249_s8 + $0x1ac] sm:$0xf] %vm2202_vm2, %v2740_v37  ;;  %v2738_v47 = vpack.c.bf16 %v1667_v43, %v1667_v43  ;;  %v1608_v48 = vsel %vm1352_vm14, %v2895_v35, %v1480_v39  ;;  %vm1350_vm0 = vcmp.gt.f32.partialorder %v971_v40, 0.0  ;;  %v1478_v49 = vmul.f32 0.2, %v971_v40  ;;  %v974_v50 = vpop.f32.mrb[47].mxu0 }
 0x159   : > { %v1230_v51 = vpop.f32.mrb[47].mxu1  ;;  %2244 = vst.msk [vmem:[%s3249_s8 + $0xa4] sm:$0xf] %vm2202_vm2, %v2674_v42  ;;  %v2679_v52 = vpack.c.bf16 %v1608_v48, %v1608_v48  ;;  %v1672_v53 = vsel %vm1416_vm15, %v2959_v36, %v1544_v44  ;;  %vm1414_vm1 = vcmp.gt.f32.partialorder %v1227_v41, 0.0  ;;  %v1542_v54 = vmul.f32 0.2, %v1227_v41 }
 0x15a   : > { %2308 = vst.msk [vmem:[%s3249_s8 + $0x1a4] sm:$0xf] %vm2202_vm2, %v2738_v47  ;;  %v2743_v55 = vpack.c.bf16 %v1672_v53, %v1672_v53  ;;  %v1606_v56 = vsel %vm1350_vm0, %v971_v40, %v1478_v49  ;;  %vm1353_vm3 = vcmp.gt.f32.partialorder %v2896_v45, 0.0  ;;  %v1481_v57 = vmul.f32 0.2, %v2896_v45  ;;  %v2899_v3 = vpop.f32.mrb[48].mxu0 }
 0x15b   : > { %2249 = vst.msk [vmem:[%s3249_s8 + $0xb8] sm:$0xf] %vm2202_vm2, %v2679_v52  ;;  %v2677_v58 = vpack.c.bf16 %v1606_v56, %v1606_v56  ;;  %v1670_v59 = vsel %vm1414_vm1, %v1227_v41, %v1542_v54  ;;  %vm1417_vm4 = vcmp.gt.f32.partialorder %v2960_v46, 0.0  ;;  %v1545_v60 = vmul.f32 0.2, %v2960_v46  ;;  %v2963_v4 = vpop.f32.mrb[48].mxu1 }
 0x15c   : > { %2313 = vst.msk [vmem:[%s3249_s8 + $0x1b8] sm:$0xf] %vm2202_vm2, %v2743_v55  ;;  %v2741_v61 = vpack.c.bf16 %v1670_v59, %v1670_v59  ;;  %v1609_v62 = vsel %vm1353_vm3, %v2896_v45, %v1481_v57  ;;  %vm1351_vm5 = vcmp.gt.f32.partialorder %v974_v50, 0.0  ;;  %v1479_v63 = vmul.f32 0.2, %v974_v50  ;;  %v987_v8 = vpop.f32.mrb[49].mxu0 }
 0x15d   : > { %2247 = vst.msk [vmem:[%s3249_s8 + $0xb0] sm:$0xf] %vm2202_vm2, %v2677_v58  ;;  %v2680_v0 = vpack.c.bf16 %v1609_v62, %v1609_v62  ;;  %v1673_v1 = vsel %vm1417_vm4, %v2960_v46, %v1545_v60  ;;  %vm1415_vm6 = vcmp.gt.f32.partialorder %v1230_v51, 0.0  ;;  %v1543_v2 = vmul.f32 0.2, %v1230_v51  ;;  %v1243_v9 = vpop.f32.mrb[49].mxu1 }
 0x15e   : > { %2311 = vst.msk [vmem:[%s3249_s8 + $0x1b0] sm:$0xf] %vm2202_vm2, %v2741_v61  ;;  %v2744_v5 = vpack.c.bf16 %v1673_v1, %v1673_v1  ;;  %v1607_v6 = vsel %vm1351_vm5, %v974_v50, %v1479_v63  ;;  %vm1356_vm7 = vcmp.gt.f32.partialorder %v2899_v3, 0.0  ;;  %v1484_v7 = vmul.f32 0.2, %v2899_v3  ;;  %v2900_v13 = vpop.f32.mrb[50].mxu0 }
 0x15f   : > { %2250 = vst.msk [vmem:[%s3249_s8 + $0xbc] sm:$0xf] %vm2202_vm2, %v2680_v0  ;;  %v2678_v10 = vpack.c.bf16 %v1607_v6, %v1607_v6  ;;  %v1671_v11 = vsel %vm1415_vm6, %v1230_v51, %v1543_v2  ;;  %vm1420_vm8 = vcmp.gt.f32.partialorder %v2963_v4, 0.0  ;;  %v1548_v12 = vmul.f32 0.2, %v2963_v4  ;;  %v2964_v14 = vpop.f32.mrb[50].mxu1 }
 0x160   : > { %2314 = vst.msk [vmem:[%s3249_s8 + $0x1bc] sm:$0xf] %vm2202_vm2, %v2744_v5  ;;  %v2742_v15 = vpack.c.bf16 %v1671_v11, %v1671_v11  ;;  %v1612_v16 = vsel %vm1356_vm7, %v2899_v3, %v1484_v7  ;;  %vm1354_vm9 = vcmp.gt.f32.partialorder %v987_v8, 0.0  ;;  %v1482_v17 = vmul.f32 0.2, %v987_v8  ;;  %v990_v18 = vpop.f32.mrb[51].mxu0 }
 0x161   : > { %v1246_v19 = vpop.f32.mrb[51].mxu1  ;;  %2248 = vst.msk [vmem:[%s3249_s8 + $0xb4] sm:$0xf] %vm2202_vm2, %v2678_v10  ;;  %v2683_v20 = vpack.c.bf16 %v1612_v16, %v1612_v16  ;;  %v1676_v21 = vsel %vm1420_vm8, %v2963_v4, %v1548_v12  ;;  %vm1418_vm10 = vcmp.gt.f32.partialorder %v1243_v9, 0.0  ;;  %v1546_v22 = vmul.f32 0.2, %v1243_v9 }
 0x162   : > { %2312 = vst.msk [vmem:[%s3249_s8 + $0x1b4] sm:$0xf] %vm2202_vm2, %v2742_v15  ;;  %v2747_v23 = vpack.c.bf16 %v1676_v21, %v1676_v21  ;;  %v1610_v24 = vsel %vm1354_vm9, %v987_v8, %v1482_v17  ;;  %vm1357_vm11 = vcmp.gt.f32.partialorder %v2900_v13, 0.0  ;;  %v1485_v25 = vmul.f32 0.2, %v2900_v13  ;;  %v2903_v35 = vpop.f32.mrb[52].mxu0 }
 0x163   : > { %2253 = vst.msk [vmem:[%s3249_s8 + $0xc8] sm:$0xf] %vm2202_vm2, %v2683_v20  ;;  %v2681_v26 = vpack.c.bf16 %v1610_v24, %v1610_v24  ;;  %v1674_v27 = vsel %vm1418_vm10, %v1243_v9, %v1546_v22  ;;  %vm1421_vm12 = vcmp.gt.f32.partialorder %v2964_v14, 0.0  ;;  %v1549_v28 = vmul.f32 0.2, %v2964_v14  ;;  %v2967_v36 = vpop.f32.mrb[52].mxu1 }
 0x164   : > { %2317 = vst.msk [vmem:[%s3249_s8 + $0x1c8] sm:$0xf] %vm2202_vm2, %v2747_v23  ;;  %v2745_v29 = vpack.c.bf16 %v1674_v27, %v1674_v27  ;;  %v1613_v30 = vsel %vm1357_vm11, %v2900_v13, %v1485_v25  ;;  %vm1355_vm13 = vcmp.gt.f32.partialorder %v990_v18, 0.0  ;;  %v1483_v31 = vmul.f32 0.2, %v990_v18  ;;  %v1003_v40 = vpop.f32.mrb[53].mxu0 }
 0x165   : > { %2251 = vst.msk [vmem:[%s3249_s8 + $0xc0] sm:$0xf] %vm2202_vm2, %v2681_v26  ;;  %v2684_v32 = vpack.c.bf16 %v1613_v30, %v1613_v30  ;;  %v1677_v33 = vsel %vm1421_vm12, %v2964_v14, %v1549_v28  ;;  %vm1419_vm14 = vcmp.gt.f32.partialorder %v1246_v19, 0.0  ;;  %v1547_v34 = vmul.f32 0.2, %v1246_v19  ;;  %v1259_v41 = vpop.f32.mrb[53].mxu1 }
 0x166   : > { %2315 = vst.msk [vmem:[%s3249_s8 + $0x1c0] sm:$0xf] %vm2202_vm2, %v2745_v29  ;;  %v2748_v37 = vpack.c.bf16 %v1677_v33, %v1677_v33  ;;  %v1611_v38 = vsel %vm1355_vm13, %v990_v18, %v1483_v31  ;;  %vm1360_vm15 = vcmp.gt.f32.partialorder %v2903_v35, 0.0  ;;  %v1488_v39 = vmul.f32 0.2, %v2903_v35  ;;  %v2904_v45 = vpop.f32.mrb[54].mxu0 }
 0x167   : > { %2254 = vst.msk [vmem:[%s3249_s8 + $0xcc] sm:$0xf] %vm2202_vm2, %v2684_v32  ;;  %v2682_v42 = vpack.c.bf16 %v1611_v38, %v1611_v38  ;;  %v1675_v43 = vsel %vm1419_vm14, %v1246_v19, %v1547_v34  ;;  %vm1424_vm0 = vcmp.gt.f32.partialorder %v2967_v36, 0.0  ;;  %v1552_v44 = vmul.f32 0.2, %v2967_v36  ;;  %v2968_v46 = vpop.f32.mrb[54].mxu1 }
 0x168   : > { %2318 = vst.msk [vmem:[%s3249_s8 + $0x1cc] sm:$0xf] %vm2202_vm2, %v2748_v37  ;;  %v2746_v47 = vpack.c.bf16 %v1675_v43, %v1675_v43  ;;  %v1616_v48 = vsel %vm1360_vm15, %v2903_v35, %v1488_v39  ;;  %vm1358_vm1 = vcmp.gt.f32.partialorder %v1003_v40, 0.0  ;;  %v1486_v49 = vmul.f32 0.2, %v1003_v40  ;;  %v1006_v50 = vpop.f32.mrb[55].mxu0 }
 0x169   : > { %v1262_v51 = vpop.f32.mrb[55].mxu1  ;;  %2252 = vst.msk [vmem:[%s3249_s8 + $0xc4] sm:$0xf] %vm2202_vm2, %v2682_v42  ;;  %v2687_v52 = vpack.c.bf16 %v1616_v48, %v1616_v48  ;;  %v1680_v53 = vsel %vm1424_vm0, %v2967_v36, %v1552_v44  ;;  %vm1422_vm3 = vcmp.gt.f32.partialorder %v1259_v41, 0.0  ;;  %v1550_v54 = vmul.f32 0.2, %v1259_v41 }
 0x16a   : > { %2316 = vst.msk [vmem:[%s3249_s8 + $0x1c4] sm:$0xf] %vm2202_vm2, %v2746_v47  ;;  %v2751_v55 = vpack.c.bf16 %v1680_v53, %v1680_v53  ;;  %v1614_v56 = vsel %vm1358_vm1, %v1003_v40, %v1486_v49  ;;  %vm1361_vm4 = vcmp.gt.f32.partialorder %v2904_v45, 0.0  ;;  %v1489_v57 = vmul.f32 0.2, %v2904_v45  ;;  %v2907_v3 = vpop.f32.mrb[56].mxu0 }
 0x16b   : > { %2257 = vst.msk [vmem:[%s3249_s8 + $0xd8] sm:$0xf] %vm2202_vm2, %v2687_v52  ;;  %v2685_v58 = vpack.c.bf16 %v1614_v56, %v1614_v56  ;;  %v1678_v59 = vsel %vm1422_vm3, %v1259_v41, %v1550_v54  ;;  %vm1425_vm5 = vcmp.gt.f32.partialorder %v2968_v46, 0.0  ;;  %v1553_v60 = vmul.f32 0.2, %v2968_v46  ;;  %v2971_v4 = vpop.f32.mrb[56].mxu1 }
 0x16c   : > { %2321 = vst.msk [vmem:[%s3249_s8 + $0x1d8] sm:$0xf] %vm2202_vm2, %v2751_v55  ;;  %v2749_v61 = vpack.c.bf16 %v1678_v59, %v1678_v59  ;;  %v1617_v62 = vsel %vm1361_vm4, %v2904_v45, %v1489_v57  ;;  %vm1359_vm6 = vcmp.gt.f32.partialorder %v1006_v50, 0.0  ;;  %v1487_v63 = vmul.f32 0.2, %v1006_v50  ;;  %v1019_v8 = vpop.f32.mrb[57].mxu0 }
 0x16d   : > { %2255 = vst.msk [vmem:[%s3249_s8 + $0xd0] sm:$0xf] %vm2202_vm2, %v2685_v58  ;;  %v2688_v0 = vpack.c.bf16 %v1617_v62, %v1617_v62  ;;  %v1681_v1 = vsel %vm1425_vm5, %v2968_v46, %v1553_v60  ;;  %vm1423_vm7 = vcmp.gt.f32.partialorder %v1262_v51, 0.0  ;;  %v1551_v2 = vmul.f32 0.2, %v1262_v51  ;;  %v1275_v9 = vpop.f32.mrb[57].mxu1 }
 0x16e   : > { %2319 = vst.msk [vmem:[%s3249_s8 + $0x1d0] sm:$0xf] %vm2202_vm2, %v2749_v61  ;;  %v2752_v5 = vpack.c.bf16 %v1681_v1, %v1681_v1  ;;  %v1615_v6 = vsel %vm1359_vm6, %v1006_v50, %v1487_v63  ;;  %vm1364_vm8 = vcmp.gt.f32.partialorder %v2907_v3, 0.0  ;;  %v1492_v7 = vmul.f32 0.2, %v2907_v3  ;;  %v2908_v13 = vpop.f32.mrb[58].mxu0 }
 0x16f   : > { %2258 = vst.msk [vmem:[%s3249_s8 + $0xdc] sm:$0xf] %vm2202_vm2, %v2688_v0  ;;  %v2686_v10 = vpack.c.bf16 %v1615_v6, %v1615_v6  ;;  %v1679_v11 = vsel %vm1423_vm7, %v1262_v51, %v1551_v2  ;;  %vm1428_vm9 = vcmp.gt.f32.partialorder %v2971_v4, 0.0  ;;  %v1556_v12 = vmul.f32 0.2, %v2971_v4  ;;  %v2972_v14 = vpop.f32.mrb[58].mxu1 }
 0x170   : > { %2322 = vst.msk [vmem:[%s3249_s8 + $0x1dc] sm:$0xf] %vm2202_vm2, %v2752_v5  ;;  %v2750_v15 = vpack.c.bf16 %v1679_v11, %v1679_v11  ;;  %v1620_v16 = vsel %vm1364_vm8, %v2907_v3, %v1492_v7  ;;  %vm1362_vm10 = vcmp.gt.f32.partialorder %v1019_v8, 0.0  ;;  %v1490_v17 = vmul.f32 0.2, %v1019_v8  ;;  %v1022_v18 = vpop.f32.mrb[59].mxu0 }
 0x171   : > { %v1278_v19 = vpop.f32.mrb[59].mxu1  ;;  %2256 = vst.msk [vmem:[%s3249_s8 + $0xd4] sm:$0xf] %vm2202_vm2, %v2686_v10  ;;  %v2691_v20 = vpack.c.bf16 %v1620_v16, %v1620_v16  ;;  %v1684_v21 = vsel %vm1428_vm9, %v2971_v4, %v1556_v12  ;;  %vm1426_vm11 = vcmp.gt.f32.partialorder %v1275_v9, 0.0  ;;  %v1554_v22 = vmul.f32 0.2, %v1275_v9 }
 0x172   : > { %2320 = vst.msk [vmem:[%s3249_s8 + $0x1d4] sm:$0xf] %vm2202_vm2, %v2750_v15  ;;  %v2755_v23 = vpack.c.bf16 %v1684_v21, %v1684_v21  ;;  %v1618_v24 = vsel %vm1362_vm10, %v1019_v8, %v1490_v17  ;;  %vm1365_vm12 = vcmp.gt.f32.partialorder %v2908_v13, 0.0  ;;  %v1493_v25 = vmul.f32 0.2, %v2908_v13  ;;  %v2911_v35 = vpop.f32.mrb[60].mxu0 }
 0x173   : > { %2261 = vst.msk [vmem:[%s3249_s8 + $0xe8] sm:$0xf] %vm2202_vm2, %v2691_v20  ;;  %v2689_v26 = vpack.c.bf16 %v1618_v24, %v1618_v24  ;;  %v1682_v27 = vsel %vm1426_vm11, %v1275_v9, %v1554_v22  ;;  %vm1429_vm13 = vcmp.gt.f32.partialorder %v2972_v14, 0.0  ;;  %v1557_v28 = vmul.f32 0.2, %v2972_v14  ;;  %v2975_v36 = vpop.f32.mrb[60].mxu1 }
 0x174   : > { %2325 = vst.msk [vmem:[%s3249_s8 + $0x1e8] sm:$0xf] %vm2202_vm2, %v2755_v23  ;;  %v2753_v29 = vpack.c.bf16 %v1682_v27, %v1682_v27  ;;  %v1621_v30 = vsel %vm1365_vm12, %v2908_v13, %v1493_v25  ;;  %vm1363_vm14 = vcmp.gt.f32.partialorder %v1022_v18, 0.0  ;;  %v1491_v31 = vmul.f32 0.2, %v1022_v18  ;;  %v1035_v40 = vpop.f32.mrb[61].mxu0 }
 0x175   : > { %2259 = vst.msk [vmem:[%s3249_s8 + $0xe0] sm:$0xf] %vm2202_vm2, %v2689_v26  ;;  %v2692_v32 = vpack.c.bf16 %v1621_v30, %v1621_v30  ;;  %v1685_v33 = vsel %vm1429_vm13, %v2972_v14, %v1557_v28  ;;  %vm1427_vm15 = vcmp.gt.f32.partialorder %v1278_v19, 0.0  ;;  %v1555_v34 = vmul.f32 0.2, %v1278_v19  ;;  %v1291_v41 = vpop.f32.mrb[61].mxu1 }
 0x176   : > { %2323 = vst.msk [vmem:[%s3249_s8 + $0x1e0] sm:$0xf] %vm2202_vm2, %v2753_v29  ;;  %v2756_v37 = vpack.c.bf16 %v1685_v33, %v1685_v33  ;;  %v1619_v38 = vsel %vm1363_vm14, %v1022_v18, %v1491_v31  ;;  %vm1368_vm0 = vcmp.gt.f32.partialorder %v2911_v35, 0.0  ;;  %v1496_v39 = vmul.f32 0.2, %v2911_v35  ;;  %v2912_v45 = vpop.f32.mrb[62].mxu0 }
 0x177   : > { %2262 = vst.msk [vmem:[%s3249_s8 + $0xec] sm:$0xf] %vm2202_vm2, %v2692_v32  ;;  %v2690_v42 = vpack.c.bf16 %v1619_v38, %v1619_v38  ;;  %v1683_v43 = vsel %vm1427_vm15, %v1278_v19, %v1555_v34  ;;  %vm1432_vm1 = vcmp.gt.f32.partialorder %v2975_v36, 0.0  ;;  %v1560_v44 = vmul.f32 0.2, %v2975_v36  ;;  %v2976_v46 = vpop.f32.mrb[62].mxu1 }
 0x178   : > { %2326 = vst.msk [vmem:[%s3249_s8 + $0x1ec] sm:$0xf] %vm2202_vm2, %v2756_v37  ;;  %v2754_v47 = vpack.c.bf16 %v1683_v43, %v1683_v43  ;;  %v1624_v48 = vsel %vm1368_vm0, %v2911_v35, %v1496_v39  ;;  %vm1366_vm3 = vcmp.gt.f32.partialorder %v1035_v40, 0.0  ;;  %v1494_v49 = vmul.f32 0.2, %v1035_v40  ;;  %v1038_v50 = vpop.f32.mrb[63].mxu0 }
 0x179   : > { %v1294_v51 = vpop.f32.mrb[63].mxu1  ;;  %2260 = vst.msk [vmem:[%s3249_s8 + $0xe4] sm:$0xf] %vm2202_vm2, %v2690_v42  ;;  %v2695_v52 = vpack.c.bf16 %v1624_v48, %v1624_v48  ;;  %v1688_v53 = vsel %vm1432_vm1, %v2975_v36, %v1560_v44  ;;  %vm1430_vm4 = vcmp.gt.f32.partialorder %v1291_v41, 0.0  ;;  %v1558_v54 = vmul.f32 0.2, %v1291_v41 }
 0x17a   : > { %2324 = vst.msk [vmem:[%s3249_s8 + $0x1e4] sm:$0xf] %vm2202_vm2, %v2754_v47  ;;  %v2759_v55 = vpack.c.bf16 %v1688_v53, %v1688_v53  ;;  %v1622_v56 = vsel %vm1366_vm3, %v1035_v40, %v1494_v49  ;;  %vm1369_vm5 = vcmp.gt.f32.partialorder %v2912_v45, 0.0  ;;  %v1497_v57 = vmul.f32 0.2, %v2912_v45 }
 0x17b   : > { %2265 = vst.msk [vmem:[%s3249_s8 + $0xf8] sm:$0xf] %vm2202_vm2, %v2695_v52  ;;  %v2693_v58 = vpack.c.bf16 %v1622_v56, %v1622_v56  ;;  %v1686_v59 = vsel %vm1430_vm4, %v1291_v41, %v1558_v54  ;;  %vm1433_vm6 = vcmp.gt.f32.partialorder %v2976_v46, 0.0  ;;  %v1561_v60 = vmul.f32 0.2, %v2976_v46 }
 0x17c   : > { %2329 = vst.msk [vmem:[%s3249_s8 + $0x1f8] sm:$0xf] %vm2202_vm2, %v2759_v55  ;;  %v2757_v61 = vpack.c.bf16 %v1686_v59, %v1686_v59  ;;  %v1625_v62 = vsel %vm1369_vm5, %v2912_v45, %v1497_v57  ;;  %vm1367_vm7 = vcmp.gt.f32.partialorder %v1038_v50, 0.0  ;;  %v1495_v63 = vmul.f32 0.2, %v1038_v50 }
 0x17d   : > { %2263 = vst.msk [vmem:[%s3249_s8 + $0xf0] sm:$0xf] %vm2202_vm2, %v2693_v58  ;;  %v2696_v0 = vpack.c.bf16 %v1625_v62, %v1625_v62  ;;  %v1689_v1 = vsel %vm1433_vm6, %v2976_v46, %v1561_v60  ;;  %vm1431_vm8 = vcmp.gt.f32.partialorder %v1294_v51, 0.0  ;;  %v1559_v2 = vmul.f32 0.2, %v1294_v51 }
 0x17e   : > { %2327 = vst.msk [vmem:[%s3249_s8 + $0x1f0] sm:$0xf] %vm2202_vm2, %v2757_v61  ;;  %v2760_v3 = vpack.c.bf16 %v1689_v1, %v1689_v1  ;;  %v1623_v4 = vsel %vm1367_vm7, %v1038_v50, %v1495_v63 }
 0x17f   : > { %2266 = vst.msk [vmem:[%s3249_s8 + $0xfc] sm:$0xf] %vm2202_vm2, %v2696_v0  ;;  %v2694_v5 = vpack.c.bf16 %v1623_v4, %v1623_v4  ;;  %v1687_v6 = vsel %vm1431_vm8, %v1294_v51, %v1559_v2 }
 0x180   : > { %2330 = vst.msk [vmem:[%s3249_s8 + $0x1fc] sm:$0xf] %vm2202_vm2, %v2760_v3  ;;  %v2758_v7 = vpack.c.bf16 %v1687_v6, %v1687_v6 }
 0x181   : > { %2264 = vst.msk [vmem:[%s3249_s8 + $0xf4] sm:$0xf] %vm2202_vm2, %v2694_v5 }
 0x182   : > { %2328 = vst.msk [vmem:[%s3249_s8 + $0x1f4] sm:$0xf] %vm2202_vm2, %v2758_v7 }
 0x183 PF: > { %s12_s11 = sadd.s32 1, %s3111_s11   ;;  %s3520_s9 = smov %s3107_s10 }
 0x184   : > { %p9_p5 = scmp.ge.s32.totalorder %s12_s11, 4   ;;  %s3521_s10 = smov %s3523_s12 }
 0x186   :  { %11 = sbr.rel (!%p9_p5) target bundleno = 2 (0x2), region = 61 }

// kernel: netd_forward.9
= control target key start
LH: loop header
LB: loop body
LE: loop exit
PB: predicated region body
PF: predicated region fallthrough
CT: control target
= control target key end

     0   :  { %v2860_v0 = vmov 0   ;;  %vm1873_vm0 = vcmask 519168   ;;  %vm1938_vm1 = vcmask 523264   ;;  %s3790_s1 = inlined_call_operand.vmem [shape: bf16[512,64], index: 1, kind: input, shape index: {}]   ;;  %s3791_s0 = inlined_call_operand.vmem [shape: bf16[512,512], index: 0, kind: input, shape index: {}]   ;;  %s3792_s2 = inlined_call_operand.vmem [shape: bf16[512,64], index: 2, kind: output, shape index: {0}]   ;;  %s3793_s3 = inlined_call_operand.vmem [shape: f32[1,8,64], index: 3, kind: output, shape index: {1}]   ;;  %s3794_s4 = inlined_call_operand.vmem [shape: f32[1,8,64], index: 4, kind: output, shape index: {2}]  }
   0x1   :  { %1039 = vmatprep.subr.bf16.mxu1 %v2860_v0  ;;  %1328 = vmatprep.subr.bf16.mxu0 %v2860_v0  ;;  %v2636_v1 = vld [vmem:[%s3790_s1] sm:$0xff]   ;;  %v2638_v3 = vld [vmem:[%s3790_s1 + $0x8] sm:$0xff]   ;;  %v2640_v5 = vld [vmem:[%s3790_s1 + $0x10] sm:$0xff]  }
   0x2   :  { %v2637_v2 = vld [vmem:[%s3790_s1 + $0x80] sm:$0xff]   ;;  %1040 = vmatpush1.bf16.msra.mxu1 %v2636_v1  ;;  %v2639_v4 = vld [vmem:[%s3790_s1 + $0x88] sm:$0xff]   ;;  %v2641_v6 = vld [vmem:[%s3790_s1 + $0x90] sm:$0xff]  }
   0x3   :  { %1329 = vmatpush1.bf16.msra.mxu0 %v2637_v2  ;;  %1041 = vmatprep.subr.bf16.mxu1 %v2860_v0  ;;  %v2642_v7 = vld [vmem:[%s3790_s1 + $0x18] sm:$0xff]   ;;  %v2644_v9 = vld [vmem:[%s3790_s1 + $0x20] sm:$0xff]   ;;  %v2646_v11 = vld [vmem:[%s3790_s1 + $0x28] sm:$0xff]  }
   0x4   :  { %1330 = vmatprep.subr.bf16.mxu0 %v2860_v0  ;;  %v2643_v8 = vld [vmem:[%s3790_s1 + $0x98] sm:$0xff]   ;;  %v2645_v10 = vld [vmem:[%s3790_s1 + $0xa0] sm:$0xff]   ;;  %v2647_v12 = vld [vmem:[%s3790_s1 + $0xa8] sm:$0xff]  }
   0x5   :  { %v2648_v13 = vld [vmem:[%s3790_s1 + $0x30] sm:$0xff]   ;;  %v2650_v15 = vld [vmem:[%s3790_s1 + $0x38] sm:$0xff]   ;;  %v2652_v17 = vld [vmem:[%s3790_s1 + $0x40] sm:$0xff]  }
   0x6   :  { %1042 = vmatpush1.bf16.msra.mxu1 %v2638_v3  ;;  %v2649_v14 = vld [vmem:[%s3790_s1 + $0xb0] sm:$0xff]   ;;  %v2651_v16 = vld [vmem:[%s3790_s1 + $0xb8] sm:$0xff]   ;;  %v2653_v18 = vld [vmem:[%s3790_s1 + $0xc0] sm:$0xff]  }
   0x7   :  { %1331 = vmatpush1.bf16.msra.mxu0 %v2639_v4  ;;  %1043 = vmatprep.subr.bf16.mxu1 %v2860_v0  ;;  %v2670_v19 = vld [vmem:[%s3791_s0 + $0x4] ss:$16 sps:$4 sm:$0xff]   ;;  %v2654_v20 = vld [vmem:[%s3790_s1 + $0x48] sm:$0xff]   ;;  %v2658_v25 = vld [vmem:[%s3790_s1 + $0x58] sm:$0xff]  }
   0x8   :  { %1332 = vmatprep.subr.bf16.mxu0 %v2860_v0  ;;  %v2673_v21 = vld [vmem:[%s3791_s0 + $0xc] ss:$16 sps:$4 sm:$0xff]   ;;  %1071 = vmatprep.mubr.bf16.mxu1 %v2670_v19  ;;  %v2656_v23 = vld [vmem:[%s3790_s1 + $0x50] sm:$0xff]   ;;  %v2660_v27 = vld [vmem:[%s3790_s1 + $0x60] sm:$0xff]  }
   0x9   :  { %v2655_v22 = vld [vmem:[%s3790_s1 + $0xc8] sm:$0xff]   ;;  %1360 = vmatprep.mubr.bf16.mxu0 %v2673_v21  ;;  %v2657_v24 = vld [vmem:[%s3790_s1 + $0xd0] sm:$0xff]   ;;  %v2659_v26 = vld [vmem:[%s3790_s1 + $0xd8] sm:$0xff]  }
   0xa   :  { %1044 = vmatpush1.bf16.msra.mxu1 %v2640_v5  ;;  %v2661_v28 = vld [vmem:[%s3790_s1 + $0xe0] sm:$0xff]   ;;  %v2662_v29 = vld [vmem:[%s3790_s1 + $0x68] sm:$0xff]   ;;  %v2664_v31 = vld [vmem:[%s3790_s1 + $0x70] sm:$0xff]  }
   0xb   :  { %1333 = vmatpush1.bf16.msra.mxu0 %v2641_v6  ;;  %1045 = vmatprep.subr.bf16.mxu1 %v2860_v0  ;;  %v2663_v30 = vld [vmem:[%s3790_s1 + $0xe8] sm:$0xff]   ;;  %v2665_v32 = vld [vmem:[%s3790_s1 + $0xf0] sm:$0xff]   ;;  %v2666_v33 = vld [vmem:[%s3790_s1 + $0x78] sm:$0xff]  }
   0xc   :  { %1334 = vmatprep.subr.bf16.mxu0 %v2860_v0  ;;  %v2667_v34 = vld [vmem:[%s3790_s1 + $0xf8] sm:$0xff]   ;;  %v2668_v35 = vld [vmem:[%s3791_s0] ss:$16 sps:$4 sm:$0xff]   ;;  %v2674_v37 = vld [vmem:[%s3791_s0 + $0x24] ss:$16 sps:$4 sm:$0xff]  }
   0xd   :  { %v2671_v36 = vld [vmem:[%s3791_s0 + $0x8] ss:$16 sps:$4 sm:$0xff]   ;;  %v2676_v38 = vld [vmem:[%s3791_s0 + $0x2c] ss:$16 sps:$4 sm:$0xff]   ;;  %v2678_v39 = vld [vmem:[%s3791_s0 + $0x20] ss:$16 sps:$4 sm:$0xff]  }
   0xe   :  { %1046 = vmatpush1.bf16.msra.mxu1 %v2642_v7  ;;  %v2679_v40 = vld [vmem:[%s3791_s0 + $0x28] ss:$16 sps:$4 sm:$0xff]   ;;  %v2680_v41 = vld [vmem:[%s3791_s0 + $0x44] ss:$16 sps:$4 sm:$0xff]   ;;  %v2682_v42 = vld [vmem:[%s3791_s0 + $0x4c] ss:$16 sps:$4 sm:$0xff]  }
   0xf   :  { %1335 = vmatpush1.bf16.msra.mxu0 %v2643_v8  ;;  %1047 = vmatprep.subr.bf16.mxu1 %v2860_v0  ;;  %v2684_v43 = vld [vmem:[%s3791_s0 + $0x40] ss:$16 sps:$4 sm:$0xff]   ;;  %v2685_v44 = vld [vmem:[%s3791_s0 + $0x48] ss:$16 sps:$4 sm:$0xff]   ;;  %v2686_v45 = vld [vmem:[%s3791_s0 + $0x64] ss:$16 sps:$4 sm:$0xff]  }
  0x10   :  { %1336 = vmatprep.subr.bf16.mxu0 %v2860_v0  ;;  %v2688_v46 = vld [vmem:[%s3791_s0 + $0x6c] ss:$16 sps:$4 sm:$0xff]   ;;  %v2690_v47 = vld [vmem:[%s3791_s0 + $0x60] ss:$16 sps:$4 sm:$0xff]   ;;  %v2691_v48 = vld [vmem:[%s3791_s0 + $0x68] ss:$16 sps:$4 sm:$0xff]  }
  0x11   :  { %v2692_v49 = vld [vmem:[%s3791_s0 + $0x84] ss:$16 sps:$4 sm:$0xff]   ;;  %v2694_v50 = vld [vmem:[%s3791_s0 + $0x8c] ss:$16 sps:$4 sm:$0xff]   ;;  %v2696_v51 = vld [vmem:[%s3791_s0 + $0x80] ss:$16 sps:$4 sm:$0xff]  }
  0x12   :  { %1048 = vmatpush1.bf16.msra.mxu1 %v2644_v9  ;;  %v2697_v52 = vld [vmem:[%s3791_s0 + $0x88] ss:$16 sps:$4 sm:$0xff]   ;;  %v2698_v53 = vld [vmem:[%s3791_s0 + $0xa4] ss:$16 sps:$4 sm:$0xff]   ;;  %v2700_v54 = vld [vmem:[%s3791_s0 + $0xac] ss:$16 sps:$4 sm:$0xff]  }
  0x13   :  { %1337 = vmatpush1.bf16.msra.mxu0 %v2645_v10  ;;  %1049 = vmatprep.subr.bf16.mxu1 %v2860_v0  ;;  %v2702_v55 = vld [vmem:[%s3791_s0 + $0xa0] ss:$16 sps:$4 sm:$0xff]   ;;  %v2703_v56 = vld [vmem:[%s3791_s0 + $0xa8] ss:$16 sps:$4 sm:$0xff]   ;;  %v2704_v57 = vld [vmem:[%s3791_s0 + $0xc4] ss:$16 sps:$4 sm:$0xff]  }
  0x14   :  { %1338 = vmatprep.subr.bf16.mxu0 %v2860_v0  ;;  %v2706_v58 = vld [vmem:[%s3791_s0 + $0xcc] ss:$16 sps:$4 sm:$0xff]   ;;  %v2708_v59 = vld [vmem:[%s3791_s0 + $0xc0] ss:$16 sps:$4 sm:$0xff]   ;;  %v2709_v60 = vld [vmem:[%s3791_s0 + $0xc8] ss:$16 sps:$4 sm:$0xff]  }
  0x15   :  { %v2710_v61 = vld [vmem:[%s3791_s0 + $0xe4] ss:$16 sps:$4 sm:$0xff]   ;;  %v2712_v62 = vld [vmem:[%s3791_s0 + $0xec] ss:$16 sps:$4 sm:$0xff]   ;;  %v2714_v63 = vld [vmem:[%s3791_s0 + $0xe0] ss:$16 sps:$4 sm:$0xff]  }
  0x16   :  { %1050 = vmatpush1.bf16.msra.mxu1 %v2646_v11  ;;  %v2716_v1 = vld [vmem:[%s3791_s0 + $0x104] ss:$16 sps:$4 sm:$0xff]   ;;  %v2718_v2 = vld [vmem:[%s3791_s0 + $0x10c] ss:$16 sps:$4 sm:$0xff]   ;;  %v2720_v3 = vld [vmem:[%s3791_s0 + $0x100] ss:$16 sps:$4 sm:$0xff]  }
  0x17   :  { %1339 = vmatpush1.bf16.msra.mxu0 %v2647_v12  ;;  %1051 = vmatprep.subr.bf16.mxu1 %v2860_v0  ;;  %v2721_v4 = vld [vmem:[%s3791_s0 + $0x108] ss:$16 sps:$4 sm:$0xff]   ;;  %v2722_v5 = vld [vmem:[%s3791_s0 + $0x124] ss:$16 sps:$4 sm:$0xff]   ;;  %v2724_v6 = vld [vmem:[%s3791_s0 + $0x12c] ss:$16 sps:$4 sm:$0xff]  }
  0x18   :  { %1340 = vmatprep.subr.bf16.mxu0 %v2860_v0  ;;  %v2726_v7 = vld [vmem:[%s3791_s0 + $0x120] ss:$16 sps:$4 sm:$0xff]   ;;  %v2727_v8 = vld [vmem:[%s3791_s0 + $0x128] ss:$16 sps:$4 sm:$0xff]   ;;  %v2728_v9 = vld [vmem:[%s3791_s0 + $0x144] ss:$16 sps:$4 sm:$0xff]  }
  0x19   :  { %v2730_v10 = vld [vmem:[%s3791_s0 + $0x14c] ss:$16 sps:$4 sm:$0xff]   ;;  %v2732_v11 = vld [vmem:[%s3791_s0 + $0x140] ss:$16 sps:$4 sm:$0xff]   ;;  %v2733_v12 = vld [vmem:[%s3791_s0 + $0x148] ss:$16 sps:$4 sm:$0xff]  }
  0x1a   :  { %1052 = vmatpush1.bf16.msra.mxu1 %v2648_v13  ;;  %v2734_v13 = vld [vmem:[%s3791_s0 + $0x164] ss:$16 sps:$4 sm:$0xff]   ;;  %v2744_v19 = vld [vmem:[%s3791_s0 + $0x180] ss:$16 sps:$4 sm:$0xff]  }
  0x1b   :  { %1341 = vmatpush1.bf16.msra.mxu0 %v2649_v14  ;;  %1053 = vmatprep.subr.bf16.mxu1 %v2860_v0  ;;  %v2736_v14 = vld [vmem:[%s3791_s0 + $0x16c] ss:$16 sps:$4 sm:$0xff]   ;;  %v2746_v21 = vld [vmem:[%s3791_s0 + $0x1a4] ss:$16 sps:$4 sm:$0xff]  }
  0x1c   :  { %1342 = vmatprep.subr.bf16.mxu0 %v2860_v0 }
  0x1e   :  { %1054 = vmatpush1.bf16.msra.mxu1 %v2650_v15  ;;  %v2738_v15 = vld [vmem:[%s3791_s0 + $0x160] ss:$16 sps:$4 sm:$0xff]  }
  0x1f   :  { %1343 = vmatpush1.bf16.msra.mxu0 %v2651_v16  ;;  %1055 = vmatprep.subr.bf16.mxu1 %v2860_v0  ;;  %v2739_v16 = vld [vmem:[%s3791_s0 + $0x168] ss:$16 sps:$4 sm:$0xff]  }
  0x20   :  { %1344 = vmatprep.subr.bf16.mxu0 %v2860_v0 }
  0x22   :  { %1056 = vmatpush1.bf16.msra.mxu1 %v2652_v17  ;;  %v2740_v17 = vld [vmem:[%s3791_s0 + $0x184] ss:$16 sps:$4 sm:$0xff]  }
  0x23   :  { %1345 = vmatpush1.bf16.msra.mxu0 %v2653_v18  ;;  %1057 = vmatprep.subr.bf16.mxu1 %v2860_v0  ;;  %v2742_v18 = vld [vmem:[%s3791_s0 + $0x18c] ss:$16 sps:$4 sm:$0xff]  }
  0x24   :  { %1346 = vmatprep.subr.bf16.mxu0 %v2860_v0 }
  0x26   :  { %1058 = vmatpush1.bf16.msra.mxu1 %v2654_v20  ;;  %v2745_v20 = vld [vmem:[%s3791_s0 + $0x188] ss:$16 sps:$4 sm:$0xff]  }
  0x27   :  { %1347 = vmatpush1.bf16.msra.mxu0 %v2655_v22  ;;  %1059 = vmatprep.subr.bf16.mxu1 %v2860_v0  ;;  %v2748_v22 = vld [vmem:[%s3791_s0 + $0x1ac] ss:$16 sps:$4 sm:$0xff]  }
  0x28   :  { %1348 = vmatprep.subr.bf16.mxu0 %v2860_v0 }
  0x2a   :  { %1060 = vmatpush1.bf16.msra.mxu1 %v2656_v23  ;;  %v2750_v23 = vld [vmem:[%s3791_s0 + $0x1a0] ss:$16 sps:$4 sm:$0xff]  }
  0x2b   :  { %1349 = vmatpush1.bf16.msra.mxu0 %v2657_v24  ;;  %1061 = vmatprep.subr.bf16.mxu1 %v2860_v0  ;;  %v2751_v24 = vld [vmem:[%s3791_s0 + $0x1a8] ss:$16 sps:$4 sm:$0xff]  }
  0x2c   :  { %1350 = vmatprep.subr.bf16.mxu0 %v2860_v0 }
  0x2e   :  { %1062 = vmatpush1.bf16.msra.mxu1 %v2658_v25  ;;  %v2752_v25 = vld [vmem:[%s3791_s0 + $0x1c4] ss:$16 sps:$4 sm:$0xff]  }
  0x2f   :  { %1351 = vmatpush1.bf16.msra.mxu0 %v2659_v26  ;;  %1063 = vmatprep.subr.bf16.mxu1 %v2860_v0  ;;  %v2754_v26 = vld [vmem:[%s3791_s0 + $0x1cc] ss:$16 sps:$4 sm:$0xff]  }
  0x30   :  { %1352 = vmatprep.subr.bf16.mxu0 %v2860_v0 }
  0x32   :  { %1064 = vmatpush1.bf16.msra.mxu1 %v2660_v27  ;;  %v2756_v27 = vld [vmem:[%s3791_s0 + $0x1c0] ss:$16 sps:$4 sm:$0xff]  }
  0x33   :  { %1353 = vmatpush1.bf16.msra.mxu0 %v2661_v28  ;;  %1065 = vmatprep.subr.bf16.mxu1 %v2860_v0  ;;  %v2757_v28 = vld [vmem:[%s3791_s0 + $0x1c8] ss:$16 sps:$4 sm:$0xff]  }
  0x34   :  { %1354 = vmatprep.subr.bf16.mxu0 %v2860_v0 }
  0x36   :  { %1066 = vmatpush1.bf16.msra.mxu1 %v2662_v29  ;;  %v2758_v29 = vld [vmem:[%s3791_s0 + $0x1e4] ss:$16 sps:$4 sm:$0xff]  }
  0x37   :  { %1355 = vmatpush1.bf16.msra.mxu0 %v2663_v30  ;;  %1067 = vmatprep.subr.bf16.mxu1 %v2860_v0  ;;  %v2760_v30 = vld [vmem:[%s3791_s0 + $0x1ec] ss:$16 sps:$4 sm:$0xff]  }
  0x38   :  { %1356 = vmatprep.subr.bf16.mxu0 %v2860_v0 }
  0x3a   :  { %1068 = vmatpush1.bf16.msra.mxu1 %v2664_v31  ;;  %v2762_v31 = vld [vmem:[%s3791_s0 + $0x1e0] ss:$16 sps:$4 sm:$0xff]  }
  0x3b   :  { %1357 = vmatpush1.bf16.msra.mxu0 %v2665_v32  ;;  %1069 = vmatprep.subr.bf16.mxu1 %v2860_v0  ;;  %v2763_v32 = vld [vmem:[%s3791_s0 + $0x1e8] ss:$16 sps:$4 sm:$0xff]  }
  0x3c   :  { %1358 = vmatprep.subr.bf16.mxu0 %v2860_v0  ;;  %v2715_v0 = vld [vmem:[%s3791_s0 + $0xe8] ss:$16 sps:$4 sm:$0xff]  }
  0x3e   :  { %1070 = vmatpush1.bf16.msra.mxu1 %v2666_v33  ;;  %v2764_v33 = vld [vmem:[%s3791_s0 + $0x204] ss:$16 sps:$4 sm:$0xff]  }
  0x3f   :  { %1359 = vmatpush1.bf16.msra.mxu0 %v2667_v34  ;;  %v2766_v34 = vld [vmem:[%s3791_s0 + $0x20c] ss:$16 sps:$4 sm:$0xff]  }
  0x41   :  { %1072 = vmatmul.mubr.bf16.vlgmr.msra.gmra.mrb[0].mxu1 %v2668_v35  ;;  %v2768_v35 = vld [vmem:[%s3791_s0 + $0x200] ss:$16 sps:$4 sm:$0xff]  }
  0x42   :  { %1361 = vmatmul.mubr.bf16.vlgmr.msra.gmra.mrb[0].mxu0 %v2671_v36  ;;  %1079 = vmatprep.mubr.bf16.mxu1 %v2674_v37  ;;  %v2769_v36 = vld [vmem:[%s3791_s0 + $0x208] ss:$16 sps:$4 sm:$0xff]   ;;  %v2770_v37 = vld [vmem:[%s3791_s0 + $0x224] ss:$16 sps:$4 sm:$0xff]  }
  0x43   :  { %1368 = vmatprep.mubr.bf16.mxu0 %v2676_v38  ;;  %v2772_v38 = vld [vmem:[%s3791_s0 + $0x22c] ss:$16 sps:$4 sm:$0xff]  }
  0x49   :  { %1080 = vmatmul.mubr.bf16.gmra.mrb[4].mxu1 %v2678_v39  ;;  %v2774_v39 = vld [vmem:[%s3791_s0 + $0x220] ss:$16 sps:$4 sm:$0xff]  }
  0x4a   :  { %1369 = vmatmul.mubr.bf16.gmra.mrb[4].mxu0 %v2679_v40  ;;  %1087 = vmatprep.mubr.bf16.mxu1 %v2680_v41  ;;  %v2775_v40 = vld [vmem:[%s3791_s0 + $0x228] ss:$16 sps:$4 sm:$0xff]   ;;  %v2776_v41 = vld [vmem:[%s3791_s0 + $0x244] ss:$16 sps:$4 sm:$0xff]  }
  0x4b   :  { %1376 = vmatprep.mubr.bf16.mxu0 %v2682_v42  ;;  %v2778_v42 = vld [vmem:[%s3791_s0 + $0x24c] ss:$16 sps:$4 sm:$0xff]  }
  0x51   :  { %1088 = vmatmul.mubr.bf16.gmra.mrb[8].mxu1 %v2684_v43  ;;  %v2780_v43 = vld [vmem:[%s3791_s0 + $0x240] ss:$16 sps:$4 sm:$0xff]  }
  0x52   :  { %1377 = vmatmul.mubr.bf16.gmra.mrb[8].mxu0 %v2685_v44  ;;  %1095 = vmatprep.mubr.bf16.mxu1 %v2686_v45  ;;  %v2781_v44 = vld [vmem:[%s3791_s0 + $0x248] ss:$16 sps:$4 sm:$0xff]   ;;  %v2782_v45 = vld [vmem:[%s3791_s0 + $0x264] ss:$16 sps:$4 sm:$0xff]  }
  0x53   :  { %1384 = vmatprep.mubr.bf16.mxu0 %v2688_v46  ;;  %v2784_v46 = vld [vmem:[%s3791_s0 + $0x26c] ss:$16 sps:$4 sm:$0xff]  }
  0x59   :  { %1096 = vmatmul.mubr.bf16.gmra.mrb[12].mxu1 %v2690_v47  ;;  %v2786_v47 = vld [vmem:[%s3791_s0 + $0x260] ss:$16 sps:$4 sm:$0xff]  }
  0x5a   :  { %1385 = vmatmul.mubr.bf16.gmra.mrb[12].mxu0 %v2691_v48  ;;  %1103 = vmatprep.mubr.bf16.mxu1 %v2692_v49  ;;  %v2787_v48 = vld [vmem:[%s3791_s0 + $0x268] ss:$16 sps:$4 sm:$0xff]   ;;  %v2788_v49 = vld [vmem:[%s3791_s0 + $0x284] ss:$16 sps:$4 sm:$0xff]  }
  0x5b   :  { %1392 = vmatprep.mubr.bf16.mxu0 %v2694_v50  ;;  %v2790_v50 = vld [vmem:[%s3791_s0 + $0x28c] ss:$16 sps:$4 sm:$0xff]  }
  0x61   :  { %1104 = vmatmul.mubr.bf16.gmra.mrb[16].mxu1 %v2696_v51  ;;  %v2792_v51 = vld [vmem:[%s3791_s0 + $0x280] ss:$16 sps:$4 sm:$0xff]  }
  0x62   :  { %1393 = vmatmul.mubr.bf16.gmra.mrb[16].mxu0 %v2697_v52  ;;  %1111 = vmatprep.mubr.bf16.mxu1 %v2698_v53  ;;  %v2793_v52 = vld [vmem:[%s3791_s0 + $0x288] ss:$16 sps:$4 sm:$0xff]   ;;  %v2794_v53 = vld [vmem:[%s3791_s0 + $0x2a4] ss:$16 sps:$4 sm:$0xff]  }
  0x63   :  { %1400 = vmatprep.mubr.bf16.mxu0 %v2700_v54  ;;  %v2796_v54 = vld [vmem:[%s3791_s0 + $0x2ac] ss:$16 sps:$4 sm:$0xff]  }
  0x69   :  { %1112 = vmatmul.mubr.bf16.gmra.mrb[20].mxu1 %v2702_v55  ;;  %v2798_v55 = vld [vmem:[%s3791_s0 + $0x2a0] ss:$16 sps:$4 sm:$0xff]  }
  0x6a   :  { %1401 = vmatmul.mubr.bf16.gmra.mrb[20].mxu0 %v2703_v56  ;;  %1119 = vmatprep.mubr.bf16.mxu1 %v2704_v57  ;;  %v2799_v56 = vld [vmem:[%s3791_s0 + $0x2a8] ss:$16 sps:$4 sm:$0xff]   ;;  %v2800_v57 = vld [vmem:[%s3791_s0 + $0x2c4] ss:$16 sps:$4 sm:$0xff]  }
  0x6b   :  { %1408 = vmatprep.mubr.bf16.mxu0 %v2706_v58  ;;  %v2802_v58 = vld [vmem:[%s3791_s0 + $0x2cc] ss:$16 sps:$4 sm:$0xff]  }
  0x71   :  { %1120 = vmatmul.mubr.bf16.gmra.mrb[24].mxu1 %v2708_v59  ;;  %v2804_v59 = vld [vmem:[%s3791_s0 + $0x2c0] ss:$16 sps:$4 sm:$0xff]  }
  0x72   :  { %1409 = vmatmul.mubr.bf16.gmra.mrb[24].mxu0 %v2709_v60  ;;  %1127 = vmatprep.mubr.bf16.mxu1 %v2710_v61  ;;  %v2805_v60 = vld [vmem:[%s3791_s0 + $0x2c8] ss:$16 sps:$4 sm:$0xff]   ;;  %v2806_v61 = vld [vmem:[%s3791_s0 + $0x2e4] ss:$16 sps:$4 sm:$0xff]  }
  0x73   :  { %1416 = vmatprep.mubr.bf16.mxu0 %v2712_v62  ;;  %v2808_v62 = vld [vmem:[%s3791_s0 + $0x2ec] ss:$16 sps:$4 sm:$0xff]  }
  0x79   :  { %1128 = vmatmul.mubr.bf16.gmra.mrb[28].mxu1 %v2714_v63  ;;  %v2810_v63 = vld [vmem:[%s3791_s0 + $0x2e0] ss:$16 sps:$4 sm:$0xff]  }
  0x7a   :  { %1417 = vmatmul.mubr.bf16.gmra.mrb[28].mxu0 %v2715_v0  ;;  %1135 = vmatprep.mubr.bf16.mxu1 %v2716_v1  ;;  %v2811_v0 = vld [vmem:[%s3791_s0 + $0x2e8] ss:$16 sps:$4 sm:$0xff]   ;;  %v2812_v1 = vld [vmem:[%s3791_s0 + $0x304] ss:$16 sps:$4 sm:$0xff]  }
  0x7b   :  { %1424 = vmatprep.mubr.bf16.mxu0 %v2718_v2  ;;  %v2814_v2 = vld [vmem:[%s3791_s0 + $0x30c] ss:$16 sps:$4 sm:$0xff]  }
  0x81   :  { %1136 = vmatmul.mubr.bf16.gmra.mrb[32].mxu1 %v2720_v3  ;;  %v2816_v3 = vld [vmem:[%s3791_s0 + $0x300] ss:$16 sps:$4 sm:$0xff]  }
  0x82   :  { %1425 = vmatmul.mubr.bf16.gmra.mrb[32].mxu0 %v2721_v4  ;;  %1143 = vmatprep.mubr.bf16.mxu1 %v2722_v5  ;;  %v2817_v4 = vld [vmem:[%s3791_s0 + $0x308] ss:$16 sps:$4 sm:$0xff]   ;;  %v2818_v5 = vld [vmem:[%s3791_s0 + $0x324] ss:$16 sps:$4 sm:$0xff]  }
  0x83   :  { %1432 = vmatprep.mubr.bf16.mxu0 %v2724_v6  ;;  %v2820_v6 = vld [vmem:[%s3791_s0 + $0x32c] ss:$16 sps:$4 sm:$0xff]  }
  0x89   :  { %1144 = vmatmul.mubr.bf16.gmra.mrb[36].mxu1 %v2726_v7  ;;  %v2822_v7 = vld [vmem:[%s3791_s0 + $0x320] ss:$16 sps:$4 sm:$0xff]  }
  0x8a   :  { %1433 = vmatmul.mubr.bf16.gmra.mrb[36].mxu0 %v2727_v8  ;;  %1151 = vmatprep.mubr.bf16.mxu1 %v2728_v9  ;;  %v2823_v8 = vld [vmem:[%s3791_s0 + $0x328] ss:$16 sps:$4 sm:$0xff]   ;;  %v2824_v9 = vld [vmem:[%s3791_s0 + $0x344] ss:$16 sps:$4 sm:$0xff]  }
  0x8b   :  { %1440 = vmatprep.mubr.bf16.mxu0 %v2730_v10  ;;  %v2826_v10 = vld [vmem:[%s3791_s0 + $0x34c] ss:$16 sps:$4 sm:$0xff]  }
  0x91   :  { %1152 = vmatmul.mubr.bf16.gmra.mrb[40].mxu1 %v2732_v11  ;;  %v2828_v11 = vld [vmem:[%s3791_s0 + $0x340] ss:$16 sps:$4 sm:$0xff]  }
  0x92   :  { %1441 = vmatmul.mubr.bf16.gmra.mrb[40].mxu0 %v2733_v12  ;;  %1159 = vmatprep.mubr.bf16.mxu1 %v2734_v13  ;;  %v2829_v12 = vld [vmem:[%s3791_s0 + $0x348] ss:$16 sps:$4 sm:$0xff]   ;;  %v2830_v13 = vld [vmem:[%s3791_s0 + $0x364] ss:$16 sps:$4 sm:$0xff]  }
  0x93   :  { %1448 = vmatprep.mubr.bf16.mxu0 %v2736_v14  ;;  %v2832_v14 = vld [vmem:[%s3791_s0 + $0x36c] ss:$16 sps:$4 sm:$0xff]  }
  0x99   :  { %1160 = vmatmul.mubr.bf16.gmra.mrb[44].mxu1 %v2738_v15 }
  0x9a   :  { %1449 = vmatmul.mubr.bf16.gmra.mrb[44].mxu0 %v2739_v16  ;;  %1167 = vmatprep.mubr.bf16.mxu1 %v2740_v17 }
  0x9b   :  { %1456 = vmatprep.mubr.bf16.mxu0 %v2742_v18  ;;  %v2834_v18 = vld [vmem:[%s3791_s0 + $0x360] ss:$16 sps:$4 sm:$0xff]  }
  0xa1   :  { %1168 = vmatmul.mubr.bf16.gmra.mrb[48].mxu1 %v2744_v19 }
  0xa2   :  { %1457 = vmatmul.mubr.bf16.gmra.mrb[48].mxu0 %v2745_v20  ;;  %1175 = vmatprep.mubr.bf16.mxu1 %v2746_v21 }
  0xa3   :  { %1464 = vmatprep.mubr.bf16.mxu0 %v2748_v22  ;;  %v2835_v22 = vld [vmem:[%s3791_s0 + $0x368] ss:$16 sps:$4 sm:$0xff]  }
  0xa9   :  { %1176 = vmatmul.mubr.bf16.gmra.mrb[52].mxu1 %v2750_v23  ;;  %v2836_v23 = vld [vmem:[%s3791_s0 + $0x384] ss:$16 sps:$4 sm:$0xff]  }
  0xaa   :  { %1465 = vmatmul.mubr.bf16.gmra.mrb[52].mxu0 %v2751_v24  ;;  %1183 = vmatprep.mubr.bf16.mxu1 %v2752_v25 }
  0xab   :  { %1472 = vmatprep.mubr.bf16.mxu0 %v2754_v26  ;;  %v2838_v26 = vld [vmem:[%s3791_s0 + $0x38c] ss:$16 sps:$4 sm:$0xff]  }
  0xb1   :  { %1184 = vmatmul.mubr.bf16.gmra.mrb[56].mxu1 %v2756_v27 }
  0xb2   :  { %1473 = vmatmul.mubr.bf16.gmra.mrb[56].mxu0 %v2757_v28  ;;  %1191 = vmatprep.mubr.bf16.mxu1 %v2758_v29 }
  0xb3   :  { %1480 = vmatprep.mubr.bf16.mxu0 %v2760_v30 }
  0xb9   :  { %1192 = vmatmul.mubr.bf16.gmra.mrb[60].mxu1 %v2762_v31 }
  0xba   :  { %1481 = vmatmul.mubr.bf16.gmra.mrb[60].mxu0 %v2763_v32  ;;  %1199 = vmatprep.mubr.bf16.mxu1 %v2764_v33 }
  0xbb   :  { %1488 = vmatprep.mubr.bf16.mxu0 %v2766_v34 }
  0xc1   :  { %1200 = vmatmul.mubr.bf16.gmra.mrb[64].mxu1 %v2768_v35 }
  0xc2   :  { %1489 = vmatmul.mubr.bf16.gmra.mrb[64].mxu0 %v2769_v36  ;;  %1207 = vmatprep.mubr.bf16.mxu1 %v2770_v37 }
  0xc3   :  { %1496 = vmatprep.mubr.bf16.mxu0 %v2772_v38 }
  0xc9   :  { %1208 = vmatmul.mubr.bf16.gmra.mrb[68].mxu1 %v2774_v39 }
  0xca   :  { %1497 = vmatmul.mubr.bf16.gmra.mrb[68].mxu0 %v2775_v40  ;;  %1215 = vmatprep.mubr.bf16.mxu1 %v2776_v41 }
  0xcb   :  { %1504 = vmatprep.mubr.bf16.mxu0 %v2778_v42  ;;  %v2840_v42 = vld [vmem:[%s3791_s0 + $0x380] ss:$16 sps:$4 sm:$0xff]  }
  0xd1   :  { %1216 = vmatmul.mubr.bf16.gmra.mrb[72].mxu1 %v2780_v43 }
  0xd2   :  { %1505 = vmatmul.mubr.bf16.gmra.mrb[72].mxu0 %v2781_v44  ;;  %1223 = vmatprep.mubr.bf16.mxu1 %v2782_v45 }
  0xd3   :  { %1512 = vmatprep.mubr.bf16.mxu0 %v2784_v46  ;;  %v2841_v46 = vld [vmem:[%s3791_s0 + $0x388] ss:$16 sps:$4 sm:$0xff]  }
  0xd9   :  { %1224 = vmatmul.mubr.bf16.gmra.mrb[76].mxu1 %v2786_v47  ;;  %v2842_v47 = vld [vmem:[%s3791_s0 + $0x3a4] ss:$16 sps:$4 sm:$0xff]  }
  0xda   :  { %1513 = vmatmul.mubr.bf16.gmra.mrb[76].mxu0 %v2787_v48  ;;  %1231 = vmatprep.mubr.bf16.mxu1 %v2788_v49 }
  0xdb   :  { %1520 = vmatprep.mubr.bf16.mxu0 %v2790_v50  ;;  %v2844_v50 = vld [vmem:[%s3791_s0 + $0x3ac] ss:$16 sps:$4 sm:$0xff]  }
  0xe1   :  { %1232 = vmatmul.mubr.bf16.gmra.mrb[80].mxu1 %v2792_v51 }
  0xe2   :  { %1521 = vmatmul.mubr.bf16.gmra.mrb[80].mxu0 %v2793_v52  ;;  %1239 = vmatprep.mubr.bf16.mxu1 %v2794_v53 }
  0xe3   :  { %1528 = vmatprep.mubr.bf16.mxu0 %v2796_v54 }
  0xe9   :  { %1240 = vmatmul.mubr.bf16.gmra.mrb[84].mxu1 %v2798_v55 }
  0xea   :  { %1529 = vmatmul.mubr.bf16.gmra.mrb[84].mxu0 %v2799_v56  ;;  %1247 = vmatprep.mubr.bf16.mxu1 %v2800_v57 }
  0xeb   :  { %1536 = vmatprep.mubr.bf16.mxu0 %v2802_v58 }
  0xf1   :  { %1248 = vmatmul.mubr.bf16.gmra.mrb[88].mxu1 %v2804_v59 }
  0xf2   :  { %1537 = vmatmul.mubr.bf16.gmra.mrb[88].mxu0 %v2805_v60  ;;  %1255 = vmatprep.mubr.bf16.mxu1 %v2806_v61 }
  0xf3   :  { %1544 = vmatprep.mubr.bf16.mxu0 %v2808_v62 }
  0xf9   :  { %1256 = vmatmul.mubr.bf16.gmra.mrb[92].mxu1 %v2810_v63 }
  0xfa   :  { %1545 = vmatmul.mubr.bf16.gmra.mrb[92].mxu0 %v2811_v0  ;;  %1263 = vmatprep.mubr.bf16.mxu1 %v2812_v1 }
  0xfb   :  { %1552 = vmatprep.mubr.bf16.mxu0 %v2814_v2 }
 0x101   :  { %1264 = vmatmul.mubr.bf16.gmra.mrb[96].mxu1 %v2816_v3 }
 0x102   :  { %1553 = vmatmul.mubr.bf16.gmra.mrb[96].mxu0 %v2817_v4  ;;  %1271 = vmatprep.mubr.bf16.mxu1 %v2818_v5  ;;  %v2846_v4 = vld [vmem:[%s3791_s0 + $0x3a0] ss:$16 sps:$4 sm:$0xff]  }
 0x103   :  { %1560 = vmatprep.mubr.bf16.mxu0 %v2820_v6 }
 0x109   :  { %1272 = vmatmul.mubr.bf16.gmra.mrb[100].mxu1 %v2822_v7 }
 0x10a   :  { %1561 = vmatmul.mubr.bf16.gmra.mrb[100].mxu0 %v2823_v8  ;;  %1279 = vmatprep.mubr.bf16.mxu1 %v2824_v9  ;;  %v2847_v8 = vld [vmem:[%s3791_s0 + $0x3a8] ss:$16 sps:$4 sm:$0xff]   ;;  %v2848_v9 = vld [vmem:[%s3791_s0 + $0x3c4] ss:$16 sps:$4 sm:$0xff]  }
 0x10b   :  { %1568 = vmatprep.mubr.bf16.mxu0 %v2826_v10 }
 0x111   :  { %1280 = vmatmul.mubr.bf16.gmra.mrb[104].mxu1 %v2828_v11 }
 0x112   :  { %1569 = vmatmul.mubr.bf16.gmra.mrb[104].mxu0 %v2829_v12  ;;  %1287 = vmatprep.mubr.bf16.mxu1 %v2830_v13  ;;  %v2850_v12 = vld [vmem:[%s3791_s0 + $0x3cc] ss:$16 sps:$4 sm:$0xff]  }
 0x113   :  { %1576 = vmatprep.mubr.bf16.mxu0 %v2832_v14 }
 0x114   :  { %v1073_v15 = vpop.f32.mrb[0].mxu1 }
 0x115   :  { %v1362_v16 = vpop.f32.mrb[0].mxu0  ;;  %v1075_v17 = vpop.f32.mrb[1].mxu1 }
 0x116   :  { %v1363_v19 = vadd.f32 %v1362_v16, %v1073_v15  ;;  %v1364_v20 = vpop.f32.mrb[1].mxu0  ;;  %v1076_v21 = vpop.f32.mrb[2].mxu1 }
 0x117   :  { %v1365_v24 = vpop.f32.mrb[2].mxu0  ;;  %v1078_v25 = vpop.f32.mrb[3].mxu1 }
 0x118   :  { %v2507_v27 = vpack.c.bf16 %v1363_v19, %v1363_v19  ;;  %v2072_v28 = vmul.f32 %v1363_v19, %v1363_v19  ;;  %v1366_v29 = vadd.f32 %v1365_v24, %v1076_v21  ;;  %v1367_v30 = vpop.f32.mrb[3].mxu0  ;;  %v1939_v31 = vsel %vm1938_vm1, %v1363_v19, 0.0 }
 0x119   :  { %1288 = vmatmul.mubr.bf16.gmra.mrb[108].mxu1 %v2834_v18  ;;  %v2852_v30 = vld [vmem:[%s3791_s0 + $0x3c0] ss:$16 sps:$4 sm:$0xff]  }
 0x11a   :  { %1874 = vst.msk [vmem:[%s3792_s2] sm:$0xf] %vm1873_vm0, %v2507_v27  ;;  %v2508_v32 = vpack.c.bf16 %v1366_v29, %v1366_v29  ;;  %v1940_v33 = vsel %vm1938_vm1, %v1366_v29, 0.0  ;;  %v2073_v34 = vmul.f32 %v1366_v29, %v1366_v29  ;;  %1577 = vmatmul.mubr.bf16.gmra.mrb[108].mxu0 %v2835_v22  ;;  %1295 = vmatprep.mubr.bf16.mxu1 %v2836_v23  ;;  %v2136_v36 = vsel %vm1938_vm1, %v2072_v28, 0.0 }
 0x11b   :  { %v1941_v35 = vadd.f32 %v1940_v33, %v1939_v31  ;;  %1584 = vmatprep.mubr.bf16.mxu0 %v2838_v26 }
 0x11c   :  { %1875 = vst.msk [vmem:[%s3792_s2 + $0x4] sm:$0xf] %vm1873_vm0, %v2508_v32  ;;  %v2137_v37 = vsel %vm1938_vm1, %v2073_v34, 0.0  ;;  %v1081_v38 = vpop.f32.mrb[4].mxu1  ;;  %v2853_v34 = vld [vmem:[%s3791_s0 + $0x3c8] ss:$16 sps:$4 sm:$0xff]  }
 0x11d   :  { %v2138_v39 = vadd.f32 %v2137_v37, %v2136_v36  ;;  %v1370_v40 = vpop.f32.mrb[4].mxu0  ;;  %v1083_v41 = vpop.f32.mrb[5].mxu1 }
 0x11e   :  { %v1371_v43 = vadd.f32 %v1370_v40, %v1081_v38  ;;  %v1372_v44 = vpop.f32.mrb[5].mxu0  ;;  %v1084_v45 = vpop.f32.mrb[6].mxu1  ;;  %v2856_v38 = vld [vmem:[%s3791_s0 + $0x3ec] ss:$16 sps:$4 sm:$0xff]  }
 0x11f   :  { %v1373_v48 = vpop.f32.mrb[6].mxu0  ;;  %v1086_v49 = vpop.f32.mrb[7].mxu1 }
 0x120   :  { %v2509_v51 = vpack.c.bf16 %v1371_v43, %v1371_v43  ;;  %v1942_v52 = vsel %vm1938_vm1, %v1371_v43, 0.0  ;;  %v2074_v53 = vmul.f32 %v1371_v43, %v1371_v43  ;;  %v1374_v54 = vadd.f32 %v1373_v48, %v1084_v45  ;;  %v1375_v55 = vpop.f32.mrb[7].mxu0 }
 0x121   :  { %v1943_v56 = vadd.f32 %v1942_v52, %v1941_v35  ;;  %1296 = vmatmul.mubr.bf16.gmra.mrb[112].mxu1 %v2840_v42  ;;  %v2854_v35 = vld [vmem:[%s3791_s0 + $0x3e4] ss:$16 sps:$4 sm:$0xff]  }
 0x122   :  { %1876 = vst.msk [vmem:[%s3792_s2 + $0x8] sm:$0xf] %vm1873_vm0, %v2509_v51  ;;  %v2139_v57 = vsel %vm1938_vm1, %v2074_v53, 0.0  ;;  %v2510_v58 = vpack.c.bf16 %v1374_v54, %v1374_v54  ;;  %v1944_v59 = vsel %vm1938_vm1, %v1374_v54, 0.0  ;;  %v2075_v60 = vmul.f32 %v1374_v54, %v1374_v54  ;;  %1585 = vmatmul.mubr.bf16.gmra.mrb[112].mxu0 %v2841_v46  ;;  %1303 = vmatprep.mubr.bf16.mxu1 %v2842_v47 }
 0x123   :  { %v2140_v61 = vadd.f32 %v2139_v57, %v2138_v39  ;;  %v1945_v62 = vadd.f32 %v1944_v59, %v1943_v56  ;;  %1592 = vmatprep.mubr.bf16.mxu0 %v2844_v50  ;;  %v2858_v56 = vld [vmem:[%s3791_s0 + $0x3e0] ss:$16 sps:$4 sm:$0xff]  }
 0x124   :  { %1877 = vst.msk [vmem:[%s3792_s2 + $0xc] sm:$0xf] %vm1873_vm0, %v2510_v58  ;;  %v2141_v63 = vsel %vm1938_vm1, %v2075_v60, 0.0  ;;  %v1089_v0 = vpop.f32.mrb[8].mxu1  ;;  %v2859_v60 = vld [vmem:[%s3791_s0 + $0x3e8] ss:$16 sps:$4 sm:$0xff]  }
 0x125   :  { %v2142_v1 = vadd.f32 %v2141_v63, %v2140_v61  ;;  %v1378_v2 = vpop.f32.mrb[8].mxu0  ;;  %v1091_v3 = vpop.f32.mrb[9].mxu1 }
 0x126   :  { %v1379_v5 = vadd.f32 %v1378_v2, %v1089_v0  ;;  %v1380_v6 = vpop.f32.mrb[9].mxu0  ;;  %v1092_v7 = vpop.f32.mrb[10].mxu1 }
 0x127   :  { %v1381_v10 = vpop.f32.mrb[10].mxu0  ;;  %v1094_v11 = vpop.f32.mrb[11].mxu1 }
 0x128   :  { %v2511_v13 = vpack.c.bf16 %v1379_v5, %v1379_v5  ;;  %v1946_v14 = vsel %vm1938_vm1, %v1379_v5, 0.0  ;;  %v2076_v15 = vmul.f32 %v1379_v5, %v1379_v5  ;;  %v1382_v16 = vadd.f32 %v1381_v10, %v1092_v7  ;;  %v1383_v17 = vpop.f32.mrb[11].mxu0 }
 0x129   :  { %v1947_v18 = vadd.f32 %v1946_v14, %v1945_v62  ;;  %1304 = vmatmul.mubr.bf16.gmra.mrb[116].mxu1 %v2846_v4 }
 0x12a   :  { %1878 = vst.msk [vmem:[%s3792_s2 + $0x10] sm:$0xf] %vm1873_vm0, %v2511_v13  ;;  %v2143_v19 = vsel %vm1938_vm1, %v2076_v15, 0.0  ;;  %v2512_v20 = vpack.c.bf16 %v1382_v16, %v1382_v16  ;;  %v1948_v21 = vsel %vm1938_vm1, %v1382_v16, 0.0  ;;  %v2077_v22 = vmul.f32 %v1382_v16, %v1382_v16  ;;  %1593 = vmatmul.mubr.bf16.gmra.mrb[116].mxu0 %v2847_v8  ;;  %1311 = vmatprep.mubr.bf16.mxu1 %v2848_v9 }
 0x12b   :  { %v2144_v23 = vadd.f32 %v2143_v19, %v2142_v1  ;;  %v1949_v24 = vadd.f32 %v1948_v21, %v1947_v18  ;;  %1600 = vmatprep.mubr.bf16.mxu0 %v2850_v12 }
 0x12c   :  { %1879 = vst.msk [vmem:[%s3792_s2 + $0x14] sm:$0xf] %vm1873_vm0, %v2512_v20  ;;  %v2145_v25 = vsel %vm1938_vm1, %v2077_v22, 0.0  ;;  %v1097_v26 = vpop.f32.mrb[12].mxu1 }
 0x12d   :  { %v2146_v27 = vadd.f32 %v2145_v25, %v2144_v23  ;;  %v1386_v28 = vpop.f32.mrb[12].mxu0  ;;  %v1099_v29 = vpop.f32.mrb[13].mxu1 }
 0x12e   :  { %v1387_v31 = vadd.f32 %v1386_v28, %v1097_v26  ;;  %v1388_v32 = vpop.f32.mrb[13].mxu0  ;;  %v1100_v33 = vpop.f32.mrb[14].mxu1 }
 0x12f   :  { %v1389_v36 = vpop.f32.mrb[14].mxu0  ;;  %v1102_v37 = vpop.f32.mrb[15].mxu1 }
 0x130   :  { %v2513_v39 = vpack.c.bf16 %v1387_v31, %v1387_v31  ;;  %v1950_v40 = vsel %vm1938_vm1, %v1387_v31, 0.0  ;;  %v2078_v41 = vmul.f32 %v1387_v31, %v1387_v31  ;;  %v1390_v42 = vadd.f32 %v1389_v36, %v1100_v33  ;;  %v1391_v43 = vpop.f32.mrb[15].mxu0 }
 0x131   :  { %v1951_v44 = vadd.f32 %v1950_v40, %v1949_v24  ;;  %1312 = vmatmul.mubr.bf16.gmra.mrb[120].mxu1 %v2852_v30 }
 0x132   :  { %1880 = vst.msk [vmem:[%s3792_s2 + $0x18] sm:$0xf] %vm1873_vm0, %v2513_v39  ;;  %v2147_v45 = vsel %vm1938_vm1, %v2078_v41, 0.0  ;;  %v2514_v46 = vpack.c.bf16 %v1390_v42, %v1390_v42  ;;  %v1952_v47 = vsel %vm1938_vm1, %v1390_v42, 0.0  ;;  %v2079_v48 = vmul.f32 %v1390_v42, %v1390_v42  ;;  %1601 = vmatmul.mubr.bf16.gmra.mrb[120].mxu0 %v2853_v34  ;;  %1319 = vmatprep.mubr.bf16.mxu1 %v2854_v35 }
 0x133   :  { %v2148_v49 = vadd.f32 %v2147_v45, %v2146_v27  ;;  %v1953_v50 = vadd.f32 %v1952_v47, %v1951_v44  ;;  %1608 = vmatprep.mubr.bf16.mxu0 %v2856_v38 }
 0x134   :  { %1881 = vst.msk [vmem:[%s3792_s2 + $0x1c] sm:$0xf] %vm1873_vm0, %v2514_v46  ;;  %v2149_v51 = vsel %vm1938_vm1, %v2079_v48, 0.0  ;;  %v1105_v52 = vpop.f32.mrb[16].mxu1 }
 0x135   :  { %v2150_v53 = vadd.f32 %v2149_v51, %v2148_v49  ;;  %v1394_v54 = vpop.f32.mrb[16].mxu0  ;;  %v1107_v55 = vpop.f32.mrb[17].mxu1 }
 0x136   :  { %v1395_v57 = vadd.f32 %v1394_v54, %v1105_v52  ;;  %v1396_v58 = vpop.f32.mrb[17].mxu0  ;;  %v1108_v59 = vpop.f32.mrb[18].mxu1 }
 0x137   :  { %v1397_v61 = vpop.f32.mrb[18].mxu0  ;;  %v1110_v62 = vpop.f32.mrb[19].mxu1 }
 0x138   :  { %v2515_v63 = vpack.c.bf16 %v1395_v57, %v1395_v57  ;;  %v1954_v0 = vsel %vm1938_vm1, %v1395_v57, 0.0  ;;  %v2080_v1 = vmul.f32 %v1395_v57, %v1395_v57  ;;  %v1398_v2 = vadd.f32 %v1397_v61, %v1108_v59  ;;  %v1399_v3 = vpop.f32.mrb[19].mxu0 }
 0x139   :  { %v1955_v4 = vadd.f32 %v1954_v0, %v1953_v50  ;;  %1320 = vmatmul.mubr.bf16.gmra.mrb[124].mxu1 %v2858_v56 }
 0x13a   :  { %1882 = vst.msk [vmem:[%s3792_s2 + $0x20] sm:$0xf] %vm1873_vm0, %v2515_v63  ;;  %v2151_v5 = vsel %vm1938_vm1, %v2080_v1, 0.0  ;;  %v2516_v6 = vpack.c.bf16 %v1398_v2, %v1398_v2  ;;  %v1956_v7 = vsel %vm1938_vm1, %v1398_v2, 0.0  ;;  %v2081_v8 = vmul.f32 %v1398_v2, %v1398_v2  ;;  %1609 = vmatmul.mubr.bf16.gmra.mrb[124].mxu0 %v2859_v60 }
 0x13b   :  { %v2152_v9 = vadd.f32 %v2151_v5, %v2150_v53  ;;  %v1957_v10 = vadd.f32 %v1956_v7, %v1955_v4 }
 0x13c   :  { %1883 = vst.msk [vmem:[%s3792_s2 + $0x24] sm:$0xf] %vm1873_vm0, %v2516_v6  ;;  %v2153_v11 = vsel %vm1938_vm1, %v2081_v8, 0.0  ;;  %v1113_v12 = vpop.f32.mrb[20].mxu1 }
 0x13d   :  { %v2154_v13 = vadd.f32 %v2153_v11, %v2152_v9  ;;  %v1402_v14 = vpop.f32.mrb[20].mxu0  ;;  %v1115_v15 = vpop.f32.mrb[21].mxu1 }
 0x13e   :  { %v1403_v16 = vadd.f32 %v1402_v14, %v1113_v12  ;;  %v1404_v17 = vpop.f32.mrb[21].mxu0  ;;  %v1116_v18 = vpop.f32.mrb[22].mxu1 }
 0x13f   :  { %v1405_v19 = vpop.f32.mrb[22].mxu0  ;;  %v1118_v20 = vpop.f32.mrb[23].mxu1 }
 0x140   :  { %v2517_v21 = vpack.c.bf16 %v1403_v16, %v1403_v16  ;;  %v1958_v22 = vsel %vm1938_vm1, %v1403_v16, 0.0  ;;  %v2082_v23 = vmul.f32 %v1403_v16, %v1403_v16  ;;  %v1406_v24 = vadd.f32 %v1405_v19, %v1116_v18  ;;  %v1407_v25 = vpop.f32.mrb[23].mxu0 }
 0x141   :  { %v1959_v26 = vadd.f32 %v1958_v22, %v1957_v10 }
 0x142   :  { %1884 = vst.msk [vmem:[%s3792_s2 + $0x28] sm:$0xf] %vm1873_vm0, %v2517_v21  ;;  %v2155_v27 = vsel %vm1938_vm1, %v2082_v23, 0.0  ;;  %v2518_v28 = vpack.c.bf16 %v1406_v24, %v1406_v24  ;;  %v1960_v29 = vsel %vm1938_vm1, %v1406_v24, 0.0  ;;  %v2083_v30 = vmul.f32 %v1406_v24, %v1406_v24 }
 0x143   :  { %v2156_v31 = vadd.f32 %v2155_v27, %v2154_v13  ;;  %v1961_v32 = vadd.f32 %v1960_v29, %v1959_v26 }
 0x144   :  { %1885 = vst.msk [vmem:[%s3792_s2 + $0x2c] sm:$0xf] %vm1873_vm0, %v2518_v28  ;;  %v2157_v33 = vsel %vm1938_vm1, %v2083_v30, 0.0  ;;  %v1121_v34 = vpop.f32.mrb[24].mxu1 }
 0x145   :  { %v2158_v35 = vadd.f32 %v2157_v33, %v2156_v31  ;;  %v1410_v36 = vpop.f32.mrb[24].mxu0  ;;  %v1123_v37 = vpop.f32.mrb[25].mxu1 }
 0x146   :  { %v1411_v38 = vadd.f32 %v1410_v36, %v1121_v34  ;;  %v1412_v39 = vpop.f32.mrb[25].mxu0  ;;  %v1124_v40 = vpop.f32.mrb[26].mxu1 }
 0x147   :  { %v1413_v41 = vpop.f32.mrb[26].mxu0  ;;  %v1126_v42 = vpop.f32.mrb[27].mxu1 }
 0x148   :  { %v2519_v43 = vpack.c.bf16 %v1411_v38, %v1411_v38  ;;  %v1962_v44 = vsel %vm1938_vm1, %v1411_v38, 0.0  ;;  %v2084_v45 = vmul.f32 %v1411_v38, %v1411_v38  ;;  %v1414_v46 = vadd.f32 %v1413_v41, %v1124_v40  ;;  %v1415_v47 = vpop.f32.mrb[27].mxu0 }
 0x149   :  { %v1963_v48 = vadd.f32 %v1962_v44, %v1961_v32 }
 0x14a   :  { %1886 = vst.msk [vmem:[%s3792_s2 + $0x30] sm:$0xf] %vm1873_vm0, %v2519_v43  ;;  %v2159_v49 = vsel %vm1938_vm1, %v2084_v45, 0.0  ;;  %v2520_v50 = vpack.c.bf16 %v1414_v46, %v1414_v46  ;;  %v1964_v51 = vsel %vm1938_vm1, %v1414_v46, 0.0  ;;  %v2085_v52 = vmul.f32 %v1414_v46, %v1414_v46 }
 0x14b   :  { %v2160_v53 = vadd.f32 %v2159_v49, %v2158_v35  ;;  %v1965_v54 = vadd.f32 %v1964_v51, %v1963_v48 }
 0x14c   :  { %1887 = vst.msk [vmem:[%s3792_s2 + $0x34] sm:$0xf] %vm1873_vm0, %v2520_v50  ;;  %v2161_v55 = vsel %vm1938_vm1, %v2085_v52, 0.0  ;;  %v1129_v56 = vpop.f32.mrb[28].mxu1 }
 0x14d   :  { %v2162_v57 = vadd.f32 %v2161_v55, %v2160_v53  ;;  %v1418_v58 = vpop.f32.mrb[28].mxu0  ;;  %v1131_v59 = vpop.f32.mrb[29].mxu1 }
 0x14e   :  { %v1419_v60 = vadd.f32 %v1418_v58, %v1129_v56  ;;  %v1420_v61 = vpop.f32.mrb[29].mxu0  ;;  %v1132_v62 = vpop.f32.mrb[30].mxu1 }
 0x14f   :  { %v1421_v63 = vpop.f32.mrb[30].mxu0  ;;  %v1134_v0 = vpop.f32.mrb[31].mxu1 }
 0x150   :  { %v2521_v1 = vpack.c.bf16 %v1419_v60, %v1419_v60  ;;  %v1966_v2 = vsel %vm1938_vm1, %v1419_v60, 0.0  ;;  %v2086_v3 = vmul.f32 %v1419_v60, %v1419_v60  ;;  %v1422_v4 = vadd.f32 %v1421_v63, %v1132_v62  ;;  %v1423_v5 = vpop.f32.mrb[31].mxu0 }
 0x151   :  { %v1967_v6 = vadd.f32 %v1966_v2, %v1965_v54 }
 0x152   :  { %1888 = vst.msk [vmem:[%s3792_s2 + $0x38] sm:$0xf] %vm1873_vm0, %v2521_v1  ;;  %v2163_v7 = vsel %vm1938_vm1, %v2086_v3, 0.0  ;;  %v2522_v8 = vpack.c.bf16 %v1422_v4, %v1422_v4  ;;  %v1968_v9 = vsel %vm1938_vm1, %v1422_v4, 0.0  ;;  %v2087_v10 = vmul.f32 %v1422_v4, %v1422_v4 }
 0x153   :  { %v2164_v11 = vadd.f32 %v2163_v7, %v2162_v57  ;;  %v1969_v12 = vadd.f32 %v1968_v9, %v1967_v6 }
 0x154   :  { %1889 = vst.msk [vmem:[%s3792_s2 + $0x3c] sm:$0xf] %vm1873_vm0, %v2522_v8  ;;  %v2165_v13 = vsel %vm1938_vm1, %v2087_v10, 0.0  ;;  %v1137_v14 = vpop.f32.mrb[32].mxu1 }
 0x155   :  { %v2166_v15 = vadd.f32 %v2165_v13, %v2164_v11  ;;  %v1426_v16 = vpop.f32.mrb[32].mxu0  ;;  %v1139_v17 = vpop.f32.mrb[33].mxu1 }
 0x156   :  { %v1427_v18 = vadd.f32 %v1426_v16, %v1137_v14  ;;  %v1428_v19 = vpop.f32.mrb[33].mxu0  ;;  %v1140_v20 = vpop.f32.mrb[34].mxu1 }
 0x157   :  { %v1429_v21 = vpop.f32.mrb[34].mxu0  ;;  %v1142_v22 = vpop.f32.mrb[35].mxu1 }
 0x158   :  { %v2523_v23 = vpack.c.bf16 %v1427_v18, %v1427_v18  ;;  %v1970_v24 = vsel %vm1938_vm1, %v1427_v18, 0.0  ;;  %v2088_v25 = vmul.f32 %v1427_v18, %v1427_v18  ;;  %v1430_v26 = vadd.f32 %v1429_v21, %v1140_v20  ;;  %v1431_v27 = vpop.f32.mrb[35].mxu0 }
 0x159   :  { %v1971_v28 = vadd.f32 %v1970_v24, %v1969_v12 }
 0x15a   :  { %1890 = vst.msk [vmem:[%s3792_s2 + $0x40] sm:$0xf] %vm1873_vm0, %v2523_v23  ;;  %v2167_v29 = vsel %vm1938_vm1, %v2088_v25, 0.0  ;;  %v2524_v30 = vpack.c.bf16 %v1430_v26, %v1430_v26  ;;  %v1972_v31 = vsel %vm1938_vm1, %v1430_v26, 0.0  ;;  %v2089_v32 = vmul.f32 %v1430_v26, %v1430_v26 }
 0x15b   :  { %v2168_v33 = vadd.f32 %v2167_v29, %v2166_v15  ;;  %v1973_v34 = vadd.f32 %v1972_v31, %v1971_v28 }
 0x15c   :  { %1891 = vst.msk [vmem:[%s3792_s2 + $0x44] sm:$0xf] %vm1873_vm0, %v2524_v30  ;;  %v2169_v35 = vsel %vm1938_vm1, %v2089_v32, 0.0  ;;  %v1145_v36 = vpop.f32.mrb[36].mxu1 }
 0x15d   :  { %v2170_v37 = vadd.f32 %v2169_v35, %v2168_v33  ;;  %v1434_v38 = vpop.f32.mrb[36].mxu0  ;;  %v1147_v39 = vpop.f32.mrb[37].mxu1 }
 0x15e   :  { %v1435_v40 = vadd.f32 %v1434_v38, %v1145_v36  ;;  %v1436_v41 = vpop.f32.mrb[37].mxu0  ;;  %v1148_v42 = vpop.f32.mrb[38].mxu1 }
 0x15f   :  { %v1437_v43 = vpop.f32.mrb[38].mxu0  ;;  %v1150_v44 = vpop.f32.mrb[39].mxu1 }
 0x160   :  { %v2525_v45 = vpack.c.bf16 %v1435_v40, %v1435_v40  ;;  %v1974_v46 = vsel %vm1938_vm1, %v1435_v40, 0.0  ;;  %v2090_v47 = vmul.f32 %v1435_v40, %v1435_v40  ;;  %v1438_v48 = vadd.f32 %v1437_v43, %v1148_v42  ;;  %v1439_v49 = vpop.f32.mrb[39].mxu0 }
 0x161   :  { %v1975_v50 = vadd.f32 %v1974_v46, %v1973_v34 }
 0x162   :  { %1892 = vst.msk [vmem:[%s3792_s2 + $0x48] sm:$0xf] %vm1873_vm0, %v2525_v45  ;;  %v2171_v51 = vsel %vm1938_vm1, %v2090_v47, 0.0  ;;  %v2526_v52 = vpack.c.bf16 %v1438_v48, %v1438_v48  ;;  %v1976_v53 = vsel %vm1938_vm1, %v1438_v48, 0.0  ;;  %v2091_v54 = vmul.f32 %v1438_v48, %v1438_v48 }
 0x163   :  { %v2172_v55 = vadd.f32 %v2171_v51, %v2170_v37  ;;  %v1977_v56 = vadd.f32 %v1976_v53, %v1975_v50 }
 0x164   :  { %1893 = vst.msk [vmem:[%s3792_s2 + $0x4c] sm:$0xf] %vm1873_vm0, %v2526_v52  ;;  %v2173_v57 = vsel %vm1938_vm1, %v2091_v54, 0.0  ;;  %v1153_v58 = vpop.f32.mrb[40].mxu1 }
 0x165   :  { %v2174_v59 = vadd.f32 %v2173_v57, %v2172_v55  ;;  %v1442_v60 = vpop.f32.mrb[40].mxu0  ;;  %v1155_v61 = vpop.f32.mrb[41].mxu1 }
 0x166   :  { %v1443_v62 = vadd.f32 %v1442_v60, %v1153_v58  ;;  %v1444_v63 = vpop.f32.mrb[41].mxu0  ;;  %v1156_v0 = vpop.f32.mrb[42].mxu1 }
 0x167   :  { %v1445_v1 = vpop.f32.mrb[42].mxu0  ;;  %v1158_v2 = vpop.f32.mrb[43].mxu1 }
 0x168   :  { %v2527_v3 = vpack.c.bf16 %v1443_v62, %v1443_v62  ;;  %v1978_v4 = vsel %vm1938_vm1, %v1443_v62, 0.0  ;;  %v2092_v5 = vmul.f32 %v1443_v62, %v1443_v62  ;;  %v1446_v6 = vadd.f32 %v1445_v1, %v1156_v0  ;;  %v1447_v7 = vpop.f32.mrb[43].mxu0 }
 0x169   :  { %v1979_v8 = vadd.f32 %v1978_v4, %v1977_v56 }
 0x16a   :  { %1894 = vst.msk [vmem:[%s3792_s2 + $0x50] sm:$0xf] %vm1873_vm0, %v2527_v3  ;;  %v2175_v9 = vsel %vm1938_vm1, %v2092_v5, 0.0  ;;  %v2528_v10 = vpack.c.bf16 %v1446_v6, %v1446_v6  ;;  %v1980_v11 = vsel %vm1938_vm1, %v1446_v6, 0.0  ;;  %v2093_v12 = vmul.f32 %v1446_v6, %v1446_v6 }
 0x16b   :  { %v2176_v13 = vadd.f32 %v2175_v9, %v2174_v59  ;;  %v1981_v14 = vadd.f32 %v1980_v11, %v1979_v8 }
 0x16c   :  { %1895 = vst.msk [vmem:[%s3792_s2 + $0x54] sm:$0xf] %vm1873_vm0, %v2528_v10  ;;  %v2177_v15 = vsel %vm1938_vm1, %v2093_v12, 0.0  ;;  %v1161_v16 = vpop.f32.mrb[44].mxu1 }
 0x16d   :  { %v2178_v17 = vadd.f32 %v2177_v15, %v2176_v13  ;;  %v1450_v18 = vpop.f32.mrb[44].mxu0  ;;  %v1163_v19 = vpop.f32.mrb[45].mxu1 }
 0x16e   :  { %v1451_v20 = vadd.f32 %v1450_v18, %v1161_v16  ;;  %v1452_v21 = vpop.f32.mrb[45].mxu0  ;;  %v1164_v22 = vpop.f32.mrb[46].mxu1 }
 0x16f   :  { %v1453_v23 = vpop.f32.mrb[46].mxu0  ;;  %v1166_v24 = vpop.f32.mrb[47].mxu1 }
 0x170   :  { %v2529_v25 = vpack.c.bf16 %v1451_v20, %v1451_v20  ;;  %v1982_v26 = vsel %vm1938_vm1, %v1451_v20, 0.0  ;;  %v2094_v27 = vmul.f32 %v1451_v20, %v1451_v20  ;;  %v1454_v28 = vadd.f32 %v1453_v23, %v1164_v22  ;;  %v1455_v29 = vpop.f32.mrb[47].mxu0 }
 0x171   :  { %v1983_v30 = vadd.f32 %v1982_v26, %v1981_v14 }
 0x172   :  { %1896 = vst.msk [vmem:[%s3792_s2 + $0x58] sm:$0xf] %vm1873_vm0, %v2529_v25  ;;  %v2179_v31 = vsel %vm1938_vm1, %v2094_v27, 0.0  ;;  %v2530_v32 = vpack.c.bf16 %v1454_v28, %v1454_v28  ;;  %v1984_v33 = vsel %vm1938_vm1, %v1454_v28, 0.0  ;;  %v2095_v34 = vmul.f32 %v1454_v28, %v1454_v28 }
 0x173   :  { %v2180_v35 = vadd.f32 %v2179_v31, %v2178_v17  ;;  %v1985_v36 = vadd.f32 %v1984_v33, %v1983_v30 }
 0x174   :  { %1897 = vst.msk [vmem:[%s3792_s2 + $0x5c] sm:$0xf] %vm1873_vm0, %v2530_v32  ;;  %v2181_v37 = vsel %vm1938_vm1, %v2095_v34, 0.0  ;;  %v1169_v38 = vpop.f32.mrb[48].mxu1 }
 0x175   :  { %v2182_v39 = vadd.f32 %v2181_v37, %v2180_v35  ;;  %v1458_v40 = vpop.f32.mrb[48].mxu0  ;;  %v1171_v41 = vpop.f32.mrb[49].mxu1 }
 0x176   :  { %v1459_v42 = vadd.f32 %v1458_v40, %v1169_v38  ;;  %v1460_v43 = vpop.f32.mrb[49].mxu0  ;;  %v1172_v44 = vpop.f32.mrb[50].mxu1 }
 0x177   :  { %v1461_v45 = vpop.f32.mrb[50].mxu0  ;;  %v1174_v46 = vpop.f32.mrb[51].mxu1 }
 0x178   :  { %v2531_v47 = vpack.c.bf16 %v1459_v42, %v1459_v42  ;;  %v1986_v48 = vsel %vm1938_vm1, %v1459_v42, 0.0  ;;  %v2096_v49 = vmul.f32 %v1459_v42, %v1459_v42  ;;  %v1462_v50 = vadd.f32 %v1461_v45, %v1172_v44  ;;  %v1463_v51 = vpop.f32.mrb[51].mxu0 }
 0x179   :  { %v1987_v52 = vadd.f32 %v1986_v48, %v1985_v36 }
 0x17a   :  { %1898 = vst.msk [vmem:[%s3792_s2 + $0x60] sm:$0xf] %vm1873_vm0, %v2531_v47  ;;  %v2183_v53 = vsel %vm1938_vm1, %v2096_v49, 0.0  ;;  %v2532_v54 = vpack.c.bf16 %v1462_v50, %v1462_v50  ;;  %v1988_v55 = vsel %vm1938_vm1, %v1462_v50, 0.0  ;;  %v2097_v56 = vmul.f32 %v1462_v50, %v1462_v50 }
 0x17b   :  { %v2184_v57 = vadd.f32 %v2183_v53, %v2182_v39  ;;  %v1989_v58 = vadd.f32 %v1988_v55, %v1987_v52 }
 0x17c   :  { %1899 = vst.msk [vmem:[%s3792_s2 + $0x64] sm:$0xf] %vm1873_vm0, %v2532_v54  ;;  %v2185_v59 = vsel %vm1938_vm1, %v2097_v56, 0.0  ;;  %v1177_v60 = vpop.f32.mrb[52].mxu1 }
 0x17d   :  { %v2186_v61 = vadd.f32 %v2185_v59, %v2184_v57  ;;  %v1466_v62 = vpop.f32.mrb[52].mxu0  ;;  %v1179_v63 = vpop.f32.mrb[53].mxu1 }
 0x17e   :  { %v1467_v0 = vadd.f32 %v1466_v62, %v1177_v60  ;;  %v1468_v1 = vpop.f32.mrb[53].mxu0  ;;  %v1180_v2 = vpop.f32.mrb[54].mxu1 }
 0x17f   :  { %v1469_v3 = vpop.f32.mrb[54].mxu0  ;;  %v1182_v4 = vpop.f32.mrb[55].mxu1 }
 0x180   :  { %v2533_v5 = vpack.c.bf16 %v1467_v0, %v1467_v0  ;;  %v1990_v6 = vsel %vm1938_vm1, %v1467_v0, 0.0  ;;  %v2098_v7 = vmul.f32 %v1467_v0, %v1467_v0  ;;  %v1470_v8 = vadd.f32 %v1469_v3, %v1180_v2  ;;  %v1471_v9 = vpop.f32.mrb[55].mxu0 }
 0x181   :  { %v1991_v10 = vadd.f32 %v1990_v6, %v1989_v58 }
 0x182   :  { %1900 = vst.msk [vmem:[%s3792_s2 + $0x68] sm:$0xf] %vm1873_vm0, %v2533_v5  ;;  %v2187_v11 = vsel %vm1938_vm1, %v2098_v7, 0.0  ;;  %v2534_v12 = vpack.c.bf16 %v1470_v8, %v1470_v8  ;;  %v1992_v13 = vsel %vm1938_vm1, %v1470_v8, 0.0  ;;  %v2099_v14 = vmul.f32 %v1470_v8, %v1470_v8 }
 0x183   :  { %v2188_v15 = vadd.f32 %v2187_v11, %v2186_v61  ;;  %v1993_v16 = vadd.f32 %v1992_v13, %v1991_v10 }
 0x184   :  { %1901 = vst.msk [vmem:[%s3792_s2 + $0x6c] sm:$0xf] %vm1873_vm0, %v2534_v12  ;;  %v2189_v17 = vsel %vm1938_vm1, %v2099_v14, 0.0  ;;  %v1185_v18 = vpop.f32.mrb[56].mxu1 }
 0x185   :  { %v2190_v19 = vadd.f32 %v2189_v17, %v2188_v15  ;;  %v1474_v20 = vpop.f32.mrb[56].mxu0  ;;  %v1187_v21 = vpop.f32.mrb[57].mxu1 }
 0x186   :  { %v1475_v22 = vadd.f32 %v1474_v20, %v1185_v18  ;;  %v1476_v23 = vpop.f32.mrb[57].mxu0  ;;  %v1188_v24 = vpop.f32.mrb[58].mxu1 }
 0x187   :  { %v1477_v25 = vpop.f32.mrb[58].mxu0  ;;  %v1190_v26 = vpop.f32.mrb[59].mxu1 }
 0x188   :  { %v2535_v27 = vpack.c.bf16 %v1475_v22, %v1475_v22  ;;  %v1994_v28 = vsel %vm1938_vm1, %v1475_v22, 0.0  ;;  %v2100_v29 = vmul.f32 %v1475_v22, %v1475_v22  ;;  %v1478_v30 = vadd.f32 %v1477_v25, %v1188_v24  ;;  %v1479_v31 = vpop.f32.mrb[59].mxu0 }
 0x189   :  { %v1995_v32 = vadd.f32 %v1994_v28, %v1993_v16 }
 0x18a   :  { %1902 = vst.msk [vmem:[%s3792_s2 + $0x70] sm:$0xf] %vm1873_vm0, %v2535_v27  ;;  %v2191_v33 = vsel %vm1938_vm1, %v2100_v29, 0.0  ;;  %v2536_v34 = vpack.c.bf16 %v1478_v30, %v1478_v30  ;;  %v1996_v35 = vsel %vm1938_vm1, %v1478_v30, 0.0  ;;  %v2101_v36 = vmul.f32 %v1478_v30, %v1478_v30 }
 0x18b   :  { %v2192_v37 = vadd.f32 %v2191_v33, %v2190_v19  ;;  %v1997_v38 = vadd.f32 %v1996_v35, %v1995_v32 }
 0x18c   :  { %1903 = vst.msk [vmem:[%s3792_s2 + $0x74] sm:$0xf] %vm1873_vm0, %v2536_v34  ;;  %v2193_v39 = vsel %vm1938_vm1, %v2101_v36, 0.0  ;;  %v1193_v40 = vpop.f32.mrb[60].mxu1 }
 0x18d   :  { %v2194_v41 = vadd.f32 %v2193_v39, %v2192_v37  ;;  %v1482_v42 = vpop.f32.mrb[60].mxu0  ;;  %v1195_v43 = vpop.f32.mrb[61].mxu1 }
 0x18e   :  { %v1483_v44 = vadd.f32 %v1482_v42, %v1193_v40  ;;  %v1484_v45 = vpop.f32.mrb[61].mxu0  ;;  %v1196_v46 = vpop.f32.mrb[62].mxu1 }
 0x18f   :  { %v1485_v47 = vpop.f32.mrb[62].mxu0  ;;  %v1198_v48 = vpop.f32.mrb[63].mxu1 }
 0x190   :  { %v2537_v49 = vpack.c.bf16 %v1483_v44, %v1483_v44  ;;  %v1998_v50 = vsel %vm1938_vm1, %v1483_v44, 0.0  ;;  %v2102_v51 = vmul.f32 %v1483_v44, %v1483_v44  ;;  %v1486_v52 = vadd.f32 %v1485_v47, %v1196_v46  ;;  %v1487_v53 = vpop.f32.mrb[63].mxu0 }
 0x191   :  { %v1999_v54 = vadd.f32 %v1998_v50, %v1997_v38 }
 0x192   :  { %1904 = vst.msk [vmem:[%s3792_s2 + $0x78] sm:$0xf] %vm1873_vm0, %v2537_v49  ;;  %v2195_v55 = vsel %vm1938_vm1, %v2102_v51, 0.0  ;;  %v2538_v56 = vpack.c.bf16 %v1486_v52, %v1486_v52  ;;  %v2000_v57 = vsel %vm1938_vm1, %v1486_v52, 0.0  ;;  %v2103_v58 = vmul.f32 %v1486_v52, %v1486_v52 }
 0x193   :  { %v2196_v59 = vadd.f32 %v2195_v55, %v2194_v41  ;;  %v2001_v60 = vadd.f32 %v2000_v57, %v1999_v54 }
 0x194   :  { %1905 = vst.msk [vmem:[%s3792_s2 + $0x7c] sm:$0xf] %vm1873_vm0, %v2538_v56  ;;  %v2197_v61 = vsel %vm1938_vm1, %v2103_v58, 0.0  ;;  %v1201_v62 = vpop.f32.mrb[64].mxu1 }
 0x195   :  { %v2198_v63 = vadd.f32 %v2197_v61, %v2196_v59  ;;  %v1490_v0 = vpop.f32.mrb[64].mxu0  ;;  %v1203_v1 = vpop.f32.mrb[65].mxu1 }
 0x196   :  { %v1491_v2 = vadd.f32 %v1490_v0, %v1201_v62  ;;  %v1492_v3 = vpop.f32.mrb[65].mxu0  ;;  %v1204_v4 = vpop.f32.mrb[66].mxu1 }
 0x197   :  { %v1493_v5 = vpop.f32.mrb[66].mxu0  ;;  %v1206_v6 = vpop.f32.mrb[67].mxu1 }
 0x198   :  { %v2539_v7 = vpack.c.bf16 %v1491_v2, %v1491_v2  ;;  %v2002_v8 = vsel %vm1938_vm1, %v1491_v2, 0.0  ;;  %v2104_v9 = vmul.f32 %v1491_v2, %v1491_v2  ;;  %v1494_v10 = vadd.f32 %v1493_v5, %v1204_v4  ;;  %v1495_v11 = vpop.f32.mrb[67].mxu0 }
 0x199   :  { %v2003_v12 = vadd.f32 %v2002_v8, %v2001_v60 }
 0x19a   :  { %1906 = vst.msk [vmem:[%s3792_s2 + $0x80] sm:$0xf] %vm1873_vm0, %v2539_v7  ;;  %v2199_v13 = vsel %vm1938_vm1, %v2104_v9, 0.0  ;;  %v2540_v14 = vpack.c.bf16 %v1494_v10, %v1494_v10  ;;  %v2004_v15 = vsel %vm1938_vm1, %v1494_v10, 0.0  ;;  %v2105_v16 = vmul.f32 %v1494_v10, %v1494_v10 }
 0x19b   :  { %v2200_v17 = vadd.f32 %v2199_v13, %v2198_v63  ;;  %v2005_v18 = vadd.f32 %v2004_v15, %v2003_v12 }
 0x19c   :  { %1907 = vst.msk [vmem:[%s3792_s2 + $0x84] sm:$0xf] %vm1873_vm0, %v2540_v14  ;;  %v2201_v19 = vsel %vm1938_vm1, %v2105_v16, 0.0  ;;  %v1209_v20 = vpop.f32.mrb[68].mxu1 }
 0x19d   :  { %v2202_v21 = vadd.f32 %v2201_v19, %v2200_v17  ;;  %v1498_v22 = vpop.f32.mrb[68].mxu0  ;;  %v1211_v23 = vpop.f32.mrb[69].mxu1 }
 0x19e   :  { %v1499_v24 = vadd.f32 %v1498_v22, %v1209_v20  ;;  %v1500_v25 = vpop.f32.mrb[69].mxu0  ;;  %v1212_v26 = vpop.f32.mrb[70].mxu1 }
 0x19f   :  { %v1501_v27 = vpop.f32.mrb[70].mxu0  ;;  %v1214_v28 = vpop.f32.mrb[71].mxu1 }
 0x1a0   :  { %v2541_v29 = vpack.c.bf16 %v1499_v24, %v1499_v24  ;;  %v2006_v30 = vsel %vm1938_vm1, %v1499_v24, 0.0  ;;  %v2106_v31 = vmul.f32 %v1499_v24, %v1499_v24  ;;  %v1502_v32 = vadd.f32 %v1501_v27, %v1212_v26  ;;  %v1503_v33 = vpop.f32.mrb[71].mxu0 }
 0x1a1   :  { %v2007_v34 = vadd.f32 %v2006_v30, %v2005_v18 }
 0x1a2   :  { %1908 = vst.msk [vmem:[%s3792_s2 + $0x88] sm:$0xf] %vm1873_vm0, %v2541_v29  ;;  %v2203_v35 = vsel %vm1938_vm1, %v2106_v31, 0.0  ;;  %v2542_v36 = vpack.c.bf16 %v1502_v32, %v1502_v32  ;;  %v2008_v37 = vsel %vm1938_vm1, %v1502_v32, 0.0  ;;  %v2107_v38 = vmul.f32 %v1502_v32, %v1502_v32 }
 0x1a3   :  { %v2204_v39 = vadd.f32 %v2203_v35, %v2202_v21  ;;  %v2009_v40 = vadd.f32 %v2008_v37, %v2007_v34 }
 0x1a4   :  { %1909 = vst.msk [vmem:[%s3792_s2 + $0x8c] sm:$0xf] %vm1873_vm0, %v2542_v36  ;;  %v2205_v41 = vsel %vm1938_vm1, %v2107_v38, 0.0  ;;  %v1217_v42 = vpop.f32.mrb[72].mxu1 }
 0x1a5   :  { %v2206_v43 = vadd.f32 %v2205_v41, %v2204_v39  ;;  %v1506_v44 = vpop.f32.mrb[72].mxu0  ;;  %v1219_v45 = vpop.f32.mrb[73].mxu1 }
 0x1a6   :  { %v1507_v46 = vadd.f32 %v1506_v44, %v1217_v42  ;;  %v1508_v47 = vpop.f32.mrb[73].mxu0  ;;  %v1220_v48 = vpop.f32.mrb[74].mxu1 }
 0x1a7   :  { %v1509_v49 = vpop.f32.mrb[74].mxu0  ;;  %v1222_v50 = vpop.f32.mrb[75].mxu1 }
 0x1a8   :  { %v2543_v51 = vpack.c.bf16 %v1507_v46, %v1507_v46  ;;  %v2010_v52 = vsel %vm1938_vm1, %v1507_v46, 0.0  ;;  %v2108_v53 = vmul.f32 %v1507_v46, %v1507_v46  ;;  %v1510_v54 = vadd.f32 %v1509_v49, %v1220_v48  ;;  %v1511_v55 = vpop.f32.mrb[75].mxu0 }
 0x1a9   :  { %v2011_v56 = vadd.f32 %v2010_v52, %v2009_v40 }
 0x1aa   :  { %1910 = vst.msk [vmem:[%s3792_s2 + $0x90] sm:$0xf] %vm1873_vm0, %v2543_v51  ;;  %v2207_v57 = vsel %vm1938_vm1, %v2108_v53, 0.0  ;;  %v2544_v58 = vpack.c.bf16 %v1510_v54, %v1510_v54  ;;  %v2012_v59 = vsel %vm1938_vm1, %v1510_v54, 0.0  ;;  %v2109_v60 = vmul.f32 %v1510_v54, %v1510_v54 }
 0x1ab   :  { %v2208_v61 = vadd.f32 %v2207_v57, %v2206_v43  ;;  %v2013_v62 = vadd.f32 %v2012_v59, %v2011_v56 }
 0x1ac   :  { %1911 = vst.msk [vmem:[%s3792_s2 + $0x94] sm:$0xf] %vm1873_vm0, %v2544_v58  ;;  %v2209_v63 = vsel %vm1938_vm1, %v2109_v60, 0.0  ;;  %v1225_v0 = vpop.f32.mrb[76].mxu1 }
 0x1ad   :  { %v2210_v1 = vadd.f32 %v2209_v63, %v2208_v61  ;;  %v1514_v2 = vpop.f32.mrb[76].mxu0  ;;  %v1227_v3 = vpop.f32.mrb[77].mxu1 }
 0x1ae   :  { %v1515_v4 = vadd.f32 %v1514_v2, %v1225_v0  ;;  %v1516_v5 = vpop.f32.mrb[77].mxu0  ;;  %v1228_v6 = vpop.f32.mrb[78].mxu1 }
 0x1af   :  { %v1517_v7 = vpop.f32.mrb[78].mxu0  ;;  %v1230_v8 = vpop.f32.mrb[79].mxu1 }
 0x1b0   :  { %v2545_v9 = vpack.c.bf16 %v1515_v4, %v1515_v4  ;;  %v2014_v10 = vsel %vm1938_vm1, %v1515_v4, 0.0  ;;  %v2110_v11 = vmul.f32 %v1515_v4, %v1515_v4  ;;  %v1518_v12 = vadd.f32 %v1517_v7, %v1228_v6  ;;  %v1519_v13 = vpop.f32.mrb[79].mxu0 }
 0x1b1   :  { %v2015_v14 = vadd.f32 %v2014_v10, %v2013_v62 }
 0x1b2   :  { %1912 = vst.msk [vmem:[%s3792_s2 + $0x98] sm:$0xf] %vm1873_vm0, %v2545_v9  ;;  %v2211_v15 = vsel %vm1938_vm1, %v2110_v11, 0.0  ;;  %v2546_v16 = vpack.c.bf16 %v1518_v12, %v1518_v12  ;;  %v2016_v17 = vsel %vm1938_vm1, %v1518_v12, 0.0  ;;  %v2111_v18 = vmul.f32 %v1518_v12, %v1518_v12 }
 0x1b3   :  { %v2212_v19 = vadd.f32 %v2211_v15, %v2210_v1  ;;  %v2017_v20 = vadd.f32 %v2016_v17, %v2015_v14 }
 0x1b4   :  { %1913 = vst.msk [vmem:[%s3792_s2 + $0x9c] sm:$0xf] %vm1873_vm0, %v2546_v16  ;;  %v2213_v21 = vsel %vm1938_vm1, %v2111_v18, 0.0  ;;  %v1233_v22 = vpop.f32.mrb[80].mxu1 }
 0x1b5   :  { %v2214_v23 = vadd.f32 %v2213_v21, %v2212_v19  ;;  %v1522_v24 = vpop.f32.mrb[80].mxu0  ;;  %v1235_v25 = vpop.f32.mrb[81].mxu1 }
 0x1b6   :  { %v1523_v26 = vadd.f32 %v1522_v24, %v1233_v22  ;;  %v1524_v27 = vpop.f32.mrb[81].mxu0  ;;  %v1236_v28 = vpop.f32.mrb[82].mxu1 }
 0x1b7   :  { %v1525_v29 = vpop.f32.mrb[82].mxu0  ;;  %v1238_v30 = vpop.f32.mrb[83].mxu1 }
 0x1b8   :  { %v2547_v31 = vpack.c.bf16 %v1523_v26, %v1523_v26  ;;  %v2018_v32 = vsel %vm1938_vm1, %v1523_v26, 0.0  ;;  %v2112_v33 = vmul.f32 %v1523_v26, %v1523_v26  ;;  %v1526_v34 = vadd.f32 %v1525_v29, %v1236_v28  ;;  %v1527_v35 = vpop.f32.mrb[83].mxu0 }
 0x1b9   :  { %v2019_v36 = vadd.f32 %v2018_v32, %v2017_v20 }
 0x1ba   :  { %1914 = vst.msk [vmem:[%s3792_s2 + $0xa0] sm:$0xf] %vm1873_vm0, %v2547_v31  ;;  %v2215_v37 = vsel %vm1938_vm1, %v2112_v33, 0.0  ;;  %v2548_v38 = vpack.c.bf16 %v1526_v34, %v1526_v34  ;;  %v2020_v39 = vsel %vm1938_vm1, %v1526_v34, 0.0  ;;  %v2113_v40 = vmul.f32 %v1526_v34, %v1526_v34 }
 0x1bb   :  { %v2216_v41 = vadd.f32 %v2215_v37, %v2214_v23  ;;  %v2021_v42 = vadd.f32 %v2020_v39, %v2019_v36 }
 0x1bc   :  { %1915 = vst.msk [vmem:[%s3792_s2 + $0xa4] sm:$0xf] %vm1873_vm0, %v2548_v38  ;;  %v2217_v43 = vsel %vm1938_vm1, %v2113_v40, 0.0  ;;  %v1241_v44 = vpop.f32.mrb[84].mxu1 }
 0x1bd   :  { %v2218_v45 = vadd.f32 %v2217_v43, %v2216_v41  ;;  %v1530_v46 = vpop.f32.mrb[84].mxu0  ;;  %v1243_v47 = vpop.f32.mrb[85].mxu1 }
 0x1be   :  { %v1531_v48 = vadd.f32 %v1530_v46, %v1241_v44  ;;  %v1532_v49 = vpop.f32.mrb[85].mxu0  ;;  %v1244_v50 = vpop.f32.mrb[86].mxu1 }
 0x1bf   :  { %v1533_v51 = vpop.f32.mrb[86].mxu0  ;;  %v1246_v52 = vpop.f32.mrb[87].mxu1 }
 0x1c0   :  { %v2549_v53 = vpack.c.bf16 %v1531_v48, %v1531_v48  ;;  %v2022_v54 = vsel %vm1938_vm1, %v1531_v48, 0.0  ;;  %v2114_v55 = vmul.f32 %v1531_v48, %v1531_v48  ;;  %v1534_v56 = vadd.f32 %v1533_v51, %v1244_v50  ;;  %v1535_v57 = vpop.f32.mrb[87].mxu0 }
 0x1c1   :  { %v2023_v58 = vadd.f32 %v2022_v54, %v2021_v42 }
 0x1c2   :  { %1916 = vst.msk [vmem:[%s3792_s2 + $0xa8] sm:$0xf] %vm1873_vm0, %v2549_v53  ;;  %v2219_v59 = vsel %vm1938_vm1, %v2114_v55, 0.0  ;;  %v2550_v60 = vpack.c.bf16 %v1534_v56, %v1534_v56  ;;  %v2024_v61 = vsel %vm1938_vm1, %v1534_v56, 0.0  ;;  %v2115_v62 = vmul.f32 %v1534_v56, %v1534_v56 }
 0x1c3   :  { %v2220_v63 = vadd.f32 %v2219_v59, %v2218_v45  ;;  %v2025_v0 = vadd.f32 %v2024_v61, %v2023_v58 }
 0x1c4   :  { %1917 = vst.msk [vmem:[%s3792_s2 + $0xac] sm:$0xf] %vm1873_vm0, %v2550_v60  ;;  %v2221_v1 = vsel %vm1938_vm1, %v2115_v62, 0.0  ;;  %v1249_v2 = vpop.f32.mrb[88].mxu1 }
 0x1c5   :  { %v2222_v3 = vadd.f32 %v2221_v1, %v2220_v63  ;;  %v1538_v4 = vpop.f32.mrb[88].mxu0  ;;  %v1251_v5 = vpop.f32.mrb[89].mxu1 }
 0x1c6   :  { %v1539_v6 = vadd.f32 %v1538_v4, %v1249_v2  ;;  %v1540_v7 = vpop.f32.mrb[89].mxu0  ;;  %v1252_v8 = vpop.f32.mrb[90].mxu1 }
 0x1c7   :  { %v1541_v9 = vpop.f32.mrb[90].mxu0  ;;  %v1254_v10 = vpop.f32.mrb[91].mxu1 }
 0x1c8   :  { %v2551_v11 = vpack.c.bf16 %v1539_v6, %v1539_v6  ;;  %v2026_v12 = vsel %vm1938_vm1, %v1539_v6, 0.0  ;;  %v2116_v13 = vmul.f32 %v1539_v6, %v1539_v6  ;;  %v1542_v14 = vadd.f32 %v1541_v9, %v1252_v8  ;;  %v1543_v15 = vpop.f32.mrb[91].mxu0 }
 0x1c9   :  { %v2027_v16 = vadd.f32 %v2026_v12, %v2025_v0 }
 0x1ca   :  { %1918 = vst.msk [vmem:[%s3792_s2 + $0xb0] sm:$0xf] %vm1873_vm0, %v2551_v11  ;;  %v2223_v17 = vsel %vm1938_vm1, %v2116_v13, 0.0  ;;  %v2552_v18 = vpack.c.bf16 %v1542_v14, %v1542_v14  ;;  %v2028_v19 = vsel %vm1938_vm1, %v1542_v14, 0.0  ;;  %v2117_v20 = vmul.f32 %v1542_v14, %v1542_v14 }
 0x1cb   :  { %v2224_v21 = vadd.f32 %v2223_v17, %v2222_v3  ;;  %v2029_v22 = vadd.f32 %v2028_v19, %v2027_v16 }
 0x1cc   :  { %1919 = vst.msk [vmem:[%s3792_s2 + $0xb4] sm:$0xf] %vm1873_vm0, %v2552_v18  ;;  %v2225_v23 = vsel %vm1938_vm1, %v2117_v20, 0.0  ;;  %v1257_v24 = vpop.f32.mrb[92].mxu1 }
 0x1cd   :  { %v2226_v25 = vadd.f32 %v2225_v23, %v2224_v21  ;;  %v1546_v26 = vpop.f32.mrb[92].mxu0  ;;  %v1259_v27 = vpop.f32.mrb[93].mxu1 }
 0x1ce   :  { %v1547_v28 = vadd.f32 %v1546_v26, %v1257_v24  ;;  %v1548_v29 = vpop.f32.mrb[93].mxu0  ;;  %v1260_v30 = vpop.f32.mrb[94].mxu1 }
 0x1cf   :  { %v1549_v31 = vpop.f32.mrb[94].mxu0  ;;  %v1262_v32 = vpop.f32.mrb[95].mxu1 }
 0x1d0   :  { %v2553_v33 = vpack.c.bf16 %v1547_v28, %v1547_v28  ;;  %v2030_v34 = vsel %vm1938_vm1, %v1547_v28, 0.0  ;;  %v2118_v35 = vmul.f32 %v1547_v28, %v1547_v28  ;;  %v1550_v36 = vadd.f32 %v1549_v31, %v1260_v30  ;;  %v1551_v37 = vpop.f32.mrb[95].mxu0 }
 0x1d1   :  { %v2031_v38 = vadd.f32 %v2030_v34, %v2029_v22 }
 0x1d2   :  { %1920 = vst.msk [vmem:[%s3792_s2 + $0xb8] sm:$0xf] %vm1873_vm0, %v2553_v33  ;;  %v2227_v39 = vsel %vm1938_vm1, %v2118_v35, 0.0  ;;  %v2554_v40 = vpack.c.bf16 %v1550_v36, %v1550_v36  ;;  %v2032_v41 = vsel %vm1938_vm1, %v1550_v36, 0.0  ;;  %v2119_v42 = vmul.f32 %v1550_v36, %v1550_v36 }
 0x1d3   :  { %v2228_v43 = vadd.f32 %v2227_v39, %v2226_v25  ;;  %v2033_v44 = vadd.f32 %v2032_v41, %v2031_v38 }
 0x1d4   :  { %1921 = vst.msk [vmem:[%s3792_s2 + $0xbc] sm:$0xf] %vm1873_vm0, %v2554_v40  ;;  %v2229_v45 = vsel %vm1938_vm1, %v2119_v42, 0.0  ;;  %v1265_v46 = vpop.f32.mrb[96].mxu1 }
 0x1d5   :  { %v2230_v47 = vadd.f32 %v2229_v45, %v2228_v43  ;;  %v1554_v48 = vpop.f32.mrb[96].mxu0  ;;  %v1267_v49 = vpop.f32.mrb[97].mxu1 }
 0x1d6   :  { %v1555_v50 = vadd.f32 %v1554_v48, %v1265_v46  ;;  %v1556_v51 = vpop.f32.mrb[97].mxu0  ;;  %v1268_v52 = vpop.f32.mrb[98].mxu1 }
 0x1d7   :  { %v1557_v53 = vpop.f32.mrb[98].mxu0  ;;  %v1270_v54 = vpop.f32.mrb[99].mxu1 }
 0x1d8   :  { %v2555_v55 = vpack.c.bf16 %v1555_v50, %v1555_v50  ;;  %v2034_v56 = vsel %vm1938_vm1, %v1555_v50, 0.0  ;;  %v2120_v57 = vmul.f32 %v1555_v50, %v1555_v50  ;;  %v1558_v58 = vadd.f32 %v1557_v53, %v1268_v52  ;;  %v1559_v59 = vpop.f32.mrb[99].mxu0 }
 0x1d9   :  { %v2035_v60 = vadd.f32 %v2034_v56, %v2033_v44 }
 0x1da   :  { %1922 = vst.msk [vmem:[%s3792_s2 + $0xc0] sm:$0xf] %vm1873_vm0, %v2555_v55  ;;  %v2231_v61 = vsel %vm1938_vm1, %v2120_v57, 0.0  ;;  %v2556_v62 = vpack.c.bf16 %v1558_v58, %v1558_v58  ;;  %v2036_v63 = vsel %vm1938_vm1, %v1558_v58, 0.0  ;;  %v2121_v0 = vmul.f32 %v1558_v58, %v1558_v58 }
 0x1db   :  { %v2232_v1 = vadd.f32 %v2231_v61, %v2230_v47  ;;  %v2037_v2 = vadd.f32 %v2036_v63, %v2035_v60 }
 0x1dc   :  { %1923 = vst.msk [vmem:[%s3792_s2 + $0xc4] sm:$0xf] %vm1873_vm0, %v2556_v62  ;;  %v2233_v3 = vsel %vm1938_vm1, %v2121_v0, 0.0  ;;  %v1273_v4 = vpop.f32.mrb[100].mxu1 }
 0x1dd   :  { %v2234_v5 = vadd.f32 %v2233_v3, %v2232_v1  ;;  %v1562_v6 = vpop.f32.mrb[100].mxu0  ;;  %v1275_v7 = vpop.f32.mrb[101].mxu1 }
 0x1de   :  { %v1563_v8 = vadd.f32 %v1562_v6, %v1273_v4  ;;  %v1564_v9 = vpop.f32.mrb[101].mxu0  ;;  %v1276_v10 = vpop.f32.mrb[102].mxu1 }
 0x1df   :  { %v1565_v11 = vpop.f32.mrb[102].mxu0  ;;  %v1278_v12 = vpop.f32.mrb[103].mxu1 }
 0x1e0   :  { %v2557_v13 = vpack.c.bf16 %v1563_v8, %v1563_v8  ;;  %v2038_v14 = vsel %vm1938_vm1, %v1563_v8, 0.0  ;;  %v2122_v15 = vmul.f32 %v1563_v8, %v1563_v8  ;;  %v1566_v16 = vadd.f32 %v1565_v11, %v1276_v10  ;;  %v1567_v17 = vpop.f32.mrb[103].mxu0 }
 0x1e1   :  { %v2039_v18 = vadd.f32 %v2038_v14, %v2037_v2 }
 0x1e2   :  { %1924 = vst.msk [vmem:[%s3792_s2 + $0xc8] sm:$0xf] %vm1873_vm0, %v2557_v13  ;;  %v2235_v19 = vsel %vm1938_vm1, %v2122_v15, 0.0  ;;  %v2558_v20 = vpack.c.bf16 %v1566_v16, %v1566_v16  ;;  %v2040_v21 = vsel %vm1938_vm1, %v1566_v16, 0.0  ;;  %v2123_v22 = vmul.f32 %v1566_v16, %v1566_v16 }
 0x1e3   :  { %v2236_v23 = vadd.f32 %v2235_v19, %v2234_v5  ;;  %v2041_v24 = vadd.f32 %v2040_v21, %v2039_v18 }
 0x1e4   :  { %1925 = vst.msk [vmem:[%s3792_s2 + $0xcc] sm:$0xf] %vm1873_vm0, %v2558_v20  ;;  %v2237_v25 = vsel %vm1938_vm1, %v2123_v22, 0.0  ;;  %v1281_v26 = vpop.f32.mrb[104].mxu1 }
 0x1e5   :  { %v2238_v27 = vadd.f32 %v2237_v25, %v2236_v23  ;;  %v1570_v28 = vpop.f32.mrb[104].mxu0  ;;  %v1283_v29 = vpop.f32.mrb[105].mxu1 }
 0x1e6   :  { %v1571_v30 = vadd.f32 %v1570_v28, %v1281_v26  ;;  %v1572_v31 = vpop.f32.mrb[105].mxu0  ;;  %v1284_v32 = vpop.f32.mrb[106].mxu1 }
 0x1e7   :  { %v1573_v33 = vpop.f32.mrb[106].mxu0  ;;  %v1286_v34 = vpop.f32.mrb[107].mxu1 }
 0x1e8   :  { %v2559_v35 = vpack.c.bf16 %v1571_v30, %v1571_v30  ;;  %v2042_v36 = vsel %vm1938_vm1, %v1571_v30, 0.0  ;;  %v2124_v37 = vmul.f32 %v1571_v30, %v1571_v30  ;;  %v1574_v38 = vadd.f32 %v1573_v33, %v1284_v32  ;;  %v1575_v39 = vpop.f32.mrb[107].mxu0 }
 0x1e9   :  { %v2043_v40 = vadd.f32 %v2042_v36, %v2041_v24 }
 0x1ea   :  { %1926 = vst.msk [vmem:[%s3792_s2 + $0xd0] sm:$0xf] %vm1873_vm0, %v2559_v35  ;;  %v2239_v41 = vsel %vm1938_vm1, %v2124_v37, 0.0  ;;  %v2560_v42 = vpack.c.bf16 %v1574_v38, %v1574_v38  ;;  %v2044_v43 = vsel %vm1938_vm1, %v1574_v38, 0.0  ;;  %v2125_v44 = vmul.f32 %v1574_v38, %v1574_v38 }
 0x1eb   :  { %v2240_v45 = vadd.f32 %v2239_v41, %v2238_v27  ;;  %v2045_v46 = vadd.f32 %v2044_v43, %v2043_v40 }
 0x1ec   :  { %1927 = vst.msk [vmem:[%s3792_s2 + $0xd4] sm:$0xf] %vm1873_vm0, %v2560_v42  ;;  %v2241_v47 = vsel %vm1938_vm1, %v2125_v44, 0.0  ;;  %v1289_v48 = vpop.f32.mrb[108].mxu1 }
 0x1ed   :  { %v2242_v49 = vadd.f32 %v2241_v47, %v2240_v45  ;;  %v1578_v50 = vpop.f32.mrb[108].mxu0  ;;  %v1291_v51 = vpop.f32.mrb[109].mxu1 }
 0x1ee   :  { %v1579_v52 = vadd.f32 %v1578_v50, %v1289_v48  ;;  %v1580_v53 = vpop.f32.mrb[109].mxu0  ;;  %v1292_v54 = vpop.f32.mrb[110].mxu1 }
 0x1ef   :  { %v1581_v55 = vpop.f32.mrb[110].mxu0  ;;  %v1294_v56 = vpop.f32.mrb[111].mxu1 }
 0x1f0   :  { %v2561_v57 = vpack.c.bf16 %v1579_v52, %v1579_v52  ;;  %v2046_v58 = vsel %vm1938_vm1, %v1579_v52, 0.0  ;;  %v2126_v59 = vmul.f32 %v1579_v52, %v1579_v52  ;;  %v1582_v60 = vadd.f32 %v1581_v55, %v1292_v54  ;;  %v1583_v61 = vpop.f32.mrb[111].mxu0 }
 0x1f1   :  { %v2047_v62 = vadd.f32 %v2046_v58, %v2045_v46 }
 0x1f2   :  { %1928 = vst.msk [vmem:[%s3792_s2 + $0xd8] sm:$0xf] %vm1873_vm0, %v2561_v57  ;;  %v2243_v63 = vsel %vm1938_vm1, %v2126_v59, 0.0  ;;  %v2562_v0 = vpack.c.bf16 %v1582_v60, %v1582_v60  ;;  %v2048_v1 = vsel %vm1938_vm1, %v1582_v60, 0.0  ;;  %v2127_v2 = vmul.f32 %v1582_v60, %v1582_v60 }
 0x1f3   :  { %v2244_v3 = vadd.f32 %v2243_v63, %v2242_v49  ;;  %v2049_v4 = vadd.f32 %v2048_v1, %v2047_v62 }
 0x1f4   :  { %1929 = vst.msk [vmem:[%s3792_s2 + $0xdc] sm:$0xf] %vm1873_vm0, %v2562_v0  ;;  %v2245_v5 = vsel %vm1938_vm1, %v2127_v2, 0.0  ;;  %v1297_v6 = vpop.f32.mrb[112].mxu1 }
 0x1f5   :  { %v2246_v7 = vadd.f32 %v2245_v5, %v2244_v3  ;;  %v1586_v8 = vpop.f32.mrb[112].mxu0  ;;  %v1299_v9 = vpop.f32.mrb[113].mxu1 }
 0x1f6   :  { %v1587_v10 = vadd.f32 %v1586_v8, %v1297_v6  ;;  %v1588_v11 = vpop.f32.mrb[113].mxu0  ;;  %v1300_v12 = vpop.f32.mrb[114].mxu1 }
 0x1f7   :  { %v1589_v13 = vpop.f32.mrb[114].mxu0  ;;  %v1302_v14 = vpop.f32.mrb[115].mxu1 }
 0x1f8   :  { %v2563_v15 = vpack.c.bf16 %v1587_v10, %v1587_v10  ;;  %v2050_v16 = vsel %vm1938_vm1, %v1587_v10, 0.0  ;;  %v2128_v17 = vmul.f32 %v1587_v10, %v1587_v10  ;;  %v1590_v18 = vadd.f32 %v1589_v13, %v1300_v12  ;;  %v1591_v19 = vpop.f32.mrb[115].mxu0 }
 0x1f9   :  { %v2051_v20 = vadd.f32 %v2050_v16, %v2049_v4 }
 0x1fa   :  { %1930 = vst.msk [vmem:[%s3792_s2 + $0xe0] sm:$0xf] %vm1873_vm0, %v2563_v15  ;;  %v2247_v21 = vsel %vm1938_vm1, %v2128_v17, 0.0  ;;  %v2564_v22 = vpack.c.bf16 %v1590_v18, %v1590_v18  ;;  %v2052_v23 = vsel %vm1938_vm1, %v1590_v18, 0.0  ;;  %v2129_v24 = vmul.f32 %v1590_v18, %v1590_v18 }
 0x1fb   :  { %v2248_v25 = vadd.f32 %v2247_v21, %v2246_v7  ;;  %v2053_v26 = vadd.f32 %v2052_v23, %v2051_v20 }
 0x1fc   :  { %1931 = vst.msk [vmem:[%s3792_s2 + $0xe4] sm:$0xf] %vm1873_vm0, %v2564_v22  ;;  %v2249_v27 = vsel %vm1938_vm1, %v2129_v24, 0.0  ;;  %v1305_v28 = vpop.f32.mrb[116].mxu1 }
 0x1fd   :  { %v2250_v29 = vadd.f32 %v2249_v27, %v2248_v25  ;;  %v1594_v30 = vpop.f32.mrb[116].mxu0  ;;  %v1307_v31 = vpop.f32.mrb[117].mxu1 }
 0x1fe   :  { %v1595_v32 = vadd.f32 %v1594_v30, %v1305_v28  ;;  %v1596_v33 = vpop.f32.mrb[117].mxu0  ;;  %v1308_v34 = vpop.f32.mrb[118].mxu1 }
 0x1ff   :  { %v1597_v35 = vpop.f32.mrb[118].mxu0  ;;  %v1310_v36 = vpop.f32.mrb[119].mxu1 }
 0x200   :  { %v2565_v37 = vpack.c.bf16 %v1595_v32, %v1595_v32  ;;  %v2054_v38 = vsel %vm1938_vm1, %v1595_v32, 0.0  ;;  %v2130_v39 = vmul.f32 %v1595_v32, %v1595_v32  ;;  %v1598_v40 = vadd.f32 %v1597_v35, %v1308_v34  ;;  %v1599_v41 = vpop.f32.mrb[119].mxu0 }
 0x201   :  { %v2055_v42 = vadd.f32 %v2054_v38, %v2053_v26 }
 0x202   :  { %1932 = vst.msk [vmem:[%s3792_s2 + $0xe8] sm:$0xf] %vm1873_vm0, %v2565_v37  ;;  %v2251_v43 = vsel %vm1938_vm1, %v2130_v39, 0.0  ;;  %v2566_v44 = vpack.c.bf16 %v1598_v40, %v1598_v40  ;;  %v2056_v45 = vsel %vm1938_vm1, %v1598_v40, 0.0  ;;  %v2131_v46 = vmul.f32 %v1598_v40, %v1598_v40 }
 0x203   :  { %v2252_v47 = vadd.f32 %v2251_v43, %v2250_v29  ;;  %v2057_v48 = vadd.f32 %v2056_v45, %v2055_v42 }
 0x204   :  { %1933 = vst.msk [vmem:[%s3792_s2 + $0xec] sm:$0xf] %vm1873_vm0, %v2566_v44  ;;  %v2253_v49 = vsel %vm1938_vm1, %v2131_v46, 0.0  ;;  %v1313_v50 = vpop.f32.mrb[120].mxu1 }
 0x205   :  { %v2254_v51 = vadd.f32 %v2253_v49, %v2252_v47  ;;  %v1602_v52 = vpop.f32.mrb[120].mxu0  ;;  %v1315_v53 = vpop.f32.mrb[121].mxu1 }
 0x206   :  { %v1603_v54 = vadd.f32 %v1602_v52, %v1313_v50  ;;  %v1604_v55 = vpop.f32.mrb[121].mxu0  ;;  %v1316_v56 = vpop.f32.mrb[122].mxu1 }
 0x207   :  { %v1605_v57 = vpop.f32.mrb[122].mxu0  ;;  %v1318_v58 = vpop.f32.mrb[123].mxu1 }
 0x208   :  { %v2567_v59 = vpack.c.bf16 %v1603_v54, %v1603_v54  ;;  %v2058_v60 = vsel %vm1938_vm1, %v1603_v54, 0.0  ;;  %v2132_v61 = vmul.f32 %v1603_v54, %v1603_v54  ;;  %v1606_v62 = vadd.f32 %v1605_v57, %v1316_v56  ;;  %v1607_v63 = vpop.f32.mrb[123].mxu0 }
 0x209   :  { %v2059_v0 = vadd.f32 %v2058_v60, %v2057_v48 }
 0x20a   :  { %1934 = vst.msk [vmem:[%s3792_s2 + $0xf0] sm:$0xf] %vm1873_vm0, %v2567_v59  ;;  %v2255_v1 = vsel %vm1938_vm1, %v2132_v61, 0.0  ;;  %v2568_v2 = vpack.c.bf16 %v1606_v62, %v1606_v62  ;;  %v2060_v3 = vsel %vm1938_vm1, %v1606_v62, 0.0  ;;  %v2133_v4 = vmul.f32 %v1606_v62, %v1606_v62 }
 0x20b   :  { %v2256_v5 = vadd.f32 %v2255_v1, %v2254_v51  ;;  %v2061_v6 = vadd.f32 %v2060_v3, %v2059_v0 }
 0x20c   :  { %1935 = vst.msk [vmem:[%s3792_s2 + $0xf4] sm:$0xf] %vm1873_vm0, %v2568_v2  ;;  %v2257_v7 = vsel %vm1938_vm1, %v2133_v4, 0.0  ;;  %v1321_v8 = vpop.f32.mrb[124].mxu1 }
 0x20d   :  { %v2258_v9 = vadd.f32 %v2257_v7, %v2256_v5  ;;  %v1610_v10 = vpop.f32.mrb[124].mxu0  ;;  %v1323_v11 = vpop.f32.mrb[125].mxu1 }
 0x20e   :  { %v1611_v12 = vadd.f32 %v1610_v10, %v1321_v8  ;;  %v1612_v13 = vpop.f32.mrb[125].mxu0  ;;  %v1324_v14 = vpop.f32.mrb[126].mxu1 }
 0x20f   :  { %v1613_v15 = vpop.f32.mrb[126].mxu0  ;;  %v1326_v16 = vpop.f32.mrb[127].mxu1 }
 0x210   :  { %v2569_v17 = vpack.c.bf16 %v1611_v12, %v1611_v12  ;;  %v2062_v18 = vsel %vm1938_vm1, %v1611_v12, 0.0  ;;  %v2134_v19 = vmul.f32 %v1611_v12, %v1611_v12  ;;  %v1614_v20 = vadd.f32 %v1613_v15, %v1324_v14  ;;  %v1615_v21 = vpop.f32.mrb[127].mxu0 }
 0x211   :  { %v2063_v22 = vadd.f32 %v2062_v18, %v2061_v6 }
 0x212   :  { %1936 = vst.msk [vmem:[%s3792_s2 + $0xf8] sm:$0xf] %vm1873_vm0, %v2569_v17  ;;  %v2259_v23 = vsel %vm1938_vm1, %v2134_v19, 0.0  ;;  %v2570_v24 = vpack.c.bf16 %v1614_v20, %v1614_v20  ;;  %v2064_v25 = vsel %vm1938_vm1, %v1614_v20, 0.0  ;;  %v2135_v26 = vmul.f32 %v1614_v20, %v1614_v20 }
 0x213   :  { %v2260_v27 = vadd.f32 %v2259_v23, %v2258_v9  ;;  %v2065_v28 = vadd.f32 %v2064_v25, %v2063_v22 }
 0x214   :  { %1937 = vst.msk [vmem:[%s3792_s2 + $0xfc] sm:$0xf] %vm1873_vm0, %v2570_v24  ;;  %v2261_v29 = vsel %vm1938_vm1, %v2135_v26, 0.0 }
 0x215   :  { %v2066_v30 = vrot.slane %v2065_v28, 4  ;;  %v2262_v31 = vadd.f32 %v2261_v29, %v2260_v27 }
 0x217   :  { %v2067_v32 = vadd.f32 %v2066_v30, %v2065_v28  ;;  %v2263_v33 = vrot.slane %v2262_v31, 4 }
 0x219   :  { %v2068_v34 = vrot.slane %v2067_v32, 2  ;;  %v2264_v35 = vadd.f32 %v2263_v33, %v2262_v31 }
 0x21b   :  { %v2069_v36 = vadd.f32 %v2068_v34, %v2067_v32  ;;  %v2265_v37 = vrot.slane %v2264_v35, 2 }
 0x21d   :  { %v2070_v38 = vrot.slane %v2069_v36, 1  ;;  %v2266_v39 = vadd.f32 %v2265_v37, %v2264_v35 }
 0x21f   :  { %v2071_v40 = vadd.f32 %v2070_v38, %v2069_v36  ;;  %v2267_v41 = vrot.slane %v2266_v39, 1 }
 0x221   :  { %v2268_v42 = vadd.f32 %v2267_v41, %v2266_v39  ;;  %2269 = vst.msk [vmem:[%s3793_s3] sm:$0xff] %vm1938_vm1, %v2071_v40 }
 0x223   :  { %2270 = vst.msk [vmem:[%s3794_s4] sm:$0xff] %vm1938_vm1, %v2268_v42 }

// kernel: netd_forward.10
= control target key start
LH: loop header
LB: loop body
LE: loop exit
PB: predicated region body
PF: predicated region fallthrough
CT: control target
= control target key end

     0   :  { %vm732_vm0 = vcmask 519168   ;;  %s1608_s0 = inlined_call_operand.vmem [shape: bf16[512,64], index: 0, kind: input, shape index: {}]   ;;  %s1609_s1 = inlined_call_operand.vmem [shape: f32[1,64], index: 1, kind: input, shape index: {}]   ;;  %s1610_s2 = inlined_call_operand.vmem [shape: f32[1,64], index: 2, kind: input, shape index: {}]   ;;  %s1611_s3 = inlined_call_operand.vmem [shape: bf16[512,64], index: 3, kind: output, shape index: {}]  }
   0x1   :  { %v932_v0 = vld [vmem:[%s1608_s0] sm:$0xff]   ;;  %v1059_v4 = vld [vmem:[%s1608_s0 + $0x8] sm:$0xff]   ;;  %v1060_v5 = vld [vmem:[%s1608_s0 + $0x10] sm:$0xff]  }
   0x2   :  { %v1118_v1 = vld [vmem:[%s1609_s1] ss:$0 sm:$0xff]  ;;  %v933_v2 = vunpack.c.l.bf16 %v932_v0  ;;  %v934_v3 = vunpack.c.h.bf16 %v932_v0  ;;  %v1061_v6 = vld [vmem:[%s1608_s0 + $0x18] sm:$0xff]   ;;  %v937_v8 = vunpack.c.l.bf16 %v1059_v4  ;;  %v938_v9 = vunpack.c.h.bf16 %v1059_v4  ;;  %v1063_v40 = vld [vmem:[%s1608_s0 + $0x28] sm:$0xff]  }
   0x3   :  { %v1132_v7 = vld [vmem:[%s1610_s2] ss:$0 sm:$0xff]  ;;  %v941_v10 = vunpack.c.l.bf16 %v1060_v5  ;;  %v942_v11 = vunpack.c.h.bf16 %v1060_v5  ;;  %v945_v14 = vunpack.c.l.bf16 %v1061_v6  ;;  %v946_v15 = vunpack.c.h.bf16 %v1061_v6  ;;  %v1064_v52 = vld [vmem:[%s1608_s0 + $0x30] sm:$0xff]  }
   0x4   :  { %v149_v12 = vmul.f32 %v933_v2, %v1118_v1  ;;  %v150_v13 = vmul.f32 %v934_v3, %v1118_v1  ;;  %v151_v16 = vmul.f32 %v937_v8, %v1118_v1  ;;  %v152_v17 = vmul.f32 %v938_v9, %v1118_v1  ;;  %v1062_v39 = vld [vmem:[%s1608_s0 + $0x20] sm:$0xff]  }
   0x5   :  { %v153_v18 = vmul.f32 %v941_v10, %v1118_v1  ;;  %v154_v19 = vmul.f32 %v942_v11, %v1118_v1  ;;  %v155_v22 = vmul.f32 %v945_v14, %v1118_v1  ;;  %v156_v23 = vmul.f32 %v946_v15, %v1118_v1 }
   0x6   :  { %v220_v20 = vadd.f32 %v1132_v7, %v149_v12  ;;  %v221_v21 = vadd.f32 %v1132_v7, %v150_v13  ;;  %v222_v24 = vadd.f32 %v1132_v7, %v151_v16  ;;  %v223_v25 = vadd.f32 %v1132_v7, %v152_v17  ;;  %v1065_v17 = vld [vmem:[%s1608_s0 + $0x38] sm:$0xff]  }
   0x7   :  { %v224_v26 = vadd.f32 %v1132_v7, %v153_v18  ;;  %v225_v27 = vadd.f32 %v1132_v7, %v154_v19  ;;  %v226_v46 = vadd.f32 %v1132_v7, %v155_v22  ;;  %v227_v47 = vadd.f32 %v1132_v7, %v156_v23  ;;  %v1066_v18 = vld [vmem:[%s1608_s0 + $0x40] sm:$0xff]   ;;  %v1067_v23 = vld [vmem:[%s1608_s0 + $0x48] sm:$0xff]  }
   0x8   :  { %vm284_vm1 = vcmp.gt.f32.partialorder %v220_v20, 0.0  ;;  %v348_v28 = vmul.f32 0.2, %v220_v20  ;;  %vm285_vm2 = vcmp.gt.f32.partialorder %v221_v21, 0.0  ;;  %v349_v29 = vmul.f32 0.2, %v221_v21 }
   0x9   :  { %vm286_vm3 = vcmp.gt.f32.partialorder %v222_v24, 0.0  ;;  %v350_v30 = vmul.f32 0.2, %v222_v24  ;;  %vm287_vm4 = vcmp.gt.f32.partialorder %v223_v25, 0.0  ;;  %v351_v31 = vmul.f32 0.2, %v223_v25 }
   0xa   :  { %v412_v32 = vsel %vm284_vm1, %v220_v20, %v348_v28  ;;  %v413_v33 = vsel %vm285_vm2, %v221_v21, %v349_v29  ;;  %vm288_vm5 = vcmp.gt.f32.partialorder %v224_v26, 0.0  ;;  %v352_v34 = vmul.f32 0.2, %v224_v26 }
   0xb   :  { %v867_v35 = vpack.c.bf16 %v412_v32, %v412_v32  ;;  %v868_v36 = vpack.c.bf16 %v413_v33, %v413_v33  ;;  %v414_v37 = vsel %vm286_vm3, %v222_v24, %v350_v30  ;;  %v415_v38 = vsel %vm287_vm4, %v223_v25, %v351_v31 }
   0xc   :  { %v869_v41 = vpack.c.bf16 %v414_v37, %v414_v37  ;;  %v870_v42 = vpack.c.bf16 %v415_v38, %v415_v38  ;;  %v416_v43 = vsel %vm288_vm5, %v224_v26, %v352_v34  ;;  %vm289_vm6 = vcmp.gt.f32.partialorder %v225_v27, 0.0 }
   0xd   :  { %733 = vst.msk [vmem:[%s1611_s3] sm:$0xf] %vm732_vm0, %v867_v35  ;;  %734 = vst.msk [vmem:[%s1611_s3 + $0x4] sm:$0xf] %vm732_vm0, %v868_v36  ;;  %v871_v44 = vpack.c.bf16 %v416_v43, %v416_v43  ;;  %v353_v45 = vmul.f32 0.2, %v225_v27  ;;  %v949_v48 = vunpack.c.l.bf16 %v1062_v39  ;;  %v950_v49 = vunpack.c.h.bf16 %v1062_v39 }
   0xe   :  { %735 = vst.msk [vmem:[%s1611_s3 + $0x8] sm:$0xf] %vm732_vm0, %v869_v41  ;;  %736 = vst.msk [vmem:[%s1611_s3 + $0xc] sm:$0xf] %vm732_vm0, %v870_v42  ;;  %v953_v50 = vunpack.c.l.bf16 %v1063_v40  ;;  %v954_v51 = vunpack.c.h.bf16 %v1063_v40  ;;  %vm290_vm7 = vcmp.gt.f32.partialorder %v226_v46, 0.0  ;;  %vm291_vm8 = vcmp.gt.f32.partialorder %v227_v47, 0.0 }
   0xf   :  { %737 = vst.msk [vmem:[%s1611_s3 + $0x10] sm:$0xf] %vm732_vm0, %v871_v44  ;;  %v417_v53 = vsel %vm289_vm6, %v225_v27, %v353_v45  ;;  %v354_v54 = vmul.f32 0.2, %v226_v46  ;;  %v355_v56 = vmul.f32 0.2, %v227_v47  ;;  %v157_v57 = vmul.f32 %v949_v48, %v1118_v1 }
  0x10   :  { %v872_v55 = vpack.c.bf16 %v417_v53, %v417_v53  ;;  %v158_v58 = vmul.f32 %v950_v49, %v1118_v1  ;;  %v159_v60 = vmul.f32 %v953_v50, %v1118_v1  ;;  %v160_v61 = vmul.f32 %v954_v51, %v1118_v1 }
  0x11   :  { %v418_v59 = vsel %vm290_vm7, %v226_v46, %v354_v54  ;;  %v957_v62 = vunpack.c.l.bf16 %v1064_v52  ;;  %v419_v0 = vsel %vm291_vm8, %v227_v47, %v355_v56  ;;  %v228_v2 = vadd.f32 %v1132_v7, %v157_v57  ;;  %v1068_v57 = vld [vmem:[%s1608_s0 + $0x50] sm:$0xff]  }
  0x12   :  { %738 = vst.msk [vmem:[%s1611_s3 + $0x14] sm:$0xf] %vm732_vm0, %v872_v55  ;;  %v873_v63 = vpack.c.bf16 %v418_v59, %v418_v59  ;;  %v229_v3 = vadd.f32 %v1132_v7, %v158_v58  ;;  %v874_v4 = vpack.c.bf16 %v419_v0, %v419_v0  ;;  %v230_v5 = vadd.f32 %v1132_v7, %v159_v60 }
  0x13   :  { %v231_v6 = vadd.f32 %v1132_v7, %v160_v61  ;;  %v161_v8 = vmul.f32 %v957_v62, %v1118_v1  ;;  %vm292_vm9 = vcmp.gt.f32.partialorder %v228_v2, 0.0  ;;  %v356_v9 = vmul.f32 0.2, %v228_v2  ;;  %v1069_v62 = vld [vmem:[%s1608_s0 + $0x58] sm:$0xff]  }
  0x14   :  { %739 = vst.msk [vmem:[%s1611_s3 + $0x18] sm:$0xf] %vm732_vm0, %v873_v63  ;;  %vm293_vm10 = vcmp.gt.f32.partialorder %v229_v3, 0.0  ;;  %v357_v10 = vmul.f32 0.2, %v229_v3  ;;  %vm294_vm11 = vcmp.gt.f32.partialorder %v230_v5, 0.0  ;;  %v958_v16 = vunpack.c.h.bf16 %v1064_v52 }
  0x15   :  { %740 = vst.msk [vmem:[%s1611_s3 + $0x1c] sm:$0xf] %vm732_vm0, %v874_v4  ;;  %v358_v11 = vmul.f32 0.2, %v230_v5  ;;  %vm295_vm12 = vcmp.gt.f32.partialorder %v231_v6, 0.0  ;;  %v420_v13 = vsel %vm292_vm9, %v228_v2, %v356_v9  ;;  %v232_v15 = vadd.f32 %v1132_v7, %v161_v8 }
  0x16   :  { %v359_v12 = vmul.f32 0.2, %v231_v6  ;;  %v421_v14 = vsel %vm293_vm10, %v229_v3, %v357_v10  ;;  %v875_v19 = vpack.c.bf16 %v420_v13, %v420_v13  ;;  %v162_v27 = vmul.f32 %v958_v16, %v1118_v1  ;;  %v1070_v3 = vld [vmem:[%s1608_s0 + $0x60] sm:$0xff]   ;;  %v1071_v13 = vld [vmem:[%s1608_s0 + $0x68] sm:$0xff]  }
  0x17   :  { %v876_v20 = vpack.c.bf16 %v421_v14, %v421_v14  ;;  %v422_v21 = vsel %vm294_vm11, %v230_v5, %v358_v11  ;;  %vm296_vm13 = vcmp.gt.f32.partialorder %v232_v15, 0.0  ;;  %v360_v26 = vmul.f32 0.2, %v232_v15 }
  0x18   :  { %v423_v22 = vsel %vm295_vm12, %v231_v6, %v359_v12  ;;  %v877_v24 = vpack.c.bf16 %v422_v21, %v422_v21  ;;  %741 = vst.msk [vmem:[%s1611_s3 + $0x20] sm:$0xf] %vm732_vm0, %v875_v19  ;;  %v961_v28 = vunpack.c.l.bf16 %v1065_v17  ;;  %v962_v29 = vunpack.c.h.bf16 %v1065_v17 }
  0x19   :  { %v878_v25 = vpack.c.bf16 %v423_v22, %v423_v22  ;;  %742 = vst.msk [vmem:[%s1611_s3 + $0x24] sm:$0xf] %vm732_vm0, %v876_v20  ;;  %v965_v30 = vunpack.c.l.bf16 %v1066_v18  ;;  %v424_v31 = vsel %vm296_vm13, %v232_v15, %v360_v26  ;;  %v966_v32 = vunpack.c.h.bf16 %v1066_v18 }
  0x1a   :  { %743 = vst.msk [vmem:[%s1611_s3 + $0x28] sm:$0xf] %vm732_vm0, %v877_v24  ;;  %v969_v33 = vunpack.c.l.bf16 %v1067_v23  ;;  %v970_v34 = vunpack.c.h.bf16 %v1067_v23  ;;  %v879_v35 = vpack.c.bf16 %v424_v31, %v424_v31  ;;  %v233_v36 = vadd.f32 %v1132_v7, %v162_v27 }
  0x1b   :  { %744 = vst.msk [vmem:[%s1611_s3 + $0x2c] sm:$0xf] %vm732_vm0, %v878_v25  ;;  %v163_v37 = vmul.f32 %v961_v28, %v1118_v1  ;;  %v164_v38 = vmul.f32 %v962_v29, %v1118_v1  ;;  %v165_v39 = vmul.f32 %v965_v30, %v1118_v1  ;;  %v166_v40 = vmul.f32 %v966_v32, %v1118_v1 }
  0x1c   :  { %v167_v41 = vmul.f32 %v969_v33, %v1118_v1  ;;  %v168_v42 = vmul.f32 %v970_v34, %v1118_v1  ;;  %745 = vst.msk [vmem:[%s1611_s3 + $0x30] sm:$0xf] %vm732_vm0, %v879_v35  ;;  %vm297_vm14 = vcmp.gt.f32.partialorder %v233_v36, 0.0  ;;  %v361_v43 = vmul.f32 0.2, %v233_v36 }
  0x1d   :  { %v234_v44 = vadd.f32 %v1132_v7, %v163_v37  ;;  %v235_v45 = vadd.f32 %v1132_v7, %v164_v38  ;;  %v236_v46 = vadd.f32 %v1132_v7, %v165_v39  ;;  %v237_v47 = vadd.f32 %v1132_v7, %v166_v40 }
  0x1e   :  { %v238_v48 = vadd.f32 %v1132_v7, %v167_v41  ;;  %v239_v49 = vadd.f32 %v1132_v7, %v168_v42  ;;  %v425_v50 = vsel %vm297_vm14, %v233_v36, %v361_v43  ;;  %v973_v8 = vunpack.c.l.bf16 %v1068_v57  ;;  %v1072_v41 = vld [vmem:[%s1608_s0 + $0x70] sm:$0xff]  }
  0x1f   :  { %vm298_vm15 = vcmp.gt.f32.partialorder %v234_v44, 0.0  ;;  %v362_v51 = vmul.f32 0.2, %v234_v44  ;;  %vm299_vm1 = vcmp.gt.f32.partialorder %v235_v45, 0.0  ;;  %v880_v52 = vpack.c.bf16 %v425_v50, %v425_v50 }
  0x20   :  { %v363_v53 = vmul.f32 0.2, %v235_v45  ;;  %vm300_vm2 = vcmp.gt.f32.partialorder %v236_v46, 0.0  ;;  %v364_v54 = vmul.f32 0.2, %v236_v46  ;;  %vm301_vm3 = vcmp.gt.f32.partialorder %v237_v47, 0.0 }
  0x21   :  { %v426_v55 = vsel %vm298_vm15, %v234_v44, %v362_v51  ;;  %v365_v56 = vmul.f32 0.2, %v237_v47  ;;  %vm302_vm4 = vcmp.gt.f32.partialorder %v238_v48, 0.0  ;;  %746 = vst.msk [vmem:[%s1611_s3 + $0x34] sm:$0xf] %vm732_vm0, %v880_v52  ;;  %vm303_vm5 = vcmp.gt.f32.partialorder %v239_v49, 0.0 }
  0x22   :  { %v881_v58 = vpack.c.bf16 %v426_v55, %v426_v55  ;;  %v427_v59 = vsel %vm299_vm1, %v235_v45, %v363_v53  ;;  %v428_v60 = vsel %vm300_vm2, %v236_v46, %v364_v54  ;;  %v366_v61 = vmul.f32 0.2, %v238_v48  ;;  %v1073_v45 = vld [vmem:[%s1608_s0 + $0x78] sm:$0xff]  }
  0x23   :  { %v882_v63 = vpack.c.bf16 %v427_v59, %v427_v59  ;;  %v883_v0 = vpack.c.bf16 %v428_v60, %v428_v60  ;;  %v429_v2 = vsel %vm301_vm3, %v237_v47, %v365_v56  ;;  %v367_v6 = vmul.f32 0.2, %v239_v49 }
  0x24   :  { %747 = vst.msk [vmem:[%s1611_s3 + $0x38] sm:$0xf] %vm732_vm0, %v881_v58  ;;  %v884_v4 = vpack.c.bf16 %v429_v2, %v429_v2  ;;  %v430_v5 = vsel %vm302_vm4, %v238_v48, %v366_v61  ;;  %v974_v10 = vunpack.c.h.bf16 %v1068_v57  ;;  %v977_v11 = vunpack.c.l.bf16 %v1069_v62 }
  0x25   :  { %748 = vst.msk [vmem:[%s1611_s3 + $0x3c] sm:$0xf] %vm732_vm0, %v882_v63  ;;  %749 = vst.msk [vmem:[%s1611_s3 + $0x40] sm:$0xf] %vm732_vm0, %v883_v0  ;;  %v885_v9 = vpack.c.bf16 %v430_v5, %v430_v5  ;;  %v978_v12 = vunpack.c.h.bf16 %v1069_v62  ;;  %v431_v14 = vsel %vm303_vm5, %v239_v49, %v367_v6  ;;  %v169_v15 = vmul.f32 %v973_v8, %v1118_v1  ;;  %v1074_v62 = vld [vmem:[%s1608_s0 + $0x80] sm:$0xff]  }
  0x26   :  { %750 = vst.msk [vmem:[%s1611_s3 + $0x44] sm:$0xf] %vm732_vm0, %v884_v4  ;;  %v981_v16 = vunpack.c.l.bf16 %v1070_v3  ;;  %v982_v17 = vunpack.c.h.bf16 %v1070_v3  ;;  %v886_v18 = vpack.c.bf16 %v431_v14, %v431_v14  ;;  %v170_v19 = vmul.f32 %v974_v10, %v1118_v1 }
  0x27   :  { %751 = vst.msk [vmem:[%s1611_s3 + $0x48] sm:$0xf] %vm732_vm0, %v885_v9  ;;  %v171_v20 = vmul.f32 %v977_v11, %v1118_v1  ;;  %v172_v21 = vmul.f32 %v978_v12, %v1118_v1  ;;  %v240_v22 = vadd.f32 %v1132_v7, %v169_v15  ;;  %v985_v25 = vunpack.c.l.bf16 %v1071_v13 }
  0x28   :  { %v173_v23 = vmul.f32 %v981_v16, %v1118_v1  ;;  %v174_v24 = vmul.f32 %v982_v17, %v1118_v1  ;;  %752 = vst.msk [vmem:[%s1611_s3 + $0x4c] sm:$0xf] %vm732_vm0, %v886_v18  ;;  %v241_v26 = vadd.f32 %v1132_v7, %v170_v19  ;;  %v986_v29 = vunpack.c.h.bf16 %v1071_v13  ;;  %v1075_v16 = vld [vmem:[%s1608_s0 + $0x88] sm:$0xff]  }
  0x29   :  { %v242_v27 = vadd.f32 %v1132_v7, %v171_v20  ;;  %v243_v28 = vadd.f32 %v1132_v7, %v172_v21  ;;  %vm304_vm6 = vcmp.gt.f32.partialorder %v240_v22, 0.0  ;;  %v368_v30 = vmul.f32 0.2, %v240_v22 }
  0x2a   :  { %v244_v31 = vadd.f32 %v1132_v7, %v173_v23  ;;  %v245_v32 = vadd.f32 %v1132_v7, %v174_v24  ;;  %vm305_vm7 = vcmp.gt.f32.partialorder %v241_v26, 0.0  ;;  %v369_v33 = vmul.f32 0.2, %v241_v26  ;;  %v1076_v24 = vld [vmem:[%s1608_s0 + $0x90] sm:$0xff]  }
  0x2b   :  { %vm306_vm8 = vcmp.gt.f32.partialorder %v242_v27, 0.0  ;;  %v370_v34 = vmul.f32 0.2, %v242_v27  ;;  %v432_v35 = vsel %vm304_vm6, %v240_v22, %v368_v30  ;;  %vm307_vm9 = vcmp.gt.f32.partialorder %v243_v28, 0.0 }
  0x2c   :  { %v371_v36 = vmul.f32 0.2, %v243_v28  ;;  %vm308_vm10 = vcmp.gt.f32.partialorder %v244_v31, 0.0  ;;  %v887_v37 = vpack.c.bf16 %v432_v35, %v432_v35  ;;  %v433_v38 = vsel %vm305_vm7, %v241_v26, %v369_v33 }
  0x2d   :  { %v434_v39 = vsel %vm306_vm8, %v242_v27, %v370_v34  ;;  %v372_v40 = vmul.f32 0.2, %v244_v31  ;;  %v888_v42 = vpack.c.bf16 %v433_v38, %v433_v38  ;;  %vm309_vm11 = vcmp.gt.f32.partialorder %v245_v32, 0.0 }
  0x2e   :  { %v889_v43 = vpack.c.bf16 %v434_v39, %v434_v39  ;;  %v435_v44 = vsel %vm307_vm9, %v243_v28, %v371_v36  ;;  %753 = vst.msk [vmem:[%s1611_s3 + $0x50] sm:$0xf] %vm732_vm0, %v887_v37  ;;  %v373_v48 = vmul.f32 0.2, %v245_v32  ;;  %v175_v49 = vmul.f32 %v985_v25, %v1118_v1 }
  0x2f   :  { %v890_v46 = vpack.c.bf16 %v435_v44, %v435_v44  ;;  %v436_v47 = vsel %vm308_vm10, %v244_v31, %v372_v40  ;;  %754 = vst.msk [vmem:[%s1611_s3 + $0x54] sm:$0xf] %vm732_vm0, %v888_v42  ;;  %v176_v51 = vmul.f32 %v986_v29, %v1118_v1  ;;  %v989_v52 = vunpack.c.l.bf16 %v1072_v41  ;;  %v1359_v29 = vld [vmem:[%s1608_s0 + $0x98] sm:$0xff]  }
  0x30   :  { %755 = vst.msk [vmem:[%s1611_s3 + $0x58] sm:$0xf] %vm732_vm0, %v889_v43  ;;  %v891_v50 = vpack.c.bf16 %v436_v47, %v436_v47  ;;  %v990_v53 = vunpack.c.h.bf16 %v1072_v41  ;;  %v437_v54 = vsel %vm309_vm11, %v245_v32, %v373_v48  ;;  %v246_v55 = vadd.f32 %v1132_v7, %v175_v49 }
  0x31   :  { %756 = vst.msk [vmem:[%s1611_s3 + $0x5c] sm:$0xf] %vm732_vm0, %v890_v46  ;;  %v993_v56 = vunpack.c.l.bf16 %v1073_v45  ;;  %v994_v57 = vunpack.c.h.bf16 %v1073_v45  ;;  %v892_v58 = vpack.c.bf16 %v437_v54, %v437_v54  ;;  %v247_v59 = vadd.f32 %v1132_v7, %v176_v51 }
  0x32   :  { %757 = vst.msk [vmem:[%s1611_s3 + $0x60] sm:$0xf] %vm732_vm0, %v891_v50  ;;  %v177_v60 = vmul.f32 %v989_v52, %v1118_v1  ;;  %v178_v61 = vmul.f32 %v990_v53, %v1118_v1  ;;  %vm310_vm12 = vcmp.gt.f32.partialorder %v246_v55, 0.0  ;;  %v374_v63 = vmul.f32 0.2, %v246_v55 }
  0x33   :  { %v179_v0 = vmul.f32 %v993_v56, %v1118_v1  ;;  %v180_v2 = vmul.f32 %v994_v57, %v1118_v1  ;;  %758 = vst.msk [vmem:[%s1611_s3 + $0x64] sm:$0xf] %vm732_vm0, %v892_v58  ;;  %vm311_vm13 = vcmp.gt.f32.partialorder %v247_v59, 0.0  ;;  %v375_v3 = vmul.f32 0.2, %v247_v59  ;;  %v1078_v58 = vld [vmem:[%s1608_s0 + $0xa0] sm:$0xff]  }
  0x34   :  { %v248_v4 = vadd.f32 %v1132_v7, %v177_v60  ;;  %v249_v5 = vadd.f32 %v1132_v7, %v178_v61  ;;  %v438_v6 = vsel %vm310_vm12, %v246_v55, %v374_v63  ;;  %v997_v10 = vunpack.c.l.bf16 %v1074_v62 }
  0x35   :  { %v250_v8 = vadd.f32 %v1132_v7, %v179_v0  ;;  %v251_v9 = vadd.f32 %v1132_v7, %v180_v2  ;;  %v893_v11 = vpack.c.bf16 %v438_v6, %v438_v6  ;;  %v439_v12 = vsel %vm311_vm13, %v247_v59, %v375_v3  ;;  %v1080_v6 = vld [vmem:[%s1608_s0 + $0xb0] sm:$0xff]  }
  0x36   :  { %vm312_vm14 = vcmp.gt.f32.partialorder %v248_v4, 0.0  ;;  %v376_v13 = vmul.f32 0.2, %v248_v4  ;;  %v894_v14 = vpack.c.bf16 %v439_v12, %v439_v12  ;;  %vm313_vm15 = vcmp.gt.f32.partialorder %v249_v5, 0.0  ;;  %v1081_v12 = vld [vmem:[%s1608_s0 + $0xb8] sm:$0xff]  }
  0x37   :  { %v377_v15 = vmul.f32 0.2, %v249_v5  ;;  %vm314_vm1 = vcmp.gt.f32.partialorder %v250_v8, 0.0  ;;  %759 = vst.msk [vmem:[%s1611_s3 + $0x68] sm:$0xf] %vm732_vm0, %v893_v11  ;;  %vm315_vm2 = vcmp.gt.f32.partialorder %v251_v9, 0.0  ;;  %v181_v22 = vmul.f32 %v997_v10, %v1118_v1 }
  0x38   :  { %v440_v17 = vsel %vm312_vm14, %v248_v4, %v376_v13  ;;  %v378_v18 = vmul.f32 0.2, %v250_v8  ;;  %v379_v19 = vmul.f32 0.2, %v251_v9  ;;  %760 = vst.msk [vmem:[%s1611_s3 + $0x6c] sm:$0xf] %vm732_vm0, %v894_v14  ;;  %v998_v23 = vunpack.c.h.bf16 %v1074_v62 }
  0x39   :  { %v895_v20 = vpack.c.bf16 %v440_v17, %v440_v17  ;;  %v441_v21 = vsel %vm313_vm15, %v249_v5, %v377_v15  ;;  %v1001_v28 = vunpack.c.l.bf16 %v1075_v16  ;;  %v252_v32 = vadd.f32 %v1132_v7, %v181_v22  ;;  %v1079_v5 = vld [vmem:[%s1608_s0 + $0xa8] sm:$0xff]  }
  0x3a   :  { %v896_v25 = vpack.c.bf16 %v441_v21, %v441_v21  ;;  %v442_v26 = vsel %vm314_vm1, %v250_v8, %v378_v18  ;;  %v443_v27 = vsel %vm315_vm2, %v251_v9, %v379_v19  ;;  %v182_v33 = vmul.f32 %v998_v23, %v1118_v1 }
  0x3b   :  { %761 = vst.msk [vmem:[%s1611_s3 + $0x70] sm:$0xf] %vm732_vm0, %v895_v20  ;;  %v897_v30 = vpack.c.bf16 %v442_v26, %v442_v26  ;;  %v898_v31 = vpack.c.bf16 %v443_v27, %v443_v27  ;;  %v183_v34 = vmul.f32 %v1001_v28, %v1118_v1  ;;  %v1002_v35 = vunpack.c.h.bf16 %v1075_v16 }
  0x3c   :  { %762 = vst.msk [vmem:[%s1611_s3 + $0x74] sm:$0xf] %vm732_vm0, %v896_v25  ;;  %v1005_v36 = vunpack.c.l.bf16 %v1076_v24  ;;  %v1006_v37 = vunpack.c.h.bf16 %v1076_v24  ;;  %vm316_vm3 = vcmp.gt.f32.partialorder %v252_v32, 0.0  ;;  %v380_v38 = vmul.f32 0.2, %v252_v32 }
  0x3d   :  { %763 = vst.msk [vmem:[%s1611_s3 + $0x78] sm:$0xf] %vm732_vm0, %v897_v30  ;;  %764 = vst.msk [vmem:[%s1611_s3 + $0x7c] sm:$0xf] %vm732_vm0, %v898_v31  ;;  %v253_v39 = vadd.f32 %v1132_v7, %v182_v33  ;;  %v1009_v40 = vunpack.c.l.bf16 %v1359_v29  ;;  %v254_v41 = vadd.f32 %v1132_v7, %v183_v34  ;;  %v184_v42 = vmul.f32 %v1002_v35, %v1118_v1 }
  0x3e   :  { %v185_v43 = vmul.f32 %v1005_v36, %v1118_v1  ;;  %v186_v44 = vmul.f32 %v1006_v37, %v1118_v1  ;;  %v444_v45 = vsel %vm316_vm3, %v252_v32, %v380_v38  ;;  %v1010_v3 = vunpack.c.h.bf16 %v1359_v29 }
  0x3f   :  { %vm317_vm4 = vcmp.gt.f32.partialorder %v253_v39, 0.0  ;;  %v381_v46 = vmul.f32 0.2, %v253_v39  ;;  %v187_v47 = vmul.f32 %v1009_v40, %v1118_v1  ;;  %v899_v48 = vpack.c.bf16 %v444_v45, %v444_v45 }
  0x40   :  { %vm318_vm5 = vcmp.gt.f32.partialorder %v254_v41, 0.0  ;;  %v382_v49 = vmul.f32 0.2, %v254_v41  ;;  %v255_v50 = vadd.f32 %v1132_v7, %v184_v42  ;;  %v256_v52 = vadd.f32 %v1132_v7, %v185_v43 }
  0x41   :  { %v445_v51 = vsel %vm317_vm4, %v253_v39, %v381_v46  ;;  %v257_v53 = vadd.f32 %v1132_v7, %v186_v44  ;;  %v258_v54 = vadd.f32 %v1132_v7, %v187_v47  ;;  %765 = vst.msk [vmem:[%s1611_s3 + $0x80] sm:$0xf] %vm732_vm0, %v899_v48  ;;  %v1013_v4 = vunpack.c.l.bf16 %v1078_v58 }
  0x42   :  { %v900_v55 = vpack.c.bf16 %v445_v51, %v445_v51  ;;  %v446_v56 = vsel %vm318_vm5, %v254_v41, %v382_v49  ;;  %vm319_vm6 = vcmp.gt.f32.partialorder %v255_v50, 0.0  ;;  %v383_v57 = vmul.f32 0.2, %v255_v50  ;;  %v1082_v41 = vld [vmem:[%s1608_s0 + $0xc0] sm:$0xff]  }
  0x43   :  { %v901_v59 = vpack.c.bf16 %v446_v56, %v446_v56  ;;  %vm320_vm7 = vcmp.gt.f32.partialorder %v256_v52, 0.0  ;;  %v384_v60 = vmul.f32 0.2, %v256_v52  ;;  %vm321_vm8 = vcmp.gt.f32.partialorder %v257_v53, 0.0 }
  0x44   :  { %766 = vst.msk [vmem:[%s1611_s3 + $0x84] sm:$0xf] %vm732_vm0, %v900_v55  ;;  %v447_v61 = vsel %vm319_vm6, %v255_v50, %v383_v57  ;;  %v385_v62 = vmul.f32 0.2, %v257_v53  ;;  %vm322_vm9 = vcmp.gt.f32.partialorder %v258_v54, 0.0  ;;  %v1014_v11 = vunpack.c.h.bf16 %v1078_v58 }
  0x45   :  { %v386_v63 = vmul.f32 0.2, %v258_v54  ;;  %767 = vst.msk [vmem:[%s1611_s3 + $0x88] sm:$0xf] %vm732_vm0, %v901_v59  ;;  %v902_v0 = vpack.c.bf16 %v447_v61, %v447_v61  ;;  %v448_v2 = vsel %vm320_vm7, %v256_v52, %v384_v60  ;;  %v188_v15 = vmul.f32 %v1010_v3, %v1118_v1  ;;  %v1083_v52 = vld [vmem:[%s1608_s0 + $0xc8] sm:$0xff]  }
  0x46   :  { %v903_v8 = vpack.c.bf16 %v448_v2, %v448_v2  ;;  %v449_v9 = vsel %vm321_vm8, %v257_v53, %v385_v62  ;;  %v189_v16 = vmul.f32 %v1013_v4, %v1118_v1  ;;  %v190_v17 = vmul.f32 %v1014_v11, %v1118_v1 }
  0x47   :  { %v450_v10 = vsel %vm322_vm9, %v258_v54, %v386_v63  ;;  %768 = vst.msk [vmem:[%s1611_s3 + $0x8c] sm:$0xf] %vm732_vm0, %v902_v0  ;;  %v904_v13 = vpack.c.bf16 %v449_v9, %v449_v9  ;;  %v1017_v18 = vunpack.c.l.bf16 %v1079_v5  ;;  %v1018_v19 = vunpack.c.h.bf16 %v1079_v5  ;;  %v1084_v9 = vld [vmem:[%s1608_s0 + $0xd0] sm:$0xff]  }
  0x48   :  { %v905_v14 = vpack.c.bf16 %v450_v10, %v450_v10  ;;  %769 = vst.msk [vmem:[%s1611_s3 + $0x90] sm:$0xf] %vm732_vm0, %v903_v8  ;;  %v1021_v20 = vunpack.c.l.bf16 %v1080_v6  ;;  %v259_v21 = vadd.f32 %v1132_v7, %v188_v15  ;;  %v260_v22 = vadd.f32 %v1132_v7, %v189_v16 }
  0x49   :  { %770 = vst.msk [vmem:[%s1611_s3 + $0x94] sm:$0xf] %vm732_vm0, %v904_v13  ;;  %v1022_v23 = vunpack.c.h.bf16 %v1080_v6  ;;  %v1025_v24 = vunpack.c.l.bf16 %v1081_v12  ;;  %v261_v25 = vadd.f32 %v1132_v7, %v190_v17  ;;  %v191_v26 = vmul.f32 %v1017_v18, %v1118_v1 }
  0x4a   :  { %771 = vst.msk [vmem:[%s1611_s3 + $0x98] sm:$0xf] %vm732_vm0, %v905_v14  ;;  %v192_v27 = vmul.f32 %v1018_v19, %v1118_v1  ;;  %v193_v28 = vmul.f32 %v1021_v20, %v1118_v1  ;;  %vm323_vm10 = vcmp.gt.f32.partialorder %v259_v21, 0.0  ;;  %v387_v29 = vmul.f32 0.2, %v259_v21 }
  0x4b   :  { %vm324_vm11 = vcmp.gt.f32.partialorder %v260_v22, 0.0  ;;  %v388_v30 = vmul.f32 0.2, %v260_v22  ;;  %vm325_vm12 = vcmp.gt.f32.partialorder %v261_v25, 0.0  ;;  %v389_v31 = vmul.f32 0.2, %v261_v25 }
  0x4c   :  { %v262_v32 = vadd.f32 %v1132_v7, %v191_v26  ;;  %v263_v33 = vadd.f32 %v1132_v7, %v192_v27  ;;  %v451_v34 = vsel %vm323_vm10, %v259_v21, %v387_v29  ;;  %v264_v36 = vadd.f32 %v1132_v7, %v193_v28 }
  0x4d   :  { %v452_v35 = vsel %vm324_vm11, %v260_v22, %v388_v30  ;;  %v194_v37 = vmul.f32 %v1022_v23, %v1118_v1  ;;  %v906_v38 = vpack.c.bf16 %v451_v34, %v451_v34  ;;  %v453_v40 = vsel %vm325_vm12, %v261_v25, %v389_v31  ;;  %v1085_v23 = vld [vmem:[%s1608_s0 + $0xd8] sm:$0xff]   ;;  %v1086_v30 = vld [vmem:[%s1608_s0 + $0xe0] sm:$0xff]  }
  0x4e   :  { %v907_v39 = vpack.c.bf16 %v452_v35, %v452_v35  ;;  %vm326_vm13 = vcmp.gt.f32.partialorder %v262_v32, 0.0  ;;  %v908_v42 = vpack.c.bf16 %v453_v40, %v453_v40  ;;  %v390_v43 = vmul.f32 0.2, %v262_v32 }
  0x4f   :  { %vm327_vm14 = vcmp.gt.f32.partialorder %v263_v33, 0.0  ;;  %v391_v44 = vmul.f32 0.2, %v263_v33  ;;  %772 = vst.msk [vmem:[%s1611_s3 + $0x9c] sm:$0xf] %vm732_vm0, %v906_v38  ;;  %vm328_vm15 = vcmp.gt.f32.partialorder %v264_v36, 0.0  ;;  %v265_v46 = vadd.f32 %v1132_v7, %v194_v37 }
  0x50   :  { %773 = vst.msk [vmem:[%s1611_s3 + $0xa0] sm:$0xf] %vm732_vm0, %v907_v39  ;;  %v392_v45 = vmul.f32 0.2, %v264_v36  ;;  %v195_v47 = vmul.f32 %v1025_v24, %v1118_v1  ;;  %774 = vst.msk [vmem:[%s1611_s3 + $0xa4] sm:$0xf] %vm732_vm0, %v908_v42  ;;  %v454_v48 = vsel %vm326_vm13, %v262_v32, %v390_v43  ;;  %v1026_v50 = vunpack.c.h.bf16 %v1081_v12 }
  0x51   :  { %v455_v49 = vsel %vm327_vm14, %v263_v33, %v391_v44  ;;  %v1029_v51 = vunpack.c.l.bf16 %v1082_v41  ;;  %v909_v53 = vpack.c.bf16 %v454_v48, %v454_v48  ;;  %vm329_vm1 = vcmp.gt.f32.partialorder %v265_v46, 0.0  ;;  %v1087_v39 = vld [vmem:[%s1608_s0 + $0xe8] sm:$0xff]  }
  0x52   :  { %v910_v54 = vpack.c.bf16 %v455_v49, %v455_v49  ;;  %v456_v55 = vsel %vm328_vm15, %v264_v36, %v392_v45  ;;  %v393_v57 = vmul.f32 0.2, %v265_v46  ;;  %v266_v58 = vadd.f32 %v1132_v7, %v195_v47 }
  0x53   :  { %v911_v56 = vpack.c.bf16 %v456_v55, %v456_v55  ;;  %v196_v59 = vmul.f32 %v1026_v50, %v1118_v1  ;;  %775 = vst.msk [vmem:[%s1611_s3 + $0xa8] sm:$0xf] %vm732_vm0, %v909_v53  ;;  %v197_v60 = vmul.f32 %v1029_v51, %v1118_v1  ;;  %v1030_v61 = vunpack.c.h.bf16 %v1082_v41 }
  0x54   :  { %776 = vst.msk [vmem:[%s1611_s3 + $0xac] sm:$0xf] %vm732_vm0, %v910_v54  ;;  %v1033_v62 = vunpack.c.l.bf16 %v1083_v52  ;;  %v1034_v63 = vunpack.c.h.bf16 %v1083_v52  ;;  %v457_v0 = vsel %vm329_vm1, %v265_v46, %v393_v57  ;;  %vm330_vm2 = vcmp.gt.f32.partialorder %v266_v58, 0.0 }
  0x55   :  { %777 = vst.msk [vmem:[%s1611_s3 + $0xb0] sm:$0xf] %vm732_vm0, %v911_v56  ;;  %v394_v2 = vmul.f32 0.2, %v266_v58  ;;  %v267_v3 = vadd.f32 %v1132_v7, %v196_v59  ;;  %v912_v4 = vpack.c.bf16 %v457_v0, %v457_v0  ;;  %v268_v5 = vadd.f32 %v1132_v7, %v197_v60  ;;  %v1088_v0 = vld [vmem:[%s1608_s0 + $0xf0] sm:$0xff]  }
  0x56   :  { %v198_v6 = vmul.f32 %v1030_v61, %v1118_v1  ;;  %v199_v8 = vmul.f32 %v1033_v62, %v1118_v1  ;;  %v200_v12 = vmul.f32 %v1034_v63, %v1118_v1  ;;  %v1037_v19 = vunpack.c.l.bf16 %v1084_v9 }
  0x57   :  { %v458_v10 = vsel %vm330_vm2, %v266_v58, %v394_v2  ;;  %vm331_vm3 = vcmp.gt.f32.partialorder %v267_v3, 0.0  ;;  %v395_v11 = vmul.f32 0.2, %v267_v3  ;;  %778 = vst.msk [vmem:[%s1611_s3 + $0xb4] sm:$0xf] %vm732_vm0, %v912_v4  ;;  %vm332_vm4 = vcmp.gt.f32.partialorder %v268_v5, 0.0 }
  0x58   :  { %v913_v13 = vpack.c.bf16 %v458_v10, %v458_v10  ;;  %v396_v14 = vmul.f32 0.2, %v268_v5  ;;  %v269_v15 = vadd.f32 %v1132_v7, %v198_v6  ;;  %v270_v17 = vadd.f32 %v1132_v7, %v199_v8 }
  0x59   :  { %v459_v16 = vsel %vm331_vm3, %v267_v3, %v395_v11  ;;  %v271_v18 = vadd.f32 %v1132_v7, %v200_v12  ;;  %v201_v28 = vmul.f32 %v1037_v19, %v1118_v1  ;;  %v1038_v29 = vunpack.c.h.bf16 %v1084_v9 }
  0x5a   :  { %779 = vst.msk [vmem:[%s1611_s3 + $0xb8] sm:$0xf] %vm732_vm0, %v913_v13  ;;  %v914_v20 = vpack.c.bf16 %v459_v16, %v459_v16  ;;  %v460_v21 = vsel %vm332_vm4, %v268_v5, %v396_v14  ;;  %vm333_vm5 = vcmp.gt.f32.partialorder %v269_v15, 0.0  ;;  %v397_v22 = vmul.f32 0.2, %v269_v15  ;;  %v1089_v13 = vld [vmem:[%s1608_s0 + $0xf8] sm:$0xff]  }
  0x5b   :  { %v915_v24 = vpack.c.bf16 %v460_v21, %v460_v21  ;;  %vm334_vm6 = vcmp.gt.f32.partialorder %v270_v17, 0.0  ;;  %v398_v25 = vmul.f32 0.2, %v270_v17  ;;  %vm335_vm7 = vcmp.gt.f32.partialorder %v271_v18, 0.0 }
  0x5c   :  { %780 = vst.msk [vmem:[%s1611_s3 + $0xbc] sm:$0xf] %vm732_vm0, %v914_v20  ;;  %v461_v26 = vsel %vm333_vm5, %v269_v15, %v397_v22  ;;  %v399_v27 = vmul.f32 0.2, %v271_v18  ;;  %v1041_v33 = vunpack.c.l.bf16 %v1085_v23  ;;  %v1042_v34 = vunpack.c.h.bf16 %v1085_v23 }
  0x5d   :  { %781 = vst.msk [vmem:[%s1611_s3 + $0xc0] sm:$0xf] %vm732_vm0, %v915_v24  ;;  %v916_v31 = vpack.c.bf16 %v461_v26, %v461_v26  ;;  %v462_v32 = vsel %vm334_vm6, %v270_v17, %v398_v25  ;;  %v272_v37 = vadd.f32 %v1132_v7, %v201_v28  ;;  %v202_v38 = vmul.f32 %v1038_v29, %v1118_v1 }
  0x5e   :  { %v917_v35 = vpack.c.bf16 %v462_v32, %v462_v32  ;;  %v463_v36 = vsel %vm335_vm7, %v271_v18, %v399_v27  ;;  %v203_v41 = vmul.f32 %v1041_v33, %v1118_v1  ;;  %v204_v42 = vmul.f32 %v1042_v34, %v1118_v1  ;;  %v1090_v27 = vld [vmem:[%s1609_s1] ss:$0 sm:$0xff] }
  0x5f   :  { %782 = vst.msk [vmem:[%s1611_s3 + $0xc4] sm:$0xf] %vm732_vm0, %v916_v31  ;;  %v918_v40 = vpack.c.bf16 %v463_v36, %v463_v36  ;;  %v1045_v43 = vunpack.c.l.bf16 %v1086_v30  ;;  %vm336_vm8 = vcmp.gt.f32.partialorder %v272_v37, 0.0  ;;  %v400_v44 = vmul.f32 0.2, %v272_v37 }
  0x60   :  { %783 = vst.msk [vmem:[%s1611_s3 + $0xc8] sm:$0xf] %vm732_vm0, %v917_v35  ;;  %v273_v45 = vadd.f32 %v1132_v7, %v202_v38  ;;  %v1046_v46 = vunpack.c.h.bf16 %v1086_v30  ;;  %v274_v47 = vadd.f32 %v1132_v7, %v203_v41  ;;  %v275_v48 = vadd.f32 %v1132_v7, %v204_v42 }
  0x61   :  { %784 = vst.msk [vmem:[%s1611_s3 + $0xcc] sm:$0xf] %vm732_vm0, %v918_v40  ;;  %v205_v49 = vmul.f32 %v1045_v43, %v1118_v1  ;;  %v1049_v50 = vunpack.c.l.bf16 %v1087_v39  ;;  %v464_v51 = vsel %vm336_vm8, %v272_v37, %v400_v44  ;;  %v1050_v63 = vunpack.c.h.bf16 %v1087_v39 }
  0x62   :  { %vm337_vm9 = vcmp.gt.f32.partialorder %v273_v45, 0.0  ;;  %v401_v52 = vmul.f32 0.2, %v273_v45  ;;  %v206_v53 = vmul.f32 %v1046_v46, %v1118_v1  ;;  %v919_v54 = vpack.c.bf16 %v464_v51, %v464_v51 }
  0x63   :  { %vm338_vm10 = vcmp.gt.f32.partialorder %v274_v47, 0.0  ;;  %v402_v55 = vmul.f32 0.2, %v274_v47  ;;  %vm339_vm11 = vcmp.gt.f32.partialorder %v275_v48, 0.0  ;;  %v403_v57 = vmul.f32 0.2, %v275_v48 }
  0x64   :  { %v465_v56 = vsel %vm337_vm9, %v273_v45, %v401_v52  ;;  %v276_v58 = vadd.f32 %v1132_v7, %v205_v49  ;;  %v277_v59 = vadd.f32 %v1132_v7, %v206_v53  ;;  %785 = vst.msk [vmem:[%s1611_s3 + $0xd0] sm:$0xf] %vm732_vm0, %v919_v54  ;;  %v207_v62 = vmul.f32 %v1049_v50, %v1118_v1 }
  0x65   :  { %v920_v60 = vpack.c.bf16 %v465_v56, %v465_v56  ;;  %v466_v61 = vsel %vm338_vm10, %v274_v47, %v402_v55  ;;  %v467_v3 = vsel %vm339_vm11, %v275_v48, %v403_v57  ;;  %v208_v10 = vmul.f32 %v1050_v63, %v1118_v1 }
  0x66   :  { %v921_v2 = vpack.c.bf16 %v466_v61, %v466_v61  ;;  %vm340_vm12 = vcmp.gt.f32.partialorder %v276_v58, 0.0  ;;  %v404_v4 = vmul.f32 0.2, %v276_v58  ;;  %v922_v5 = vpack.c.bf16 %v467_v3, %v467_v3 }
  0x67   :  { %786 = vst.msk [vmem:[%s1611_s3 + $0xd4] sm:$0xf] %vm732_vm0, %v920_v60  ;;  %vm341_vm13 = vcmp.gt.f32.partialorder %v277_v59, 0.0  ;;  %v405_v6 = vmul.f32 0.2, %v277_v59  ;;  %v278_v8 = vadd.f32 %v1132_v7, %v207_v62  ;;  %v1053_v11 = vunpack.c.l.bf16 %v1088_v0 }
  0x68   :  { %787 = vst.msk [vmem:[%s1611_s3 + $0xd8] sm:$0xf] %vm732_vm0, %v921_v2  ;;  %v468_v9 = vsel %vm340_vm12, %v276_v58, %v404_v4  ;;  %v1054_v12 = vunpack.c.h.bf16 %v1088_v0  ;;  %788 = vst.msk [vmem:[%s1611_s3 + $0xdc] sm:$0xf] %vm732_vm0, %v922_v5  ;;  %v279_v18 = vadd.f32 %v1132_v7, %v208_v10  ;;  %v1057_v22 = vunpack.c.l.bf16 %v1089_v13 }
  0x69   :  { %v923_v14 = vpack.c.bf16 %v468_v9, %v468_v9  ;;  %v469_v15 = vsel %vm341_vm13, %v277_v59, %v405_v6  ;;  %vm342_vm14 = vcmp.gt.f32.partialorder %v278_v8, 0.0  ;;  %v406_v16 = vmul.f32 0.2, %v278_v8 }
  0x6a   :  { %v924_v17 = vpack.c.bf16 %v469_v15, %v469_v15  ;;  %v209_v19 = vmul.f32 %v1053_v11, %v1118_v1  ;;  %v210_v20 = vmul.f32 %v1054_v12, %v1118_v1  ;;  %v1058_v23 = vunpack.c.h.bf16 %v1089_v13 }
  0x6b   :  { %789 = vst.msk [vmem:[%s1611_s3 + $0xe0] sm:$0xf] %vm732_vm0, %v923_v14  ;;  %v470_v21 = vsel %vm342_vm14, %v278_v8, %v406_v16  ;;  %vm343_vm15 = vcmp.gt.f32.partialorder %v279_v18, 0.0  ;;  %v407_v25 = vmul.f32 0.2, %v279_v18  ;;  %v211_v28 = vmul.f32 %v1090_v27, %v1057_v22 }
  0x6c   :  { %790 = vst.msk [vmem:[%s1611_s3 + $0xe4] sm:$0xf] %vm732_vm0, %v924_v17  ;;  %v925_v24 = vpack.c.bf16 %v470_v21, %v470_v21  ;;  %v280_v26 = vadd.f32 %v1132_v7, %v209_v19  ;;  %v281_v1 = vadd.f32 %v1132_v7, %v210_v20  ;;  %v212_v29 = vmul.f32 %v1090_v27, %v1058_v23  ;;  %v1091_v7 = vld [vmem:[%s1610_s2] ss:$0 sm:$0xff] }
  0x6d   :  { %v471_v30 = vsel %vm343_vm15, %v279_v18, %v407_v25  ;;  %v282_v34 = vadd.f32 %v1091_v7, %v211_v28 }
  0x6e   :  { %791 = vst.msk [vmem:[%s1611_s3 + $0xe8] sm:$0xf] %vm732_vm0, %v925_v24  ;;  %vm344_vm1 = vcmp.gt.f32.partialorder %v280_v26, 0.0  ;;  %v408_v31 = vmul.f32 0.2, %v280_v26  ;;  %v926_v32 = vpack.c.bf16 %v471_v30, %v471_v30  ;;  %vm345_vm2 = vcmp.gt.f32.partialorder %v281_v1, 0.0 }
  0x6f   :  { %v409_v33 = vmul.f32 0.2, %v281_v1  ;;  %v283_v36 = vadd.f32 %v1091_v7, %v212_v29  ;;  %vm346_vm3 = vcmp.gt.f32.partialorder %v282_v34, 0.0  ;;  %v410_v39 = vmul.f32 0.2, %v282_v34 }
  0x70   :  { %v472_v35 = vsel %vm344_vm1, %v280_v26, %v408_v31  ;;  %792 = vst.msk [vmem:[%s1611_s3 + $0xec] sm:$0xf] %vm732_vm0, %v926_v32 }
  0x71   :  { %v927_v37 = vpack.c.bf16 %v472_v35, %v472_v35  ;;  %v473_v38 = vsel %vm345_vm2, %v281_v1, %v409_v33  ;;  %vm347_vm4 = vcmp.gt.f32.partialorder %v283_v36, 0.0  ;;  %v411_v41 = vmul.f32 0.2, %v283_v36 }
  0x72   :  { %v928_v40 = vpack.c.bf16 %v473_v38, %v473_v38  ;;  %v474_v42 = vsel %vm346_vm3, %v282_v34, %v410_v39 }
  0x73   :  { %793 = vst.msk [vmem:[%s1611_s3 + $0xf0] sm:$0xf] %vm732_vm0, %v927_v37  ;;  %v929_v43 = vpack.c.bf16 %v474_v42, %v474_v42  ;;  %v475_v44 = vsel %vm347_vm4, %v283_v36, %v411_v41 }
  0x74   :  { %794 = vst.msk [vmem:[%s1611_s3 + $0xf4] sm:$0xf] %vm732_vm0, %v928_v40  ;;  %v930_v45 = vpack.c.bf16 %v475_v44, %v475_v44 }
  0x75   :  { %795 = vst.msk [vmem:[%s1611_s3 + $0xf8] sm:$0xf] %vm732_vm0, %v929_v43 }
  0x76   :  { %796 = vst.msk [vmem:[%s1611_s3 + $0xfc] sm:$0xf] %vm732_vm0, %v930_v45 }

// kernel: netd_forward.12
= control target key start
LH: loop header
LB: loop body
LE: loop exit
PB: predicated region body
PF: predicated region fallthrough
CT: control target
= control target key end

     0   :  { %s455_s0 = inlined_call_operand.vmem [shape: bf16[128,128], index: 0, kind: input, shape index: {}]   ;;  %s456_s1 = inlined_call_operand.vmem [shape: f32[1,128], index: 1, kind: input, shape index: {}]   ;;  %s457_s2 = inlined_call_operand.vmem [shape: f32[1,128], index: 2, kind: input, shape index: {}]   ;;  %s458_s3 = inlined_call_operand.vmem [shape: bf16[128,128], index: 3, kind: output, shape index: {}]  }
   0x1   :  { %v259_v0 = vld [vmem:[%s455_s0] sm:$0xff]   ;;  %v330_v4 = vld [vmem:[%s455_s0 + $0x8] sm:$0xff]   ;;  %v331_v5 = vld [vmem:[%s455_s0 + $0x10] sm:$0xff]  }
   0x2   :  { %v370_v1 = vld [vmem:[%s456_s1] ss:$0 sm:$0xff]  ;;  %v260_v2 = vunpack.c.l.bf16 %v259_v0  ;;  %v261_v3 = vunpack.c.h.bf16 %v259_v0  ;;  %v332_v6 = vld [vmem:[%s455_s0 + $0x18] sm:$0xff]   ;;  %v264_v8 = vunpack.c.l.bf16 %v330_v4  ;;  %v265_v9 = vunpack.c.h.bf16 %v330_v4  ;;  %v334_v35 = vld [vmem:[%s455_s0 + $0x28] sm:$0xff]  }
   0x3   :  { %v384_v7 = vld [vmem:[%s457_s2] ss:$0 sm:$0xff]  ;;  %v268_v10 = vunpack.c.l.bf16 %v331_v5  ;;  %v269_v11 = vunpack.c.h.bf16 %v331_v5  ;;  %v272_v14 = vunpack.c.l.bf16 %v332_v6  ;;  %v273_v15 = vunpack.c.h.bf16 %v332_v6  ;;  %v335_v48 = vld [vmem:[%s455_s0 + $0x30] sm:$0xff]   ;;  %v336_v4 = vld [vmem:[%s455_s0 + $0x38] sm:$0xff]  }
   0x4   :  { %v53_v12 = vmul.f32 %v260_v2, %v370_v1  ;;  %v54_v13 = vmul.f32 %v261_v3, %v370_v1  ;;  %v55_v16 = vmul.f32 %v264_v8, %v370_v1  ;;  %v56_v17 = vmul.f32 %v265_v9, %v370_v1  ;;  %v333_v34 = vld [vmem:[%s455_s0 + $0x20] sm:$0xff]  }
   0x5   :  { %v57_v18 = vmul.f32 %v268_v10, %v370_v1  ;;  %v58_v19 = vmul.f32 %v269_v11, %v370_v1  ;;  %v59_v22 = vmul.f32 %v272_v14, %v370_v1  ;;  %v60_v23 = vmul.f32 %v273_v15, %v370_v1 }
   0x6   :  { %v76_v20 = vadd.f32 %v384_v7, %v53_v12  ;;  %v77_v21 = vadd.f32 %v384_v7, %v54_v13  ;;  %v78_v24 = vadd.f32 %v384_v7, %v55_v16  ;;  %v79_v25 = vadd.f32 %v384_v7, %v56_v17 }
   0x7   :  { %v80_v26 = vadd.f32 %v384_v7, %v57_v18  ;;  %v81_v27 = vadd.f32 %v384_v7, %v58_v19  ;;  %v82_v42 = vadd.f32 %v384_v7, %v59_v22  ;;  %v83_v43 = vadd.f32 %v384_v7, %v60_v23 }
   0x8   :  { %vm92_vm0 = vcmp.gt.f32.partialorder %v76_v20, 0.0  ;;  %vm93_vm1 = vcmp.gt.f32.partialorder %v77_v21, 0.0  ;;  %v108_v28 = vmul.f32 0.2, %v76_v20  ;;  %v109_v29 = vmul.f32 0.2, %v77_v21 }
   0x9   :  { %vm94_vm2 = vcmp.gt.f32.partialorder %v78_v24, 0.0  ;;  %vm95_vm3 = vcmp.gt.f32.partialorder %v79_v25, 0.0  ;;  %v110_v30 = vmul.f32 0.2, %v78_v24  ;;  %v111_v31 = vmul.f32 0.2, %v79_v25 }
   0xa   :  { %v124_v32 = vsel %vm92_vm0, %v76_v20, %v108_v28  ;;  %v125_v33 = vsel %vm93_vm1, %v77_v21, %v109_v29  ;;  %vm96_vm4 = vcmp.gt.f32.partialorder %v80_v26, 0.0  ;;  %vm97_vm5 = vcmp.gt.f32.partialorder %v81_v27, 0.0 }
   0xb   :  { %v293_v36 = vpack.c.bf16 %v125_v33, %v124_v32  ;;  %v126_v37 = vsel %vm94_vm2, %v78_v24, %v110_v30  ;;  %v127_v38 = vsel %vm95_vm3, %v79_v25, %v111_v31  ;;  %v112_v39 = vmul.f32 0.2, %v80_v26 }
   0xc   :  { %v298_v40 = vpack.c.bf16 %v127_v38, %v126_v37  ;;  %v113_v41 = vmul.f32 0.2, %v81_v27  ;;  %v276_v45 = vunpack.c.l.bf16 %v333_v34  ;;  %v277_v46 = vunpack.c.h.bf16 %v333_v34 }
   0xd   :  { %294 = vst [vmem:[%s458_s3] sm:$0xff] %v293_v36   ;;  %v128_v44 = vsel %vm96_vm4, %v80_v26, %v112_v39  ;;  %v280_v47 = vunpack.c.l.bf16 %v334_v35  ;;  %vm98_vm6 = vcmp.gt.f32.partialorder %v82_v42, 0.0  ;;  %vm99_vm7 = vcmp.gt.f32.partialorder %v83_v43, 0.0 }
   0xe   :  { %337 = vst [vmem:[%s458_s3 + $0x8] sm:$0xff] %v298_v40   ;;  %v129_v49 = vsel %vm97_vm5, %v81_v27, %v113_v41  ;;  %v114_v50 = vmul.f32 0.2, %v82_v42  ;;  %v115_v52 = vmul.f32 0.2, %v83_v43  ;;  %v61_v53 = vmul.f32 %v276_v45, %v370_v1 }
   0xf   :  { %v303_v51 = vpack.c.bf16 %v129_v49, %v128_v44  ;;  %v62_v54 = vmul.f32 %v277_v46, %v370_v1  ;;  %v281_v56 = vunpack.c.h.bf16 %v334_v35  ;;  %v63_v57 = vmul.f32 %v280_v47, %v370_v1 }
  0x10   :  { %v130_v55 = vsel %vm98_vm6, %v82_v42, %v114_v50  ;;  %v284_v58 = vunpack.c.l.bf16 %v335_v48  ;;  %v131_v59 = vsel %vm99_vm7, %v83_v43, %v115_v52  ;;  %v84_v60 = vadd.f32 %v384_v7, %v61_v53 }
  0x11   :  { %338 = vst [vmem:[%s458_s3 + $0x10] sm:$0xff] %v303_v51   ;;  %v85_v61 = vadd.f32 %v384_v7, %v62_v54  ;;  %v285_v62 = vunpack.c.h.bf16 %v335_v48  ;;  %v308_v63 = vpack.c.bf16 %v131_v59, %v130_v55  ;;  %v64_v0 = vmul.f32 %v281_v56, %v370_v1 }
  0x12   :  { %v86_v2 = vadd.f32 %v384_v7, %v63_v57  ;;  %v65_v3 = vmul.f32 %v284_v58, %v370_v1  ;;  %vm100_vm8 = vcmp.gt.f32.partialorder %v84_v60, 0.0  ;;  %v116_v5 = vmul.f32 0.2, %v84_v60 }
  0x13   :  { %vm101_vm9 = vcmp.gt.f32.partialorder %v85_v61, 0.0  ;;  %v117_v6 = vmul.f32 0.2, %v85_v61  ;;  %339 = vst [vmem:[%s458_s3 + $0x18] sm:$0xff] %v308_v63   ;;  %v87_v8 = vadd.f32 %v384_v7, %v64_v0  ;;  %v66_v10 = vmul.f32 %v285_v62, %v370_v1 }
  0x14   :  { %vm102_vm10 = vcmp.gt.f32.partialorder %v86_v2, 0.0  ;;  %v118_v9 = vmul.f32 0.2, %v86_v2  ;;  %v132_v11 = vsel %vm100_vm8, %v84_v60, %v116_v5  ;;  %v88_v13 = vadd.f32 %v384_v7, %v65_v3 }
  0x15   :  { %v133_v12 = vsel %vm101_vm9, %v85_v61, %v117_v6  ;;  %v288_v14 = vunpack.c.l.bf16 %v336_v4  ;;  %vm103_vm11 = vcmp.gt.f32.partialorder %v87_v8, 0.0  ;;  %v119_v16 = vmul.f32 0.2, %v87_v8 }
  0x16   :  { %v313_v15 = vpack.c.bf16 %v133_v12, %v132_v11  ;;  %v134_v17 = vsel %vm102_vm10, %v86_v2, %v118_v9  ;;  %v89_v18 = vadd.f32 %v384_v7, %v66_v10  ;;  %vm104_vm12 = vcmp.gt.f32.partialorder %v88_v13, 0.0 }
  0x17   :  { %v120_v19 = vmul.f32 0.2, %v88_v13  ;;  %v289_v20 = vunpack.c.h.bf16 %v336_v4  ;;  %v135_v21 = vsel %vm103_vm11, %v87_v8, %v119_v16  ;;  %v67_v22 = vmul.f32 %v288_v14, %v370_v1 }
  0x18   :  { %340 = vst [vmem:[%s458_s3 + $0x20] sm:$0xff] %v313_v15   ;;  %v318_v23 = vpack.c.bf16 %v135_v21, %v134_v17  ;;  %vm105_vm13 = vcmp.gt.f32.partialorder %v89_v18, 0.0  ;;  %v121_v24 = vmul.f32 0.2, %v89_v18 }
  0x19   :  { %v136_v25 = vsel %vm104_vm12, %v88_v13, %v120_v19  ;;  %v68_v26 = vmul.f32 %v289_v20, %v370_v1  ;;  %v90_v27 = vadd.f32 %v384_v7, %v67_v22 }
  0x1a   :  { %341 = vst [vmem:[%s458_s3 + $0x28] sm:$0xff] %v318_v23   ;;  %v137_v28 = vsel %vm105_vm13, %v89_v18, %v121_v24 }
  0x1b   :  { %v323_v29 = vpack.c.bf16 %v137_v28, %v136_v25  ;;  %v91_v30 = vadd.f32 %v384_v7, %v68_v26  ;;  %vm106_vm14 = vcmp.gt.f32.partialorder %v90_v27, 0.0  ;;  %v122_v31 = vmul.f32 0.2, %v90_v27 }
  0x1d   :  { %342 = vst [vmem:[%s458_s3 + $0x30] sm:$0xff] %v323_v29   ;;  %vm107_vm15 = vcmp.gt.f32.partialorder %v91_v30, 0.0  ;;  %v123_v32 = vmul.f32 0.2, %v91_v30  ;;  %v138_v33 = vsel %vm106_vm14, %v90_v27, %v122_v31 }
  0x1f   :  { %v139_v1 = vsel %vm107_vm15, %v91_v30, %v123_v32 }
  0x20   :  { %v328_v34 = vpack.c.bf16 %v139_v1, %v138_v33 }
  0x22   :  { %343 = vst [vmem:[%s458_s3 + $0x38] sm:$0xff] %v328_v34  }

// kernel: netd_forward.11
= control target key start
LH: loop header
LB: loop body
LE: loop exit
PB: predicated region body
PF: predicated region fallthrough
CT: control target
= control target key end

     0   :  { %s2465_s1 = inlined_call_operand.vmem [shape: bf16[1024,128], index: 1, kind: input, shape index: {}]   ;;  %s2466_s0 = inlined_call_operand.vmem [shape: bf16[128,1024], index: 0, kind: input, shape index: {}]   ;;  %s2467_s2 = inlined_call_operand.vmem [shape: bf16[128,128], index: 2, kind: output, shape index: {0}]   ;;  %s2468_s3 = inlined_call_operand.vmem [shape: f32[1,8,128], index: 3, kind: output, shape index: {1}]   ;;  %s2469_s4 = inlined_call_operand.vmem [shape: f32[1,8,128], index: 4, kind: output, shape index: {2}]  }
   0x1   :  { %v1914_v0 = vld [vmem:[%s2465_s1 + $0x40] sm:$0xff]   ;;  %v1918_v4 = vld [vmem:[%s2465_s1 + $0x48] sm:$0xff]   ;;  %v1922_v8 = vld [vmem:[%s2465_s1 + $0x50] sm:$0xff]  }
   0x2   :  { %v1915_v1 = vld [vmem:[%s2465_s1 + $0xc0] sm:$0xff]   ;;  %1658 = vmatprep.subr.bf16.mxu0 %v1914_v0  ;;  %v1919_v5 = vld [vmem:[%s2465_s1 + $0xc8] sm:$0xff]   ;;  %v1923_v9 = vld [vmem:[%s2465_s1 + $0xd0] sm:$0xff]  }
   0x3   :  { %v1916_v2 = vld [vmem:[%s2465_s1] sm:$0xff]   ;;  %1722 = vmatprep.subr.bf16.mxu1 %v1915_v1  ;;  %v1920_v6 = vld [vmem:[%s2465_s1 + $0x8] sm:$0xff]   ;;  %v1924_v10 = vld [vmem:[%s2465_s1 + $0x10] sm:$0xff]  }
   0x4   :  { %v1917_v3 = vld [vmem:[%s2465_s1 + $0x80] sm:$0xff]   ;;  %1659 = vmatpush3.bf16.msra.mxu0 %v1916_v2  ;;  %v1921_v7 = vld [vmem:[%s2465_s1 + $0x88] sm:$0xff]   ;;  %v1925_v11 = vld [vmem:[%s2465_s1 + $0x90] sm:$0xff]  }
   0x5   :  { %1723 = vmatpush3.bf16.msra.mxu1 %v1917_v3  ;;  %1660 = vmatprep.subr.bf16.mxu0 %v1918_v4  ;;  %v1926_v12 = vld [vmem:[%s2465_s1 + $0x58] sm:$0xff]   ;;  %v1930_v16 = vld [vmem:[%s2465_s1 + $0x60] sm:$0xff]   ;;  %v1934_v20 = vld [vmem:[%s2465_s1 + $0x68] sm:$0xff]  }
   0x6   :  { %1724 = vmatprep.subr.bf16.mxu1 %v1919_v5  ;;  %v1927_v13 = vld [vmem:[%s2465_s1 + $0xd8] sm:$0xff]   ;;  %v1931_v17 = vld [vmem:[%s2465_s1 + $0xe0] sm:$0xff]   ;;  %v1935_v21 = vld [vmem:[%s2465_s1 + $0xe8] sm:$0xff]  }
   0x7   :  { %v1928_v14 = vld [vmem:[%s2465_s1 + $0x18] sm:$0xff]   ;;  %v1932_v18 = vld [vmem:[%s2465_s1 + $0x20] sm:$0xff]   ;;  %v1936_v22 = vld [vmem:[%s2465_s1 + $0x28] sm:$0xff]  }
   0x8   :  { %1661 = vmatpush3.bf16.msra.mxu0 %v1920_v6  ;;  %v1929_v15 = vld [vmem:[%s2465_s1 + $0x98] sm:$0xff]   ;;  %v1933_v19 = vld [vmem:[%s2465_s1 + $0xa0] sm:$0xff]   ;;  %v1937_v23 = vld [vmem:[%s2465_s1 + $0xa8] sm:$0xff]  }
   0x9   :  { %1725 = vmatpush3.bf16.msra.mxu1 %v1921_v7  ;;  %1662 = vmatprep.subr.bf16.mxu0 %v1922_v8  ;;  %v1938_v24 = vld [vmem:[%s2465_s1 + $0x70] sm:$0xff]   ;;  %v1942_v28 = vld [vmem:[%s2465_s1 + $0x78] sm:$0xff]   ;;  %v15_v32 = vld [vmem:[%s2466_s0] sm:$0xff] }
   0xa   :  { %1726 = vmatprep.subr.bf16.mxu1 %v1923_v9  ;;  %v1939_v25 = vld [vmem:[%s2465_s1 + $0xf0] sm:$0xff]   ;;  %v1943_v29 = vld [vmem:[%s2465_s1 + $0xf8] sm:$0xff]   ;;  %v19_v33 = vld [vmem:[%s2466_s0 + $0x20] sm:$0xff] }
   0xb   :  { %v1940_v26 = vld [vmem:[%s2465_s1 + $0x30] sm:$0xff]   ;;  %v1944_v30 = vld [vmem:[%s2465_s1 + $0x38] sm:$0xff]   ;;  %v16_v34 = vld [vmem:[%s2466_s0 + $0x8] sm:$0xff]  ;;  %v1451_v35 = vcombine.low %v15_v32, %v19_v33  ;;  %v1452_v36 = vcombine.high %v15_v32, %v19_v33 }
   0xc   :  { %1663 = vmatpush3.bf16.msra.mxu0 %v1924_v10  ;;  %v1941_v27 = vld [vmem:[%s2465_s1 + $0xb0] sm:$0xff]   ;;  %v1945_v31 = vld [vmem:[%s2465_s1 + $0xb8] sm:$0xff]   ;;  %v20_v37 = vld [vmem:[%s2466_s0 + $0x28] sm:$0xff] }
   0xd   :  { %1727 = vmatpush3.bf16.msra.mxu1 %v1925_v11  ;;  %1664 = vmatprep.subr.bf16.mxu0 %v1926_v12  ;;  %v1453_v38 = vcombine.low %v16_v34, %v20_v37  ;;  %v1454_v39 = vcombine.high %v16_v34, %v20_v37  ;;  %v1946_v40 = vld [vmem:[%s2465_s1 + $0x140] sm:$0xff]   ;;  %v24_v47 = vld [vmem:[%s2466_s0 + $0x48] sm:$0xff]  ;;  %v1954_v62 = vld [vmem:[%s2465_s1 + $0x150] sm:$0xff]  }
   0xe   :  { %1728 = vmatprep.subr.bf16.mxu1 %v1927_v13  ;;  %943 = vmatprep.mubr.bf16.mxu0 %v1452_v36  ;;  %v1947_v41 = vld [vmem:[%s2465_s1 + $0x100] sm:$0xff]   ;;  %v28_v48 = vld [vmem:[%s2466_s0 + $0x68] sm:$0xff]  ;;  %v1955_v63 = vld [vmem:[%s2465_s1 + $0x110] sm:$0xff]  }
   0xf   :  { %1040 = vmatprep.mubr.bf16.mxu1 %v1454_v39  ;;  %v1948_v42 = vld [vmem:[%s2465_s1 + $0x1c0] sm:$0xff]   ;;  %v1462_v49 = vcombine.high %v24_v47, %v28_v48  ;;  %v1950_v50 = vld [vmem:[%s2465_s1 + $0x148] sm:$0xff]   ;;  %v1461_v53 = vcombine.low %v24_v47, %v28_v48  ;;  %v1956_v0 = vld [vmem:[%s2465_s1 + $0x1d0] sm:$0xff]  }
  0x10   :  { %1665 = vmatpush3.bf16.msra.mxu0 %v1928_v14  ;;  %v1949_v43 = vld [vmem:[%s2465_s1 + $0x180] sm:$0xff]   ;;  %v1951_v52 = vld [vmem:[%s2465_s1 + $0x108] sm:$0xff]   ;;  %v1957_v1 = vld [vmem:[%s2465_s1 + $0x190] sm:$0xff]  }
  0x11   :  { %1729 = vmatpush3.bf16.msra.mxu1 %v1929_v15  ;;  %1666 = vmatprep.subr.bf16.mxu0 %v1930_v16  ;;  %v23_v44 = vld [vmem:[%s2466_s0 + $0x40] sm:$0xff]  ;;  %v1952_v54 = vld [vmem:[%s2465_s1 + $0x1c8] sm:$0xff]   ;;  %v1958_v10 = vld [vmem:[%s2465_s1 + $0x158] sm:$0xff]  }
  0x12   :  { %1730 = vmatprep.subr.bf16.mxu1 %v1931_v17  ;;  %v27_v45 = vld [vmem:[%s2466_s0 + $0x60] sm:$0xff]  ;;  %v1953_v55 = vld [vmem:[%s2465_s1 + $0x188] sm:$0xff]   ;;  %v1959_v11 = vld [vmem:[%s2465_s1 + $0x118] sm:$0xff]  }
  0x13   :  { %v1460_v46 = vcombine.high %v23_v44, %v27_v45  ;;  %v1459_v51 = vcombine.low %v23_v44, %v27_v45  ;;  %v31_v56 = vld [vmem:[%s2466_s0 + $0x80] sm:$0xff]  ;;  %v32_v58 = vld [vmem:[%s2466_s0 + $0x88] sm:$0xff]  ;;  %v1960_v12 = vld [vmem:[%s2465_s1 + $0x1d8] sm:$0xff]  }
  0x14   :  { %1667 = vmatpush3.bf16.msra.mxu0 %v1932_v18  ;;  %v35_v57 = vld [vmem:[%s2466_s0 + $0xa0] sm:$0xff]  ;;  %v36_v59 = vld [vmem:[%s2466_s0 + $0xa8] sm:$0xff]  ;;  %v1961_v13 = vld [vmem:[%s2465_s1 + $0x198] sm:$0xff]  }
  0x15   :  { %1731 = vmatpush3.bf16.msra.mxu1 %v1933_v19  ;;  %1668 = vmatprep.subr.bf16.mxu0 %v1934_v20  ;;  %v1468_v60 = vcombine.high %v31_v56, %v35_v57  ;;  %v1470_v61 = vcombine.high %v32_v58, %v36_v59  ;;  %v1467_v2 = vcombine.low %v31_v56, %v35_v57  ;;  %v39_v3 = vld [vmem:[%s2466_s0 + $0xc0] sm:$0xff]  ;;  %v40_v5 = vld [vmem:[%s2466_s0 + $0xc8] sm:$0xff]  ;;  %v1971_v39 = vld [vmem:[%s2465_s1 + $0x130] sm:$0xff]  }
  0x16   :  { %1732 = vmatprep.subr.bf16.mxu1 %v1935_v21  ;;  %v43_v4 = vld [vmem:[%s2466_s0 + $0xe0] sm:$0xff]  ;;  %v1469_v6 = vcombine.low %v32_v58, %v36_v59  ;;  %v44_v8 = vld [vmem:[%s2466_s0 + $0xe8] sm:$0xff]  ;;  %v1975_v48 = vld [vmem:[%s2465_s1 + $0x138] sm:$0xff]  }
  0x17   :  { %v1476_v7 = vcombine.high %v39_v3, %v43_v4  ;;  %v1478_v9 = vcombine.high %v40_v5, %v44_v8  ;;  %v47_v14 = vld [vmem:[%s2466_s0 + $0x100] sm:$0xff]  ;;  %v48_v16 = vld [vmem:[%s2466_s0 + $0x108] sm:$0xff]  ;;  %v1475_v19 = vcombine.low %v39_v3, %v43_v4  ;;  %v1477_v21 = vcombine.low %v40_v5, %v44_v8  ;;  %v26_v8 = vld [vmem:[%s2466_s0 + $0x58] sm:$0xff] }
  0x18   :  { %1669 = vmatpush3.bf16.msra.mxu0 %v1936_v22  ;;  %v51_v15 = vld [vmem:[%s2466_s0 + $0x120] sm:$0xff]  ;;  %v52_v17 = vld [vmem:[%s2466_s0 + $0x128] sm:$0xff] }
  0x19   :  { %1733 = vmatpush3.bf16.msra.mxu1 %v1937_v23  ;;  %1670 = vmatprep.subr.bf16.mxu0 %v1938_v24  ;;  %v1962_v18 = vld [vmem:[%s2465_s1 + $0x160] sm:$0xff]   ;;  %v1484_v22 = vcombine.high %v47_v14, %v51_v15  ;;  %v1486_v24 = vcombine.high %v48_v16, %v52_v17  ;;  %v1968_v32 = vld [vmem:[%s2465_s1 + $0x1e8] sm:$0xff]   ;;  %v1483_v34 = vcombine.low %v47_v14, %v51_v15  ;;  %v33_v14 = vld [vmem:[%s2466_s0 + $0x90] sm:$0xff] }
  0x1a   :  { %1734 = vmatprep.subr.bf16.mxu1 %v1939_v25  ;;  %v1963_v20 = vld [vmem:[%s2465_s1 + $0x120] sm:$0xff]   ;;  %v1969_v33 = vld [vmem:[%s2465_s1 + $0x1a8] sm:$0xff]   ;;  %v37_v15 = vld [vmem:[%s2466_s0 + $0xb0] sm:$0xff] }
  0x1b   :  { %v1964_v23 = vld [vmem:[%s2465_s1 + $0x1e0] sm:$0xff]   ;;  %v64_v44 = vld [vmem:[%s2466_s0 + $0x188] sm:$0xff] }
  0x1c   :  { %1671 = vmatpush3.bf16.msra.mxu0 %v1940_v26  ;;  %v1965_v25 = vld [vmem:[%s2465_s1 + $0x1a0] sm:$0xff]   ;;  %v68_v45 = vld [vmem:[%s2466_s0 + $0x1a8] sm:$0xff] }
  0x1d   :  { %1735 = vmatpush3.bf16.msra.mxu1 %v1941_v27  ;;  %1672 = vmatprep.subr.bf16.mxu0 %v1942_v28  ;;  %v55_v26 = vld [vmem:[%s2466_s0 + $0x140] sm:$0xff]  ;;  %v1966_v28 = vld [vmem:[%s2465_s1 + $0x168] sm:$0xff]   ;;  %v1501_v59 = vcombine.low %v64_v44, %v68_v45 }
  0x1e   :  { %1736 = vmatprep.subr.bf16.mxu1 %v1943_v29  ;;  %v59_v27 = vld [vmem:[%s2466_s0 + $0x160] sm:$0xff]  ;;  %v56_v29 = vld [vmem:[%s2466_s0 + $0x148] sm:$0xff] }
  0x1f   :  { %v1492_v36 = vcombine.high %v55_v26, %v59_v27  ;;  %v1491_v47 = vcombine.low %v55_v26, %v59_v27  ;;  %v72_v56 = vld [vmem:[%s2466_s0 + $0x1c8] sm:$0xff]  ;;  %v1471_v26 = vcombine.low %v33_v14, %v37_v15 }
  0x20   :  { %1673 = vmatpush3.bf16.msra.mxu0 %v1944_v30  ;;  %v60_v30 = vld [vmem:[%s2466_s0 + $0x168] sm:$0xff] }
  0x21   :  { %1737 = vmatpush3.bf16.msra.mxu1 %v1945_v31  ;;  %1786 = vmatprep.subr.bf16.mxu0 %v1946_v40  ;;  %v1967_v31 = vld [vmem:[%s2465_s1 + $0x128] sm:$0xff]   ;;  %v1494_v37 = vcombine.high %v56_v29, %v60_v30  ;;  %v1972_v40 = vld [vmem:[%s2465_s1 + $0x1f0] sm:$0xff]  }
  0x22   :  { %1850 = vmatprep.subr.bf16.mxu1 %v1948_v42  ;;  %v67_v42 = vld [vmem:[%s2466_s0 + $0x1a0] sm:$0xff]  ;;  %v76_v57 = vld [vmem:[%s2466_s0 + $0x1e8] sm:$0xff] }
  0x23   :  { %944 = vmatmul.mubr.bf16.vlgmr.msra.gmra.mrb[0].mxu0 %v1451_v35  ;;  %v1485_v35 = vcombine.low %v48_v16, %v52_v17  ;;  %v1509_v3 = vcombine.low %v72_v56, %v76_v57  ;;  %v34_v16 = vld [vmem:[%s2466_s0 + $0x98] sm:$0xff] }
  0x24   :  { %1041 = vmatmul.mubr.bf16.vlgmr.msra.gmra.mrb[0].mxu1 %v1453_v38  ;;  %1787 = vmatpush3.bf16.msra.mxu0 %v1947_v41  ;;  %v1970_v38 = vld [vmem:[%s2465_s1 + $0x170] sm:$0xff]   ;;  %v63_v41 = vld [vmem:[%s2466_s0 + $0x180] sm:$0xff]  ;;  %v38_v17 = vld [vmem:[%s2466_s0 + $0xb8] sm:$0xff] }
  0x25   :  { %1851 = vmatpush3.bf16.msra.mxu1 %v1949_v43  ;;  %951 = vmatprep.mubr.bf16.mxu0 %v1460_v46  ;;  %v1973_v43 = vld [vmem:[%s2465_s1 + $0x1b0] sm:$0xff]   ;;  %v1974_v46 = vld [vmem:[%s2465_s1 + $0x178] sm:$0xff]   ;;  %v1499_v58 = vcombine.low %v63_v41, %v67_v42  ;;  %v1473_v27 = vcombine.low %v34_v16, %v38_v17 }
  0x26   :  { %1048 = vmatprep.mubr.bf16.mxu1 %v1462_v49  ;;  %1788 = vmatprep.subr.bf16.mxu0 %v1950_v50  ;;  %v1493_v49 = vcombine.low %v56_v29, %v60_v30  ;;  %v1500_v50 = vcombine.high %v63_v41, %v67_v42  ;;  %v49_v30 = vld [vmem:[%s2466_s0 + $0x110] sm:$0xff]  ;;  %v62_v41 = vld [vmem:[%s2466_s0 + $0x178] sm:$0xff] }
  0x27   :  { %1852 = vmatprep.subr.bf16.mxu1 %v1952_v54  ;;  %v71_v54 = vld [vmem:[%s2466_s0 + $0x1c0] sm:$0xff] }
  0x28   :  { %1789 = vmatpush3.bf16.msra.mxu0 %v1951_v52  ;;  %v1502_v52 = vcombine.high %v64_v44, %v68_v45 }
  0x29   :  { %1853 = vmatpush3.bf16.msra.mxu1 %v1953_v55  ;;  %1790 = vmatprep.subr.bf16.mxu0 %v1954_v62  ;;  %v75_v55 = vld [vmem:[%s2466_s0 + $0x1e0] sm:$0xff]  ;;  %v17_v62 = vld [vmem:[%s2466_s0 + $0x10] sm:$0xff] }
  0x2a   :  { %1854 = vmatprep.subr.bf16.mxu1 %v1956_v0  ;;  %v18_v0 = vld [vmem:[%s2466_s0 + $0x18] sm:$0xff] }
  0x2b   :  { %952 = vmatmul.mubr.bf16.gmra.mrb[4].mxu0 %v1459_v51  ;;  %v1976_v51 = vld [vmem:[%s2465_s1 + $0x1f8] sm:$0xff]  }
  0x2c   :  { %1049 = vmatmul.mubr.bf16.gmra.mrb[4].mxu1 %v1461_v53  ;;  %959 = vmatprep.mubr.bf16.mxu0 %v1468_v60  ;;  %v1977_v53 = vld [vmem:[%s2465_s1 + $0x1b8] sm:$0xff]   ;;  %v1508_v60 = vcombine.high %v71_v54, %v75_v55 }
  0x2d   :  { %1056 = vmatprep.mubr.bf16.mxu1 %v1470_v61  ;;  %1791 = vmatpush3.bf16.msra.mxu0 %v1955_v63  ;;  %v1510_v61 = vcombine.high %v72_v56, %v76_v57  ;;  %v21_v63 = vld [vmem:[%s2466_s0 + $0x30] sm:$0xff]  ;;  %v74_v56 = vld [vmem:[%s2466_s0 + $0x1d8] sm:$0xff] }
  0x2e   :  { %1855 = vmatpush3.bf16.msra.mxu1 %v1957_v1  ;;  %1792 = vmatprep.subr.bf16.mxu0 %v1958_v10  ;;  %v22_v1 = vld [vmem:[%s2466_s0 + $0x38] sm:$0xff]  ;;  %v1456_v4 = vcombine.high %v17_v62, %v21_v63  ;;  %v1455_v10 = vcombine.low %v17_v62, %v21_v63 }
  0x2f   :  { %1856 = vmatprep.subr.bf16.mxu1 %v1960_v12  ;;  %v1458_v5 = vcombine.high %v18_v0, %v22_v1  ;;  %v78_v57 = vld [vmem:[%s2466_s0 + $0x1f8] sm:$0xff] }
  0x30   :  { %v1513_v63 = vcombine.low %v74_v56, %v78_v57 }
  0x31   :  { %1793 = vmatpush3.bf16.msra.mxu0 %v1959_v11  ;;  %v1457_v11 = vcombine.low %v18_v0, %v22_v1 }
  0x32   :  { %1857 = vmatpush3.bf16.msra.mxu1 %v1961_v13  ;;  %1794 = vmatprep.subr.bf16.mxu0 %v1962_v18 }
  0x33   :  { %960 = vmatmul.mubr.bf16.gmra.mrb[8].mxu0 %v1467_v2  ;;  %1858 = vmatprep.subr.bf16.mxu1 %v1964_v23  ;;  %v1507_v2 = vcombine.low %v71_v54, %v75_v55  ;;  %v45_v23 = vld [vmem:[%s2466_s0 + $0xf0] sm:$0xff] }
  0x34   :  { %1057 = vmatmul.mubr.bf16.gmra.mrb[8].mxu1 %v1469_v6  ;;  %967 = vmatprep.mubr.bf16.mxu0 %v1476_v7  ;;  %v25_v6 = vld [vmem:[%s2466_s0 + $0x50] sm:$0xff] }
  0x35   :  { %1064 = vmatprep.mubr.bf16.mxu1 %v1478_v9  ;;  %1795 = vmatpush3.bf16.msra.mxu0 %v1963_v20  ;;  %v29_v7 = vld [vmem:[%s2466_s0 + $0x70] sm:$0xff]  ;;  %v30_v9 = vld [vmem:[%s2466_s0 + $0x78] sm:$0xff]  ;;  %v1472_v20 = vcombine.high %v33_v14, %v37_v15 }
  0x36   :  { %1859 = vmatpush3.bf16.msra.mxu1 %v1965_v25  ;;  %1796 = vmatprep.subr.bf16.mxu0 %v1966_v28  ;;  %v1464_v12 = vcombine.high %v25_v6, %v29_v7  ;;  %v1466_v13 = vcombine.high %v26_v8, %v30_v9  ;;  %v1463_v18 = vcombine.low %v25_v6, %v29_v7  ;;  %v46_v25 = vld [vmem:[%s2466_s0 + $0xf8] sm:$0xff]  ;;  %v73_v54 = vld [vmem:[%s2466_s0 + $0x1d0] sm:$0xff] }
  0x37   :  { %1860 = vmatprep.subr.bf16.mxu1 %v1968_v32  ;;  %v50_v32 = vld [vmem:[%s2466_s0 + $0x118] sm:$0xff]  ;;  %v77_v55 = vld [vmem:[%s2466_s0 + $0x1f0] sm:$0xff] }
  0x38   :  { %v1511_v62 = vcombine.low %v73_v54, %v77_v55 }
  0x39   :  { %1797 = vmatpush3.bf16.msra.mxu0 %v1967_v31  ;;  %v53_v31 = vld [vmem:[%s2466_s0 + $0x130] sm:$0xff] }
  0x3a   :  { %1861 = vmatpush3.bf16.msra.mxu1 %v1969_v33  ;;  %1798 = vmatprep.subr.bf16.mxu0 %v1970_v38  ;;  %v54_v33 = vld [vmem:[%s2466_s0 + $0x138] sm:$0xff]  ;;  %v57_v38 = vld [vmem:[%s2466_s0 + $0x150] sm:$0xff]  ;;  %v1487_v42 = vcombine.low %v49_v30, %v53_v31 }
  0x3b   :  { %968 = vmatmul.mubr.bf16.gmra.mrb[12].mxu0 %v1475_v19  ;;  %1862 = vmatprep.subr.bf16.mxu1 %v1972_v40  ;;  %v1465_v19 = vcombine.low %v26_v8, %v30_v9  ;;  %v58_v40 = vld [vmem:[%s2466_s0 + $0x158] sm:$0xff] }
  0x3c   :  { %1065 = vmatmul.mubr.bf16.gmra.mrb[12].mxu1 %v1477_v21  ;;  %975 = vmatprep.mubr.bf16.mxu0 %v1484_v22  ;;  %v1474_v21 = vcombine.high %v34_v16, %v38_v17  ;;  %v41_v22 = vld [vmem:[%s2466_s0 + $0xd0] sm:$0xff]  ;;  %v1498_v45 = vcombine.high %v58_v40, %v62_v41 }
  0x3d   :  { %1072 = vmatprep.mubr.bf16.mxu1 %v1486_v24  ;;  %1799 = vmatpush3.bf16.msra.mxu0 %v1971_v39  ;;  %v42_v24 = vld [vmem:[%s2466_s0 + $0xd8] sm:$0xff]  ;;  %v1480_v28 = vcombine.high %v41_v22, %v45_v23  ;;  %v61_v39 = vld [vmem:[%s2466_s0 + $0x170] sm:$0xff] }
  0x3e   :  { %1863 = vmatpush3.bf16.msra.mxu1 %v1973_v43  ;;  %1800 = vmatprep.subr.bf16.mxu0 %v1974_v46  ;;  %v1482_v29 = vcombine.high %v42_v24, %v46_v25  ;;  %v1489_v43 = vcombine.low %v50_v32, %v54_v33  ;;  %v1496_v44 = vcombine.high %v57_v38, %v61_v39  ;;  %v65_v46 = vld [vmem:[%s2466_s0 + $0x190] sm:$0xff] }
  0x3f   :  { %1864 = vmatprep.subr.bf16.mxu1 %v1976_v51  ;;  %v1497_v51 = vcombine.low %v58_v40, %v62_v41 }
  0x41   :  { %1801 = vmatpush3.bf16.msra.mxu0 %v1975_v48  ;;  %v66_v48 = vld [vmem:[%s2466_s0 + $0x198] sm:$0xff] }
  0x42   :  { %1865 = vmatpush3.bf16.msra.mxu1 %v1977_v53 }
  0x43   :  { %976 = vmatmul.mubr.bf16.gmra.mrb[16].mxu0 %v1483_v34  ;;  %v1479_v34 = vcombine.low %v41_v22, %v45_v23 }
  0x44   :  { %1073 = vmatmul.mubr.bf16.gmra.mrb[16].mxu1 %v1485_v35  ;;  %983 = vmatprep.mubr.bf16.mxu0 %v1492_v36  ;;  %v1481_v35 = vcombine.low %v42_v24, %v46_v25  ;;  %v1488_v36 = vcombine.high %v49_v30, %v53_v31 }
  0x45   :  { %1080 = vmatprep.mubr.bf16.mxu1 %v1494_v37  ;;  %v1490_v37 = vcombine.high %v50_v32, %v54_v33 }
  0x4b   :  { %984 = vmatmul.mubr.bf16.gmra.mrb[20].mxu0 %v1491_v47  ;;  %v69_v47 = vld [vmem:[%s2466_s0 + $0x1b0] sm:$0xff] }
  0x4c   :  { %1081 = vmatmul.mubr.bf16.gmra.mrb[20].mxu1 %v1493_v49  ;;  %991 = vmatprep.mubr.bf16.mxu0 %v1500_v50  ;;  %v70_v49 = vld [vmem:[%s2466_s0 + $0x1b8] sm:$0xff]  ;;  %v1495_v50 = vcombine.low %v57_v38, %v61_v39 }
  0x4d   :  { %1088 = vmatprep.mubr.bf16.mxu1 %v1502_v52  ;;  %v1504_v52 = vcombine.high %v65_v46, %v69_v47  ;;  %v1506_v53 = vcombine.high %v66_v48, %v70_v49 }
  0x53   :  { %992 = vmatmul.mubr.bf16.gmra.mrb[24].mxu0 %v1499_v58  ;;  %v1503_v58 = vcombine.low %v65_v46, %v69_v47 }
  0x54   :  { %1089 = vmatmul.mubr.bf16.gmra.mrb[24].mxu1 %v1501_v59  ;;  %999 = vmatprep.mubr.bf16.mxu0 %v1508_v60  ;;  %v1505_v59 = vcombine.low %v66_v48, %v70_v49  ;;  %v1512_v60 = vcombine.high %v73_v54, %v77_v55 }
  0x55   :  { %1096 = vmatprep.mubr.bf16.mxu1 %v1510_v61  ;;  %v1514_v61 = vcombine.high %v74_v56, %v78_v57 }
  0x5b   :  { %1000 = vmatmul.mubr.bf16.gmra.mrb[28].mxu0 %v1507_v2 }
  0x5c   :  { %1097 = vmatmul.mubr.bf16.gmra.mrb[28].mxu1 %v1509_v3  ;;  %1137 = vmatprep.mubr.bf16.mxu0 %v1456_v4 }
  0x5d   :  { %1234 = vmatprep.mubr.bf16.mxu1 %v1458_v5 }
  0x63   :  { %1138 = vmatmul.mubr.bf16.vlgmr.msra.gmra.mrb[32].mxu0 %v1455_v10 }
  0x64   :  { %1235 = vmatmul.mubr.bf16.vlgmr.msra.gmra.mrb[32].mxu1 %v1457_v11  ;;  %1145 = vmatprep.mubr.bf16.mxu0 %v1464_v12 }
  0x65   :  { %1242 = vmatprep.mubr.bf16.mxu1 %v1466_v13 }
  0x6b   :  { %1146 = vmatmul.mubr.bf16.gmra.mrb[36].mxu0 %v1463_v18 }
  0x6c   :  { %1243 = vmatmul.mubr.bf16.gmra.mrb[36].mxu1 %v1465_v19  ;;  %1153 = vmatprep.mubr.bf16.mxu0 %v1472_v20 }
  0x6d   :  { %1250 = vmatprep.mubr.bf16.mxu1 %v1474_v21 }
  0x73   :  { %1154 = vmatmul.mubr.bf16.gmra.mrb[40].mxu0 %v1471_v26 }
  0x74   :  { %1251 = vmatmul.mubr.bf16.gmra.mrb[40].mxu1 %v1473_v27  ;;  %1161 = vmatprep.mubr.bf16.mxu0 %v1480_v28 }
  0x75   :  { %1258 = vmatprep.mubr.bf16.mxu1 %v1482_v29 }
  0x7b   :  { %1162 = vmatmul.mubr.bf16.gmra.mrb[44].mxu0 %v1479_v34 }
  0x7c   :  { %1259 = vmatmul.mubr.bf16.gmra.mrb[44].mxu1 %v1481_v35  ;;  %1169 = vmatprep.mubr.bf16.mxu0 %v1488_v36 }
  0x7d   :  { %1266 = vmatprep.mubr.bf16.mxu1 %v1490_v37 }
  0x83   :  { %1170 = vmatmul.mubr.bf16.gmra.mrb[48].mxu0 %v1487_v42 }
  0x84   :  { %1267 = vmatmul.mubr.bf16.gmra.mrb[48].mxu1 %v1489_v43  ;;  %1177 = vmatprep.mubr.bf16.mxu0 %v1496_v44 }
  0x85   :  { %1274 = vmatprep.mubr.bf16.mxu1 %v1498_v45 }
  0x8b   :  { %1178 = vmatmul.mubr.bf16.gmra.mrb[52].mxu0 %v1495_v50 }
  0x8c   :  { %1275 = vmatmul.mubr.bf16.gmra.mrb[52].mxu1 %v1497_v51  ;;  %1185 = vmatprep.mubr.bf16.mxu0 %v1504_v52 }
  0x8d   :  { %1282 = vmatprep.mubr.bf16.mxu1 %v1506_v53 }
  0x93   :  { %1186 = vmatmul.mubr.bf16.gmra.mrb[56].mxu0 %v1503_v58 }
  0x94   :  { %1283 = vmatmul.mubr.bf16.gmra.mrb[56].mxu1 %v1505_v59  ;;  %1193 = vmatprep.mubr.bf16.mxu0 %v1512_v60 }
  0x95   :  { %1290 = vmatprep.mubr.bf16.mxu1 %v1514_v61 }
  0x9b   :  { %1194 = vmatmul.mubr.bf16.gmra.mrb[60].mxu0 %v1511_v62 }
  0x9c   :  { %1291 = vmatmul.mubr.bf16.gmra.mrb[60].mxu1 %v1513_v63 }
  0xf6   :  { %v1674_v0 = vpop.f32.mrb[0].mxu0 }
  0xf7   :  { %v1738_v1 = vpop.f32.mrb[0].mxu1  ;;  %v1675_v2 = vpop.f32.mrb[1].mxu0 }
  0xf8   :  { %v1676_v3 = vadd.f32 %v1675_v2, %v1674_v0  ;;  %v1739_v4 = vpop.f32.mrb[1].mxu1  ;;  %v1677_v5 = vpop.f32.mrb[2].mxu0 }
  0xf9   :  { %v1740_v6 = vadd.f32 %v1739_v4, %v1738_v1  ;;  %v1741_v7 = vpop.f32.mrb[2].mxu1  ;;  %v1678_v8 = vpop.f32.mrb[3].mxu0 }
  0xfa   :  { %v1679_v9 = vadd.f32 %v1678_v8, %v1677_v5  ;;  %v1742_v10 = vpop.f32.mrb[3].mxu1 }
  0xfb   :  { %v2387_v11 = vadd.f32 %v1740_v6, %v1676_v3  ;;  %v1743_v12 = vadd.f32 %v1742_v10, %v1741_v7 }
  0xfd   :  { %v2389_v13 = vadd.f32 %v1743_v12, %v1679_v9 }
  0xfe   :  { %v1680_v14 = vpop.f32.mrb[4].mxu0 }
  0xff   :  { %v1744_v15 = vpop.f32.mrb[4].mxu1  ;;  %v1681_v16 = vpop.f32.mrb[5].mxu0 }
 0x100   :  { %v1682_v17 = vadd.f32 %v1681_v16, %v1680_v14  ;;  %v1745_v18 = vpop.f32.mrb[5].mxu1  ;;  %v1683_v19 = vpop.f32.mrb[6].mxu0 }
 0x101   :  { %v1746_v20 = vadd.f32 %v1745_v18, %v1744_v15  ;;  %v1747_v21 = vpop.f32.mrb[6].mxu1  ;;  %v1684_v22 = vpop.f32.mrb[7].mxu0 }
 0x102   :  { %v1685_v23 = vadd.f32 %v1684_v22, %v1683_v19  ;;  %v1748_v24 = vpop.f32.mrb[7].mxu1 }
 0x103   :  { %v2391_v25 = vadd.f32 %v1746_v20, %v1682_v17  ;;  %v1749_v26 = vadd.f32 %v1748_v24, %v1747_v21 }
 0x105   :  { %v2393_v27 = vadd.f32 %v1749_v26, %v1685_v23 }
 0x106   :  { %v1686_v28 = vpop.f32.mrb[8].mxu0 }
 0x107   :  { %v1750_v29 = vpop.f32.mrb[8].mxu1  ;;  %v1687_v30 = vpop.f32.mrb[9].mxu0 }
 0x108   :  { %v1688_v31 = vadd.f32 %v1687_v30, %v1686_v28  ;;  %v1751_v32 = vpop.f32.mrb[9].mxu1  ;;  %v1689_v33 = vpop.f32.mrb[10].mxu0 }
 0x109   :  { %v1752_v34 = vadd.f32 %v1751_v32, %v1750_v29  ;;  %v1753_v35 = vpop.f32.mrb[10].mxu1  ;;  %v1690_v36 = vpop.f32.mrb[11].mxu0 }
 0x10a   :  { %v1691_v37 = vadd.f32 %v1690_v36, %v1689_v33  ;;  %v1754_v38 = vpop.f32.mrb[11].mxu1 }
 0x10b   :  { %v2395_v39 = vadd.f32 %v1752_v34, %v1688_v31  ;;  %v1755_v40 = vadd.f32 %v1754_v38, %v1753_v35 }
 0x10d   :  { %v2397_v41 = vadd.f32 %v1755_v40, %v1691_v37 }
 0x10e   :  { %v1692_v42 = vpop.f32.mrb[12].mxu0 }
 0x10f   :  { %v1756_v43 = vpop.f32.mrb[12].mxu1  ;;  %v1693_v44 = vpop.f32.mrb[13].mxu0 }
 0x110   :  { %v1694_v45 = vadd.f32 %v1693_v44, %v1692_v42  ;;  %v1757_v46 = vpop.f32.mrb[13].mxu1  ;;  %v1695_v47 = vpop.f32.mrb[14].mxu0 }
 0x111   :  { %v1758_v48 = vadd.f32 %v1757_v46, %v1756_v43  ;;  %v1759_v49 = vpop.f32.mrb[14].mxu1  ;;  %v1696_v50 = vpop.f32.mrb[15].mxu0 }
 0x112   :  { %v1697_v51 = vadd.f32 %v1696_v50, %v1695_v47  ;;  %v1760_v52 = vpop.f32.mrb[15].mxu1 }
 0x113   :  { %v2399_v53 = vadd.f32 %v1758_v48, %v1694_v45  ;;  %v1761_v54 = vadd.f32 %v1760_v52, %v1759_v49 }
 0x115   :  { %v2401_v55 = vadd.f32 %v1761_v54, %v1697_v51 }
 0x116   :  { %v1698_v56 = vpop.f32.mrb[16].mxu0 }
 0x117   :  { %v1762_v57 = vpop.f32.mrb[16].mxu1  ;;  %v1699_v58 = vpop.f32.mrb[17].mxu0 }
 0x118   :  { %v1700_v59 = vadd.f32 %v1699_v58, %v1698_v56  ;;  %v1763_v60 = vpop.f32.mrb[17].mxu1  ;;  %v1701_v61 = vpop.f32.mrb[18].mxu0 }
 0x119   :  { %v1764_v62 = vadd.f32 %v1763_v60, %v1762_v57  ;;  %v1765_v63 = vpop.f32.mrb[18].mxu1  ;;  %v1702_v0 = vpop.f32.mrb[19].mxu0 }
 0x11a   :  { %v1703_v1 = vadd.f32 %v1702_v0, %v1701_v61  ;;  %v1766_v2 = vpop.f32.mrb[19].mxu1 }
 0x11b   :  { %v2403_v3 = vadd.f32 %v1764_v62, %v1700_v59  ;;  %v1767_v4 = vadd.f32 %v1766_v2, %v1765_v63 }
 0x11d   :  { %v2405_v5 = vadd.f32 %v1767_v4, %v1703_v1 }
 0x11e   :  { %v1704_v6 = vpop.f32.mrb[20].mxu0 }
 0x11f   :  { %v1768_v7 = vpop.f32.mrb[20].mxu1  ;;  %v1705_v8 = vpop.f32.mrb[21].mxu0 }
 0x120   :  { %v1706_v9 = vadd.f32 %v1705_v8, %v1704_v6  ;;  %v1769_v10 = vpop.f32.mrb[21].mxu1  ;;  %v1707_v12 = vpop.f32.mrb[22].mxu0 }
 0x121   :  { %v1770_v14 = vadd.f32 %v1769_v10, %v1768_v7  ;;  %v1771_v15 = vpop.f32.mrb[22].mxu1  ;;  %v1708_v16 = vpop.f32.mrb[23].mxu0 }
 0x122   :  { %v1709_v17 = vadd.f32 %v1708_v16, %v1707_v12  ;;  %v1772_v18 = vpop.f32.mrb[23].mxu1 }
 0x123   :  { %v2407_v19 = vadd.f32 %v1770_v14, %v1706_v9  ;;  %v1773_v20 = vadd.f32 %v1772_v18, %v1771_v15 }
 0x125   :  { %v2409_v21 = vadd.f32 %v1773_v20, %v1709_v17 }
 0x126   :  { %v1710_v22 = vpop.f32.mrb[24].mxu0 }
 0x127   :  { %v1774_v23 = vpop.f32.mrb[24].mxu1  ;;  %v1711_v24 = vpop.f32.mrb[25].mxu0 }
 0x128   :  { %v1712_v26 = vadd.f32 %v1711_v24, %v1710_v22  ;;  %v1775_v28 = vpop.f32.mrb[25].mxu1  ;;  %v1713_v29 = vpop.f32.mrb[26].mxu0 }
 0x129   :  { %v1776_v30 = vadd.f32 %v1775_v28, %v1774_v23  ;;  %v1777_v31 = vpop.f32.mrb[26].mxu1  ;;  %v1714_v32 = vpop.f32.mrb[27].mxu0 }
 0x12a   :  { %v1715_v33 = vadd.f32 %v1714_v32, %v1713_v29  ;;  %v1778_v34 = vpop.f32.mrb[27].mxu1 }
 0x12b   :  { %v2411_v35 = vadd.f32 %v1776_v30, %v1712_v26  ;;  %v1779_v36 = vadd.f32 %v1778_v34, %v1777_v31 }
 0x12d   :  { %v2413_v37 = vadd.f32 %v1779_v36, %v1715_v33 }
 0x12e   :  { %v1716_v38 = vpop.f32.mrb[28].mxu0 }
 0x12f   :  { %v1780_v40 = vpop.f32.mrb[28].mxu1  ;;  %v1717_v42 = vpop.f32.mrb[29].mxu0 }
 0x130   :  { %v1718_v43 = vadd.f32 %v1717_v42, %v1716_v38  ;;  %v1781_v44 = vpop.f32.mrb[29].mxu1  ;;  %v1719_v45 = vpop.f32.mrb[30].mxu0 }
 0x131   :  { %v1782_v46 = vadd.f32 %v1781_v44, %v1780_v40  ;;  %v1783_v47 = vpop.f32.mrb[30].mxu1  ;;  %v1720_v48 = vpop.f32.mrb[31].mxu0 }
 0x132   :  { %v1721_v49 = vadd.f32 %v1720_v48, %v1719_v45  ;;  %v1784_v50 = vpop.f32.mrb[31].mxu1 }
 0x133   :  { %v2415_v51 = vadd.f32 %v1782_v46, %v1718_v43  ;;  %v1785_v52 = vadd.f32 %v1784_v50, %v1783_v47 }
 0x135   :  { %v2417_v54 = vadd.f32 %v1785_v52, %v1721_v49 }
 0x136   :  { %v1802_v56 = vpop.f32.mrb[32].mxu0 }
 0x137   :  { %v1866_v57 = vpop.f32.mrb[32].mxu1  ;;  %v1803_v58 = vpop.f32.mrb[33].mxu0 }
 0x138   :  { %v1804_v59 = vadd.f32 %v1803_v58, %v1802_v56  ;;  %v1867_v60 = vpop.f32.mrb[33].mxu1  ;;  %v1805_v61 = vpop.f32.mrb[34].mxu0 }
 0x139   :  { %v1868_v62 = vadd.f32 %v1867_v60, %v1866_v57  ;;  %v1869_v63 = vpop.f32.mrb[34].mxu1  ;;  %v1806_v0 = vpop.f32.mrb[35].mxu0 }
 0x13a   :  { %v1140_v1 = vadd.f32 %v1804_v59, %v2387_v11  ;;  %v1807_v2 = vadd.f32 %v1806_v0, %v1805_v61  ;;  %v1870_v4 = vpop.f32.mrb[35].mxu1 }
 0x13b   :  { %v1871_v6 = vadd.f32 %v1870_v4, %v1869_v63 }
 0x13c   :  { %v1237_v7 = vadd.f32 %v1868_v62, %v1140_v1  ;;  %v1143_v8 = vadd.f32 %v1807_v2, %v2389_v13 }
 0x13e   :  { %v1240_v9 = vadd.f32 %v1871_v6, %v1143_v8  ;;  %v1808_v10 = vpop.f32.mrb[36].mxu0  ;;  %v1400_v12 = vmul.f32 %v1237_v7, %v1237_v7 }
 0x13f   :  { %v1872_v14 = vpop.f32.mrb[36].mxu1  ;;  %v1809_v15 = vpop.f32.mrb[37].mxu0 }
 0x140   :  { %v1614_v16 = vpack.c.bf16 %v1240_v9, %v1237_v7  ;;  %v1379_v17 = vadd.f32 %v1240_v9, %v1237_v7  ;;  %v1401_v18 = vmul.f32 %v1240_v9, %v1240_v9  ;;  %v1810_v20 = vadd.f32 %v1809_v15, %v1808_v10  ;;  %v1873_v22 = vpop.f32.mrb[37].mxu1  ;;  %v1811_v23 = vpop.f32.mrb[38].mxu0 }
 0x141   :  { %v1874_v24 = vadd.f32 %v1873_v22, %v1872_v14  ;;  %v1875_v26 = vpop.f32.mrb[38].mxu1  ;;  %v1812_v11 = vpop.f32.mrb[39].mxu0 }
 0x142   :  { %1615 = vst [vmem:[%s2467_s2] sm:$0xff] %v1614_v16   ;;  %v1416_v28 = vadd.f32 %v1401_v18, %v1400_v12  ;;  %v1148_v13 = vadd.f32 %v1810_v20, %v2391_v25  ;;  %v1813_v29 = vadd.f32 %v1812_v11, %v1811_v23  ;;  %v1876_v30 = vpop.f32.mrb[39].mxu1 }
 0x143   :  { %v1877_v31 = vadd.f32 %v1876_v30, %v1875_v26 }
 0x144   :  { %v1245_v32 = vadd.f32 %v1874_v24, %v1148_v13  ;;  %v1151_v33 = vadd.f32 %v1813_v29, %v2393_v27 }
 0x146   :  { %v1380_v34 = vadd.f32 %v1379_v17, %v1245_v32  ;;  %v1402_v36 = vmul.f32 %v1245_v32, %v1245_v32  ;;  %v1248_v38 = vadd.f32 %v1877_v31, %v1151_v33  ;;  %v1814_v40 = vpop.f32.mrb[40].mxu0 }
 0x147   :  { %v1878_v42 = vpop.f32.mrb[40].mxu1  ;;  %v1815_v43 = vpop.f32.mrb[41].mxu0 }
 0x148   :  { %v1417_v44 = vadd.f32 %v1416_v28, %v1402_v36  ;;  %v1619_v45 = vpack.c.bf16 %v1248_v38, %v1245_v32  ;;  %v1381_v46 = vadd.f32 %v1380_v34, %v1248_v38  ;;  %v1403_v47 = vmul.f32 %v1248_v38, %v1248_v38  ;;  %v1879_v48 = vpop.f32.mrb[41].mxu1  ;;  %v1817_v49 = vpop.f32.mrb[42].mxu0 }
 0x149   :  { %v1816_v50 = vadd.f32 %v1815_v43, %v1814_v40  ;;  %v1880_v25 = vadd.f32 %v1879_v48, %v1878_v42  ;;  %v1881_v52 = vpop.f32.mrb[42].mxu1  ;;  %v1818_v56 = vpop.f32.mrb[43].mxu0 }
 0x14a   :  { %1651 = vst [vmem:[%s2467_s2 + $0x8] sm:$0xff] %v1619_v45   ;;  %v1418_v27 = vadd.f32 %v1417_v44, %v1403_v47  ;;  %v1819_v57 = vadd.f32 %v1818_v56, %v1817_v49  ;;  %v1882_v58 = vpop.f32.mrb[43].mxu1 }
 0x14b   :  { %v1156_v59 = vadd.f32 %v1816_v50, %v2395_v39  ;;  %v1883_v60 = vadd.f32 %v1882_v58, %v1881_v52 }
 0x14c   :  { %v1159_v61 = vadd.f32 %v1819_v57, %v2397_v41 }
 0x14d   :  { %v1253_v62 = vadd.f32 %v1880_v25, %v1156_v59 }
 0x14e   :  { %v1256_v63 = vadd.f32 %v1883_v60, %v1159_v61  ;;  %v1820_v0 = vpop.f32.mrb[44].mxu0 }
 0x14f   :  { %v1382_v1 = vadd.f32 %v1381_v46, %v1253_v62  ;;  %v1404_v2 = vmul.f32 %v1253_v62, %v1253_v62  ;;  %v1884_v4 = vpop.f32.mrb[44].mxu1  ;;  %v1821_v6 = vpop.f32.mrb[45].mxu0 }
 0x150   :  { %v1624_v7 = vpack.c.bf16 %v1256_v63, %v1253_v62  ;;  %v1405_v8 = vmul.f32 %v1256_v63, %v1256_v63  ;;  %v1822_v9 = vadd.f32 %v1821_v6, %v1820_v0  ;;  %v1885_v10 = vpop.f32.mrb[45].mxu1  ;;  %v1823_v12 = vpop.f32.mrb[46].mxu0 }
 0x151   :  { %v1419_v14 = vadd.f32 %v1418_v27, %v1404_v2  ;;  %v1383_v15 = vadd.f32 %v1382_v1, %v1256_v63  ;;  %v1886_v16 = vadd.f32 %v1885_v10, %v1884_v4  ;;  %v1887_v17 = vpop.f32.mrb[46].mxu1  ;;  %v1824_v39 = vpop.f32.mrb[47].mxu0 }
 0x152   :  { %1652 = vst [vmem:[%s2467_s2 + $0x10] sm:$0xff] %v1624_v7   ;;  %v1164_v41 = vadd.f32 %v1822_v9, %v2399_v53  ;;  %v1825_v18 = vadd.f32 %v1824_v39, %v1823_v12  ;;  %v1888_v20 = vpop.f32.mrb[47].mxu1 }
 0x153   :  { %v1420_v22 = vadd.f32 %v1419_v14, %v1405_v8  ;;  %v1889_v23 = vadd.f32 %v1888_v20, %v1887_v17 }
 0x154   :  { %v1261_v24 = vadd.f32 %v1886_v16, %v1164_v41  ;;  %v1167_v26 = vadd.f32 %v1825_v18, %v2401_v55 }
 0x156   :  { %v1384_v11 = vadd.f32 %v1383_v15, %v1261_v24  ;;  %v1406_v28 = vmul.f32 %v1261_v24, %v1261_v24  ;;  %v1264_v13 = vadd.f32 %v1889_v23, %v1167_v26  ;;  %v1826_v29 = vpop.f32.mrb[48].mxu0 }
 0x157   :  { %v1890_v30 = vpop.f32.mrb[48].mxu1  ;;  %v1827_v31 = vpop.f32.mrb[49].mxu0 }
 0x158   :  { %v1421_v32 = vadd.f32 %v1420_v22, %v1406_v28  ;;  %v1629_v33 = vpack.c.bf16 %v1264_v13, %v1261_v24  ;;  %v1385_v34 = vadd.f32 %v1384_v11, %v1264_v13  ;;  %v1407_v36 = vmul.f32 %v1264_v13, %v1264_v13  ;;  %v1891_v38 = vpop.f32.mrb[49].mxu1  ;;  %v1829_v40 = vpop.f32.mrb[50].mxu0 }
 0x159   :  { %v1828_v53 = vadd.f32 %v1827_v31, %v1826_v29  ;;  %v1892_v42 = vadd.f32 %v1891_v38, %v1890_v30  ;;  %v1893_v43 = vpop.f32.mrb[50].mxu1  ;;  %v1830_v44 = vpop.f32.mrb[51].mxu0 }
 0x15a   :  { %1653 = vst [vmem:[%s2467_s2 + $0x18] sm:$0xff] %v1629_v33   ;;  %v1422_v55 = vadd.f32 %v1421_v32, %v1407_v36  ;;  %v1831_v45 = vadd.f32 %v1830_v44, %v1829_v40  ;;  %v1894_v46 = vpop.f32.mrb[51].mxu1 }
 0x15b   :  { %v1172_v47 = vadd.f32 %v1828_v53, %v2403_v3  ;;  %v1895_v48 = vadd.f32 %v1894_v46, %v1893_v43 }
 0x15c   :  { %v1175_v49 = vadd.f32 %v1831_v45, %v2405_v5 }
 0x15d   :  { %v1269_v50 = vadd.f32 %v1892_v42, %v1172_v47 }
 0x15e   :  { %v1272_v25 = vadd.f32 %v1895_v48, %v1175_v49  ;;  %v1832_v52 = vpop.f32.mrb[52].mxu0 }
 0x15f   :  { %v1386_v56 = vadd.f32 %v1385_v34, %v1269_v50  ;;  %v1408_v27 = vmul.f32 %v1269_v50, %v1269_v50  ;;  %v1896_v57 = vpop.f32.mrb[52].mxu1  ;;  %v1833_v58 = vpop.f32.mrb[53].mxu0 }
 0x160   :  { %v1634_v59 = vpack.c.bf16 %v1272_v25, %v1269_v50  ;;  %v1409_v60 = vmul.f32 %v1272_v25, %v1272_v25  ;;  %v1834_v61 = vadd.f32 %v1833_v58, %v1832_v52  ;;  %v1897_v62 = vpop.f32.mrb[53].mxu1  ;;  %v1835_v63 = vpop.f32.mrb[54].mxu0 }
 0x161   :  { %v1423_v0 = vadd.f32 %v1422_v55, %v1408_v27  ;;  %v1387_v1 = vadd.f32 %v1386_v56, %v1272_v25  ;;  %v1898_v2 = vadd.f32 %v1897_v62, %v1896_v57  ;;  %v1899_v4 = vpop.f32.mrb[54].mxu1  ;;  %v1836_v3 = vpop.f32.mrb[55].mxu0 }
 0x162   :  { %1654 = vst [vmem:[%s2467_s2 + $0x20] sm:$0xff] %v1634_v59   ;;  %v1180_v5 = vadd.f32 %v1834_v61, %v2407_v19  ;;  %v1837_v6 = vadd.f32 %v1836_v3, %v1835_v63  ;;  %v1900_v7 = vpop.f32.mrb[55].mxu1 }
 0x163   :  { %v1424_v8 = vadd.f32 %v1423_v0, %v1409_v60  ;;  %v1901_v9 = vadd.f32 %v1900_v7, %v1899_v4 }
 0x164   :  { %v1277_v10 = vadd.f32 %v1898_v2, %v1180_v5  ;;  %v1183_v12 = vadd.f32 %v1837_v6, %v2409_v21 }
 0x166   :  { %v1388_v14 = vadd.f32 %v1387_v1, %v1277_v10  ;;  %v1410_v15 = vmul.f32 %v1277_v10, %v1277_v10  ;;  %v1280_v16 = vadd.f32 %v1901_v9, %v1183_v12  ;;  %v1838_v17 = vpop.f32.mrb[56].mxu0 }
 0x167   :  { %v1902_v39 = vpop.f32.mrb[56].mxu1  ;;  %v1839_v41 = vpop.f32.mrb[57].mxu0 }
 0x168   :  { %v1425_v18 = vadd.f32 %v1424_v8, %v1410_v15  ;;  %v1639_v20 = vpack.c.bf16 %v1280_v16, %v1277_v10  ;;  %v1389_v22 = vadd.f32 %v1388_v14, %v1280_v16  ;;  %v1411_v23 = vmul.f32 %v1280_v16, %v1280_v16  ;;  %v1903_v24 = vpop.f32.mrb[57].mxu1  ;;  %v1841_v26 = vpop.f32.mrb[58].mxu0 }
 0x169   :  { %v1840_v19 = vadd.f32 %v1839_v41, %v1838_v17  ;;  %v1904_v11 = vadd.f32 %v1903_v24, %v1902_v39  ;;  %v1905_v28 = vpop.f32.mrb[58].mxu1  ;;  %v1842_v13 = vpop.f32.mrb[59].mxu0 }
 0x16a   :  { %1655 = vst [vmem:[%s2467_s2 + $0x28] sm:$0xff] %v1639_v20   ;;  %v1426_v21 = vadd.f32 %v1425_v18, %v1411_v23  ;;  %v1843_v29 = vadd.f32 %v1842_v13, %v1841_v26  ;;  %v1906_v30 = vpop.f32.mrb[59].mxu1 }
 0x16b   :  { %v1188_v31 = vadd.f32 %v1840_v19, %v2411_v35  ;;  %v1907_v32 = vadd.f32 %v1906_v30, %v1905_v28 }
 0x16c   :  { %v1191_v33 = vadd.f32 %v1843_v29, %v2413_v37 }
 0x16d   :  { %v1285_v34 = vadd.f32 %v1904_v11, %v1188_v31 }
 0x16e   :  { %v1288_v36 = vadd.f32 %v1907_v32, %v1191_v33  ;;  %v1844_v38 = vpop.f32.mrb[60].mxu0 }
 0x16f   :  { %v1390_v40 = vadd.f32 %v1389_v22, %v1285_v34  ;;  %v1412_v53 = vmul.f32 %v1285_v34, %v1285_v34  ;;  %v1908_v42 = vpop.f32.mrb[60].mxu1  ;;  %v1845_v43 = vpop.f32.mrb[61].mxu0 }
 0x170   :  { %v1644_v44 = vpack.c.bf16 %v1288_v36, %v1285_v34  ;;  %v1413_v55 = vmul.f32 %v1288_v36, %v1288_v36  ;;  %v1846_v45 = vadd.f32 %v1845_v43, %v1844_v38  ;;  %v1909_v46 = vpop.f32.mrb[61].mxu1  ;;  %v1847_v47 = vpop.f32.mrb[62].mxu0 }
 0x171   :  { %v1427_v48 = vadd.f32 %v1426_v21, %v1412_v53  ;;  %v1391_v49 = vadd.f32 %v1390_v40, %v1288_v36  ;;  %v1910_v50 = vadd.f32 %v1909_v46, %v1908_v42  ;;  %v1911_v25 = vpop.f32.mrb[62].mxu1  ;;  %v1848_v35 = vpop.f32.mrb[63].mxu0 }
 0x172   :  { %1656 = vst [vmem:[%s2467_s2 + $0x30] sm:$0xff] %v1644_v44   ;;  %v1196_v37 = vadd.f32 %v1846_v45, %v2415_v51  ;;  %v1849_v52 = vadd.f32 %v1848_v35, %v1847_v47  ;;  %v1912_v56 = vpop.f32.mrb[63].mxu1 }
 0x173   :  { %v1428_v27 = vadd.f32 %v1427_v48, %v1413_v55  ;;  %v1913_v57 = vadd.f32 %v1912_v56, %v1911_v25 }
 0x174   :  { %v1293_v58 = vadd.f32 %v1910_v50, %v1196_v37  ;;  %v1199_v59 = vadd.f32 %v1849_v52, %v2417_v54 }
 0x176   :  { %v1392_v60 = vadd.f32 %v1391_v49, %v1293_v58  ;;  %v1414_v61 = vmul.f32 %v1293_v58, %v1293_v58  ;;  %v1296_v62 = vadd.f32 %v1913_v57, %v1199_v59 }
 0x178   :  { %v1429_v63 = vadd.f32 %v1428_v27, %v1414_v61  ;;  %v1649_v0 = vpack.c.bf16 %v1296_v62, %v1293_v58  ;;  %v1393_v1 = vadd.f32 %v1392_v60, %v1296_v62  ;;  %v1415_v2 = vmul.f32 %v1296_v62, %v1296_v62 }
 0x17a   :  { %1657 = vst [vmem:[%s2467_s2 + $0x38] sm:$0xff] %v1649_v0   ;;  %v1394_v4 = vrot.slane %v1393_v1, 4  ;;  %v1430_v51 = vadd.f32 %v1429_v63, %v1415_v2 }
 0x17c   :  { %v1395_v3 = vadd.f32 %v1394_v4, %v1393_v1  ;;  %v1431_v5 = vrot.slane %v1430_v51, 4 }
 0x17e   :  { %v1396_v6 = vrot.slane %v1395_v3, 2  ;;  %v1432_v7 = vadd.f32 %v1431_v5, %v1430_v51 }
 0x180   :  { %v1397_v8 = vadd.f32 %v1396_v6, %v1395_v3  ;;  %v1433_v9 = vrot.slane %v1432_v7, 2 }
 0x182   :  { %v1398_v54 = vrot.slane %v1397_v8, 1  ;;  %v1434_v10 = vadd.f32 %v1433_v9, %v1432_v7 }
 0x184   :  { %v1399_v12 = vadd.f32 %v1398_v54, %v1397_v8  ;;  %v1435_v14 = vrot.slane %v1434_v10, 1 }
 0x186   :  { %v1436_v15 = vadd.f32 %v1435_v14, %v1434_v10  ;;  %1437 = vst [vmem:[%s2468_s3] sm:$0xff] %v1399_v12 }
 0x188   :  { %1438 = vst [vmem:[%s2469_s4] sm:$0xff] %v1436_v15 }

// kernel: netd_forward.13
= control target key start
LH: loop header
LB: loop body
LE: loop exit
PB: predicated region body
PF: predicated region fallthrough
CT: control target
= control target key end

     0   :  { %s3878_s15 = smov 0   ;;  %s3880_s16 = smov 0   ;;  %s4728_s0 = inlined_call_operand.vmem [shape: bf16[32,2048], index: 0, kind: input, shape index: {}]   ;;  %s4729_s1 = inlined_call_operand.vmem [shape: bf16[2048,256], index: 1, kind: input, shape index: {}]   ;;  %s4730_s2 = inlined_call_operand.vmem [shape: bf16[32,256], index: 2, kind: output, shape index: {0}]   ;;  %s4731_s3 = inlined_call_operand.vmem [shape: f32[1,8,256], index: 3, kind: output, shape index: {1}]   ;;  %s4732_s4 = inlined_call_operand.vmem [shape: f32[1,8,256], index: 4, kind: output, shape index: {2}]  }
   0x1   :  { %s3882_s17 = smov 0   ;;  %s3884_s18 = smov 0  }
   0x2   :  { %s3886_s19 = smov 0  }
   0x3 LB: > { %s24_s20 = sadd.s32 1, %s3847_s18  ;;  %s3226_s21 = sadd.s32 4294967295, %s3851_s19   ;;  %s3851_s19 = sphi %s3886_s19, %s15_s19   ;;  %s3847_s18 = sphi %s3884_s18, %s4737_s18   ;;  %s3843_s17 = sphi %s3882_s17, %s4736_s17   ;;  %s3839_s16 = sphi %s3880_s16, %s4735_s16   ;;  %s3835_s15 = sphi %s3878_s15, %s4734_s15  }
   0x4   : > { %p25_p0 = scmp.ge.s32.totalorder %s24_s20, 2  ;;  %p67_p1 = scmp.ne.s32.totalorder %s3839_s16, %s3835_s15 }
   0x5   : > { %p68_p2 = scmp.eq.s32.totalorder %s3851_s19, 0  ;;  %p99_p4 = scmp.eq.s32.totalorder %s3226_s21, 1 }
   0x6   : > { %s4739_s20 = smov (%p25_p0, %s24_s20), 0  ;;  %s60_s23 = sadd.s32 1, %s3839_s16 }
   0x7   : > { %p69_p3 = por %p68_p2, %p67_p1  ;;  %s57_s22 = ssub.s32 %s3847_s18, %s4739_s20 }
   0x8   : > { %p58_p5 = scmp.eq.s32.totalorder %s57_s22, 0  ;;  %p3913_p6 = por %p99_p4, %p67_p1 }
   0x9   : > { %p3230_p7 = scmp.ge.s32.totalorder %s3851_s19, 2 }
   0xa   : > { %s3918_s25 = scalar_select %p58_p5, %s3839_s16, %s60_s23  }
   0xb   : > { %187 = sbr.rel (%p3230_p7) target bundleno = 192 (0xc0), region = 20 }
  0x12   : > { %190 = sbr.rel (!%p69_p3) target bundleno = 192 (0xc0), region = 24  ;;  %s192_s26 = sand.u32 (%p69_p3), 1, %s3839_s16  }
  0x13   : > { %s3232_s27 = sshll.u32 (%p69_p3), %s3847_s18, 2  ;;  %s3231_s28 = sshll.u32 (%p69_p3), %s192_s26, 10 }
  0x14   : > { %s3926_s5 = scalar_lea.vmem (%p69_p3), %s4729_s1, %s3232_s27  ;;  %s3930_s6 = scalar_lea.vmem (%p69_p3), [#allocation2], %s3231_s28 }
  0x15   : > { %v212_v0 = vld [vmem:[%s3926_s5] sm:$0xf] (%p69_p3)  ;;  %v214_v1 = vld [vmem:[%s3926_s5 + $0x8] sm:$0xf] (%p69_p3)  ;;  %v216_v2 = vld [vmem:[%s3926_s5 + $0x10] sm:$0xf] (%p69_p3) }
  0x16   : > { %213 = vst [vmem:[%s3930_s6] sm:$0xf] (%p69_p3), %v212_v0  ;;  %215 = vst [vmem:[%s3930_s6 + $0x4] sm:$0xf] (%p69_p3), %v214_v1  ;;  %v218_v3 = vld [vmem:[%s3926_s5 + $0x18] sm:$0xf] (%p69_p3) }
  0x17   : > { %v220_v4 = vld [vmem:[%s3926_s5 + $0x20] sm:$0xf] (%p69_p3)  ;;  %217 = vst [vmem:[%s3930_s6 + $0x8] sm:$0xf] (%p69_p3), %v216_v2  ;;  %219 = vst [vmem:[%s3930_s6 + $0xc] sm:$0xf] (%p69_p3), %v218_v3 }
  0x18   : > { %221 = vst [vmem:[%s3930_s6 + $0x10] sm:$0xf] (%p69_p3), %v220_v4  ;;  %v222_v5 = vld [vmem:[%s3926_s5 + $0x28] sm:$0xf] (%p69_p3)  ;;  %v224_v6 = vld [vmem:[%s3926_s5 + $0x30] sm:$0xf] (%p69_p3) }
  0x19   : > { %v226_v7 = vld [vmem:[%s3926_s5 + $0x38] sm:$0xf]  ;;  %223 = vst [vmem:[%s3930_s6 + $0x14] sm:$0xf] %v222_v5  ;;  %225 = vst [vmem:[%s3930_s6 + $0x18] sm:$0xf] %v224_v6 }
  0x1a   : > { %227 = vst [vmem:[%s3930_s6 + $0x1c] sm:$0xf] %v226_v7  ;;  %v228_v8 = vld [vmem:[%s3926_s5 + $0x40] sm:$0xf]  ;;  %v230_v9 = vld [vmem:[%s3926_s5 + $0x48] sm:$0xf] }
  0x1b   : > { %v232_v10 = vld [vmem:[%s3926_s5 + $0x50] sm:$0xf]  ;;  %229 = vst [vmem:[%s3930_s6 + $0x20] sm:$0xf] %v228_v8  ;;  %231 = vst [vmem:[%s3930_s6 + $0x24] sm:$0xf] %v230_v9 }
  0x1c   : > { %233 = vst [vmem:[%s3930_s6 + $0x28] sm:$0xf] %v232_v10  ;;  %v234_v11 = vld [vmem:[%s3926_s5 + $0x58] sm:$0xf]  ;;  %v236_v12 = vld [vmem:[%s3926_s5 + $0x60] sm:$0xf] }
  0x1d   : > { %v238_v13 = vld [vmem:[%s3926_s5 + $0x68] sm:$0xf]  ;;  %235 = vst [vmem:[%s3930_s6 + $0x2c] sm:$0xf] %v234_v11  ;;  %237 = vst [vmem:[%s3930_s6 + $0x30] sm:$0xf] %v236_v12 }
  0x1e   : > { %239 = vst [vmem:[%s3930_s6 + $0x34] sm:$0xf] %v238_v13  ;;  %v240_v14 = vld [vmem:[%s3926_s5 + $0x70] sm:$0xf]  ;;  %v242_v15 = vld [vmem:[%s3926_s5 + $0x78] sm:$0xf] }
  0x1f   : > { %v244_v16 = vld [vmem:[%s3926_s5 + $0x80] sm:$0xf]  ;;  %241 = vst [vmem:[%s3930_s6 + $0x38] sm:$0xf] %v240_v14  ;;  %243 = vst [vmem:[%s3930_s6 + $0x3c] sm:$0xf] %v242_v15 }
  0x20   : > { %245 = vst [vmem:[%s3930_s6 + $0x40] sm:$0xf] %v244_v16  ;;  %v246_v17 = vld [vmem:[%s3926_s5 + $0x88] sm:$0xf]  ;;  %v248_v18 = vld [vmem:[%s3926_s5 + $0x90] sm:$0xf] }
  0x21   : > { %v250_v19 = vld [vmem:[%s3926_s5 + $0x98] sm:$0xf]  ;;  %247 = vst [vmem:[%s3930_s6 + $0x44] sm:$0xf] %v246_v17  ;;  %249 = vst [vmem:[%s3930_s6 + $0x48] sm:$0xf] %v248_v18 }
  0x22   : > { %251 = vst [vmem:[%s3930_s6 + $0x4c] sm:$0xf] %v250_v19  ;;  %v252_v20 = vld [vmem:[%s3926_s5 + $0xa0] sm:$0xf]  ;;  %v254_v21 = vld [vmem:[%s3926_s5 + $0xa8] sm:$0xf] }
  0x23   : > { %v256_v22 = vld [vmem:[%s3926_s5 + $0xb0] sm:$0xf]  ;;  %253 = vst [vmem:[%s3930_s6 + $0x50] sm:$0xf] %v252_v20  ;;  %255 = vst [vmem:[%s3930_s6 + $0x54] sm:$0xf] %v254_v21 }
  0x24   : > { %257 = vst [vmem:[%s3930_s6 + $0x58] sm:$0xf] %v256_v22  ;;  %v258_v23 = vld [vmem:[%s3926_s5 + $0xb8] sm:$0xf]  ;;  %v260_v24 = vld [vmem:[%s3926_s5 + $0xc0] sm:$0xf] }
  0x25   : > { %v262_v25 = vld [vmem:[%s3926_s5 + $0xc8] sm:$0xf]  ;;  %259 = vst [vmem:[%s3930_s6 + $0x5c] sm:$0xf] %v258_v23  ;;  %261 = vst [vmem:[%s3930_s6 + $0x60] sm:$0xf] %v260_v24 }
  0x26   : > { %263 = vst [vmem:[%s3930_s6 + $0x64] sm:$0xf] %v262_v25  ;;  %v264_v26 = vld [vmem:[%s3926_s5 + $0xd0] sm:$0xf]  ;;  %v266_v27 = vld [vmem:[%s3926_s5 + $0xd8] sm:$0xf] }
  0x27   : > { %v268_v28 = vld [vmem:[%s3926_s5 + $0xe0] sm:$0xf]  ;;  %265 = vst [vmem:[%s3930_s6 + $0x68] sm:$0xf] %v264_v26  ;;  %267 = vst [vmem:[%s3930_s6 + $0x6c] sm:$0xf] %v266_v27 }
  0x28   : > { %269 = vst [vmem:[%s3930_s6 + $0x70] sm:$0xf] %v268_v28  ;;  %v270_v29 = vld [vmem:[%s3926_s5 + $0xe8] sm:$0xf]  ;;  %v272_v30 = vld [vmem:[%s3926_s5 + $0xf0] sm:$0xf] }
  0x29   : > { %v274_v31 = vld [vmem:[%s3926_s5 + $0xf8] sm:$0xf]  ;;  %271 = vst [vmem:[%s3930_s6 + $0x74] sm:$0xf] %v270_v29  ;;  %273 = vst [vmem:[%s3930_s6 + $0x78] sm:$0xf] %v272_v30 }
  0x2a   : > { %275 = vst [vmem:[%s3930_s6 + $0x7c] sm:$0xf] %v274_v31  ;;  %v276_v32 = vld [vmem:[%s3926_s5 + $0x100] sm:$0xf]  ;;  %v278_v33 = vld [vmem:[%s3926_s5 + $0x108] sm:$0xf] }
  0x2b   : > { %v280_v34 = vld [vmem:[%s3926_s5 + $0x110] sm:$0xf]  ;;  %277 = vst [vmem:[%s3930_s6 + $0x80] sm:$0xf] %v276_v32  ;;  %279 = vst [vmem:[%s3930_s6 + $0x84] sm:$0xf] %v278_v33 }
  0x2c   : > { %281 = vst [vmem:[%s3930_s6 + $0x88] sm:$0xf] %v280_v34  ;;  %v282_v35 = vld [vmem:[%s3926_s5 + $0x118] sm:$0xf]  ;;  %v284_v36 = vld [vmem:[%s3926_s5 + $0x120] sm:$0xf] }
  0x2d   : > { %v286_v37 = vld [vmem:[%s3926_s5 + $0x128] sm:$0xf]  ;;  %283 = vst [vmem:[%s3930_s6 + $0x8c] sm:$0xf] %v282_v35  ;;  %285 = vst [vmem:[%s3930_s6 + $0x90] sm:$0xf] %v284_v36 }
  0x2e   : > { %287 = vst [vmem:[%s3930_s6 + $0x94] sm:$0xf] %v286_v37  ;;  %v288_v38 = vld [vmem:[%s3926_s5 + $0x130] sm:$0xf]  ;;  %v290_v39 = vld [vmem:[%s3926_s5 + $0x138] sm:$0xf] }
  0x2f   : > { %v292_v40 = vld [vmem:[%s3926_s5 + $0x140] sm:$0xf]  ;;  %289 = vst [vmem:[%s3930_s6 + $0x98] sm:$0xf] %v288_v38  ;;  %291 = vst [vmem:[%s3930_s6 + $0x9c] sm:$0xf] %v290_v39 }
  0x30   : > { %293 = vst [vmem:[%s3930_s6 + $0xa0] sm:$0xf] %v292_v40  ;;  %v294_v41 = vld [vmem:[%s3926_s5 + $0x148] sm:$0xf]  ;;  %v296_v42 = vld [vmem:[%s3926_s5 + $0x150] sm:$0xf] }
  0x31   : > { %v298_v43 = vld [vmem:[%s3926_s5 + $0x158] sm:$0xf]  ;;  %295 = vst [vmem:[%s3930_s6 + $0xa4] sm:$0xf] %v294_v41  ;;  %297 = vst [vmem:[%s3930_s6 + $0xa8] sm:$0xf] %v296_v42 }
  0x32   : > { %299 = vst [vmem:[%s3930_s6 + $0xac] sm:$0xf] %v298_v43  ;;  %v300_v44 = vld [vmem:[%s3926_s5 + $0x160] sm:$0xf]  ;;  %v302_v45 = vld [vmem:[%s3926_s5 + $0x168] sm:$0xf] }
  0x33   : > { %v304_v46 = vld [vmem:[%s3926_s5 + $0x170] sm:$0xf]  ;;  %301 = vst [vmem:[%s3930_s6 + $0xb0] sm:$0xf] %v300_v44  ;;  %303 = vst [vmem:[%s3930_s6 + $0xb4] sm:$0xf] %v302_v45 }
  0x34   : > { %305 = vst [vmem:[%s3930_s6 + $0xb8] sm:$0xf] %v304_v46  ;;  %v306_v47 = vld [vmem:[%s3926_s5 + $0x178] sm:$0xf]  ;;  %v308_v48 = vld [vmem:[%s3926_s5 + $0x180] sm:$0xf] }
  0x35   : > { %v310_v49 = vld [vmem:[%s3926_s5 + $0x188] sm:$0xf]  ;;  %307 = vst [vmem:[%s3930_s6 + $0xbc] sm:$0xf] %v306_v47  ;;  %309 = vst [vmem:[%s3930_s6 + $0xc0] sm:$0xf] %v308_v48 }
  0x36   : > { %311 = vst [vmem:[%s3930_s6 + $0xc4] sm:$0xf] %v310_v49  ;;  %v312_v50 = vld [vmem:[%s3926_s5 + $0x190] sm:$0xf]  ;;  %v314_v51 = vld [vmem:[%s3926_s5 + $0x198] sm:$0xf] }
  0x37   : > { %v316_v52 = vld [vmem:[%s3926_s5 + $0x1a0] sm:$0xf]  ;;  %313 = vst [vmem:[%s3930_s6 + $0xc8] sm:$0xf] %v312_v50  ;;  %315 = vst [vmem:[%s3930_s6 + $0xcc] sm:$0xf] %v314_v51 }
  0x38   : > { %317 = vst [vmem:[%s3930_s6 + $0xd0] sm:$0xf] %v316_v52  ;;  %v318_v53 = vld [vmem:[%s3926_s5 + $0x1a8] sm:$0xf]  ;;  %v320_v54 = vld [vmem:[%s3926_s5 + $0x1b0] sm:$0xf] }
  0x39   : > { %v322_v55 = vld [vmem:[%s3926_s5 + $0x1b8] sm:$0xf]  ;;  %319 = vst [vmem:[%s3930_s6 + $0xd4] sm:$0xf] %v318_v53  ;;  %321 = vst [vmem:[%s3930_s6 + $0xd8] sm:$0xf] %v320_v54 }
  0x3a   : > { %323 = vst [vmem:[%s3930_s6 + $0xdc] sm:$0xf] %v322_v55  ;;  %v324_v56 = vld [vmem:[%s3926_s5 + $0x1c0] sm:$0xf]  ;;  %v326_v57 = vld [vmem:[%s3926_s5 + $0x1c8] sm:$0xf] }
  0x3b   : > { %v328_v58 = vld [vmem:[%s3926_s5 + $0x1d0] sm:$0xf]  ;;  %325 = vst [vmem:[%s3930_s6 + $0xe0] sm:$0xf] %v324_v56  ;;  %327 = vst [vmem:[%s3930_s6 + $0xe4] sm:$0xf] %v326_v57 }
  0x3c   : > { %329 = vst [vmem:[%s3930_s6 + $0xe8] sm:$0xf] %v328_v58  ;;  %v330_v59 = vld [vmem:[%s3926_s5 + $0x1d8] sm:$0xf]  ;;  %v332_v60 = vld [vmem:[%s3926_s5 + $0x1e0] sm:$0xf] }
  0x3d   : > { %v334_v61 = vld [vmem:[%s3926_s5 + $0x1e8] sm:$0xf]  ;;  %331 = vst [vmem:[%s3930_s6 + $0xec] sm:$0xf] %v330_v59  ;;  %333 = vst [vmem:[%s3930_s6 + $0xf0] sm:$0xf] %v332_v60 }
  0x3e   : > { %335 = vst [vmem:[%s3930_s6 + $0xf4] sm:$0xf] %v334_v61  ;;  %v336_v62 = vld [vmem:[%s3926_s5 + $0x1f0] sm:$0xf]  ;;  %v338_v63 = vld [vmem:[%s3926_s5 + $0x1f8] sm:$0xf] }
  0x3f   : > { %v340_v0 = vld [vmem:[%s3926_s5 + $0x200] sm:$0xf]  ;;  %337 = vst [vmem:[%s3930_s6 + $0xf8] sm:$0xf] %v336_v62  ;;  %339 = vst [vmem:[%s3930_s6 + $0xfc] sm:$0xf] %v338_v63 }
  0x40   : > { %341 = vst [vmem:[%s3930_s6 + $0x100] sm:$0xf] %v340_v0  ;;  %v342_v1 = vld [vmem:[%s3926_s5 + $0x208] sm:$0xf]  ;;  %v344_v2 = vld [vmem:[%s3926_s5 + $0x210] sm:$0xf] }
  0x41   : > { %v346_v3 = vld [vmem:[%s3926_s5 + $0x218] sm:$0xf]  ;;  %343 = vst [vmem:[%s3930_s6 + $0x104] sm:$0xf] %v342_v1  ;;  %345 = vst [vmem:[%s3930_s6 + $0x108] sm:$0xf] %v344_v2 }
  0x42   : > { %347 = vst [vmem:[%s3930_s6 + $0x10c] sm:$0xf] %v346_v3  ;;  %v348_v4 = vld [vmem:[%s3926_s5 + $0x220] sm:$0xf]  ;;  %v350_v5 = vld [vmem:[%s3926_s5 + $0x228] sm:$0xf] }
  0x43   : > { %v352_v6 = vld [vmem:[%s3926_s5 + $0x230] sm:$0xf]  ;;  %349 = vst [vmem:[%s3930_s6 + $0x110] sm:$0xf] %v348_v4  ;;  %351 = vst [vmem:[%s3930_s6 + $0x114] sm:$0xf] %v350_v5 }
  0x44   : > { %353 = vst [vmem:[%s3930_s6 + $0x118] sm:$0xf] %v352_v6  ;;  %v354_v7 = vld [vmem:[%s3926_s5 + $0x238] sm:$0xf]  ;;  %v356_v8 = vld [vmem:[%s3926_s5 + $0x240] sm:$0xf] }
  0x45   : > { %v358_v9 = vld [vmem:[%s3926_s5 + $0x248] sm:$0xf]  ;;  %355 = vst [vmem:[%s3930_s6 + $0x11c] sm:$0xf] %v354_v7  ;;  %357 = vst [vmem:[%s3930_s6 + $0x120] sm:$0xf] %v356_v8 }
  0x46   : > { %359 = vst [vmem:[%s3930_s6 + $0x124] sm:$0xf] %v358_v9  ;;  %v360_v10 = vld [vmem:[%s3926_s5 + $0x250] sm:$0xf]  ;;  %v362_v11 = vld [vmem:[%s3926_s5 + $0x258] sm:$0xf] }
  0x47   : > { %v364_v12 = vld [vmem:[%s3926_s5 + $0x260] sm:$0xf]  ;;  %361 = vst [vmem:[%s3930_s6 + $0x128] sm:$0xf] %v360_v10  ;;  %363 = vst [vmem:[%s3930_s6 + $0x12c] sm:$0xf] %v362_v11 }
  0x48   : > { %365 = vst [vmem:[%s3930_s6 + $0x130] sm:$0xf] %v364_v12  ;;  %v366_v13 = vld [vmem:[%s3926_s5 + $0x268] sm:$0xf]  ;;  %v368_v14 = vld [vmem:[%s3926_s5 + $0x270] sm:$0xf] }
  0x49   : > { %v370_v15 = vld [vmem:[%s3926_s5 + $0x278] sm:$0xf]  ;;  %367 = vst [vmem:[%s3930_s6 + $0x134] sm:$0xf] %v366_v13  ;;  %369 = vst [vmem:[%s3930_s6 + $0x138] sm:$0xf] %v368_v14 }
  0x4a   : > { %371 = vst [vmem:[%s3930_s6 + $0x13c] sm:$0xf] %v370_v15  ;;  %v372_v16 = vld [vmem:[%s3926_s5 + $0x280] sm:$0xf]  ;;  %v374_v17 = vld [vmem:[%s3926_s5 + $0x288] sm:$0xf] }
  0x4b   : > { %v376_v18 = vld [vmem:[%s3926_s5 + $0x290] sm:$0xf]  ;;  %373 = vst [vmem:[%s3930_s6 + $0x140] sm:$0xf] %v372_v16  ;;  %375 = vst [vmem:[%s3930_s6 + $0x144] sm:$0xf] %v374_v17 }
  0x4c   : > { %377 = vst [vmem:[%s3930_s6 + $0x148] sm:$0xf] %v376_v18  ;;  %v378_v19 = vld [vmem:[%s3926_s5 + $0x298] sm:$0xf]  ;;  %v380_v20 = vld [vmem:[%s3926_s5 + $0x2a0] sm:$0xf] }
  0x4d   : > { %v382_v21 = vld [vmem:[%s3926_s5 + $0x2a8] sm:$0xf]  ;;  %379 = vst [vmem:[%s3930_s6 + $0x14c] sm:$0xf] %v378_v19  ;;  %381 = vst [vmem:[%s3930_s6 + $0x150] sm:$0xf] %v380_v20 }
  0x4e   : > { %383 = vst [vmem:[%s3930_s6 + $0x154] sm:$0xf] %v382_v21  ;;  %v384_v22 = vld [vmem:[%s3926_s5 + $0x2b0] sm:$0xf]  ;;  %v386_v23 = vld [vmem:[%s3926_s5 + $0x2b8] sm:$0xf] }
  0x4f   : > { %v388_v24 = vld [vmem:[%s3926_s5 + $0x2c0] sm:$0xf]  ;;  %385 = vst [vmem:[%s3930_s6 + $0x158] sm:$0xf] %v384_v22  ;;  %387 = vst [vmem:[%s3930_s6 + $0x15c] sm:$0xf] %v386_v23 }
  0x50   : > { %389 = vst [vmem:[%s3930_s6 + $0x160] sm:$0xf] %v388_v24  ;;  %v390_v25 = vld [vmem:[%s3926_s5 + $0x2c8] sm:$0xf]  ;;  %v392_v26 = vld [vmem:[%s3926_s5 + $0x2d0] sm:$0xf] }
  0x51   : > { %v394_v27 = vld [vmem:[%s3926_s5 + $0x2d8] sm:$0xf]  ;;  %391 = vst [vmem:[%s3930_s6 + $0x164] sm:$0xf] %v390_v25  ;;  %393 = vst [vmem:[%s3930_s6 + $0x168] sm:$0xf] %v392_v26 }
  0x52   : > { %395 = vst [vmem:[%s3930_s6 + $0x16c] sm:$0xf] %v394_v27  ;;  %v396_v28 = vld [vmem:[%s3926_s5 + $0x2e0] sm:$0xf]  ;;  %v398_v29 = vld [vmem:[%s3926_s5 + $0x2e8] sm:$0xf] }
  0x53   : > { %v400_v30 = vld [vmem:[%s3926_s5 + $0x2f0] sm:$0xf]  ;;  %397 = vst [vmem:[%s3930_s6 + $0x170] sm:$0xf] %v396_v28  ;;  %399 = vst [vmem:[%s3930_s6 + $0x174] sm:$0xf] %v398_v29 }
  0x54   : > { %401 = vst [vmem:[%s3930_s6 + $0x178] sm:$0xf] %v400_v30  ;;  %v402_v31 = vld [vmem:[%s3926_s5 + $0x2f8] sm:$0xf]  ;;  %v404_v32 = vld [vmem:[%s3926_s5 + $0x300] sm:$0xf] }
  0x55   : > { %v406_v33 = vld [vmem:[%s3926_s5 + $0x308] sm:$0xf]  ;;  %403 = vst [vmem:[%s3930_s6 + $0x17c] sm:$0xf] %v402_v31  ;;  %405 = vst [vmem:[%s3930_s6 + $0x180] sm:$0xf] %v404_v32 }
  0x56   : > { %407 = vst [vmem:[%s3930_s6 + $0x184] sm:$0xf] %v406_v33  ;;  %v408_v34 = vld [vmem:[%s3926_s5 + $0x310] sm:$0xf]  ;;  %v410_v35 = vld [vmem:[%s3926_s5 + $0x318] sm:$0xf] }
  0x57   : > { %v412_v36 = vld [vmem:[%s3926_s5 + $0x320] sm:$0xf]  ;;  %409 = vst [vmem:[%s3930_s6 + $0x188] sm:$0xf] %v408_v34  ;;  %411 = vst [vmem:[%s3930_s6 + $0x18c] sm:$0xf] %v410_v35 }
  0x58   : > { %413 = vst [vmem:[%s3930_s6 + $0x190] sm:$0xf] %v412_v36  ;;  %v414_v37 = vld [vmem:[%s3926_s5 + $0x328] sm:$0xf]  ;;  %v416_v38 = vld [vmem:[%s3926_s5 + $0x330] sm:$0xf] }
  0x59   : > { %v418_v39 = vld [vmem:[%s3926_s5 + $0x338] sm:$0xf]  ;;  %415 = vst [vmem:[%s3930_s6 + $0x194] sm:$0xf] %v414_v37  ;;  %417 = vst [vmem:[%s3930_s6 + $0x198] sm:$0xf] %v416_v38 }
  0x5a   : > { %419 = vst [vmem:[%s3930_s6 + $0x19c] sm:$0xf] %v418_v39  ;;  %v420_v40 = vld [vmem:[%s3926_s5 + $0x340] sm:$0xf]  ;;  %v422_v41 = vld [vmem:[%s3926_s5 + $0x348] sm:$0xf] }
  0x5b   : > { %v424_v42 = vld [vmem:[%s3926_s5 + $0x350] sm:$0xf]  ;;  %421 = vst [vmem:[%s3930_s6 + $0x1a0] sm:$0xf] %v420_v40  ;;  %423 = vst [vmem:[%s3930_s6 + $0x1a4] sm:$0xf] %v422_v41 }
  0x5c   : > { %425 = vst [vmem:[%s3930_s6 + $0x1a8] sm:$0xf] %v424_v42  ;;  %v426_v43 = vld [vmem:[%s3926_s5 + $0x358] sm:$0xf]  ;;  %v428_v44 = vld [vmem:[%s3926_s5 + $0x360] sm:$0xf] }
  0x5d   : > { %v430_v45 = vld [vmem:[%s3926_s5 + $0x368] sm:$0xf]  ;;  %427 = vst [vmem:[%s3930_s6 + $0x1ac] sm:$0xf] %v426_v43  ;;  %429 = vst [vmem:[%s3930_s6 + $0x1b0] sm:$0xf] %v428_v44 }
  0x5e   : > { %431 = vst [vmem:[%s3930_s6 + $0x1b4] sm:$0xf] %v430_v45  ;;  %v432_v46 = vld [vmem:[%s3926_s5 + $0x370] sm:$0xf]  ;;  %v434_v47 = vld [vmem:[%s3926_s5 + $0x378] sm:$0xf] }
  0x5f   : > { %v436_v48 = vld [vmem:[%s3926_s5 + $0x380] sm:$0xf]  ;;  %433 = vst [vmem:[%s3930_s6 + $0x1b8] sm:$0xf] %v432_v46  ;;  %435 = vst [vmem:[%s3930_s6 + $0x1bc] sm:$0xf] %v434_v47 }
  0x60   : > { %437 = vst [vmem:[%s3930_s6 + $0x1c0] sm:$0xf] %v436_v48  ;;  %v438_v49 = vld [vmem:[%s3926_s5 + $0x388] sm:$0xf]  ;;  %v440_v50 = vld [vmem:[%s3926_s5 + $0x390] sm:$0xf] }
  0x61   : > { %v442_v51 = vld [vmem:[%s3926_s5 + $0x398] sm:$0xf]  ;;  %439 = vst [vmem:[%s3930_s6 + $0x1c4] sm:$0xf] %v438_v49  ;;  %441 = vst [vmem:[%s3930_s6 + $0x1c8] sm:$0xf] %v440_v50 }
  0x62   : > { %443 = vst [vmem:[%s3930_s6 + $0x1cc] sm:$0xf] %v442_v51  ;;  %v444_v52 = vld [vmem:[%s3926_s5 + $0x3a0] sm:$0xf]  ;;  %v446_v53 = vld [vmem:[%s3926_s5 + $0x3a8] sm:$0xf] }
  0x63   : > { %v448_v54 = vld [vmem:[%s3926_s5 + $0x3b0] sm:$0xf]  ;;  %445 = vst [vmem:[%s3930_s6 + $0x1d0] sm:$0xf] %v444_v52  ;;  %447 = vst [vmem:[%s3930_s6 + $0x1d4] sm:$0xf] %v446_v53 }
  0x64   : > { %449 = vst [vmem:[%s3930_s6 + $0x1d8] sm:$0xf] %v448_v54  ;;  %v450_v55 = vld [vmem:[%s3926_s5 + $0x3b8] sm:$0xf]  ;;  %v452_v56 = vld [vmem:[%s3926_s5 + $0x3c0] sm:$0xf] }
  0x65   : > { %v454_v57 = vld [vmem:[%s3926_s5 + $0x3c8] sm:$0xf]  ;;  %451 = vst [vmem:[%s3930_s6 + $0x1dc] sm:$0xf] %v450_v55  ;;  %453 = vst [vmem:[%s3930_s6 + $0x1e0] sm:$0xf] %v452_v56 }
  0x66   : > { %455 = vst [vmem:[%s3930_s6 + $0x1e4] sm:$0xf] %v454_v57  ;;  %v456_v58 = vld [vmem:[%s3926_s5 + $0x3d0] sm:$0xf]  ;;  %v458_v59 = vld [vmem:[%s3926_s5 + $0x3d8] sm:$0xf] }
  0x67   : > { %v460_v60 = vld [vmem:[%s3926_s5 + $0x3e0] sm:$0xf]  ;;  %457 = vst [vmem:[%s3930_s6 + $0x1e8] sm:$0xf] %v456_v58  ;;  %459 = vst [vmem:[%s3930_s6 + $0x1ec] sm:$0xf] %v458_v59 }
  0x68   : > { %461 = vst [vmem:[%s3930_s6 + $0x1f0] sm:$0xf] %v460_v60  ;;  %v462_v61 = vld [vmem:[%s3926_s5 + $0x3e8] sm:$0xf]  ;;  %v464_v62 = vld [vmem:[%s3926_s5 + $0x3f0] sm:$0xf] }
  0x69   : > { %v466_v63 = vld [vmem:[%s3926_s5 + $0x3f8] sm:$0xf]  ;;  %463 = vst [vmem:[%s3930_s6 + $0x1f4] sm:$0xf] %v462_v61  ;;  %465 = vst [vmem:[%s3930_s6 + $0x1f8] sm:$0xf] %v464_v62 }
  0x6a   : > { %467 = vst [vmem:[%s3930_s6 + $0x1fc] sm:$0xf] %v466_v63  ;;  %v468_v0 = vld [vmem:[%s3926_s5 + $0x400] sm:$0xf]  ;;  %v470_v1 = vld [vmem:[%s3926_s5 + $0x408] sm:$0xf] }
  0x6b   : > { %v472_v2 = vld [vmem:[%s3926_s5 + $0x410] sm:$0xf]  ;;  %469 = vst [vmem:[%s3930_s6 + $0x200] sm:$0xf] %v468_v0  ;;  %471 = vst [vmem:[%s3930_s6 + $0x204] sm:$0xf] %v470_v1 }
  0x6c   : > { %473 = vst [vmem:[%s3930_s6 + $0x208] sm:$0xf] %v472_v2  ;;  %v474_v3 = vld [vmem:[%s3926_s5 + $0x418] sm:$0xf]  ;;  %v476_v4 = vld [vmem:[%s3926_s5 + $0x420] sm:$0xf] }
  0x6d   : > { %v478_v5 = vld [vmem:[%s3926_s5 + $0x428] sm:$0xf]  ;;  %475 = vst [vmem:[%s3930_s6 + $0x20c] sm:$0xf] %v474_v3  ;;  %477 = vst [vmem:[%s3930_s6 + $0x210] sm:$0xf] %v476_v4 }
  0x6e   : > { %479 = vst [vmem:[%s3930_s6 + $0x214] sm:$0xf] %v478_v5  ;;  %v480_v6 = vld [vmem:[%s3926_s5 + $0x430] sm:$0xf]  ;;  %v482_v7 = vld [vmem:[%s3926_s5 + $0x438] sm:$0xf] }
  0x6f   : > { %v484_v8 = vld [vmem:[%s3926_s5 + $0x440] sm:$0xf]  ;;  %481 = vst [vmem:[%s3930_s6 + $0x218] sm:$0xf] %v480_v6  ;;  %483 = vst [vmem:[%s3930_s6 + $0x21c] sm:$0xf] %v482_v7 }
  0x70   : > { %485 = vst [vmem:[%s3930_s6 + $0x220] sm:$0xf] %v484_v8  ;;  %v486_v9 = vld [vmem:[%s3926_s5 + $0x448] sm:$0xf]  ;;  %v488_v10 = vld [vmem:[%s3926_s5 + $0x450] sm:$0xf] }
  0x71   : > { %v490_v11 = vld [vmem:[%s3926_s5 + $0x458] sm:$0xf]  ;;  %487 = vst [vmem:[%s3930_s6 + $0x224] sm:$0xf] %v486_v9  ;;  %489 = vst [vmem:[%s3930_s6 + $0x228] sm:$0xf] %v488_v10 }
  0x72   : > { %491 = vst [vmem:[%s3930_s6 + $0x22c] sm:$0xf] %v490_v11  ;;  %v492_v12 = vld [vmem:[%s3926_s5 + $0x460] sm:$0xf]  ;;  %v494_v13 = vld [vmem:[%s3926_s5 + $0x468] sm:$0xf] }
  0x73   : > { %v496_v14 = vld [vmem:[%s3926_s5 + $0x470] sm:$0xf]  ;;  %493 = vst [vmem:[%s3930_s6 + $0x230] sm:$0xf] %v492_v12  ;;  %495 = vst [vmem:[%s3930_s6 + $0x234] sm:$0xf] %v494_v13 }
  0x74   : > { %497 = vst [vmem:[%s3930_s6 + $0x238] sm:$0xf] %v496_v14  ;;  %v498_v15 = vld [vmem:[%s3926_s5 + $0x478] sm:$0xf]  ;;  %v500_v16 = vld [vmem:[%s3926_s5 + $0x480] sm:$0xf] }
  0x75   : > { %v502_v17 = vld [vmem:[%s3926_s5 + $0x488] sm:$0xf]  ;;  %499 = vst [vmem:[%s3930_s6 + $0x23c] sm:$0xf] %v498_v15  ;;  %501 = vst [vmem:[%s3930_s6 + $0x240] sm:$0xf] %v500_v16 }
  0x76   : > { %503 = vst [vmem:[%s3930_s6 + $0x244] sm:$0xf] %v502_v17  ;;  %v504_v18 = vld [vmem:[%s3926_s5 + $0x490] sm:$0xf]  ;;  %v506_v19 = vld [vmem:[%s3926_s5 + $0x498] sm:$0xf] }
  0x77   : > { %v508_v20 = vld [vmem:[%s3926_s5 + $0x4a0] sm:$0xf]  ;;  %505 = vst [vmem:[%s3930_s6 + $0x248] sm:$0xf] %v504_v18  ;;  %507 = vst [vmem:[%s3930_s6 + $0x24c] sm:$0xf] %v506_v19 }
  0x78   : > { %509 = vst [vmem:[%s3930_s6 + $0x250] sm:$0xf] %v508_v20  ;;  %v510_v21 = vld [vmem:[%s3926_s5 + $0x4a8] sm:$0xf]  ;;  %v512_v22 = vld [vmem:[%s3926_s5 + $0x4b0] sm:$0xf] }
  0x79   : > { %v514_v23 = vld [vmem:[%s3926_s5 + $0x4b8] sm:$0xf]  ;;  %511 = vst [vmem:[%s3930_s6 + $0x254] sm:$0xf] %v510_v21  ;;  %513 = vst [vmem:[%s3930_s6 + $0x258] sm:$0xf] %v512_v22 }
  0x7a   : > { %515 = vst [vmem:[%s3930_s6 + $0x25c] sm:$0xf] %v514_v23  ;;  %v516_v24 = vld [vmem:[%s3926_s5 + $0x4c0] sm:$0xf]  ;;  %v518_v25 = vld [vmem:[%s3926_s5 + $0x4c8] sm:$0xf] }
  0x7b   : > { %v520_v26 = vld [vmem:[%s3926_s5 + $0x4d0] sm:$0xf]  ;;  %517 = vst [vmem:[%s3930_s6 + $0x260] sm:$0xf] %v516_v24  ;;  %519 = vst [vmem:[%s3930_s6 + $0x264] sm:$0xf] %v518_v25 }
  0x7c   : > { %521 = vst [vmem:[%s3930_s6 + $0x268] sm:$0xf] %v520_v26  ;;  %v522_v27 = vld [vmem:[%s3926_s5 + $0x4d8] sm:$0xf]  ;;  %v524_v28 = vld [vmem:[%s3926_s5 + $0x4e0] sm:$0xf] }
  0x7d   : > { %v526_v29 = vld [vmem:[%s3926_s5 + $0x4e8] sm:$0xf]  ;;  %523 = vst [vmem:[%s3930_s6 + $0x26c] sm:$0xf] %v522_v27  ;;  %525 = vst [vmem:[%s3930_s6 + $0x270] sm:$0xf] %v524_v28 }
  0x7e   : > { %527 = vst [vmem:[%s3930_s6 + $0x274] sm:$0xf] %v526_v29  ;;  %v528_v30 = vld [vmem:[%s3926_s5 + $0x4f0] sm:$0xf]  ;;  %v530_v31 = vld [vmem:[%s3926_s5 + $0x4f8] sm:$0xf] }
  0x7f   : > { %v532_v32 = vld [vmem:[%s3926_s5 + $0x500] sm:$0xf]  ;;  %529 = vst [vmem:[%s3930_s6 + $0x278] sm:$0xf] %v528_v30  ;;  %531 = vst [vmem:[%s3930_s6 + $0x27c] sm:$0xf] %v530_v31 }
  0x80   : > { %533 = vst [vmem:[%s3930_s6 + $0x280] sm:$0xf] %v532_v32  ;;  %v534_v33 = vld [vmem:[%s3926_s5 + $0x508] sm:$0xf]  ;;  %v536_v34 = vld [vmem:[%s3926_s5 + $0x510] sm:$0xf] }
  0x81   : > { %v538_v35 = vld [vmem:[%s3926_s5 + $0x518] sm:$0xf]  ;;  %535 = vst [vmem:[%s3930_s6 + $0x284] sm:$0xf] %v534_v33  ;;  %537 = vst [vmem:[%s3930_s6 + $0x288] sm:$0xf] %v536_v34 }
  0x82   : > { %539 = vst [vmem:[%s3930_s6 + $0x28c] sm:$0xf] %v538_v35  ;;  %v540_v36 = vld [vmem:[%s3926_s5 + $0x520] sm:$0xf]  ;;  %v542_v37 = vld [vmem:[%s3926_s5 + $0x528] sm:$0xf] }
  0x83   : > { %v544_v38 = vld [vmem:[%s3926_s5 + $0x530] sm:$0xf]  ;;  %541 = vst [vmem:[%s3930_s6 + $0x290] sm:$0xf] %v540_v36  ;;  %543 = vst [vmem:[%s3930_s6 + $0x294] sm:$0xf] %v542_v37 }
  0x84   : > { %545 = vst [vmem:[%s3930_s6 + $0x298] sm:$0xf] %v544_v38  ;;  %v546_v39 = vld [vmem:[%s3926_s5 + $0x538] sm:$0xf]  ;;  %v548_v40 = vld [vmem:[%s3926_s5 + $0x540] sm:$0xf] }
  0x85   : > { %v550_v41 = vld [vmem:[%s3926_s5 + $0x548] sm:$0xf]  ;;  %547 = vst [vmem:[%s3930_s6 + $0x29c] sm:$0xf] %v546_v39  ;;  %549 = vst [vmem:[%s3930_s6 + $0x2a0] sm:$0xf] %v548_v40 }
  0x86   : > { %551 = vst [vmem:[%s3930_s6 + $0x2a4] sm:$0xf] %v550_v41  ;;  %v552_v42 = vld [vmem:[%s3926_s5 + $0x550] sm:$0xf]  ;;  %v554_v43 = vld [vmem:[%s3926_s5 + $0x558] sm:$0xf] }
  0x87   : > { %v556_v44 = vld [vmem:[%s3926_s5 + $0x560] sm:$0xf]  ;;  %553 = vst [vmem:[%s3930_s6 + $0x2a8] sm:$0xf] %v552_v42  ;;  %555 = vst [vmem:[%s3930_s6 + $0x2ac] sm:$0xf] %v554_v43 }
  0x88   : > { %557 = vst [vmem:[%s3930_s6 + $0x2b0] sm:$0xf] %v556_v44  ;;  %v558_v45 = vld [vmem:[%s3926_s5 + $0x568] sm:$0xf]  ;;  %v560_v46 = vld [vmem:[%s3926_s5 + $0x570] sm:$0xf] }
  0x89   : > { %v562_v47 = vld [vmem:[%s3926_s5 + $0x578] sm:$0xf]  ;;  %559 = vst [vmem:[%s3930_s6 + $0x2b4] sm:$0xf] %v558_v45  ;;  %561 = vst [vmem:[%s3930_s6 + $0x2b8] sm:$0xf] %v560_v46 }
  0x8a   : > { %563 = vst [vmem:[%s3930_s6 + $0x2bc] sm:$0xf] %v562_v47  ;;  %v564_v48 = vld [vmem:[%s3926_s5 + $0x580] sm:$0xf]  ;;  %v566_v49 = vld [vmem:[%s3926_s5 + $0x588] sm:$0xf] }
  0x8b   : > { %v568_v50 = vld [vmem:[%s3926_s5 + $0x590] sm:$0xf]  ;;  %565 = vst [vmem:[%s3930_s6 + $0x2c0] sm:$0xf] %v564_v48  ;;  %567 = vst [vmem:[%s3930_s6 + $0x2c4] sm:$0xf] %v566_v49 }
  0x8c   : > { %569 = vst [vmem:[%s3930_s6 + $0x2c8] sm:$0xf] %v568_v50  ;;  %v570_v51 = vld [vmem:[%s3926_s5 + $0x598] sm:$0xf]  ;;  %v572_v52 = vld [vmem:[%s3926_s5 + $0x5a0] sm:$0xf] }
  0x8d   : > { %v574_v53 = vld [vmem:[%s3926_s5 + $0x5a8] sm:$0xf]  ;;  %571 = vst [vmem:[%s3930_s6 + $0x2cc] sm:$0xf] %v570_v51  ;;  %573 = vst [vmem:[%s3930_s6 + $0x2d0] sm:$0xf] %v572_v52 }
  0x8e   : > { %575 = vst [vmem:[%s3930_s6 + $0x2d4] sm:$0xf] %v574_v53  ;;  %v576_v54 = vld [vmem:[%s3926_s5 + $0x5b0] sm:$0xf]  ;;  %v578_v55 = vld [vmem:[%s3926_s5 + $0x5b8] sm:$0xf] }
  0x8f   : > { %v580_v56 = vld [vmem:[%s3926_s5 + $0x5c0] sm:$0xf]  ;;  %577 = vst [vmem:[%s3930_s6 + $0x2d8] sm:$0xf] %v576_v54  ;;  %579 = vst [vmem:[%s3930_s6 + $0x2dc] sm:$0xf] %v578_v55 }
  0x90   : > { %581 = vst [vmem:[%s3930_s6 + $0x2e0] sm:$0xf] %v580_v56  ;;  %v582_v57 = vld [vmem:[%s3926_s5 + $0x5c8] sm:$0xf]  ;;  %v584_v58 = vld [vmem:[%s3926_s5 + $0x5d0] sm:$0xf] }
  0x91   : > { %v586_v59 = vld [vmem:[%s3926_s5 + $0x5d8] sm:$0xf]  ;;  %583 = vst [vmem:[%s3930_s6 + $0x2e4] sm:$0xf] %v582_v57  ;;  %585 = vst [vmem:[%s3930_s6 + $0x2e8] sm:$0xf] %v584_v58 }
  0x92   : > { %587 = vst [vmem:[%s3930_s6 + $0x2ec] sm:$0xf] %v586_v59  ;;  %v588_v60 = vld [vmem:[%s3926_s5 + $0x5e0] sm:$0xf]  ;;  %v590_v61 = vld [vmem:[%s3926_s5 + $0x5e8] sm:$0xf] }
  0x93   : > { %v592_v62 = vld [vmem:[%s3926_s5 + $0x5f0] sm:$0xf]  ;;  %589 = vst [vmem:[%s3930_s6 + $0x2f0] sm:$0xf] %v588_v60  ;;  %591 = vst [vmem:[%s3930_s6 + $0x2f4] sm:$0xf] %v590_v61 }
  0x94   : > { %593 = vst [vmem:[%s3930_s6 + $0x2f8] sm:$0xf] %v592_v62  ;;  %v594_v63 = vld [vmem:[%s3926_s5 + $0x5f8] sm:$0xf]  ;;  %v596_v0 = vld [vmem:[%s3926_s5 + $0x600] sm:$0xf] }
  0x95   : > { %v598_v1 = vld [vmem:[%s3926_s5 + $0x608] sm:$0xf]  ;;  %595 = vst [vmem:[%s3930_s6 + $0x2fc] sm:$0xf] %v594_v63  ;;  %597 = vst [vmem:[%s3930_s6 + $0x300] sm:$0xf] %v596_v0 }
  0x96   : > { %599 = vst [vmem:[%s3930_s6 + $0x304] sm:$0xf] %v598_v1  ;;  %v600_v2 = vld [vmem:[%s3926_s5 + $0x610] sm:$0xf]  ;;  %v602_v3 = vld [vmem:[%s3926_s5 + $0x618] sm:$0xf] }
  0x97   : > { %v604_v4 = vld [vmem:[%s3926_s5 + $0x620] sm:$0xf]  ;;  %601 = vst [vmem:[%s3930_s6 + $0x308] sm:$0xf] %v600_v2  ;;  %603 = vst [vmem:[%s3930_s6 + $0x30c] sm:$0xf] %v602_v3 }
  0x98   : > { %605 = vst [vmem:[%s3930_s6 + $0x310] sm:$0xf] %v604_v4  ;;  %v606_v5 = vld [vmem:[%s3926_s5 + $0x628] sm:$0xf]  ;;  %v608_v6 = vld [vmem:[%s3926_s5 + $0x630] sm:$0xf] }
  0x99   : > { %v610_v7 = vld [vmem:[%s3926_s5 + $0x638] sm:$0xf]  ;;  %607 = vst [vmem:[%s3930_s6 + $0x314] sm:$0xf] %v606_v5  ;;  %609 = vst [vmem:[%s3930_s6 + $0x318] sm:$0xf] %v608_v6 }
  0x9a   : > { %611 = vst [vmem:[%s3930_s6 + $0x31c] sm:$0xf] %v610_v7  ;;  %v612_v8 = vld [vmem:[%s3926_s5 + $0x640] sm:$0xf]  ;;  %v614_v9 = vld [vmem:[%s3926_s5 + $0x648] sm:$0xf] }
  0x9b   : > { %v616_v10 = vld [vmem:[%s3926_s5 + $0x650] sm:$0xf]  ;;  %613 = vst [vmem:[%s3930_s6 + $0x320] sm:$0xf] %v612_v8  ;;  %615 = vst [vmem:[%s3930_s6 + $0x324] sm:$0xf] %v614_v9 }
  0x9c   : > { %617 = vst [vmem:[%s3930_s6 + $0x328] sm:$0xf] %v616_v10  ;;  %v618_v11 = vld [vmem:[%s3926_s5 + $0x658] sm:$0xf]  ;;  %v620_v12 = vld [vmem:[%s3926_s5 + $0x660] sm:$0xf] }
  0x9d   : > { %v622_v13 = vld [vmem:[%s3926_s5 + $0x668] sm:$0xf]  ;;  %619 = vst [vmem:[%s3930_s6 + $0x32c] sm:$0xf] %v618_v11  ;;  %621 = vst [vmem:[%s3930_s6 + $0x330] sm:$0xf] %v620_v12 }
  0x9e   : > { %623 = vst [vmem:[%s3930_s6 + $0x334] sm:$0xf] %v622_v13  ;;  %v624_v14 = vld [vmem:[%s3926_s5 + $0x670] sm:$0xf]  ;;  %v626_v15 = vld [vmem:[%s3926_s5 + $0x678] sm:$0xf] }
  0x9f   : > { %v628_v16 = vld [vmem:[%s3926_s5 + $0x680] sm:$0xf]  ;;  %625 = vst [vmem:[%s3930_s6 + $0x338] sm:$0xf] %v624_v14  ;;  %627 = vst [vmem:[%s3930_s6 + $0x33c] sm:$0xf] %v626_v15 }
  0xa0   : > { %629 = vst [vmem:[%s3930_s6 + $0x340] sm:$0xf] %v628_v16  ;;  %v630_v17 = vld [vmem:[%s3926_s5 + $0x688] sm:$0xf]  ;;  %v632_v18 = vld [vmem:[%s3926_s5 + $0x690] sm:$0xf] }
  0xa1   : > { %v634_v19 = vld [vmem:[%s3926_s5 + $0x698] sm:$0xf]  ;;  %631 = vst [vmem:[%s3930_s6 + $0x344] sm:$0xf] %v630_v17  ;;  %633 = vst [vmem:[%s3930_s6 + $0x348] sm:$0xf] %v632_v18 }
  0xa2   : > { %635 = vst [vmem:[%s3930_s6 + $0x34c] sm:$0xf] %v634_v19  ;;  %v636_v20 = vld [vmem:[%s3926_s5 + $0x6a0] sm:$0xf]  ;;  %v638_v21 = vld [vmem:[%s3926_s5 + $0x6a8] sm:$0xf] }
  0xa3   : > { %v640_v22 = vld [vmem:[%s3926_s5 + $0x6b0] sm:$0xf]  ;;  %637 = vst [vmem:[%s3930_s6 + $0x350] sm:$0xf] %v636_v20  ;;  %639 = vst [vmem:[%s3930_s6 + $0x354] sm:$0xf] %v638_v21 }
  0xa4   : > { %641 = vst [vmem:[%s3930_s6 + $0x358] sm:$0xf] %v640_v22  ;;  %v642_v23 = vld [vmem:[%s3926_s5 + $0x6b8] sm:$0xf]  ;;  %v644_v24 = vld [vmem:[%s3926_s5 + $0x6c0] sm:$0xf] }
  0xa5   : > { %v646_v25 = vld [vmem:[%s3926_s5 + $0x6c8] sm:$0xf]  ;;  %643 = vst [vmem:[%s3930_s6 + $0x35c] sm:$0xf] %v642_v23  ;;  %645 = vst [vmem:[%s3930_s6 + $0x360] sm:$0xf] %v644_v24 }
  0xa6   : > { %647 = vst [vmem:[%s3930_s6 + $0x364] sm:$0xf] %v646_v25  ;;  %v648_v26 = vld [vmem:[%s3926_s5 + $0x6d0] sm:$0xf]  ;;  %v650_v27 = vld [vmem:[%s3926_s5 + $0x6d8] sm:$0xf] }
  0xa7   : > { %v652_v28 = vld [vmem:[%s3926_s5 + $0x6e0] sm:$0xf]  ;;  %649 = vst [vmem:[%s3930_s6 + $0x368] sm:$0xf] %v648_v26  ;;  %651 = vst [vmem:[%s3930_s6 + $0x36c] sm:$0xf] %v650_v27 }
  0xa8   : > { %653 = vst [vmem:[%s3930_s6 + $0x370] sm:$0xf] %v652_v28  ;;  %v654_v29 = vld [vmem:[%s3926_s5 + $0x6e8] sm:$0xf]  ;;  %v656_v30 = vld [vmem:[%s3926_s5 + $0x6f0] sm:$0xf] }
  0xa9   : > { %v658_v31 = vld [vmem:[%s3926_s5 + $0x6f8] sm:$0xf]  ;;  %655 = vst [vmem:[%s3930_s6 + $0x374] sm:$0xf] %v654_v29  ;;  %657 = vst [vmem:[%s3930_s6 + $0x378] sm:$0xf] %v656_v30 }
  0xaa   : > { %659 = vst [vmem:[%s3930_s6 + $0x37c] sm:$0xf] %v658_v31  ;;  %v660_v32 = vld [vmem:[%s3926_s5 + $0x700] sm:$0xf]  ;;  %v662_v33 = vld [vmem:[%s3926_s5 + $0x708] sm:$0xf] }
  0xab   : > { %v664_v34 = vld [vmem:[%s3926_s5 + $0x710] sm:$0xf]  ;;  %661 = vst [vmem:[%s3930_s6 + $0x380] sm:$0xf] %v660_v32  ;;  %663 = vst [vmem:[%s3930_s6 + $0x384] sm:$0xf] %v662_v33 }
  0xac   : > { %665 = vst [vmem:[%s3930_s6 + $0x388] sm:$0xf] %v664_v34  ;;  %v666_v35 = vld [vmem:[%s3926_s5 + $0x718] sm:$0xf]  ;;  %v668_v36 = vld [vmem:[%s3926_s5 + $0x720] sm:$0xf] }
  0xad   : > { %v670_v37 = vld [vmem:[%s3926_s5 + $0x728] sm:$0xf]  ;;  %667 = vst [vmem:[%s3930_s6 + $0x38c] sm:$0xf] %v666_v35  ;;  %669 = vst [vmem:[%s3930_s6 + $0x390] sm:$0xf] %v668_v36 }
  0xae   : > { %671 = vst [vmem:[%s3930_s6 + $0x394] sm:$0xf] %v670_v37  ;;  %v672_v38 = vld [vmem:[%s3926_s5 + $0x730] sm:$0xf]  ;;  %v674_v39 = vld [vmem:[%s3926_s5 + $0x738] sm:$0xf] }
  0xaf   : > { %v676_v40 = vld [vmem:[%s3926_s5 + $0x740] sm:$0xf]  ;;  %673 = vst [vmem:[%s3930_s6 + $0x398] sm:$0xf] %v672_v38  ;;  %675 = vst [vmem:[%s3930_s6 + $0x39c] sm:$0xf] %v674_v39 }
  0xb0   : > { %677 = vst [vmem:[%s3930_s6 + $0x3a0] sm:$0xf] %v676_v40  ;;  %v678_v41 = vld [vmem:[%s3926_s5 + $0x748] sm:$0xf]  ;;  %v680_v42 = vld [vmem:[%s3926_s5 + $0x750] sm:$0xf] }
  0xb1   : > { %v682_v43 = vld [vmem:[%s3926_s5 + $0x758] sm:$0xf]  ;;  %679 = vst [vmem:[%s3930_s6 + $0x3a4] sm:$0xf] %v678_v41  ;;  %681 = vst [vmem:[%s3930_s6 + $0x3a8] sm:$0xf] %v680_v42 }
  0xb2   : > { %683 = vst [vmem:[%s3930_s6 + $0x3ac] sm:$0xf] %v682_v43  ;;  %v684_v44 = vld [vmem:[%s3926_s5 + $0x760] sm:$0xf]  ;;  %v686_v45 = vld [vmem:[%s3926_s5 + $0x768] sm:$0xf] }
  0xb3   : > { %v688_v46 = vld [vmem:[%s3926_s5 + $0x770] sm:$0xf]  ;;  %685 = vst [vmem:[%s3930_s6 + $0x3b0] sm:$0xf] %v684_v44  ;;  %687 = vst [vmem:[%s3930_s6 + $0x3b4] sm:$0xf] %v686_v45 }
  0xb4   : > { %689 = vst [vmem:[%s3930_s6 + $0x3b8] sm:$0xf] %v688_v46  ;;  %v690_v47 = vld [vmem:[%s3926_s5 + $0x778] sm:$0xf]  ;;  %v692_v48 = vld [vmem:[%s3926_s5 + $0x780] sm:$0xf] }
  0xb5   : > { %v694_v49 = vld [vmem:[%s3926_s5 + $0x788] sm:$0xf]  ;;  %691 = vst [vmem:[%s3930_s6 + $0x3bc] sm:$0xf] %v690_v47  ;;  %693 = vst [vmem:[%s3930_s6 + $0x3c0] sm:$0xf] %v692_v48 }
  0xb6   : > { %695 = vst [vmem:[%s3930_s6 + $0x3c4] sm:$0xf] %v694_v49  ;;  %v696_v50 = vld [vmem:[%s3926_s5 + $0x790] sm:$0xf]  ;;  %v698_v51 = vld [vmem:[%s3926_s5 + $0x798] sm:$0xf] }
  0xb7   : > { %v700_v52 = vld [vmem:[%s3926_s5 + $0x7a0] sm:$0xf]  ;;  %697 = vst [vmem:[%s3930_s6 + $0x3c8] sm:$0xf] %v696_v50  ;;  %699 = vst [vmem:[%s3930_s6 + $0x3cc] sm:$0xf] %v698_v51 }
  0xb8   : > { %701 = vst [vmem:[%s3930_s6 + $0x3d0] sm:$0xf] %v700_v52  ;;  %v702_v53 = vld [vmem:[%s3926_s5 + $0x7a8] sm:$0xf]  ;;  %v704_v54 = vld [vmem:[%s3926_s5 + $0x7b0] sm:$0xf] }
  0xb9   : > { %v706_v55 = vld [vmem:[%s3926_s5 + $0x7b8] sm:$0xf]  ;;  %703 = vst [vmem:[%s3930_s6 + $0x3d4] sm:$0xf] %v702_v53  ;;  %705 = vst [vmem:[%s3930_s6 + $0x3d8] sm:$0xf] %v704_v54 }
  0xba   : > { %707 = vst [vmem:[%s3930_s6 + $0x3dc] sm:$0xf] %v706_v55  ;;  %v708_v56 = vld [vmem:[%s3926_s5 + $0x7c0] sm:$0xf]  ;;  %v710_v57 = vld [vmem:[%s3926_s5 + $0x7c8] sm:$0xf] }
  0xbb   : > { %v712_v58 = vld [vmem:[%s3926_s5 + $0x7d0] sm:$0xf]  ;;  %709 = vst [vmem:[%s3930_s6 + $0x3e0] sm:$0xf] %v708_v56  ;;  %711 = vst [vmem:[%s3930_s6 + $0x3e4] sm:$0xf] %v710_v57 }
  0xbc   : > { %713 = vst [vmem:[%s3930_s6 + $0x3e8] sm:$0xf] %v712_v58  ;;  %v714_v59 = vld [vmem:[%s3926_s5 + $0x7d8] sm:$0xf]  ;;  %v716_v60 = vld [vmem:[%s3926_s5 + $0x7e0] sm:$0xf] }
  0xbd   : > { %v718_v61 = vld [vmem:[%s3926_s5 + $0x7e8] sm:$0xf]  ;;  %715 = vst [vmem:[%s3930_s6 + $0x3ec] sm:$0xf] %v714_v59  ;;  %717 = vst [vmem:[%s3930_s6 + $0x3f0] sm:$0xf] %v716_v60 }
  0xbe   : > { %719 = vst [vmem:[%s3930_s6 + $0x3f4] sm:$0xf] %v718_v61  ;;  %v720_v62 = vld [vmem:[%s3926_s5 + $0x7f0] sm:$0xf]  ;;  %v722_v63 = vld [vmem:[%s3926_s5 + $0x7f8] sm:$0xf] }
  0xbf   : > { %721 = vst [vmem:[%s3930_s6 + $0x3f8] sm:$0xf] %v720_v62  ;;  %723 = vst [vmem:[%s3930_s6 + $0x3fc] sm:$0xf] %v722_v63 }
  0xc0 PF: > { %p3233_p8 = scmp.ge.s32.totalorder %s3851_s19, 1  ;;  %p1257_p9 = scmp.lt.s32.totalorder %s3851_s19, 3 }
  0xc2   : > { %p1258_p10 = pnand %p3233_p8, %p1257_p9 }
  0xc3   : > { %s1264_s7 = sand.u32 (!%p1258_p10), 1, %s3835_s15   ;;  %v4448_v0 = vld [vmem:[%s4728_s0] sm:$0xff] (!%p1258_p10)  ;;  %v4458_v2 = vld [vmem:[%s4728_s0 + $0x8] sm:$0xff] (!%p1258_p10)  ;;  %p1320_p11 = scmp.lt.s32.totalorder (!%p1258_p10), %s3843_s17, 1 }
  0xc4   : > { %1261 = sbr.rel (%p1258_p10) target bundleno = 574 (0x23e), region = 65  ;;  %v4453_v1 = vld [vmem:[%s4728_s0 + $0x40] sm:$0xff] (!%p1258_p10)  ;;  %s3234_s14 = sshll.u32 (!%p1258_p10), %s1264_s7, 10  ;;  %v4467_v4 = vld [vmem:[%s4728_s0 + $0x48] sm:$0xff] (!%p1258_p10) }
  0xc5   : > { %v3239_v3 = vcombine.high (!%p1258_p10), %v4448_v0, %v4453_v1  ;;  %v3241_v5 = vcombine.high (!%p1258_p10), %v4458_v2, %v4467_v4  ;;  %s4471_s23 = scalar_lea.vmem (!%p1258_p10), [#allocation2], %s3234_s14  ;;  %v1351_v35 = vld [vmem:[%s4728_s0 + $0x80] sm:$0xff] (!%p1258_p10)  ;;  %v1352_v38 = vld [vmem:[%s4728_s0 + $0x88] sm:$0xff] (!%p1258_p10)  ;;  %v3238_v42 = vcombine.low (!%p1258_p10), %v4448_v0, %v4453_v1  ;;  %v3240_v43 = vcombine.low (!%p1258_p10), %v4458_v2, %v4467_v4  ;;  %s3235_s8 = sshll.u32 (!%p1258_p10), %s1264_s7, 4 }
  0xc6   : > { %v3685_v6 = vld [vmem:[%s4471_s23 + $0x40] sm:$0xff] (!%p1258_p10)   ;;  %v3689_v10 = vld [vmem:[%s4471_s23 + $0x48] sm:$0xff] (!%p1258_p10)   ;;  %v3693_v14 = vld [vmem:[%s4471_s23 + $0x50] sm:$0xff] (!%p1258_p10)   ;;  %s4691_s9 = scalar_lea.vmem (!%p1258_p10), [#allocation3], %s3235_s8 }
  0xc7   : > { %2583 = vmatprep.mubr.bf16.mxu0 (!%p1258_p10), %v3239_v3  ;;  %v3686_v7 = vld [vmem:[%s4471_s23 + $0xc0] sm:$0xff] (!%p1258_p10)   ;;  %2632 = vmatprep.mubr.bf16.mxu1 (!%p1258_p10), %v3241_v5  ;;  %v3690_v11 = vld [vmem:[%s4471_s23 + $0xc8] sm:$0xff] (!%p1258_p10)   ;;  %v3694_v15 = vld [vmem:[%s4471_s23 + $0xd0] sm:$0xff] (!%p1258_p10)  }
  0xc8   : > { %3421 = vmatprep.subr.bf16.mxu0 (!%p1258_p10), %v3685_v6  ;;  %v3687_v8 = vld [vmem:[%s4471_s23] sm:$0xff] (!%p1258_p10)   ;;  %3449 = vmatprep.subr.bf16.mxu1 (!%p1258_p10), %v3686_v7  ;;  %v3691_v12 = vld [vmem:[%s4471_s23 + $0x8] sm:$0xff] (!%p1258_p10)   ;;  %v3695_v16 = vld [vmem:[%s4471_s23 + $0x10] sm:$0xff] (!%p1258_p10)  }
  0xc9   : > { %v3688_v9 = vld [vmem:[%s4471_s23 + $0x80] sm:$0xff] (!%p1258_p10)   ;;  %3422 = vmatpush3.bf16.msra.mxu0 (!%p1258_p10), %v3687_v8  ;;  %v3692_v13 = vld [vmem:[%s4471_s23 + $0x88] sm:$0xff] (!%p1258_p10)   ;;  %v3696_v17 = vld [vmem:[%s4471_s23 + $0x90] sm:$0xff] (!%p1258_p10)  }
  0xca   : > { %3450 = vmatpush3.bf16.msra.mxu1 (!%p1258_p10), %v3688_v9  ;;  %3423 = vmatprep.subr.bf16.mxu0 (!%p1258_p10), %v3689_v10  ;;  %v3697_v18 = vld [vmem:[%s4471_s23 + $0x58] sm:$0xff] (!%p1258_p10)   ;;  %v3701_v22 = vld [vmem:[%s4471_s23 + $0x60] sm:$0xff] (!%p1258_p10)   ;;  %v3705_v26 = vld [vmem:[%s4471_s23 + $0x68] sm:$0xff] (!%p1258_p10)  }
  0xcb   : > { %3451 = vmatprep.subr.bf16.mxu1 %v3690_v11  ;;  %v3698_v19 = vld [vmem:[%s4471_s23 + $0xd8] sm:$0xff]   ;;  %v3702_v23 = vld [vmem:[%s4471_s23 + $0xe0] sm:$0xff]   ;;  %v3706_v27 = vld [vmem:[%s4471_s23 + $0xe8] sm:$0xff]   ;;  %s1321_s15 = scalar_select %p1320_p11, %s3843_s17, 1 }
  0xcc   : > { %v3699_v20 = vld [vmem:[%s4471_s23 + $0x18] sm:$0xff]   ;;  %v3703_v24 = vld [vmem:[%s4471_s23 + $0x20] sm:$0xff]   ;;  %v3707_v28 = vld [vmem:[%s4471_s23 + $0x28] sm:$0xff]   ;;  %s3403_s22 = sshll.u32 (%p3913_p6), %s3843_s17, 2 }
  0xcd   : > { %3424 = vmatpush3.bf16.msra.mxu0 %v3691_v12  ;;  %v3700_v21 = vld [vmem:[%s4471_s23 + $0x98] sm:$0xff]   ;;  %v3704_v25 = vld [vmem:[%s4471_s23 + $0xa0] sm:$0xff]   ;;  %v3708_v29 = vld [vmem:[%s4471_s23 + $0xa8] sm:$0xff]   ;;  %s3236_s7 = sshll.u32 %s1321_s15, 3  ;;  %s3014_s27 = scalar_lea.vmem (%p3913_p6), %s4730_s2, %s3403_s22 }
  0xce   : > { %3452 = vmatpush3.bf16.msra.mxu1 %v3692_v13  ;;  %3425 = vmatprep.subr.bf16.mxu0 %v3693_v14  ;;  %v3709_v30 = vld [vmem:[%s4471_s23 + $0x70] sm:$0xff]   ;;  %v3713_v34 = vld [vmem:[%s4471_s23 + $0x78] sm:$0xff]   ;;  %v1359_v36 = vld [vmem:[%s4728_s0 + $0xc0] sm:$0xff]  ;;  %s1325_s12 = scalar_lea.vmem %s4731_s3, %s3236_s7  ;;  %s1333_s21 = scalar_lea.vmem %s4732_s4, %s3236_s7 }
  0xcf   : > { %3453 = vmatprep.subr.bf16.mxu1 %v3694_v15  ;;  %v3710_v31 = vld [vmem:[%s4471_s23 + $0xf0] sm:$0xff]   ;;  %v3714_v37 = vld [vmem:[%s4471_s23 + $0xf8] sm:$0xff]   ;;  %v1360_v39 = vld [vmem:[%s4728_s0 + $0xc8] sm:$0xff]  ;;  %v3255_v46 = vcombine.high %v1351_v35, %v1359_v36  ;;  %v3254_v54 = vcombine.low %v1351_v35, %v1359_v36 }
  0xd0   : > { %v3711_v32 = vld [vmem:[%s4471_s23 + $0x30] sm:$0xff]   ;;  %v3715_v40 = vld [vmem:[%s4471_s23 + $0x38] sm:$0xff]   ;;  %v3717_v44 = vld [vmem:[%s4471_s23 + $0x140] sm:$0xff]   ;;  %v3257_v48 = vcombine.high %v1352_v38, %v1360_v39  ;;  %v3256_v56 = vcombine.low %v1352_v38, %v1360_v39 }
  0xd1   : > { %3426 = vmatpush3.bf16.msra.mxu0 %v3695_v16  ;;  %v3712_v33 = vld [vmem:[%s4471_s23 + $0xb0] sm:$0xff]   ;;  %v3716_v41 = vld [vmem:[%s4471_s23 + $0xb8] sm:$0xff]   ;;  %v3718_v45 = vld [vmem:[%s4471_s23 + $0x1c0] sm:$0xff]  }
  0xd2   : > { %3454 = vmatpush3.bf16.msra.mxu1 %v3696_v17  ;;  %3427 = vmatprep.subr.bf16.mxu0 %v3697_v18  ;;  %v3719_v47 = vld [vmem:[%s4471_s23 + $0x100] sm:$0xff]   ;;  %v3721_v50 = vld [vmem:[%s4471_s23 + $0x148] sm:$0xff]   ;;  %v3725_v55 = vld [vmem:[%s4471_s23 + $0x150] sm:$0xff]  }
  0xd3   : > { %3455 = vmatprep.subr.bf16.mxu1 %v3698_v19  ;;  %v3720_v49 = vld [vmem:[%s4471_s23 + $0x180] sm:$0xff]   ;;  %v3722_v51 = vld [vmem:[%s4471_s23 + $0x1c8] sm:$0xff]   ;;  %v3726_v57 = vld [vmem:[%s4471_s23 + $0x1d0] sm:$0xff]  }
  0xd4   : > { %v3723_v52 = vld [vmem:[%s4471_s23 + $0x108] sm:$0xff]   ;;  %v3727_v58 = vld [vmem:[%s4471_s23 + $0x110] sm:$0xff]   ;;  %v3729_v60 = vld [vmem:[%s4471_s23 + $0x158] sm:$0xff]  }
  0xd5   : > { %3428 = vmatpush3.bf16.msra.mxu0 %v3699_v20  ;;  %v3724_v53 = vld [vmem:[%s4471_s23 + $0x188] sm:$0xff]   ;;  %v3728_v59 = vld [vmem:[%s4471_s23 + $0x190] sm:$0xff]   ;;  %v3730_v61 = vld [vmem:[%s4471_s23 + $0x1d8] sm:$0xff]  }
  0xd6   : > { %3456 = vmatpush3.bf16.msra.mxu1 %v3700_v21  ;;  %3429 = vmatprep.subr.bf16.mxu0 %v3701_v22  ;;  %v3731_v62 = vld [vmem:[%s4471_s23 + $0x118] sm:$0xff]   ;;  %v3733_v0 = vld [vmem:[%s4471_s23 + $0x160] sm:$0xff]   ;;  %v3737_v4 = vld [vmem:[%s4471_s23 + $0x168] sm:$0xff]  }
  0xd7   : > { %3457 = vmatprep.subr.bf16.mxu1 %v3702_v23  ;;  %v3732_v63 = vld [vmem:[%s4471_s23 + $0x198] sm:$0xff]   ;;  %v3734_v1 = vld [vmem:[%s4471_s23 + $0x1e0] sm:$0xff]   ;;  %v3738_v5 = vld [vmem:[%s4471_s23 + $0x1e8] sm:$0xff]  }
  0xd8   : > { %v3735_v2 = vld [vmem:[%s4471_s23 + $0x120] sm:$0xff]   ;;  %v3739_v6 = vld [vmem:[%s4471_s23 + $0x128] sm:$0xff]   ;;  %v3741_v8 = vld [vmem:[%s4471_s23 + $0x170] sm:$0xff]  }
  0xd9   : > { %3430 = vmatpush3.bf16.msra.mxu0 %v3703_v24  ;;  %v3736_v3 = vld [vmem:[%s4471_s23 + $0x1a0] sm:$0xff]   ;;  %v3740_v7 = vld [vmem:[%s4471_s23 + $0x1a8] sm:$0xff]   ;;  %v3742_v9 = vld [vmem:[%s4471_s23 + $0x1f0] sm:$0xff]  }
  0xda   : > { %3458 = vmatpush3.bf16.msra.mxu1 %v3704_v25  ;;  %3431 = vmatprep.subr.bf16.mxu0 %v3705_v26  ;;  %v3743_v10 = vld [vmem:[%s4471_s23 + $0x130] sm:$0xff]   ;;  %v3745_v12 = vld [vmem:[%s4471_s23 + $0x178] sm:$0xff]   ;;  %v3749_v24 = vld [vmem:[%s4471_s23 + $0x240] sm:$0xff]  }
  0xdb   : > { %3459 = vmatprep.subr.bf16.mxu1 %v3706_v27  ;;  %v3744_v11 = vld [vmem:[%s4471_s23 + $0x1b0] sm:$0xff]   ;;  %v3746_v14 = vld [vmem:[%s4471_s23 + $0x1f8] sm:$0xff]   ;;  %v3750_v25 = vld [vmem:[%s4471_s23 + $0x2c0] sm:$0xff]  }
  0xdc   : > { %v1337_v13 = vld [vmem:[%s4728_s0 + $0x10] sm:$0xff]  ;;  %v3747_v15 = vld [vmem:[%s4471_s23 + $0x138] sm:$0xff]   ;;  %v3751_v26 = vld [vmem:[%s4471_s23 + $0x200] sm:$0xff]  }
  0xdd   : > { %3432 = vmatpush3.bf16.msra.mxu0 %v3707_v28  ;;  %v3748_v16 = vld [vmem:[%s4471_s23 + $0x1b8] sm:$0xff]   ;;  %v1345_v17 = vld [vmem:[%s4728_s0 + $0x50] sm:$0xff]  ;;  %v3752_v27 = vld [vmem:[%s4471_s23 + $0x280] sm:$0xff]  }
  0xde   : > { %3460 = vmatpush3.bf16.msra.mxu1 %v3708_v29  ;;  %3433 = vmatprep.subr.bf16.mxu0 %v3709_v30  ;;  %v1338_v18 = vld [vmem:[%s4728_s0 + $0x18] sm:$0xff]  ;;  %v3242_v20 = vcombine.low %v1337_v13, %v1345_v17  ;;  %v3243_v21 = vcombine.high %v1337_v13, %v1345_v17  ;;  %v3753_v28 = vld [vmem:[%s4471_s23 + $0x248] sm:$0xff]   ;;  %v3757_v36 = vld [vmem:[%s4471_s23 + $0x250] sm:$0xff]  }
  0xdf   : > { %3461 = vmatprep.subr.bf16.mxu1 %v3710_v31  ;;  %v1346_v19 = vld [vmem:[%s4728_s0 + $0x58] sm:$0xff]  ;;  %v3754_v29 = vld [vmem:[%s4471_s23 + $0x2c8] sm:$0xff]   ;;  %v1363_v17 = vld [vmem:[%s4728_s0 + $0xe0] sm:$0xff] }
  0xe0   : > { %v3244_v22 = vcombine.low %v1338_v18, %v1346_v19  ;;  %v3245_v23 = vcombine.high %v1338_v18, %v1346_v19  ;;  %v3755_v30 = vld [vmem:[%s4471_s23 + $0x208] sm:$0xff]   ;;  %v1354_v38 = vld [vmem:[%s4728_s0 + $0x98] sm:$0xff] }
  0xe1   : > { %3434 = vmatpush3.bf16.msra.mxu0 %v3711_v32  ;;  %v3756_v31 = vld [vmem:[%s4471_s23 + $0x288] sm:$0xff]   ;;  %v1353_v32 = vld [vmem:[%s4728_s0 + $0x90] sm:$0xff]  ;;  %v1362_v39 = vld [vmem:[%s4728_s0 + $0xd8] sm:$0xff] }
  0xe2   : > { %3462 = vmatpush3.bf16.msra.mxu1 %v3712_v33  ;;  %3435 = vmatprep.subr.bf16.mxu0 %v3713_v34  ;;  %v1361_v33 = vld [vmem:[%s4728_s0 + $0xd0] sm:$0xff]  ;;  %v3786_v13 = vld [vmem:[%s4471_s23 + $0x3c8] sm:$0xff]  }
  0xe3   : > { %3463 = vmatprep.subr.bf16.mxu1 %v3714_v37  ;;  %v3259_v34 = vcombine.high %v1353_v32, %v1361_v33  ;;  %v3258_v35 = vcombine.low %v1353_v32, %v1361_v33  ;;  %v3758_v37 = vld [vmem:[%s4471_s23 + $0x2d0] sm:$0xff]   ;;  %v3797_v32 = vld [vmem:[%s4471_s23 + $0x360] sm:$0xff]  }
  0xe4   : > { %v3798_v33 = vld [vmem:[%s4471_s23 + $0x3e0] sm:$0xff]  }
  0xe5   : > { %3436 = vmatpush3.bf16.msra.mxu0 %v3715_v40  ;;  %v3261_v40 = vcombine.high %v1354_v38, %v1362_v39 }
  0xe6   : > { %3464 = vmatpush3.bf16.msra.mxu1 %v3716_v41  ;;  %3477 = vmatprep.subr.bf16.mxu0 %v3717_v44  ;;  %v3759_v41 = vld [vmem:[%s4471_s23 + $0x210] sm:$0xff]   ;;  %v3761_v44 = vld [vmem:[%s4471_s23 + $0x258] sm:$0xff]  }
  0xe7   : > { %3505 = vmatprep.subr.bf16.mxu1 %v3718_v45  ;;  %v3762_v45 = vld [vmem:[%s4471_s23 + $0x2d8] sm:$0xff]  }
  0xe8   : > { %2584 = vmatmul.mubr.bf16.vlgmr.msra.gmra.mrb[0].mxu0 %v3238_v42  ;;  %v3260_v42 = vcombine.low %v1354_v38, %v1362_v39  ;;  %v3803_v38 = vld [vmem:[%s4471_s23 + $0x328] sm:$0xff]  }
  0xe9   : > { %2633 = vmatmul.mubr.bf16.vlgmr.msra.gmra.mrb[0].mxu1 %v3240_v43  ;;  %3478 = vmatpush3.bf16.msra.mxu0 %v3719_v47  ;;  %v3760_v43 = vld [vmem:[%s4471_s23 + $0x290] sm:$0xff]   ;;  %v3764_v47 = vld [vmem:[%s4471_s23 + $0x298] sm:$0xff]   ;;  %v3804_v39 = vld [vmem:[%s4471_s23 + $0x3a8] sm:$0xff]  }
  0xea   : > { %3506 = vmatpush3.bf16.msra.mxu1 %v3720_v49  ;;  %2591 = vmatprep.mubr.bf16.mxu0 %v3255_v46  ;;  %v3763_v46 = vld [vmem:[%s4471_s23 + $0x218] sm:$0xff]   ;;  %v3766_v49 = vld [vmem:[%s4471_s23 + $0x2e0] sm:$0xff]  }
  0xeb   : > { %3479 = vmatprep.subr.bf16.mxu0 %v3721_v50  ;;  %2640 = vmatprep.mubr.bf16.mxu1 %v3257_v48  ;;  %v3765_v48 = vld [vmem:[%s4471_s23 + $0x260] sm:$0xff]  }
  0xec   : > { %3507 = vmatprep.subr.bf16.mxu1 %v3722_v51  ;;  %v3767_v50 = vld [vmem:[%s4471_s23 + $0x220] sm:$0xff]  }
  0xed   : > { %3480 = vmatpush3.bf16.msra.mxu0 %v3723_v52  ;;  %v3768_v51 = vld [vmem:[%s4471_s23 + $0x2a0] sm:$0xff]   ;;  %v3769_v52 = vld [vmem:[%s4471_s23 + $0x268] sm:$0xff]  }
  0xee   : > { %3508 = vmatpush3.bf16.msra.mxu1 %v3724_v53  ;;  %3481 = vmatprep.subr.bf16.mxu0 %v3725_v55  ;;  %v3770_v53 = vld [vmem:[%s4471_s23 + $0x2e8] sm:$0xff]  }
  0xef   : > { %3509 = vmatprep.subr.bf16.mxu1 %v3726_v57  ;;  %v3772_v55 = vld [vmem:[%s4471_s23 + $0x2a8] sm:$0xff]   ;;  %v3774_v57 = vld [vmem:[%s4471_s23 + $0x2f0] sm:$0xff]  }
  0xf0   : > { %2592 = vmatmul.mubr.bf16.gmra.mrb[4].mxu0 %v3254_v54  ;;  %v3771_v54 = vld [vmem:[%s4471_s23 + $0x228] sm:$0xff]  }
  0xf1   : > { %3482 = vmatpush3.bf16.msra.mxu0 %v3727_v58  ;;  %2641 = vmatmul.mubr.bf16.gmra.mrb[4].mxu1 %v3256_v56  ;;  %v3773_v56 = vld [vmem:[%s4471_s23 + $0x270] sm:$0xff]  }
  0xf2   : > { %3510 = vmatpush3.bf16.msra.mxu1 %v3728_v59  ;;  %3483 = vmatprep.subr.bf16.mxu0 %v3729_v60  ;;  %v3775_v58 = vld [vmem:[%s4471_s23 + $0x230] sm:$0xff]   ;;  %v3777_v60 = vld [vmem:[%s4471_s23 + $0x278] sm:$0xff]  }
  0xf3   : > { %3511 = vmatprep.subr.bf16.mxu1 %v3730_v61  ;;  %2681 = vmatprep.mubr.bf16.mxu0 %v3243_v21  ;;  %v3776_v59 = vld [vmem:[%s4471_s23 + $0x2b0] sm:$0xff]   ;;  %v3778_v61 = vld [vmem:[%s4471_s23 + $0x2f8] sm:$0xff]  }
  0xf4   : > { %2730 = vmatprep.mubr.bf16.mxu1 %v3245_v23  ;;  %v3790_v21 = vld [vmem:[%s4471_s23 + $0x3d0] sm:$0xff]   ;;  %v1364_v23 = vld [vmem:[%s4728_s0 + $0xe8] sm:$0xff] }
  0xf5   : > { %3484 = vmatpush3.bf16.msra.mxu0 %v3731_v62  ;;  %v3779_v62 = vld [vmem:[%s4471_s23 + $0x238] sm:$0xff]  }
  0xf6   : > { %3512 = vmatpush3.bf16.msra.mxu1 %v3732_v63  ;;  %3485 = vmatprep.subr.bf16.mxu0 %v3733_v0  ;;  %v3780_v63 = vld [vmem:[%s4471_s23 + $0x2b8] sm:$0xff]   ;;  %v1339_v0 = vld [vmem:[%s4728_s0 + $0x20] sm:$0xff] }
  0xf7   : > { %3513 = vmatprep.subr.bf16.mxu1 %v3734_v1  ;;  %v1347_v1 = vld [vmem:[%s4728_s0 + $0x60] sm:$0xff] }
  0xf9   : > { %3486 = vmatpush3.bf16.msra.mxu0 %v3735_v2  ;;  %v3246_v2 = vcombine.low %v1339_v0, %v1347_v1 }
  0xfa   : > { %3514 = vmatpush3.bf16.msra.mxu1 %v3736_v3  ;;  %3487 = vmatprep.subr.bf16.mxu0 %v3737_v4  ;;  %v3247_v3 = vcombine.high %v1339_v0, %v1347_v1  ;;  %v1340_v4 = vld [vmem:[%s4728_s0 + $0x28] sm:$0xff] }
  0xfb   : > { %3515 = vmatprep.subr.bf16.mxu1 %v3738_v5  ;;  %v1348_v5 = vld [vmem:[%s4728_s0 + $0x68] sm:$0xff] }
  0xfd   : > { %3488 = vmatpush3.bf16.msra.mxu0 %v3739_v6  ;;  %v3248_v6 = vcombine.low %v1340_v4, %v1348_v5 }
  0xfe   : > { %3516 = vmatpush3.bf16.msra.mxu1 %v3740_v7  ;;  %3489 = vmatprep.subr.bf16.mxu0 %v3741_v8  ;;  %v3249_v7 = vcombine.high %v1340_v4, %v1348_v5  ;;  %v3781_v8 = vld [vmem:[%s4471_s23 + $0x340] sm:$0xff]  }
  0xff   : > { %3517 = vmatprep.subr.bf16.mxu1 %v3742_v9  ;;  %v3782_v9 = vld [vmem:[%s4471_s23 + $0x3c0] sm:$0xff]  }
 0x101   : > { %3490 = vmatpush3.bf16.msra.mxu0 %v3743_v10  ;;  %v3783_v10 = vld [vmem:[%s4471_s23 + $0x300] sm:$0xff]  }
 0x102   : > { %3518 = vmatpush3.bf16.msra.mxu1 %v3744_v11  ;;  %3491 = vmatprep.subr.bf16.mxu0 %v3745_v12  ;;  %v3784_v11 = vld [vmem:[%s4471_s23 + $0x380] sm:$0xff]   ;;  %v3785_v12 = vld [vmem:[%s4471_s23 + $0x348] sm:$0xff]  }
 0x103   : > { %3519 = vmatprep.subr.bf16.mxu1 %v3746_v14  ;;  %v3787_v14 = vld [vmem:[%s4471_s23 + $0x308] sm:$0xff]  }
 0x105   : > { %3492 = vmatpush3.bf16.msra.mxu0 %v3747_v15  ;;  %v3788_v15 = vld [vmem:[%s4471_s23 + $0x388] sm:$0xff]  }
 0x106   : > { %3520 = vmatpush3.bf16.msra.mxu1 %v3748_v16  ;;  %3533 = vmatprep.subr.bf16.mxu0 %v3749_v24  ;;  %v1355_v16 = vld [vmem:[%s4728_s0 + $0xa0] sm:$0xff] }
 0x107   : > { %3561 = vmatprep.subr.bf16.mxu1 %v3750_v25  ;;  %v3263_v18 = vcombine.high %v1355_v16, %v1363_v17  ;;  %v3262_v19 = vcombine.low %v1355_v16, %v1363_v17  ;;  %v3791_v25 = vld [vmem:[%s4471_s23 + $0x310] sm:$0xff]  }
 0x108   : > { %2682 = vmatmul.mubr.bf16.vlgmr.msra.gmra.mrb[8].mxu0 %v3242_v20  ;;  %v3789_v20 = vld [vmem:[%s4471_s23 + $0x350] sm:$0xff]  }
 0x109   : > { %2731 = vmatmul.mubr.bf16.vlgmr.msra.gmra.mrb[8].mxu1 %v3244_v22  ;;  %3534 = vmatpush3.bf16.msra.mxu0 %v3751_v26  ;;  %v1356_v22 = vld [vmem:[%s4728_s0 + $0xa8] sm:$0xff] }
 0x10a   : > { %3562 = vmatpush3.bf16.msra.mxu1 %v3752_v27  ;;  %3535 = vmatprep.subr.bf16.mxu0 %v3753_v28  ;;  %v3265_v24 = vcombine.high %v1356_v22, %v1364_v23  ;;  %v3264_v26 = vcombine.low %v1356_v22, %v1364_v23  ;;  %v3792_v27 = vld [vmem:[%s4471_s23 + $0x390] sm:$0xff]   ;;  %v3793_v28 = vld [vmem:[%s4471_s23 + $0x358] sm:$0xff]  }
 0x10b   : > { %3563 = vmatprep.subr.bf16.mxu1 %v3754_v29  ;;  %2689 = vmatprep.mubr.bf16.mxu0 %v3259_v34  ;;  %v3794_v29 = vld [vmem:[%s4471_s23 + $0x3d8] sm:$0xff]   ;;  %v3799_v34 = vld [vmem:[%s4471_s23 + $0x320] sm:$0xff]  }
 0x10c   : > { %2738 = vmatprep.mubr.bf16.mxu1 %v3261_v40  ;;  %v3805_v40 = vld [vmem:[%s4471_s23 + $0x370] sm:$0xff]  }
 0x10d   : > { %3536 = vmatpush3.bf16.msra.mxu0 %v3755_v30  ;;  %v3795_v30 = vld [vmem:[%s4471_s23 + $0x318] sm:$0xff]  }
 0x10e   : > { %3564 = vmatpush3.bf16.msra.mxu1 %v3756_v31  ;;  %3537 = vmatprep.subr.bf16.mxu0 %v3757_v36  ;;  %v3796_v31 = vld [vmem:[%s4471_s23 + $0x398] sm:$0xff]   ;;  %v3801_v36 = vld [vmem:[%s4471_s23 + $0x368] sm:$0xff]  }
 0x10f   : > { %3565 = vmatprep.subr.bf16.mxu1 %v3758_v37  ;;  %v3802_v37 = vld [vmem:[%s4471_s23 + $0x3e8] sm:$0xff]  }
 0x110   : > { %2690 = vmatmul.mubr.bf16.gmra.mrb[12].mxu0 %v3258_v35  ;;  %v3800_v35 = vld [vmem:[%s4471_s23 + $0x3a0] sm:$0xff]  }
 0x111   : > { %3538 = vmatpush3.bf16.msra.mxu0 %v3759_v41  ;;  %2739 = vmatmul.mubr.bf16.gmra.mrb[12].mxu1 %v3260_v42  ;;  %v3806_v41 = vld [vmem:[%s4471_s23 + $0x3f0] sm:$0xff]  }
 0x112   : > { %3566 = vmatpush3.bf16.msra.mxu1 %v3760_v43  ;;  %3539 = vmatprep.subr.bf16.mxu0 %v3761_v44  ;;  %v3807_v42 = vld [vmem:[%s4471_s23 + $0x330] sm:$0xff]   ;;  %v3809_v44 = vld [vmem:[%s4471_s23 + $0x378] sm:$0xff]  }
 0x113   : > { %3567 = vmatprep.subr.bf16.mxu1 %v3762_v45  ;;  %2779 = vmatprep.mubr.bf16.mxu0 %v3247_v3  ;;  %v3808_v43 = vld [vmem:[%s4471_s23 + $0x3b0] sm:$0xff]   ;;  %v3810_v45 = vld [vmem:[%s4471_s23 + $0x3f8] sm:$0xff]  }
 0x114   : > { %2828 = vmatprep.mubr.bf16.mxu1 %v3249_v7 }
 0x115   : > { %3540 = vmatpush3.bf16.msra.mxu0 %v3763_v46  ;;  %v3811_v46 = vld [vmem:[%s4471_s23 + $0x338] sm:$0xff]  }
 0x116   : > { %3568 = vmatpush3.bf16.msra.mxu1 %v3764_v47  ;;  %3541 = vmatprep.subr.bf16.mxu0 %v3765_v48  ;;  %v3812_v47 = vld [vmem:[%s4471_s23 + $0x3b8] sm:$0xff]   ;;  %v1341_v48 = vld [vmem:[%s4728_s0 + $0x30] sm:$0xff] }
 0x117   : > { %3569 = vmatprep.subr.bf16.mxu1 %v3766_v49  ;;  %v1349_v49 = vld [vmem:[%s4728_s0 + $0x70] sm:$0xff] }
 0x119   : > { %3542 = vmatpush3.bf16.msra.mxu0 %v3767_v50  ;;  %v1342_v50 = vld [vmem:[%s4728_s0 + $0x38] sm:$0xff] }
 0x11a   : > { %3570 = vmatpush3.bf16.msra.mxu1 %v3768_v51  ;;  %3543 = vmatprep.subr.bf16.mxu0 %v3769_v52  ;;  %v3250_v51 = vcombine.low %v1341_v48, %v1349_v49  ;;  %v3251_v52 = vcombine.high %v1341_v48, %v1349_v49 }
 0x11b   : > { %3571 = vmatprep.subr.bf16.mxu1 %v3770_v53  ;;  %v1350_v53 = vld [vmem:[%s4728_s0 + $0x78] sm:$0xff] }
 0x11d   : > { %3544 = vmatpush3.bf16.msra.mxu0 %v3771_v54  ;;  %v1357_v54 = vld [vmem:[%s4728_s0 + $0xb0] sm:$0xff] }
 0x11e   : > { %3572 = vmatpush3.bf16.msra.mxu1 %v3772_v55  ;;  %3545 = vmatprep.subr.bf16.mxu0 %v3773_v56  ;;  %v1365_v55 = vld [vmem:[%s4728_s0 + $0xf0] sm:$0xff]  ;;  %v3252_v56 = vcombine.low %v1342_v50, %v1350_v53 }
 0x11f   : > { %3573 = vmatprep.subr.bf16.mxu1 %v3774_v57  ;;  %v3253_v57 = vcombine.high %v1342_v50, %v1350_v53 }
 0x121   : > { %3546 = vmatpush3.bf16.msra.mxu0 %v3775_v58  ;;  %v3267_v58 = vcombine.high %v1357_v54, %v1365_v55 }
 0x122   : > { %3574 = vmatpush3.bf16.msra.mxu1 %v3776_v59  ;;  %3547 = vmatprep.subr.bf16.mxu0 %v3777_v60  ;;  %v1358_v59 = vld [vmem:[%s4728_s0 + $0xb8] sm:$0xff] }
 0x123   : > { %3575 = vmatprep.subr.bf16.mxu1 %v3778_v61  ;;  %v1366_v60 = vld [vmem:[%s4728_s0 + $0xf8] sm:$0xff] }
 0x124   : > { %v3269_v61 = vcombine.high %v1358_v59, %v1366_v60 }
 0x125   : > { %3548 = vmatpush3.bf16.msra.mxu0 %v3779_v62  ;;  %v3266_v62 = vcombine.low %v1357_v54, %v1365_v55 }
 0x126   : > { %3576 = vmatpush3.bf16.msra.mxu1 %v3780_v63  ;;  %3589 = vmatprep.subr.bf16.mxu0 %v3781_v8  ;;  %v3268_v63 = vcombine.low %v1358_v59, %v1366_v60 }
 0x127   : > { %3617 = vmatprep.subr.bf16.mxu1 %v3782_v9 }
 0x128   : > { %2780 = vmatmul.mubr.bf16.vlgmr.msra.gmra.mrb[16].mxu0 %v3246_v2 }
 0x129   : > { %2829 = vmatmul.mubr.bf16.vlgmr.msra.gmra.mrb[16].mxu1 %v3248_v6  ;;  %3590 = vmatpush3.bf16.msra.mxu0 %v3783_v10 }
 0x12a   : > { %3618 = vmatpush3.bf16.msra.mxu1 %v3784_v11  ;;  %3591 = vmatprep.subr.bf16.mxu0 %v3785_v12 }
 0x12b   : > { %3619 = vmatprep.subr.bf16.mxu1 %v3786_v13  ;;  %2787 = vmatprep.mubr.bf16.mxu0 %v3263_v18 }
 0x12c   : > { %2836 = vmatprep.mubr.bf16.mxu1 %v3265_v24 }
 0x12d   : > { %3592 = vmatpush3.bf16.msra.mxu0 %v3787_v14 }
 0x12e   : > { %3620 = vmatpush3.bf16.msra.mxu1 %v3788_v15  ;;  %3593 = vmatprep.subr.bf16.mxu0 %v3789_v20 }
 0x12f   : > { %3621 = vmatprep.subr.bf16.mxu1 %v3790_v21 }
 0x130   : > { %2788 = vmatmul.mubr.bf16.gmra.mrb[20].mxu0 %v3262_v19 }
 0x131   : > { %3594 = vmatpush3.bf16.msra.mxu0 %v3791_v25  ;;  %2837 = vmatmul.mubr.bf16.gmra.mrb[20].mxu1 %v3264_v26 }
 0x132   : > { %3622 = vmatpush3.bf16.msra.mxu1 %v3792_v27  ;;  %3595 = vmatprep.subr.bf16.mxu0 %v3793_v28 }
 0x133   : > { %3623 = vmatprep.subr.bf16.mxu1 %v3794_v29  ;;  %2877 = vmatprep.mubr.bf16.mxu0 %v3251_v52 }
 0x134   : > { %2926 = vmatprep.mubr.bf16.mxu1 %v3253_v57 }
 0x135   : > { %3596 = vmatpush3.bf16.msra.mxu0 %v3795_v30 }
 0x136   : > { %3624 = vmatpush3.bf16.msra.mxu1 %v3796_v31  ;;  %3597 = vmatprep.subr.bf16.mxu0 %v3797_v32 }
 0x137   : > { %3625 = vmatprep.subr.bf16.mxu1 %v3798_v33 }
 0x139   : > { %3598 = vmatpush3.bf16.msra.mxu0 %v3799_v34 }
 0x13a   : > { %3626 = vmatpush3.bf16.msra.mxu1 %v3800_v35  ;;  %3599 = vmatprep.subr.bf16.mxu0 %v3801_v36 }
 0x13b   : > { %3627 = vmatprep.subr.bf16.mxu1 %v3802_v37 }
 0x13d   : > { %3600 = vmatpush3.bf16.msra.mxu0 %v3803_v38 }
 0x13e   : > { %3628 = vmatpush3.bf16.msra.mxu1 %v3804_v39  ;;  %3601 = vmatprep.subr.bf16.mxu0 %v3805_v40 }
 0x13f   : > { %3629 = vmatprep.subr.bf16.mxu1 %v3806_v41 }
 0x141   : > { %3602 = vmatpush3.bf16.msra.mxu0 %v3807_v42 }
 0x142   : > { %3630 = vmatpush3.bf16.msra.mxu1 %v3808_v43  ;;  %3603 = vmatprep.subr.bf16.mxu0 %v3809_v44 }
 0x143   : > { %3631 = vmatprep.subr.bf16.mxu1 %v3810_v45 }
 0x145   : > { %3604 = vmatpush3.bf16.msra.mxu0 %v3811_v46 }
 0x146   : > { %3632 = vmatpush3.bf16.msra.mxu1 %v3812_v47 }
 0x148   : > { %2878 = vmatmul.mubr.bf16.vlgmr.msra.gmra.mrb[24].mxu0 %v3250_v51 }
 0x149   : > { %2927 = vmatmul.mubr.bf16.vlgmr.msra.gmra.mrb[24].mxu1 %v3252_v56  ;;  %2885 = vmatprep.mubr.bf16.mxu0 %v3267_v58 }
 0x14a   : > { %2934 = vmatprep.mubr.bf16.mxu1 %v3269_v61 }
 0x150   : > { %2886 = vmatmul.mubr.bf16.gmra.mrb[28].mxu0 %v3266_v62 }
 0x151   : > { %2935 = vmatmul.mubr.bf16.gmra.mrb[28].mxu1 %v3268_v63 }
 0x1bb   : > { %v3437_v0 = vpop.f32.mrb[0].mxu0 }
 0x1bc   : > { %v3465_v1 = vpop.f32.mrb[0].mxu1  ;;  %v3438_v2 = vpop.f32.mrb[1].mxu0 }
 0x1bd   : > { %v3439_v3 = vadd.f32 %v3438_v2, %v3437_v0  ;;  %v3466_v4 = vpop.f32.mrb[1].mxu1  ;;  %v3440_v5 = vpop.f32.mrb[2].mxu0 }
 0x1be   : > { %v3467_v6 = vadd.f32 %v3466_v4, %v3465_v1  ;;  %v3468_v7 = vpop.f32.mrb[2].mxu1  ;;  %v3441_v8 = vpop.f32.mrb[3].mxu0 }
 0x1bf   : > { %v3442_v9 = vadd.f32 %v3441_v8, %v3440_v5  ;;  %v3469_v10 = vpop.f32.mrb[3].mxu1 }
 0x1c0   : > { %v2635_v11 = vadd.f32 %v3467_v6, %v3439_v3  ;;  %v3470_v12 = vadd.f32 %v3469_v10, %v3468_v7 }
 0x1c2   : > { %v2638_v13 = vadd.f32 %v3470_v12, %v3442_v9 }
 0x1c3   : > { %v3443_v14 = vpop.f32.mrb[4].mxu0 }
 0x1c4   : > { %v3471_v15 = vpop.f32.mrb[4].mxu1  ;;  %v3444_v16 = vpop.f32.mrb[5].mxu0 }
 0x1c5   : > { %v3445_v17 = vadd.f32 %v3444_v16, %v3443_v14  ;;  %v3472_v18 = vpop.f32.mrb[5].mxu1  ;;  %v3446_v19 = vpop.f32.mrb[6].mxu0 }
 0x1c6   : > { %v3473_v20 = vadd.f32 %v3472_v18, %v3471_v15  ;;  %v3474_v21 = vpop.f32.mrb[6].mxu1  ;;  %v3447_v22 = vpop.f32.mrb[7].mxu0 }
 0x1c7   : > { %v3448_v23 = vadd.f32 %v3447_v22, %v3446_v19  ;;  %v3475_v24 = vpop.f32.mrb[7].mxu1 }
 0x1c8   : > { %v2643_v25 = vadd.f32 %v3473_v20, %v3445_v17  ;;  %v3476_v26 = vadd.f32 %v3475_v24, %v3474_v21 }
 0x1ca   : > { %v2646_v27 = vadd.f32 %v3476_v26, %v3448_v23 }
 0x1db   : > { %v3493_v28 = vpop.f32.mrb[8].mxu0 }
 0x1dc   : > { %v3521_v29 = vpop.f32.mrb[8].mxu1  ;;  %v3494_v30 = vpop.f32.mrb[9].mxu0 }
 0x1dd   : > { %v3522_v31 = vpop.f32.mrb[9].mxu1  ;;  %v3495_v32 = vadd.f32 %v3494_v30, %v3493_v28  ;;  %v3496_v34 = vpop.f32.mrb[10].mxu0 }
 0x1de   : > { %v3523_v33 = vadd.f32 %v3522_v31, %v3521_v29  ;;  %v3524_v35 = vpop.f32.mrb[10].mxu1  ;;  %v3497_v36 = vpop.f32.mrb[11].mxu0 }
 0x1df   : > { %v3525_v37 = vpop.f32.mrb[11].mxu1  ;;  %v2684_v38 = vadd.f32 %v3495_v32, %v2635_v11  ;;  %v3498_v39 = vadd.f32 %v3497_v36, %v3496_v34 }
 0x1e0   : > { %v3526_v40 = vadd.f32 %v3525_v37, %v3524_v35 }
 0x1e1   : > { %v2733_v41 = vadd.f32 %v3523_v33, %v2684_v38  ;;  %v2687_v42 = vadd.f32 %v3498_v39, %v2638_v13 }
 0x1e3   : > { %v2736_v43 = vadd.f32 %v3526_v40, %v2687_v42  ;;  %v3499_v44 = vpop.f32.mrb[12].mxu0 }
 0x1e4   : > { %v3500_v45 = vpop.f32.mrb[13].mxu0  ;;  %v3527_v50 = vpop.f32.mrb[12].mxu1 }
 0x1e5   : > { %v3501_v46 = vadd.f32 %v3500_v45, %v3499_v44  ;;  %v3502_v47 = vpop.f32.mrb[14].mxu0  ;;  %v3528_v52 = vpop.f32.mrb[13].mxu1 }
 0x1e6   : > { %v3503_v48 = vpop.f32.mrb[15].mxu0  ;;  %v3529_v54 = vadd.f32 %v3528_v52, %v3527_v50  ;;  %v3530_v55 = vpop.f32.mrb[14].mxu1 }
 0x1e7   : > { %v2692_v49 = vadd.f32 %v3501_v46, %v2643_v25  ;;  %v3504_v51 = vadd.f32 %v3503_v48, %v3502_v47  ;;  %v3531_v56 = vpop.f32.mrb[15].mxu1 }
 0x1e8   : > { %v3532_v58 = vadd.f32 %v3531_v56, %v3530_v55 }
 0x1e9   : > { %v2695_v53 = vadd.f32 %v3504_v51, %v2646_v27  ;;  %v2741_v57 = vadd.f32 %v3529_v54, %v2692_v49 }
 0x1eb   : > { %v2744_v59 = vadd.f32 %v3532_v58, %v2695_v53 }
 0x1fb   : > { %v3549_v60 = vpop.f32.mrb[16].mxu0 }
 0x1fc   : > { %v3577_v61 = vpop.f32.mrb[16].mxu1  ;;  %v3550_v62 = vpop.f32.mrb[17].mxu0 }
 0x1fd   : > { %v3551_v63 = vadd.f32 %v3550_v62, %v3549_v60  ;;  %v3578_v0 = vpop.f32.mrb[17].mxu1  ;;  %v3552_v1 = vpop.f32.mrb[18].mxu0 }
 0x1fe   : > { %v3579_v2 = vadd.f32 %v3578_v0, %v3577_v61  ;;  %v3580_v3 = vpop.f32.mrb[18].mxu1  ;;  %v3553_v4 = vpop.f32.mrb[19].mxu0 }
 0x1ff   : > { %v2782_v5 = vadd.f32 %v3551_v63, %v2733_v41  ;;  %v3554_v6 = vadd.f32 %v3553_v4, %v3552_v1  ;;  %v3581_v7 = vpop.f32.mrb[19].mxu1 }
 0x200   : > { %v3582_v8 = vadd.f32 %v3581_v7, %v3580_v3 }
 0x201   : > { %v2831_v9 = vadd.f32 %v3579_v2, %v2782_v5  ;;  %v2785_v10 = vadd.f32 %v3554_v6, %v2736_v43 }
 0x203   : > { %v2834_v11 = vadd.f32 %v3582_v8, %v2785_v10  ;;  %v3555_v12 = vpop.f32.mrb[20].mxu0 }
 0x204   : > { %v3556_v13 = vpop.f32.mrb[21].mxu0  ;;  %v3583_v16 = vpop.f32.mrb[20].mxu1 }
 0x205   : > { %v3557_v14 = vadd.f32 %v3556_v13, %v3555_v12  ;;  %v3558_v15 = vpop.f32.mrb[22].mxu0  ;;  %v3584_v20 = vpop.f32.mrb[21].mxu1 }
 0x206   : > { %v3559_v17 = vpop.f32.mrb[23].mxu0  ;;  %v3585_v21 = vadd.f32 %v3584_v20, %v3583_v16  ;;  %v3586_v22 = vpop.f32.mrb[22].mxu1 }
 0x207   : > { %v2790_v18 = vadd.f32 %v3557_v14, %v2741_v57  ;;  %v3560_v19 = vadd.f32 %v3559_v17, %v3558_v15  ;;  %v3587_v24 = vpop.f32.mrb[23].mxu1 }
 0x208   : > { %v3588_v26 = vadd.f32 %v3587_v24, %v3586_v22 }
 0x209   : > { %v2793_v23 = vadd.f32 %v3560_v19, %v2744_v59  ;;  %v2839_v25 = vadd.f32 %v3585_v21, %v2790_v18 }
 0x20b   : > { %v2842_v27 = vadd.f32 %v3588_v26, %v2793_v23 }
 0x21b   : > { %v3605_v28 = vpop.f32.mrb[24].mxu0 }
 0x21c   : > { %v3633_v29 = vpop.f32.mrb[24].mxu1  ;;  %v3606_v30 = vpop.f32.mrb[25].mxu0 }
 0x21d   : > { %v3607_v31 = vadd.f32 %v3606_v30, %v3605_v28  ;;  %v3634_v32 = vpop.f32.mrb[25].mxu1  ;;  %v3608_v33 = vpop.f32.mrb[26].mxu0 }
 0x21e   : > { %v3635_v34 = vadd.f32 %v3634_v32, %v3633_v29  ;;  %v3636_v35 = vpop.f32.mrb[26].mxu1  ;;  %v3609_v36 = vpop.f32.mrb[27].mxu0 }
 0x21f   : > { %v2880_v37 = vadd.f32 %v3607_v31, %v2831_v9  ;;  %v3610_v38 = vadd.f32 %v3609_v36, %v3608_v33  ;;  %v3637_v39 = vpop.f32.mrb[27].mxu1 }
 0x220   : > { %v3638_v40 = vadd.f32 %v3637_v39, %v3636_v35 }
 0x221   : > { %v2929_v41 = vadd.f32 %v3635_v34, %v2880_v37  ;;  %v2883_v42 = vadd.f32 %v3610_v38, %v2834_v11 }
 0x223   : > { %v2932_v43 = vadd.f32 %v3638_v40, %v2883_v42  ;;  %v3611_v44 = vpop.f32.mrb[28].mxu0  ;;  %v2972_v45 = vmul.f32 %v2929_v41, %v2929_v41 }
 0x224   : > { %v3639_v46 = vpop.f32.mrb[28].mxu1  ;;  %v3612_v47 = vpop.f32.mrb[29].mxu0 }
 0x225   : > { %v3413_v48 = vpack.c.bf16 %v2932_v43, %v2929_v41  ;;  %v2963_v49 = vadd.f32 %v2932_v43, %v2929_v41  ;;  %v2973_v50 = vmul.f32 %v2932_v43, %v2932_v43  ;;  %v3613_v51 = vadd.f32 %v3612_v47, %v3611_v44  ;;  %v3640_v52 = vpop.f32.mrb[29].mxu1  ;;  %v3614_v53 = vpop.f32.mrb[30].mxu0 }
 0x226   : > { %v3641_v54 = vadd.f32 %v3640_v52, %v3639_v46  ;;  %v3642_v55 = vpop.f32.mrb[30].mxu1  ;;  %v3615_v56 = vpop.f32.mrb[31].mxu0 }
 0x227   : > { %3414 = vst [vmem:[%s4691_s9] sm:$0xff] %v3413_v48   ;;  %v2976_v57 = vadd.f32 %v2973_v50, %v2972_v45  ;;  %v2888_v58 = vadd.f32 %v3613_v51, %v2839_v25  ;;  %v3616_v59 = vadd.f32 %v3615_v56, %v3614_v53  ;;  %v3643_v60 = vpop.f32.mrb[31].mxu1 }
 0x228   : > { %v3644_v61 = vadd.f32 %v3643_v60, %v3642_v55 }
 0x229   : > { %v2937_v62 = vadd.f32 %v3641_v54, %v2888_v58  ;;  %v2891_v63 = vadd.f32 %v3616_v59, %v2842_v27 }
 0x22b   : > { %v2964_v0 = vadd.f32 %v2963_v49, %v2937_v62  ;;  %v2974_v1 = vmul.f32 %v2937_v62, %v2937_v62  ;;  %v2940_v2 = vadd.f32 %v3644_v61, %v2891_v63 }
 0x22d   : > { %v2977_v3 = vadd.f32 %v2976_v57, %v2974_v1  ;;  %v3418_v4 = vpack.c.bf16 %v2940_v2, %v2937_v62  ;;  %v2965_v5 = vadd.f32 %v2964_v0, %v2940_v2  ;;  %v2975_v6 = vmul.f32 %v2940_v2, %v2940_v2 }
 0x22e   : > { %v3030_v20 = vld [vmem:[%s4691_s9] sm:$0xf] (%p3913_p6)  ;;  %v3032_v21 = vld [vmem:[%s4691_s9 + $0x4] sm:$0xf] (%p3913_p6) }
 0x22f   : > { %3420 = vst [vmem:[%s4691_s9 + $0x8] sm:$0xff] %v3418_v4   ;;  %v2966_v7 = vrot.slane %v2965_v5, 4  ;;  %v2978_v8 = vadd.f32 %v2977_v3, %v2975_v6  ;;  %3031 = vst [vmem:[%s3014_s27] sm:$0xf] (%p3913_p6), %v3030_v20 }
 0x230   : > { %3033 = vst [vmem:[%s3014_s27 + $0x8] sm:$0xf] (%p3913_p6), %v3032_v21 }
 0x231   : > { %v2967_v9 = vadd.f32 %v2966_v7, %v2965_v5  ;;  %v2979_v10 = vrot.slane %v2978_v8, 4 }
 0x233   : > { %v2968_v11 = vrot.slane %v2967_v9, 2  ;;  %v2980_v12 = vadd.f32 %v2979_v10, %v2978_v8 }
 0x235   : > { %v2969_v13 = vadd.f32 %v2968_v11, %v2967_v9  ;;  %v2981_v14 = vrot.slane %v2980_v12, 2 }
 0x236   : > { %v3034_v22 = vld [vmem:[%s4691_s9 + $0x8] sm:$0xf] (%p3913_p6)  ;;  %v3036_v23 = vld [vmem:[%s4691_s9 + $0xc] sm:$0xf] (%p3913_p6) }
 0x237   : > { %v2970_v15 = vrot.slane %v2969_v13, 1  ;;  %v2982_v16 = vadd.f32 %v2981_v14, %v2980_v12  ;;  %3009 = sbr.rel (!%p3913_p6) target bundleno = 574 (0x23e), region = 73  ;;  %3035 = vst [vmem:[%s3014_s27 + $0x10] sm:$0xf] (%p3913_p6), %v3034_v22  ;;  %3037 = vst [vmem:[%s3014_s27 + $0x18] sm:$0xf] (%p3913_p6), %v3036_v23 }
 0x239   : > { %v2971_v17 = vadd.f32 %v2970_v15, %v2969_v13  ;;  %v2983_v18 = vrot.slane %v2982_v16, 1 }
 0x23b   : > { %v2984_v19 = vadd.f32 %v2983_v18, %v2982_v16  ;;  %2985 = vst [vmem:[%s1325_s12] sm:$0xff] %v2971_v17 }
 0x23d   : > { %2986 = vst [vmem:[%s1333_s21] sm:$0xff] %v2984_v19 }
 0x23e PF: > { %s15_s19 = sadd.s32 1, %s3851_s19   ;;  %s4734_s15 = smov %s3839_s16 }
 0x23f   : > { %p12_p12 = scmp.ge.s32.totalorder %s15_s19, 4   ;;  %s4735_s16 = smov %s3918_s25 }
 0x240   : > { %s4736_s17 = smov %s3847_s18  ;;  %s4737_s18 = smov %s4739_s20 }
 0x241   :  { %14 = sbr.rel (!%p12_p12) target bundleno = 3 (0x3), region = 172 }

// kernel: netd_forward.14
= control target key start
LH: loop header
LB: loop body
LE: loop exit
PB: predicated region body
PF: predicated region fallthrough
CT: control target
= control target key end

     0   :  { %v28_v0 = vlaneseq  ;;  %s180_s0 = inlined_call_operand.vmem [shape: bf16[32,256], index: 0, kind: input, shape index: {}]   ;;  %s181_s1 = inlined_call_operand.vmem [shape: f32[1,256], index: 1, kind: input, shape index: {}]   ;;  %s182_s2 = inlined_call_operand.vmem [shape: f32[1,256], index: 2, kind: input, shape index: {}]   ;;  %s183_s3 = inlined_call_operand.vmem [shape: bf16[32,256], index: 3, kind: output, shape index: {}]  }
   0x1   :  { %v14_v1 = vld [vmem:[%s180_s0] sm:$0xff]  ;;  %v15_v3 = vld [vmem:[%s180_s0 + $0x8] sm:$0xff]  ;;  %v16_v4 = vld [vmem:[%s180_s0 + $0x10] sm:$0xff] }
   0x2   :  { %v29_v2 = vshrl.u32 %v28_v0, 7  ;;  %v17_v5 = vld [vmem:[%s180_s0 + $0x18] sm:$0xff]  ;;  %v18_v6 = vunpack.c.l.bf16 %v14_v1  ;;  %v19_v7 = vunpack.c.h.bf16 %v14_v1  ;;  %v26_v8 = vld [vmem:[%s181_s1] sm:$0x3]  ;;  %v20_v12 = vunpack.c.l.bf16 %v15_v3 }
   0x3   :  { %v46_v9 = vld [vmem:[%s182_s2] sm:$0x3]  ;;  %v21_v13 = vunpack.c.h.bf16 %v15_v3  ;;  %v22_v14 = vunpack.c.l.bf16 %v16_v4  ;;  %v23_v15 = vunpack.c.h.bf16 %v16_v4  ;;  %v24_v16 = vunpack.c.l.bf16 %v17_v5 }
   0x4   :  { %v30_v10 = vsub.s32 0, %v29_v2  ;;  %v34_v11 = vsub.s32 1, %v29_v2  ;;  %v25_v17 = vunpack.c.h.bf16 %v17_v5 }
   0x6   :  { %v31_v18 = vrot.slane %v26_v8, %v30_v10  ;;  %v35_v19 = vrot.slane %v26_v8, %v34_v11  ;;  %v51_v20 = vrot.slane %v46_v9, %v30_v10  ;;  %v55_v21 = vrot.slane %v46_v9, %v34_v11 }
   0x8   :  { %v38_v22 = vmul.f32 %v31_v18, %v18_v6  ;;  %v39_v23 = vmul.f32 %v35_v19, %v19_v7  ;;  %v40_v24 = vmul.f32 %v31_v18, %v20_v12  ;;  %v41_v25 = vmul.f32 %v35_v19, %v21_v13 }
   0x9   :  { %v42_v26 = vmul.f32 %v31_v18, %v22_v14  ;;  %v43_v27 = vmul.f32 %v35_v19, %v23_v15  ;;  %v44_v28 = vmul.f32 %v31_v18, %v24_v16  ;;  %v45_v29 = vmul.f32 %v35_v19, %v25_v17 }
   0xa   :  { %v58_v30 = vadd.f32 %v51_v20, %v38_v22  ;;  %v59_v31 = vadd.f32 %v55_v21, %v39_v23  ;;  %v60_v32 = vadd.f32 %v51_v20, %v40_v24  ;;  %v61_v33 = vadd.f32 %v55_v21, %v41_v25 }
   0xb   :  { %v62_v34 = vadd.f32 %v51_v20, %v42_v26  ;;  %v63_v35 = vadd.f32 %v55_v21, %v43_v27  ;;  %v64_v36 = vadd.f32 %v51_v20, %v44_v28  ;;  %v65_v37 = vadd.f32 %v55_v21, %v45_v29 }
   0xc   :  { %vm66_vm0 = vcmp.gt.f32.partialorder %v58_v30, 0.0  ;;  %vm67_vm1 = vcmp.gt.f32.partialorder %v59_v31, 0.0  ;;  %v74_v38 = vmul.f32 0.2, %v58_v30  ;;  %v75_v39 = vmul.f32 0.2, %v59_v31 }
   0xd   :  { %vm68_vm2 = vcmp.gt.f32.partialorder %v60_v32, 0.0  ;;  %vm69_vm3 = vcmp.gt.f32.partialorder %v61_v33, 0.0  ;;  %v76_v40 = vmul.f32 0.2, %v60_v32  ;;  %v77_v41 = vmul.f32 0.2, %v61_v33 }
   0xe   :  { %v82_v42 = vsel %vm66_vm0, %v58_v30, %v74_v38  ;;  %v83_v43 = vsel %vm67_vm1, %v59_v31, %v75_v39  ;;  %vm70_vm4 = vcmp.gt.f32.partialorder %v62_v34, 0.0  ;;  %vm71_vm5 = vcmp.gt.f32.partialorder %v63_v35, 0.0 }
   0xf   :  { %v126_v44 = vpack.c.bf16 %v83_v43, %v82_v42  ;;  %v84_v45 = vsel %vm68_vm2, %v60_v32, %v76_v40  ;;  %v85_v46 = vsel %vm69_vm3, %v61_v33, %v77_v41  ;;  %v78_v47 = vmul.f32 0.2, %v62_v34 }
  0x10   :  { %v127_v48 = vpack.c.bf16 %v85_v46, %v84_v45  ;;  %v79_v49 = vmul.f32 0.2, %v63_v35  ;;  %vm72_vm6 = vcmp.gt.f32.partialorder %v64_v36, 0.0  ;;  %vm73_vm7 = vcmp.gt.f32.partialorder %v65_v37, 0.0 }
  0x11   :  { %114 = vst [vmem:[%s183_s3] sm:$0xff] %v126_v44  ;;  %v86_v50 = vsel %vm70_vm4, %v62_v34, %v78_v47  ;;  %v80_v51 = vmul.f32 0.2, %v64_v36  ;;  %v81_v52 = vmul.f32 0.2, %v65_v37 }
  0x12   :  { %115 = vst [vmem:[%s183_s3 + $0x8] sm:$0xff] %v127_v48  ;;  %v87_v53 = vsel %vm71_vm5, %v63_v35, %v79_v49 }
  0x13   :  { %v128_v54 = vpack.c.bf16 %v87_v53, %v86_v50  ;;  %v88_v55 = vsel %vm72_vm6, %v64_v36, %v80_v51  ;;  %v89_v56 = vsel %vm73_vm7, %v65_v37, %v81_v52 }
  0x14   :  { %v129_v57 = vpack.c.bf16 %v89_v56, %v88_v55 }
  0x15   :  { %116 = vst [vmem:[%s183_s3 + $0x10] sm:$0xff] %v128_v54 }
  0x16   :  { %117 = vst [vmem:[%s183_s3 + $0x18] sm:$0xff] %v129_v57 }

// kernel: netd_forward.15
= control target key start
LH: loop header
LB: loop body
LE: loop exit
PB: predicated region body
PF: predicated region fallthrough
CT: control target
= control target key end

     0   :  { %v31_v0 = vlaneseq  ;;  %v571_v2 = vmov 1983009808   ;;  %vm487_vm0 = vcmask 1041408   ;;  %vm559_vm1 = vcmask 1024   ;;  %s728_s1 = inlined_call_operand.vmem [shape: f32[1,4096], index: 1, kind: input, shape index: {}]   ;;  %s729_s0 = inlined_call_operand.vmem [shape: bf16[2,4096], index: 0, kind: input, shape index: {}]   ;;  %s730_s2 = inlined_call_operand.vmem [shape: f32[2,1], index: 2, kind: output, shape index: {}]  }
   0x1   :  { %v162_v3 = vunpack.c.l.s4 %v571_v2  ;;  %v23_v8 = vld [vmem:[%s728_s1] sm:$0xff]  ;;  %v24_v28 = vld [vmem:[%s728_s1 + $0x8] sm:$0xff]  ;;  %v25_v55 = vld [vmem:[%s728_s1 + $0x10] sm:$0xff] }
   0x2   :  { %v32_v1 = vshrl.u32 %v31_v0, 7  ;;  %v11_v25 = vld [vmem:[%s729_s0] sm:$0xff]  ;;  %v12_v50 = vld [vmem:[%s729_s0 + $0x8] sm:$0xff] }
   0x3   :  { %v163_v9 = vunpack.c.0.s8 %v162_v3  ;;  %v15_v31 = vunpack.c.l.bf16 %v11_v25  ;;  %v16_v40 = vunpack.c.h.bf16 %v11_v25  ;;  %v17_v57 = vunpack.c.l.bf16 %v12_v50 }
   0x4   :  { %v587_v4 = vsub.s32 0, %v32_v1  ;;  %v589_v5 = vsub.s32 1, %v32_v1  ;;  %v591_v6 = vsub.s32 2, %v32_v1  ;;  %v593_v7 = vsub.s32 3, %v32_v1 }
   0x5   :  { %v598_v10 = vsub.s32 4, %v32_v1  ;;  %v600_v11 = vsub.s32 5, %v32_v1  ;;  %v602_v12 = vsub.s32 6, %v32_v1  ;;  %v604_v13 = vsub.s32 7, %v32_v1 }
   0x6   :  { %v34_v14 = vrot.slane %v23_v8, %v587_v4  ;;  %v38_v15 = vrot.slane %v23_v8, %v589_v5  ;;  %v42_v16 = vrot.slane %v23_v8, %v591_v6  ;;  %v46_v17 = vrot.slane %v23_v8, %v593_v7 }
   0x7   :  { %v50_v18 = vrot.slane %v23_v8, %v598_v10  ;;  %v54_v19 = vrot.slane %v23_v8, %v600_v11  ;;  %v58_v20 = vrot.slane %v23_v8, %v602_v12  ;;  %v62_v21 = vrot.slane %v23_v8, %v604_v13 }
   0x8   :  { %v159_v22 = vcombine.low %v34_v14, %v38_v15  ;;  %v160_v23 = vcombine.low %v42_v16, %v46_v17  ;;  %v614_v24 = vsub.s32 %v163_v9, %v32_v1  ;;  %v66_v33 = vrot.slane %v24_v28, %v587_v4 }
   0x9   :  { %v176_v29 = vcombine.low %v50_v18, %v54_v19  ;;  %v177_v30 = vcombine.low %v58_v20, %v62_v21  ;;  %v70_v34 = vrot.slane %v24_v28, %v589_v5  ;;  %v74_v35 = vrot.slane %v24_v28, %v591_v6 }
   0xa   :  { %v167_v26 = vrot.slane %v159_v22, %v614_v24  ;;  %v174_v27 = vrot.slane %v160_v23, %v614_v24  ;;  %v78_v36 = vrot.slane %v24_v28, %v593_v7  ;;  %v82_v46 = vrot.slane %v24_v28, %v598_v10 }
   0xb   :  { %v184_v37 = vrot.slane %v176_v29, %v614_v24  ;;  %v191_v38 = vrot.slane %v177_v30, %v614_v24  ;;  %v193_v42 = vcombine.low %v66_v33, %v70_v34  ;;  %v86_v47 = vrot.slane %v24_v28, %v600_v11 }
   0xc   :  { %v175_v32 = vcombine.low %v167_v26, %v174_v27  ;;  %v194_v43 = vcombine.low %v74_v35, %v78_v36  ;;  %v90_v48 = vrot.slane %v24_v28, %v602_v12  ;;  %v94_v49 = vrot.slane %v24_v28, %v604_v13 }
   0xd   :  { %v192_v41 = vcombine.low %v184_v37, %v191_v38  ;;  %v201_v51 = vrot.slane %v193_v42, %v614_v24  ;;  %v210_v58 = vcombine.low %v82_v46, %v86_v47  ;;  %v98_v0 = vrot.slane %v25_v55, %v587_v4 }
   0xe   :  { %v303_v39 = vmul.f32 %v175_v32, %v15_v31  ;;  %v208_v52 = vrot.slane %v194_v43, %v614_v24  ;;  %v211_v59 = vcombine.low %v90_v48, %v94_v49  ;;  %v102_v1 = vrot.slane %v25_v55, %v589_v5 }
   0xf   :  { %v304_v53 = vmul.f32 %v192_v41, %v16_v40  ;;  %v106_v2 = vrot.slane %v25_v55, %v591_v6  ;;  %v110_v3 = vrot.slane %v25_v55, %v593_v7  ;;  %v218_v14 = vrot.slane %v210_v58, %v614_v24 }
  0x10   :  { %v319_v44 = vcombine.high %v303_v39, %v303_v39  ;;  %v326_v45 = vrot.slane %v303_v39, %v614_v24  ;;  %v209_v60 = vcombine.low %v201_v51, %v208_v52  ;;  %v225_v15 = vrot.slane %v211_v59, %v614_v24  ;;  %v13_v39 = vld [vmem:[%s729_s0 + $0x10] sm:$0xff]  ;;  %v26_v51 = vld [vmem:[%s728_s1 + $0x18] sm:$0xff] }
  0x11   :  { %v336_v62 = vcombine.high %v304_v53, %v304_v53  ;;  %v343_v63 = vrot.slane %v304_v53, %v614_v24  ;;  %v18_v23 = vunpack.c.h.bf16 %v12_v50  ;;  %v227_v27 = vcombine.low %v98_v0, %v102_v1 }
  0x12   :  { %v333_v54 = vrot.slane %v319_v44, %v614_v24  ;;  %v334_v56 = vcombine.high %v326_v45, %v326_v45  ;;  %v488_v8 = vsel %vm487_vm0, %v326_v45, 0.0  ;;  %v305_v18 = vmul.f32 %v209_v60, %v17_v57 }
  0x13   :  { %v350_v19 = vrot.slane %v336_v62, %v614_v24  ;;  %v351_v20 = vcombine.high %v343_v63, %v343_v63  ;;  %v495_v25 = vsel %vm487_vm0, %v343_v63, 0.0  ;;  %v226_v26 = vcombine.low %v218_v14, %v225_v15 }
  0x14   :  { %v335_v61 = vcombine.high %v333_v54, %v333_v54  ;;  %v489_v9 = vsel %vm487_vm0, %v334_v56, 0.0  ;;  %v491_v17 = vsel %vm487_vm0, %v333_v54, 0.0  ;;  %v228_v28 = vcombine.low %v106_v2, %v110_v3 }
  0x15   :  { %v490_v16 = vadd.f32 %v489_v9, %v488_v8  ;;  %v352_v30 = vcombine.high %v350_v19, %v350_v19  ;;  %v353_v31 = vcombine.high %v305_v18, %v305_v18  ;;  %v360_v32 = vrot.slane %v305_v18, %v614_v24 }
  0x16   :  { %v493_v21 = vsel %vm487_vm0, %v335_v61, 0.0  ;;  %v497_v33 = vsel %vm487_vm0, %v351_v20, 0.0  ;;  %v114_v35 = vrot.slane %v25_v55, %v598_v10  ;;  %v118_v36 = vrot.slane %v25_v55, %v600_v11 }
  0x17   :  { %v492_v22 = vadd.f32 %v491_v17, %v490_v16  ;;  %v122_v37 = vrot.slane %v25_v55, %v602_v12  ;;  %v499_v38 = vsel %vm487_vm0, %v350_v19, 0.0  ;;  %v126_v40 = vrot.slane %v25_v55, %v604_v13 }
  0x18   :  { %v235_v41 = vrot.slane %v227_v27, %v614_v24  ;;  %v242_v42 = vrot.slane %v228_v28, %v614_v24  ;;  %v306_v44 = vmul.f32 %v226_v26, %v18_v23  ;;  %v367_v45 = vrot.slane %v353_v31, %v614_v24 }
  0x19   :  { %v494_v29 = vadd.f32 %v493_v21, %v492_v22  ;;  %v368_v46 = vcombine.high %v360_v32, %v360_v32  ;;  %v501_v47 = vsel %vm487_vm0, %v352_v30, 0.0  ;;  %v19_v49 = vunpack.c.l.bf16 %v13_v39  ;;  %v14_v30 = vld [vmem:[%s729_s0 + $0x18] sm:$0xff] }
  0x1a   :  { %v503_v50 = vsel %vm487_vm0, %v360_v32, 0.0  ;;  %v243_v52 = vcombine.low %v235_v41, %v242_v42  ;;  %v244_v53 = vcombine.low %v114_v35, %v118_v36  ;;  %v245_v54 = vcombine.low %v122_v37, %v126_v40 }
  0x1b   :  { %v496_v34 = vadd.f32 %v495_v25, %v494_v29  ;;  %v369_v56 = vcombine.high %v367_v45, %v367_v45  ;;  %v370_v57 = vcombine.high %v306_v44, %v306_v44  ;;  %v377_v58 = vrot.slane %v306_v44, %v614_v24 }
  0x1c   :  { %v505_v59 = vsel %vm487_vm0, %v368_v46, 0.0  ;;  %v130_v61 = vrot.slane %v26_v51, %v587_v4  ;;  %v134_v62 = vrot.slane %v26_v51, %v589_v5  ;;  %v138_v63 = vrot.slane %v26_v51, %v591_v6 }
  0x1d   :  { %v498_v43 = vadd.f32 %v497_v33, %v496_v34  ;;  %v507_v0 = vsel %vm487_vm0, %v367_v45, 0.0  ;;  %v142_v1 = vrot.slane %v26_v51, %v593_v7  ;;  %v252_v2 = vrot.slane %v244_v53, %v614_v24 }
  0x1e   :  { %v259_v3 = vrot.slane %v245_v54, %v614_v24  ;;  %v307_v9 = vmul.f32 %v243_v52, %v19_v49  ;;  %v384_v14 = vrot.slane %v370_v57, %v614_v24  ;;  %v385_v15 = vcombine.high %v377_v58, %v377_v58 }
  0x1f   :  { %v500_v48 = vadd.f32 %v499_v38, %v498_v43  ;;  %v509_v16 = vsel %vm487_vm0, %v369_v56, 0.0  ;;  %v20_v17 = vunpack.c.h.bf16 %v13_v39  ;;  %v511_v5 = vsel %vm487_vm0, %v377_v58, 0.0 }
  0x20   :  { %v260_v6 = vcombine.low %v252_v2, %v259_v3  ;;  %v261_v18 = vcombine.low %v130_v61, %v134_v62  ;;  %v262_v19 = vcombine.low %v138_v63, %v142_v1  ;;  %v386_v7 = vcombine.high %v384_v14, %v384_v14 }
  0x21   :  { %v502_v55 = vadd.f32 %v501_v47, %v500_v48  ;;  %v387_v21 = vcombine.high %v307_v9, %v307_v9  ;;  %v394_v22 = vrot.slane %v307_v9, %v614_v24  ;;  %v513_v23 = vsel %vm487_vm0, %v385_v15, 0.0 }
  0x22   :  { %v146_v26 = vrot.slane %v26_v51, %v598_v10  ;;  %v150_v27 = vrot.slane %v26_v51, %v600_v11  ;;  %v154_v28 = vrot.slane %v26_v51, %v602_v12  ;;  %v515_v29 = vsel %vm487_vm0, %v384_v14, 0.0 }
  0x23   :  { %v504_v60 = vadd.f32 %v503_v50, %v502_v55  ;;  %v158_v31 = vrot.slane %v26_v51, %v604_v13  ;;  %v269_v32 = vrot.slane %v261_v18, %v614_v24  ;;  %v276_v33 = vrot.slane %v262_v19, %v614_v24 }
  0x24   :  { %v308_v35 = vmul.f32 %v260_v6, %v20_v17  ;;  %v401_v10 = vrot.slane %v387_v21, %v614_v24  ;;  %v402_v36 = vcombine.high %v394_v22, %v394_v22  ;;  %v517_v11 = vsel %vm487_vm0, %v386_v7, 0.0 }
  0x25   :  { %v506_v8 = vadd.f32 %v505_v59, %v504_v60  ;;  %v21_v37 = vunpack.c.l.bf16 %v14_v30  ;;  %v519_v38 = vsel %vm487_vm0, %v394_v22, 0.0  ;;  %v277_v39 = vcombine.low %v269_v32, %v276_v33 }
  0x26   :  { %v278_v40 = vcombine.low %v146_v26, %v150_v27  ;;  %v279_v41 = vcombine.low %v154_v28, %v158_v31  ;;  %v403_v13 = vcombine.high %v401_v10, %v401_v10  ;;  %v404_v43 = vcombine.high %v308_v35, %v308_v35 }
  0x27   :  { %v508_v4 = vadd.f32 %v507_v0, %v506_v8  ;;  %v411_v44 = vrot.slane %v308_v35, %v614_v24  ;;  %v521_v45 = vsel %vm487_vm0, %v402_v36, 0.0  ;;  %v523_v47 = vsel %vm487_vm0, %v401_v10, 0.0 }
  0x28   :  { %v286_v48 = vrot.slane %v278_v40, %v614_v24  ;;  %v293_v49 = vrot.slane %v279_v41, %v614_v24  ;;  %v309_v51 = vmul.f32 %v277_v39, %v21_v37  ;;  %v418_v52 = vrot.slane %v404_v43, %v614_v24 }
  0x29   :  { %v510_v20 = vadd.f32 %v509_v16, %v508_v4  ;;  %v419_v53 = vcombine.high %v411_v44, %v411_v44  ;;  %v525_v54 = vsel %vm487_vm0, %v403_v13, 0.0  ;;  %v527_v56 = vsel %vm487_vm0, %v411_v44, 0.0 }
  0x2a   :  { %v22_v57 = vunpack.c.h.bf16 %v14_v30  ;;  %v294_v58 = vcombine.low %v286_v48, %v293_v49  ;;  %v420_v60 = vcombine.high %v418_v52, %v418_v52  ;;  %v421_v61 = vcombine.high %v309_v51, %v309_v51 }
  0x2b   :  { %v512_v25 = vadd.f32 %v511_v5, %v510_v20  ;;  %v428_v62 = vrot.slane %v309_v51, %v614_v24  ;;  %v529_v63 = vsel %vm487_vm0, %v419_v53, 0.0  ;;  %v531_v1 = vsel %vm487_vm0, %v418_v52, 0.0 }
  0x2c   :  { %v310_v3 = vmul.f32 %v294_v58, %v22_v57  ;;  %v435_v8 = vrot.slane %v421_v61, %v614_v24  ;;  %v533_v14 = vsel %vm487_vm0, %v420_v60, 0.0 }
  0x2d   :  { %v514_v34 = vadd.f32 %v513_v23, %v512_v25  ;;  %v436_v9 = vcombine.high %v428_v62, %v428_v62  ;;  %v535_v16 = vsel %vm487_vm0, %v428_v62, 0.0 }
  0x2e   :  { %v437_v17 = vcombine.high %v435_v8, %v435_v8  ;;  %v438_v5 = vcombine.high %v310_v3, %v310_v3  ;;  %v445_v6 = vrot.slane %v310_v3, %v614_v24  ;;  %v539_v20 = vsel %vm487_vm0, %v435_v8, 0.0 }
  0x2f   :  { %v516_v12 = vadd.f32 %v515_v29, %v514_v34  ;;  %v537_v18 = vsel %vm487_vm0, %v436_v9, 0.0 }
  0x30   :  { %v452_v21 = vrot.slane %v438_v5, %v614_v24  ;;  %v453_v22 = vcombine.high %v445_v6, %v445_v6  ;;  %v541_v23 = vsel %vm487_vm0, %v437_v17, 0.0  ;;  %v543_v26 = vsel %vm487_vm0, %v445_v6, 0.0 }
  0x31   :  { %v518_v42 = vadd.f32 %v517_v11, %v516_v12 }
  0x32   :  { %v454_v28 = vcombine.high %v452_v21, %v452_v21  ;;  %v545_v29 = vsel %vm487_vm0, %v453_v22, 0.0  ;;  %v547_v31 = vsel %vm487_vm0, %v452_v21, 0.0 }
  0x33   :  { %v520_v46 = vadd.f32 %v519_v38, %v518_v42 }
  0x34   :  { %v549_v33 = vsel %vm487_vm0, %v454_v28, 0.0 }
  0x35   :  { %v522_v50 = vadd.f32 %v521_v45, %v520_v46 }
  0x37   :  { %v524_v55 = vadd.f32 %v523_v47, %v522_v50 }
  0x39   :  { %v526_v59 = vadd.f32 %v525_v54, %v524_v55 }
  0x3b   :  { %v528_v0 = vadd.f32 %v527_v56, %v526_v59 }
  0x3d   :  { %v530_v2 = vadd.f32 %v529_v63, %v528_v0 }
  0x3f   :  { %v532_v15 = vadd.f32 %v531_v1, %v530_v2 }
  0x41   :  { %v534_v4 = vadd.f32 %v533_v14, %v532_v15 }
  0x43   :  { %v536_v19 = vadd.f32 %v535_v16, %v534_v4 }
  0x45   :  { %v538_v7 = vadd.f32 %v537_v18, %v536_v19 }
  0x47   :  { %v540_v25 = vadd.f32 %v539_v20, %v538_v7 }
  0x49   :  { %v542_v27 = vadd.f32 %v541_v23, %v540_v25 }
  0x4b   :  { %v544_v30 = vadd.f32 %v543_v26, %v542_v27 }
  0x4d   :  { %v546_v32 = vadd.f32 %v545_v29, %v544_v30 }
  0x4f   :  { %v548_v34 = vadd.f32 %v547_v31, %v546_v32 }
  0x51   :  { %v550_v35 = vadd.f32 %v549_v33, %v548_v34 }
  0x53   :  { %551 = vadd.xlane.f32.xlu0 %v550_v35 }
  0xe0   :  { %v552_v24 = vpop.xlane.xlu0 %551 }
  0xe1   :  { %v565_v10 = vmul.f32 -1.442695, %v552_v24 }
  0xe3   :  { %567 = vpow2.f32 %v565_v10 }
  0xed   :  { %v568_v36 = vpop.eup %567 }
  0xee   :  { %v556_v11 = vadd.f32 1.0, %v568_v36 }
  0xf0   :  { %569 = vrcp.f32 %v556_v11 }
  0xfa   :  { %v570_v12 = vpop.eup %569 }
  0xfb   :  { %560 = vst.msk [vmem:[%s730_s2] sm:$0x3] %vm559_vm1, %v570_v12 }

</bundles_post_ra>
